<compile_context>
chip_gen: v7x
topology: tpu7x:2x2x1
jax: 0.10.0
libtpu: 0.0.40
codegen_flags: <defaults>
</compile_context>

<pallas_src>
import math
import functools

import jax
import jax.numpy as jnp
import numpy as np
from jax.experimental import pallas as pl
from jax.experimental.pallas import tpu as pltpu

# -----------------------------------------------------------------------------
# Small-shape config (mirrors ATPConfig structure, shrunk for this script)
# -----------------------------------------------------------------------------
N_LAYERS = 2
N_HEADS = 4
D_MODEL = 128          # must be divisible by N_HEADS
D_FF = 128
L_SEQ = 8
N_BATCH = 32           # sequences; B_BLK of them are processed per grid step
B_BLK = 16             # B_BLK * L_SEQ = 128 matmul rows (full MXU tile) per grid step
LN_EPS = 1e-5          # nn.LayerNorm default

# Row layout of the packed small-parameter slab, shape (N_LAYERS, 16, D):
#   0..2  in_proj bias (q / k / v chunks)      3  out_proj bias
#   4     linear1 bias                         5  linear2 bias
#   6,7   norm1 gamma, beta                    8,9  norm2 gamma, beta
#   10    (layer 0 only) modality embedding    11..15  zero padding
_SMALL_ROWS = 16
_MOD_ROW = 10


def _layer_norm(x, g, b):
    mu = jnp.mean(x, axis=-1, keepdims=True)
    var = jnp.mean((x - mu) ** 2, axis=-1, keepdims=True)
    return (x - mu) * jax.lax.rsqrt(var + LN_EPS) * g + b


# -----------------------------------------------------------------------------
# Pallas kernel: full encoder for a block of B sequences (scale + modality emb +
# n_layers post-LN transformer layers). All matmuls / softmax / LN in-kernel.
# -----------------------------------------------------------------------------
def atp_encoder_kernel(x_ref, in_w_ref, out_w_ref, w1_ref, w2_ref, small_ref,
                       o_ref, *, n_layers, n_heads):
    L, B, D = x_ref.shape
    H = n_heads
    Hd = D // H
    R = L * B
    scale = jnp.float32(1.0 / math.sqrt(Hd))

    # x * sqrt(d_model) + modality embedding (single VISUAL row, broadcast).
    # Flatten (L, B, D) -> (R, D): row r corresponds to (pos = r // B, seq = r % B);
    # B is a multiple of 8 so the merge of the leading dim into sublanes is tile-aligned.
    mod = small_ref[0][_MOD_ROW:_MOD_ROW + 1, :]                   # (1, D)
    x = x_ref[...].reshape(R, D) * jnp.float32(math.sqrt(D)) + mod

    # Static block-diagonal attention bias: queries may only attend keys of the same
    # sequence (r % B == r' % B). Built once, hoisted out of the layer loop. Masked
    # scores underflow to exactly 0 after exp, so the packed softmax matches the
    # per-sequence reference bit-for-bit (up to accumulation order).
    rows = jax.lax.broadcasted_iota(jnp.int32, (R, R), 0)
    cols = jax.lax.broadcasted_iota(jnp.int32, (R, R), 1)
    attn_bias = jnp.where((rows % B) == (cols % B),
                          jnp.float32(0.0), jnp.float32(-1e30))

    # TODO(synk): nn.Dropout(p=enc_dropout) is identity in eval mode; training-time
    # dropout masks are not implemented.
    for l in range(n_layers):                                      # static unroll
        sp = small_ref[l]                                          # (16, D) f32
        b_q, b_k, b_v = sp[0:1, :], sp[1:2, :], sp[2:3, :]
        out_b, b1, b2 = sp[3:4, :], sp[4:5, :], sp[5:6, :]
        ln1g, ln1b = sp[6:7, :], sp[7:8, :]
        ln2g, ln2b = sp[8:9, :], sp[9:10, :]

        # ---- multi-head self-attention (bf16 MXU operands, f32 accumulate) ----
        qkv = jnp.dot(x.astype(jnp.bfloat16), in_w_ref[l],
                      preferred_element_type=jnp.float32)          # (R, 3D)
        q = (qkv[:, 0:D] + b_q) * scale                            # (R, D)
        k = qkv[:, D:2 * D] + b_k
        v = qkv[:, 2 * D:3 * D] + b_v

        out_w_l = out_w_ref[l]                                     # (D, D) bf16
        attn = jnp.zeros((R, D), jnp.float32)
        for h in range(H):                                         # static unroll (H=4)
            sl = slice(h * Hd, (h + 1) * Hd)
            qh = q[:, sl].astype(jnp.bfloat16)                     # (R, Hd)
            kh = k[:, sl].astype(jnp.bfloat16)
            vh = v[:, sl].astype(jnp.bfloat16)
            # Packed block-diagonal scores: one (R x Hd x R) matmul per head.
            s = jax.lax.dot_general(qh, kh, (((1,), (1,)), ((), ())),
                                    preferred_element_type=jnp.float32)   # (R, R)
            s = s + attn_bias
            s = s - jnp.max(s, axis=-1, keepdims=True)
            p = jnp.exp(s)
            p = p * (1.0 / jnp.sum(p, axis=-1, keepdims=True))     # exact softmax
            ctx = jnp.dot(p.astype(jnp.bfloat16), vh,
                          preferred_element_type=jnp.float32)      # (R, Hd)
            # Per-head output projection accumulation (no concat / lane re-pack).
            attn = attn + jnp.dot(ctx.astype(jnp.bfloat16), out_w_l[sl, :],
                                  preferred_element_type=jnp.float32)
        attn = attn + out_b

        x = _layer_norm(x + attn, ln1g, ln1b)                      # norm1 (post-LN)

        # ---- feed-forward (relu) ----
        hdn = jnp.maximum(
            jnp.dot(x.astype(jnp.bfloat16), w1_ref[l],
                    preferred_element_type=jnp.float32) + b1, 0.0)
        ff = jnp.dot(hdn.astype(jnp.bfloat16), w2_ref[l],
                     preferred_element_type=jnp.float32) + b2

        x = _layer_norm(x + ff, ln2g, ln2b)                        # norm2

    o_ref[...] = x.reshape(L, B, D).astype(o_ref.dtype)


# -----------------------------------------------------------------------------
# Parameter packing (done once, outside the hot path)
# -----------------------------------------------------------------------------
def pack_params(params):
    D = D_MODEL
    assert D_FF == D_MODEL, "packed small-param slab assumes d_ff == d_model row width"

    def row(a):
        return a.reshape(N_LAYERS, 1, D).astype(jnp.float32)

    small = jnp.concatenate(
        [params["in_b"].reshape(N_LAYERS, 3, D).astype(jnp.float32),
         row(params["out_b"]), row(params["b1"]), row(params["b2"]),
         row(params["ln1g"]), row(params["ln1b"]),
         row(params["ln2g"]), row(params["ln2b"]),
         jnp.zeros((N_LAYERS, _SMALL_ROWS - 10, D), jnp.float32)], axis=1)
    small = small.at[0, _MOD_ROW, :].set(
        params["mod"].reshape(D).astype(jnp.float32))
    return {
        "in_w": params["in_w"].astype(jnp.bfloat16),
        "out_w": params["out_w"].astype(jnp.bfloat16),
        "w1": params["w1"].astype(jnp.bfloat16),
        "w2": params["w2"].astype(jnp.bfloat16),
        "small": small,                                            # (N_LAYERS, 16, D)
    }


# -----------------------------------------------------------------------------
# Wrapper: no activation transpose -- the N axis of (L, N, D) is blocked directly.
# -----------------------------------------------------------------------------
def atp_encoder_forward(x_lnd, packed, *, b_blk=B_BLK):
    """x_lnd: (L, N, D) float32 -> (L, N, D) float32 (matches PyTorch forward)."""
    L, N, D = x_lnd.shape
    assert D == D_MODEL, "inputs dimension mismatch"
    x_lnd = x_lnd.astype(jnp.float32)

    pad = (-N) % b_blk
    if pad:
        # Padded (all-zero) sequences are separate blocks of the block-diagonal mask,
        # so they cannot contaminate real sequences; their rows are sliced off below.
        x_lnd = jnp.pad(x_lnd, ((0, 0), (0, pad), (0, 0)))
    n_total = N + pad

    in_w, out_w = packed["in_w"], packed["out_w"]
    w1, w2, small = packed["w1"], packed["w2"], packed["small"]

    out = pl.pallas_call(
        functools.partial(atp_encoder_kernel, n_layers=N_LAYERS, n_heads=N_HEADS),
        out_shape=jax.ShapeDtypeStruct((L, n_total, D), jnp.float32),
        grid=(n_total // b_blk,),
        in_specs=[
            pl.BlockSpec((L, b_blk, D), lambda n: (0, n, 0)),
            # Grid-invariant parameter blocks (index_map == 0).
            pl.BlockSpec(in_w.shape, lambda n: (0, 0, 0)),
            pl.BlockSpec(out_w.shape, lambda n: (0, 0, 0)),
            pl.BlockSpec(w1.shape, lambda n: (0, 0, 0)),
            pl.BlockSpec(w2.shape, lambda n: (0, 0, 0)),
            pl.BlockSpec(small.shape, lambda n: (0, 0, 0)),
        ],
        out_specs=pl.BlockSpec((L, b_blk, D), lambda n: (0, n, 0)),
        compiler_params=pltpu.CompilerParams(
            dimension_semantics=("parallel",),
            vmem_limit_bytes=64 * 1024 * 1024),
    )(x_lnd, in_w, out_w, w1, w2, small)

    if pad:
        out = out[:, :N, :]
    return out


# -----------------------------------------------------------------------------
# Pure-JAX reference: same math and the same bf16-matmul / f32-elementwise policy,
# structured exactly like the PyTorch forward (per-sequence, per-head, exact softmax).
# -----------------------------------------------------------------------------
def reference_forward(x_lnd, params):
    D = x_lnd.shape[-1]
    H = N_HEADS
    Hd = D // H
    scale = 1.0 / math.sqrt(Hd)

    def bdot(a, w):
        return jnp.dot(a.astype(jnp.bfloat16), w.astype(jnp.bfloat16),
                       preferred_element_type=jnp.float32)

    def single(x):                                                 # x: (L, D)
        x = x * math.sqrt(D) + params["mod"]
        for l in range(N_LAYERS):
            qkv = bdot(x, params["in_w"][l]) + params["in_b"][l]
            q, k, v = qkv[:, :D], qkv[:, D:2 * D], qkv[:, 2 * D:]
            heads = []
            for h in range(H):
                sl = slice(h * Hd, (h + 1) * Hd)
                qh = (q[:, sl] * scale).astype(jnp.bfloat16)
                kh = k[:, sl].astype(jnp.bfloat16)
                vh = v[:, sl].astype(jnp.bfloat16)
                s = jnp.dot(qh, kh.T, preferred_element_type=jnp.float32)
                p = jax.nn.softmax(s, axis=-1)
                heads.append(jnp.dot(p.astype(jnp.bfloat16), vh,
                                     preferred_element_type=jnp.float32))
            attn = bdot(jnp.concatenate(heads, -1), params["out_w"][l]) + params["out_b"][l]
            x = _layer_norm(x + attn, params["ln1g"][l], params["ln1b"][l])
            hdn = jax.nn.relu(bdot(x, params["w1"][l]) + params["b1"][l])
            ff = bdot(hdn, params["w2"][l]) + params["b2"][l]
            x = _layer_norm(x + ff, params["ln2g"][l], params["ln2b"][l])
        return x

    x_nld = jnp.transpose(x_lnd, (1, 0, 2))
    return jnp.transpose(jax.vmap(single)(x_nld), (1, 0, 2))


# -----------------------------------------------------------------------------
# Deterministic synthetic parameters + run
# -----------------------------------------------------------------------------
if __name__ == "__main__":
    key = jax.random.PRNGKey(0)
    keys = jax.random.split(key, 16)

    def nrm(k, shape, scale=0.05, dtype=jnp.float32):
        return (jax.random.normal(k, shape, dtype=jnp.float32) * scale).astype(dtype)

    # Matmul weights stored pre-transposed (in_dim, out_dim) and in bf16 (the MXU
    # operand dtype on v6e/v7x); biases / LN params / modality embedding stay f32.
    params = {
        "mod":  nrm(keys[0], (1, D_MODEL), 0.02),                                    # modality embedding (VISUAL)
        "in_w": nrm(keys[1], (N_LAYERS, D_MODEL, 3 * D_MODEL), dtype=jnp.bfloat16),  # in_proj_weight^T
        "in_b": nrm(keys[2], (N_LAYERS, 3 * D_MODEL), 0.01),
        "out_w": nrm(keys[3], (N_LAYERS, D_MODEL, D_MODEL), dtype=jnp.bfloat16),     # out_proj.weight^T
        "out_b": nrm(keys[4], (N_LAYERS, D_MODEL), 0.01),
        "w1":  nrm(keys[5], (N_LAYERS, D_MODEL, D_FF), dtype=jnp.bfloat16),          # linear1.weight^T
        "b1":  nrm(keys[6], (N_LAYERS, D_FF), 0.01),
        "w2":  nrm(keys[7], (N_LAYERS, D_FF, D_MODEL), dtype=jnp.bfloat16),          # linear2.weight^T
        "b2":  nrm(keys[8], (N_LAYERS, D_MODEL), 0.01),
        "ln1g": jnp.ones((N_LAYERS, D_MODEL), jnp.float32),
        "ln1b": jnp.zeros((N_LAYERS, D_MODEL), jnp.float32),
        "ln2g": jnp.ones((N_LAYERS, D_MODEL), jnp.float32),
        "ln2b": jnp.zeros((N_LAYERS, D_MODEL), jnp.float32),
    }
    packed = pack_params(params)

    x = jax.random.normal(keys[9], (L_SEQ, N_BATCH, D_MODEL), dtype=jnp.float32)

    out = jax.block_until_ready(atp_encoder_forward(x, packed))
    ref = jax.block_until_ready(reference_forward(x, params))

    assert out.shape == (L_SEQ, N_BATCH, D_MODEL)
    # Softmax is now exact in both kernel and reference; operand-level bf16 rounding is
    # identical, so the only differences are MXU-vs-XLA accumulation order.
    np.testing.assert_allclose(np.asarray(out), np.asarray(ref), atol=2e-3, rtol=2e-3)
    print("KERNEL_OK")
</pallas_src>

<mosaic_0001>
module attributes {stable_mosaic.version = 11 : i64} {
  func.func @atp_encoder_kernel(%arg0: i32, %arg1: memref<8x16x128xf32, #tpu.memory_space<vmem>>, %arg2: memref<2x128x384xbf16, #tpu.memory_space<vmem>>, %arg3: memref<2x128x128xbf16, #tpu.memory_space<vmem>>, %arg4: memref<2x128x128xbf16, #tpu.memory_space<vmem>>, %arg5: memref<2x128x128xbf16, #tpu.memory_space<vmem>>, %arg6: memref<2x16x128xf32, #tpu.memory_space<vmem>>, %arg7: memref<8x16x128xf32, #tpu.memory_space<vmem>>) attributes {dimension_semantics = [#tpu.dimension_semantics<parallel>], iteration_bounds = array<i64: 2>, scalar_prefetch = 0 : i64, scratch_operands = 0 : i64, tpu.core_type = #tpu.core_type<tc>, window_params = [{transform_indices = @transform_0, window_bounds = array<i64: 8, 16, 128>}, {pipeline_mode = #tpu.pipeline_mode<synchronous>, transform_indices = @transform_1, window_bounds = array<i64: 2, 128, 384>}, {pipeline_mode = #tpu.pipeline_mode<synchronous>, transform_indices = @transform_2, window_bounds = array<i64: 2, 128, 128>}, {pipeline_mode = #tpu.pipeline_mode<synchronous>, transform_indices = @transform_3, window_bounds = array<i64: 2, 128, 128>}, {pipeline_mode = #tpu.pipeline_mode<synchronous>, transform_indices = @transform_4, window_bounds = array<i64: 2, 128, 128>}, {pipeline_mode = #tpu.pipeline_mode<synchronous>, transform_indices = @transform_5, window_bounds = array<i64: 2, 16, 128>}, {transform_indices = @transform_6, window_bounds = array<i64: 8, 16, 128>}]} {
    %c0 = arith.constant 0 : index
    %c0_0 = arith.constant 0 : index
    %c0_1 = arith.constant 0 : index
    %0 = vector.load %arg6[%c0, %c0_0, %c0_1] : memref<2x16x128xf32, #tpu.memory_space<vmem>>, vector<1x16x128xf32>
    %1 = vector.shape_cast %0 : vector<1x16x128xf32> to vector<16x128xf32>
    %2 = vector.extract_strided_slice %1 {offsets = [10, 0], sizes = [1, 128], strides = [1, 1]} : vector<16x128xf32> to vector<1x128xf32>
    %c0_2 = arith.constant 0 : index
    %c0_3 = arith.constant 0 : index
    %c0_4 = arith.constant 0 : index
    %3 = vector.load %arg1[%c0_2, %c0_3, %c0_4] : memref<8x16x128xf32, #tpu.memory_space<vmem>>, vector<8x16x128xf32>
    %4 = vector.shape_cast %3 : vector<8x16x128xf32> to vector<128x128xf32>
    %cst = arith.constant 11.3137083 : f32
    %5 = vector.broadcast %cst : f32 to vector<128x128xf32>
    %6 = arith.mulf %4, %5 : vector<128x128xf32>
    %7 = vector.broadcast %2 : vector<1x128xf32> to vector<128x128xf32>
    %8 = arith.addf %6, %7 : vector<128x128xf32>
    %9 = tpu.iota {dimensions = array<i32: 0>} : vector<128x128xi32>
    %10 = tpu.iota {dimensions = array<i32: 1>} : vector<128x128xi32>
    %c16_i32 = arith.constant 16 : i32
    %c0_i32 = arith.constant 0 : i32
    %11 = arith.cmpi eq, %c16_i32, %c0_i32 : i32
    %c1_i32 = arith.constant 1 : i32
    %12 = arith.select %11, %c1_i32, %c16_i32 : i32
    %13 = vector.broadcast %12 : i32 to vector<128x128xi32>
    %14 = arith.remsi %9, %13 : vector<128x128xi32>
    %c0_i32_5 = arith.constant 0 : i32
    %15 = vector.broadcast %c0_i32_5 : i32 to vector<128x128xi32>
    %16 = arith.cmpi ne, %14, %15 : vector<128x128xi32>
    %c0_i32_6 = arith.constant 0 : i32
    %17 = vector.broadcast %c0_i32_6 : i32 to vector<128x128xi32>
    %18 = arith.cmpi slt, %14, %17 : vector<128x128xi32>
    %c0_i32_7 = arith.constant 0 : i32
    %19 = arith.cmpi slt, %12, %c0_i32_7 : i32
    %20 = vector.broadcast %19 : i1 to vector<128x128xi1>
    %21 = vector.broadcast %20 : vector<128x128xi1> to vector<128x128xi1>
    %22 = arith.xori %18, %21 : vector<128x128xi1>
    %23 = arith.andi %22, %16 : vector<128x128xi1>
    %24 = vector.broadcast %12 : i32 to vector<128x128xi32>
    %25 = arith.addi %14, %24 : vector<128x128xi32>
    %26 = arith.select %23, %25, %14 : vector<128x128xi1>, vector<128x128xi32>
    %c16_i32_8 = arith.constant 16 : i32
    %c0_i32_9 = arith.constant 0 : i32
    %27 = arith.cmpi eq, %c16_i32_8, %c0_i32_9 : i32
    %c1_i32_10 = arith.constant 1 : i32
    %28 = arith.select %27, %c1_i32_10, %c16_i32_8 : i32
    %29 = vector.broadcast %28 : i32 to vector<128x128xi32>
    %30 = arith.remsi %10, %29 : vector<128x128xi32>
    %c0_i32_11 = arith.constant 0 : i32
    %31 = vector.broadcast %c0_i32_11 : i32 to vector<128x128xi32>
    %32 = arith.cmpi ne, %30, %31 : vector<128x128xi32>
    %c0_i32_12 = arith.constant 0 : i32
    %33 = vector.broadcast %c0_i32_12 : i32 to vector<128x128xi32>
    %34 = arith.cmpi slt, %30, %33 : vector<128x128xi32>
    %c0_i32_13 = arith.constant 0 : i32
    %35 = arith.cmpi slt, %28, %c0_i32_13 : i32
    %36 = vector.broadcast %35 : i1 to vector<128x128xi1>
    %37 = vector.broadcast %36 : vector<128x128xi1> to vector<128x128xi1>
    %38 = arith.xori %34, %37 : vector<128x128xi1>
    %39 = arith.andi %38, %32 : vector<128x128xi1>
    %40 = vector.broadcast %28 : i32 to vector<128x128xi32>
    %41 = arith.addi %30, %40 : vector<128x128xi32>
    %42 = arith.select %39, %41, %30 : vector<128x128xi1>, vector<128x128xi32>
    %43 = arith.cmpi eq, %26, %42 : vector<128x128xi32>
    %cst_14 = arith.constant 0.000000e+00 : f32
    %cst_15 = arith.constant -1.000000e+30 : f32
    %44 = vector.broadcast %cst_14 : f32 to vector<128x128xf32>
    %45 = vector.broadcast %cst_15 : f32 to vector<128x128xf32>
    %46 = arith.select %43, %44, %45 : vector<128x128xi1>, vector<128x128xf32>
    %c0_16 = arith.constant 0 : index
    %c0_17 = arith.constant 0 : index
    %c0_18 = arith.constant 0 : index
    %47 = vector.load %arg6[%c0_16, %c0_17, %c0_18] : memref<2x16x128xf32, #tpu.memory_space<vmem>>, vector<1x16x128xf32>
    %48 = vector.shape_cast %47 : vector<1x16x128xf32> to vector<16x128xf32>
    %49 = vector.extract_strided_slice %48 {offsets = [0, 0], sizes = [1, 128], strides = [1, 1]} : vector<16x128xf32> to vector<1x128xf32>
    %50 = vector.extract_strided_slice %48 {offsets = [1, 0], sizes = [1, 128], strides = [1, 1]} : vector<16x128xf32> to vector<1x128xf32>
    %51 = vector.extract_strided_slice %48 {offsets = [2, 0], sizes = [1, 128], strides = [1, 1]} : vector<16x128xf32> to vector<1x128xf32>
    %52 = vector.extract_strided_slice %48 {offsets = [3, 0], sizes = [1, 128], strides = [1, 1]} : vector<16x128xf32> to vector<1x128xf32>
    %53 = vector.extract_strided_slice %48 {offsets = [4, 0], sizes = [1, 128], strides = [1, 1]} : vector<16x128xf32> to vector<1x128xf32>
    %54 = vector.extract_strided_slice %48 {offsets = [5, 0], sizes = [1, 128], strides = [1, 1]} : vector<16x128xf32> to vector<1x128xf32>
    %55 = vector.extract_strided_slice %48 {offsets = [6, 0], sizes = [1, 128], strides = [1, 1]} : vector<16x128xf32> to vector<1x128xf32>
    %56 = vector.extract_strided_slice %48 {offsets = [7, 0], sizes = [1, 128], strides = [1, 1]} : vector<16x128xf32> to vector<1x128xf32>
    %57 = vector.extract_strided_slice %48 {offsets = [8, 0], sizes = [1, 128], strides = [1, 1]} : vector<16x128xf32> to vector<1x128xf32>
    %58 = vector.extract_strided_slice %48 {offsets = [9, 0], sizes = [1, 128], strides = [1, 1]} : vector<16x128xf32> to vector<1x128xf32>
    %59 = arith.truncf %8 : vector<128x128xf32> to vector<128x128xbf16>
    %c0_19 = arith.constant 0 : index
    %c0_20 = arith.constant 0 : index
    %c0_21 = arith.constant 0 : index
    %60 = vector.load %arg2[%c0_19, %c0_20, %c0_21] : memref<2x128x384xbf16, #tpu.memory_space<vmem>>, vector<1x128x384xbf16>
    %61 = vector.shape_cast %60 : vector<1x128x384xbf16> to vector<128x384xbf16>
    %cst_22 = arith.constant dense<0.000000e+00> : vector<128x384xf32>
    %62 = tpu.matmul %59, %61, %cst_22 {dimension_numbers = #tpu.dot_dimension_numbers<[1], [0], [0], [1], [0, 0, 1, 1], [], []>} : vector<128x128xbf16>, vector<128x384xbf16>, vector<128x384xf32> -> vector<128x384xf32>
    %63 = vector.extract_strided_slice %62 {offsets = [0, 0], sizes = [128, 128], strides = [1, 1]} : vector<128x384xf32> to vector<128x128xf32>
    %64 = vector.broadcast %49 : vector<1x128xf32> to vector<128x128xf32>
    %65 = arith.addf %63, %64 : vector<128x128xf32>
    %cst_23 = arith.constant 0.176776692 : f32
    %66 = vector.broadcast %cst_23 : f32 to vector<128x128xf32>
    %67 = arith.mulf %65, %66 : vector<128x128xf32>
    %68 = vector.extract_strided_slice %62 {offsets = [0, 128], sizes = [128, 128], strides = [1, 1]} : vector<128x384xf32> to vector<128x128xf32>
    %69 = vector.broadcast %50 : vector<1x128xf32> to vector<128x128xf32>
    %70 = arith.addf %68, %69 : vector<128x128xf32>
    %71 = vector.extract_strided_slice %62 {offsets = [0, 256], sizes = [128, 128], strides = [1, 1]} : vector<128x384xf32> to vector<128x128xf32>
    %72 = vector.broadcast %51 : vector<1x128xf32> to vector<128x128xf32>
    %73 = arith.addf %71, %72 : vector<128x128xf32>
    %c0_24 = arith.constant 0 : index
    %c0_25 = arith.constant 0 : index
    %c0_26 = arith.constant 0 : index
    %74 = vector.load %arg3[%c0_24, %c0_25, %c0_26] : memref<2x128x128xbf16, #tpu.memory_space<vmem>>, vector<1x128x128xbf16>
    %75 = vector.shape_cast %74 : vector<1x128x128xbf16> to vector<128x128xbf16>
    %cst_27 = arith.constant 0.000000e+00 : f32
    %76 = vector.broadcast %cst_27 : f32 to vector<128x128xf32>
    %77 = vector.extract_strided_slice %67 {offsets = [0, 0], sizes = [128, 32], strides = [1, 1]} : vector<128x128xf32> to vector<128x32xf32>
    %78 = arith.truncf %77 : vector<128x32xf32> to vector<128x32xbf16>
    %79 = vector.extract_strided_slice %70 {offsets = [0, 0], sizes = [128, 32], strides = [1, 1]} : vector<128x128xf32> to vector<128x32xf32>
    %80 = arith.truncf %79 : vector<128x32xf32> to vector<128x32xbf16>
    %81 = vector.extract_strided_slice %73 {offsets = [0, 0], sizes = [128, 32], strides = [1, 1]} : vector<128x128xf32> to vector<128x32xf32>
    %82 = arith.truncf %81 : vector<128x32xf32> to vector<128x32xbf16>
    %cst_28 = arith.constant dense<0.000000e+00> : vector<128x128xf32>
    %83 = tpu.matmul %78, %80, %cst_28 {dimension_numbers = #tpu.dot_dimension_numbers<[1], [1], [0], [0], [0, 0, 1, 0], [], []>} : vector<128x32xbf16>, vector<128x32xbf16>, vector<128x128xf32> -> vector<128x128xf32>
    %84 = arith.addf %83, %46 : vector<128x128xf32>
    %cst_29 = arith.constant dense<0xFF800000> : vector<128xf32>
    %85 = vector.multi_reduction <maximumf>, %84, %cst_29 [1] : vector<128x128xf32> to vector<128xf32>
    %86 = vector.shape_cast %85 : vector<128xf32> to vector<128x1xf32>
    %87 = vector.broadcast %86 : vector<128x1xf32> to vector<128x128xf32>
    %88 = arith.subf %84, %87 : vector<128x128xf32>
    %89 = math.exp %88 : vector<128x128xf32>
    %cst_30 = arith.constant dense<0.000000e+00> : vector<128xf32>
    %90 = vector.multi_reduction <add>, %89, %cst_30 [1] : vector<128x128xf32> to vector<128xf32>
    %91 = vector.shape_cast %90 : vector<128xf32> to vector<128x1xf32>
    %cst_31 = arith.constant 1.000000e+00 : f32
    %92 = vector.broadcast %cst_31 : f32 to vector<128x1xf32>
    %93 = arith.divf %92, %91 : vector<128x1xf32>
    %94 = vector.broadcast %93 : vector<128x1xf32> to vector<128x128xf32>
    %95 = arith.mulf %89, %94 : vector<128x128xf32>
    %96 = arith.truncf %95 : vector<128x128xf32> to vector<128x128xbf16>
    %cst_32 = arith.constant dense<0.000000e+00> : vector<128x32xf32>
    %97 = tpu.matmul %96, %82, %cst_32 {dimension_numbers = #tpu.dot_dimension_numbers<[1], [0], [0], [1], [0, 0, 1, 1], [], []>} : vector<128x128xbf16>, vector<128x32xbf16>, vector<128x32xf32> -> vector<128x32xf32>
    %98 = arith.truncf %97 : vector<128x32xf32> to vector<128x32xbf16>
    %99 = vector.extract_strided_slice %75 {offsets = [0, 0], sizes = [32, 128], strides = [1, 1]} : vector<128x128xbf16> to vector<32x128xbf16>
    %cst_33 = arith.constant dense<0.000000e+00> : vector<128x128xf32>
    %100 = tpu.matmul %98, %99, %cst_33 {dimension_numbers = #tpu.dot_dimension_numbers<[1], [0], [0], [1], [0, 0, 1, 1], [], []>} : vector<128x32xbf16>, vector<32x128xbf16>, vector<128x128xf32> -> vector<128x128xf32>
    %101 = arith.addf %76, %100 : vector<128x128xf32>
    %102 = vector.extract_strided_slice %67 {offsets = [0, 32], sizes = [128, 32], strides = [1, 1]} : vector<128x128xf32> to vector<128x32xf32>
    %103 = arith.truncf %102 : vector<128x32xf32> to vector<128x32xbf16>
    %104 = vector.extract_strided_slice %70 {offsets = [0, 32], sizes = [128, 32], strides = [1, 1]} : vector<128x128xf32> to vector<128x32xf32>
    %105 = arith.truncf %104 : vector<128x32xf32> to vector<128x32xbf16>
    %106 = vector.extract_strided_slice %73 {offsets = [0, 32], sizes = [128, 32], strides = [1, 1]} : vector<128x128xf32> to vector<128x32xf32>
    %107 = arith.truncf %106 : vector<128x32xf32> to vector<128x32xbf16>
    %cst_34 = arith.constant dense<0.000000e+00> : vector<128x128xf32>
    %108 = tpu.matmul %103, %105, %cst_34 {dimension_numbers = #tpu.dot_dimension_numbers<[1], [1], [0], [0], [0, 0, 1, 0], [], []>} : vector<128x32xbf16>, vector<128x32xbf16>, vector<128x128xf32> -> vector<128x128xf32>
    %109 = arith.addf %108, %46 : vector<128x128xf32>
    %cst_35 = arith.constant dense<0xFF800000> : vector<128xf32>
    %110 = vector.multi_reduction <maximumf>, %109, %cst_35 [1] : vector<128x128xf32> to vector<128xf32>
    %111 = vector.shape_cast %110 : vector<128xf32> to vector<128x1xf32>
    %112 = vector.broadcast %111 : vector<128x1xf32> to vector<128x128xf32>
    %113 = arith.subf %109, %112 : vector<128x128xf32>
    %114 = math.exp %113 : vector<128x128xf32>
    %cst_36 = arith.constant dense<0.000000e+00> : vector<128xf32>
    %115 = vector.multi_reduction <add>, %114, %cst_36 [1] : vector<128x128xf32> to vector<128xf32>
    %116 = vector.shape_cast %115 : vector<128xf32> to vector<128x1xf32>
    %cst_37 = arith.constant 1.000000e+00 : f32
    %117 = vector.broadcast %cst_37 : f32 to vector<128x1xf32>
    %118 = arith.divf %117, %116 : vector<128x1xf32>
    %119 = vector.broadcast %118 : vector<128x1xf32> to vector<128x128xf32>
    %120 = arith.mulf %114, %119 : vector<128x128xf32>
    %121 = arith.truncf %120 : vector<128x128xf32> to vector<128x128xbf16>
    %cst_38 = arith.constant dense<0.000000e+00> : vector<128x32xf32>
    %122 = tpu.matmul %121, %107, %cst_38 {dimension_numbers = #tpu.dot_dimension_numbers<[1], [0], [0], [1], [0, 0, 1, 1], [], []>} : vector<128x128xbf16>, vector<128x32xbf16>, vector<128x32xf32> -> vector<128x32xf32>
    %123 = arith.truncf %122 : vector<128x32xf32> to vector<128x32xbf16>
    %124 = vector.extract_strided_slice %75 {offsets = [32, 0], sizes = [32, 128], strides = [1, 1]} : vector<128x128xbf16> to vector<32x128xbf16>
    %cst_39 = arith.constant dense<0.000000e+00> : vector<128x128xf32>
    %125 = tpu.matmul %123, %124, %cst_39 {dimension_numbers = #tpu.dot_dimension_numbers<[1], [0], [0], [1], [0, 0, 1, 1], [], []>} : vector<128x32xbf16>, vector<32x128xbf16>, vector<128x128xf32> -> vector<128x128xf32>
    %126 = arith.addf %101, %125 : vector<128x128xf32>
    %127 = vector.extract_strided_slice %67 {offsets = [0, 64], sizes = [128, 32], strides = [1, 1]} : vector<128x128xf32> to vector<128x32xf32>
    %128 = arith.truncf %127 : vector<128x32xf32> to vector<128x32xbf16>
    %129 = vector.extract_strided_slice %70 {offsets = [0, 64], sizes = [128, 32], strides = [1, 1]} : vector<128x128xf32> to vector<128x32xf32>
    %130 = arith.truncf %129 : vector<128x32xf32> to vector<128x32xbf16>
    %131 = vector.extract_strided_slice %73 {offsets = [0, 64], sizes = [128, 32], strides = [1, 1]} : vector<128x128xf32> to vector<128x32xf32>
    %132 = arith.truncf %131 : vector<128x32xf32> to vector<128x32xbf16>
    %cst_40 = arith.constant dense<0.000000e+00> : vector<128x128xf32>
    %133 = tpu.matmul %128, %130, %cst_40 {dimension_numbers = #tpu.dot_dimension_numbers<[1], [1], [0], [0], [0, 0, 1, 0], [], []>} : vector<128x32xbf16>, vector<128x32xbf16>, vector<128x128xf32> -> vector<128x128xf32>
    %134 = arith.addf %133, %46 : vector<128x128xf32>
    %cst_41 = arith.constant dense<0xFF800000> : vector<128xf32>
    %135 = vector.multi_reduction <maximumf>, %134, %cst_41 [1] : vector<128x128xf32> to vector<128xf32>
    %136 = vector.shape_cast %135 : vector<128xf32> to vector<128x1xf32>
    %137 = vector.broadcast %136 : vector<128x1xf32> to vector<128x128xf32>
    %138 = arith.subf %134, %137 : vector<128x128xf32>
    %139 = math.exp %138 : vector<128x128xf32>
    %cst_42 = arith.constant dense<0.000000e+00> : vector<128xf32>
    %140 = vector.multi_reduction <add>, %139, %cst_42 [1] : vector<128x128xf32> to vector<128xf32>
    %141 = vector.shape_cast %140 : vector<128xf32> to vector<128x1xf32>
    %cst_43 = arith.constant 1.000000e+00 : f32
    %142 = vector.broadcast %cst_43 : f32 to vector<128x1xf32>
    %143 = arith.divf %142, %141 : vector<128x1xf32>
    %144 = vector.broadcast %143 : vector<128x1xf32> to vector<128x128xf32>
    %145 = arith.mulf %139, %144 : vector<128x128xf32>
    %146 = arith.truncf %145 : vector<128x128xf32> to vector<128x128xbf16>
    %cst_44 = arith.constant dense<0.000000e+00> : vector<128x32xf32>
    %147 = tpu.matmul %146, %132, %cst_44 {dimension_numbers = #tpu.dot_dimension_numbers<[1], [0], [0], [1], [0, 0, 1, 1], [], []>} : vector<128x128xbf16>, vector<128x32xbf16>, vector<128x32xf32> -> vector<128x32xf32>
    %148 = arith.truncf %147 : vector<128x32xf32> to vector<128x32xbf16>
    %149 = vector.extract_strided_slice %75 {offsets = [64, 0], sizes = [32, 128], strides = [1, 1]} : vector<128x128xbf16> to vector<32x128xbf16>
    %cst_45 = arith.constant dense<0.000000e+00> : vector<128x128xf32>
    %150 = tpu.matmul %148, %149, %cst_45 {dimension_numbers = #tpu.dot_dimension_numbers<[1], [0], [0], [1], [0, 0, 1, 1], [], []>} : vector<128x32xbf16>, vector<32x128xbf16>, vector<128x128xf32> -> vector<128x128xf32>
    %151 = arith.addf %126, %150 : vector<128x128xf32>
    %152 = vector.extract_strided_slice %67 {offsets = [0, 96], sizes = [128, 32], strides = [1, 1]} : vector<128x128xf32> to vector<128x32xf32>
    %153 = arith.truncf %152 : vector<128x32xf32> to vector<128x32xbf16>
    %154 = vector.extract_strided_slice %70 {offsets = [0, 96], sizes = [128, 32], strides = [1, 1]} : vector<128x128xf32> to vector<128x32xf32>
    %155 = arith.truncf %154 : vector<128x32xf32> to vector<128x32xbf16>
    %156 = vector.extract_strided_slice %73 {offsets = [0, 96], sizes = [128, 32], strides = [1, 1]} : vector<128x128xf32> to vector<128x32xf32>
    %157 = arith.truncf %156 : vector<128x32xf32> to vector<128x32xbf16>
    %cst_46 = arith.constant dense<0.000000e+00> : vector<128x128xf32>
    %158 = tpu.matmul %153, %155, %cst_46 {dimension_numbers = #tpu.dot_dimension_numbers<[1], [1], [0], [0], [0, 0, 1, 0], [], []>} : vector<128x32xbf16>, vector<128x32xbf16>, vector<128x128xf32> -> vector<128x128xf32>
    %159 = arith.addf %158, %46 : vector<128x128xf32>
    %cst_47 = arith.constant dense<0xFF800000> : vector<128xf32>
    %160 = vector.multi_reduction <maximumf>, %159, %cst_47 [1] : vector<128x128xf32> to vector<128xf32>
    %161 = vector.shape_cast %160 : vector<128xf32> to vector<128x1xf32>
    %162 = vector.broadcast %161 : vector<128x1xf32> to vector<128x128xf32>
    %163 = arith.subf %159, %162 : vector<128x128xf32>
    %164 = math.exp %163 : vector<128x128xf32>
    %cst_48 = arith.constant dense<0.000000e+00> : vector<128xf32>
    %165 = vector.multi_reduction <add>, %164, %cst_48 [1] : vector<128x128xf32> to vector<128xf32>
    %166 = vector.shape_cast %165 : vector<128xf32> to vector<128x1xf32>
    %cst_49 = arith.constant 1.000000e+00 : f32
    %167 = vector.broadcast %cst_49 : f32 to vector<128x1xf32>
    %168 = arith.divf %167, %166 : vector<128x1xf32>
    %169 = vector.broadcast %168 : vector<128x1xf32> to vector<128x128xf32>
    %170 = arith.mulf %164, %169 : vector<128x128xf32>
    %171 = arith.truncf %170 : vector<128x128xf32> to vector<128x128xbf16>
    %cst_50 = arith.constant dense<0.000000e+00> : vector<128x32xf32>
    %172 = tpu.matmul %171, %157, %cst_50 {dimension_numbers = #tpu.dot_dimension_numbers<[1], [0], [0], [1], [0, 0, 1, 1], [], []>} : vector<128x128xbf16>, vector<128x32xbf16>, vector<128x32xf32> -> vector<128x32xf32>
    %173 = arith.truncf %172 : vector<128x32xf32> to vector<128x32xbf16>
    %174 = vector.extract_strided_slice %75 {offsets = [96, 0], sizes = [32, 128], strides = [1, 1]} : vector<128x128xbf16> to vector<32x128xbf16>
    %cst_51 = arith.constant dense<0.000000e+00> : vector<128x128xf32>
    %175 = tpu.matmul %173, %174, %cst_51 {dimension_numbers = #tpu.dot_dimension_numbers<[1], [0], [0], [1], [0, 0, 1, 1], [], []>} : vector<128x32xbf16>, vector<32x128xbf16>, vector<128x128xf32> -> vector<128x128xf32>
    %176 = arith.addf %151, %175 : vector<128x128xf32>
    %177 = vector.broadcast %52 : vector<1x128xf32> to vector<128x128xf32>
    %178 = arith.addf %176, %177 : vector<128x128xf32>
    %179 = arith.addf %8, %178 : vector<128x128xf32>
    %cst_52 = arith.constant dense<0.000000e+00> : vector<128xf32>
    %180 = vector.multi_reduction <add>, %179, %cst_52 [1] : vector<128x128xf32> to vector<128xf32>
    %181 = vector.shape_cast %180 : vector<128xf32> to vector<128x1xf32>
    %cst_53 = arith.constant 1.280000e+02 : f32
    %182 = vector.broadcast %cst_53 : f32 to vector<128x1xf32>
    %183 = arith.divf %181, %182 : vector<128x1xf32>
    %184 = vector.broadcast %183 : vector<128x1xf32> to vector<128x128xf32>
    %185 = arith.subf %179, %184 : vector<128x128xf32>
    %186 = arith.mulf %185, %185 : vector<128x128xf32>
    %cst_54 = arith.constant dense<0.000000e+00> : vector<128xf32>
    %187 = vector.multi_reduction <add>, %186, %cst_54 [1] : vector<128x128xf32> to vector<128xf32>
    %188 = vector.shape_cast %187 : vector<128xf32> to vector<128x1xf32>
    %cst_55 = arith.constant 1.280000e+02 : f32
    %189 = vector.broadcast %cst_55 : f32 to vector<128x1xf32>
    %190 = arith.divf %188, %189 : vector<128x1xf32>
    %191 = vector.broadcast %183 : vector<128x1xf32> to vector<128x128xf32>
    %192 = arith.subf %179, %191 : vector<128x128xf32>
    %cst_56 = arith.constant 9.99999974E-6 : f32
    %193 = vector.broadcast %cst_56 : f32 to vector<128x1xf32>
    %194 = arith.addf %190, %193 : vector<128x1xf32>
    %195 = math.rsqrt %194 : vector<128x1xf32>
    %196 = vector.broadcast %195 : vector<128x1xf32> to vector<128x128xf32>
    %197 = arith.mulf %192, %196 : vector<128x128xf32>
    %198 = vector.broadcast %55 : vector<1x128xf32> to vector<128x128xf32>
    %199 = arith.mulf %197, %198 : vector<128x128xf32>
    %200 = vector.broadcast %56 : vector<1x128xf32> to vector<128x128xf32>
    %201 = arith.addf %199, %200 : vector<128x128xf32>
    %202 = arith.truncf %201 : vector<128x128xf32> to vector<128x128xbf16>
    %c0_57 = arith.constant 0 : index
    %c0_58 = arith.constant 0 : index
    %c0_59 = arith.constant 0 : index
    %203 = vector.load %arg4[%c0_57, %c0_58, %c0_59] : memref<2x128x128xbf16, #tpu.memory_space<vmem>>, vector<1x128x128xbf16>
    %204 = vector.shape_cast %203 : vector<1x128x128xbf16> to vector<128x128xbf16>
    %cst_60 = arith.constant dense<0.000000e+00> : vector<128x128xf32>
    %205 = tpu.matmul %202, %204, %cst_60 {dimension_numbers = #tpu.dot_dimension_numbers<[1], [0], [0], [1], [0, 0, 1, 1], [], []>} : vector<128x128xbf16>, vector<128x128xbf16>, vector<128x128xf32> -> vector<128x128xf32>
    %206 = vector.broadcast %53 : vector<1x128xf32> to vector<128x128xf32>
    %207 = arith.addf %205, %206 : vector<128x128xf32>
    %cst_61 = arith.constant 0.000000e+00 : f32
    %208 = vector.broadcast %cst_61 : f32 to vector<128x128xf32>
    %209 = arith.maximumf %207, %208 : vector<128x128xf32>
    %210 = arith.truncf %209 : vector<128x128xf32> to vector<128x128xbf16>
    %c0_62 = arith.constant 0 : index
    %c0_63 = arith.constant 0 : index
    %c0_64 = arith.constant 0 : index
    %211 = vector.load %arg5[%c0_62, %c0_63, %c0_64] : memref<2x128x128xbf16, #tpu.memory_space<vmem>>, vector<1x128x128xbf16>
    %212 = vector.shape_cast %211 : vector<1x128x128xbf16> to vector<128x128xbf16>
    %cst_65 = arith.constant dense<0.000000e+00> : vector<128x128xf32>
    %213 = tpu.matmul %210, %212, %cst_65 {dimension_numbers = #tpu.dot_dimension_numbers<[1], [0], [0], [1], [0, 0, 1, 1], [], []>} : vector<128x128xbf16>, vector<128x128xbf16>, vector<128x128xf32> -> vector<128x128xf32>
    %214 = vector.broadcast %54 : vector<1x128xf32> to vector<128x128xf32>
    %215 = arith.addf %213, %214 : vector<128x128xf32>
    %216 = arith.addf %201, %215 : vector<128x128xf32>
    %cst_66 = arith.constant dense<0.000000e+00> : vector<128xf32>
    %217 = vector.multi_reduction <add>, %216, %cst_66 [1] : vector<128x128xf32> to vector<128xf32>
    %218 = vector.shape_cast %217 : vector<128xf32> to vector<128x1xf32>
    %cst_67 = arith.constant 1.280000e+02 : f32
    %219 = vector.broadcast %cst_67 : f32 to vector<128x1xf32>
    %220 = arith.divf %218, %219 : vector<128x1xf32>
    %221 = vector.broadcast %220 : vector<128x1xf32> to vector<128x128xf32>
    %222 = arith.subf %216, %221 : vector<128x128xf32>
    %223 = arith.mulf %222, %222 : vector<128x128xf32>
    %cst_68 = arith.constant dense<0.000000e+00> : vector<128xf32>
    %224 = vector.multi_reduction <add>, %223, %cst_68 [1] : vector<128x128xf32> to vector<128xf32>
    %225 = vector.shape_cast %224 : vector<128xf32> to vector<128x1xf32>
    %cst_69 = arith.constant 1.280000e+02 : f32
    %226 = vector.broadcast %cst_69 : f32 to vector<128x1xf32>
    %227 = arith.divf %225, %226 : vector<128x1xf32>
    %228 = vector.broadcast %220 : vector<128x1xf32> to vector<128x128xf32>
    %229 = arith.subf %216, %228 : vector<128x128xf32>
    %cst_70 = arith.constant 9.99999974E-6 : f32
    %230 = vector.broadcast %cst_70 : f32 to vector<128x1xf32>
    %231 = arith.addf %227, %230 : vector<128x1xf32>
    %232 = math.rsqrt %231 : vector<128x1xf32>
    %233 = vector.broadcast %232 : vector<128x1xf32> to vector<128x128xf32>
    %234 = arith.mulf %229, %233 : vector<128x128xf32>
    %235 = vector.broadcast %57 : vector<1x128xf32> to vector<128x128xf32>
    %236 = arith.mulf %234, %235 : vector<128x128xf32>
    %237 = vector.broadcast %58 : vector<1x128xf32> to vector<128x128xf32>
    %238 = arith.addf %236, %237 : vector<128x128xf32>
    %c1 = arith.constant 1 : index
    %c0_71 = arith.constant 0 : index
    %c0_72 = arith.constant 0 : index
    %239 = vector.load %arg6[%c1, %c0_71, %c0_72] : memref<2x16x128xf32, #tpu.memory_space<vmem>>, vector<1x16x128xf32>
    %240 = vector.shape_cast %239 : vector<1x16x128xf32> to vector<16x128xf32>
    %241 = vector.extract_strided_slice %240 {offsets = [0, 0], sizes = [1, 128], strides = [1, 1]} : vector<16x128xf32> to vector<1x128xf32>
    %242 = vector.extract_strided_slice %240 {offsets = [1, 0], sizes = [1, 128], strides = [1, 1]} : vector<16x128xf32> to vector<1x128xf32>
    %243 = vector.extract_strided_slice %240 {offsets = [2, 0], sizes = [1, 128], strides = [1, 1]} : vector<16x128xf32> to vector<1x128xf32>
    %244 = vector.extract_strided_slice %240 {offsets = [3, 0], sizes = [1, 128], strides = [1, 1]} : vector<16x128xf32> to vector<1x128xf32>
    %245 = vector.extract_strided_slice %240 {offsets = [4, 0], sizes = [1, 128], strides = [1, 1]} : vector<16x128xf32> to vector<1x128xf32>
    %246 = vector.extract_strided_slice %240 {offsets = [5, 0], sizes = [1, 128], strides = [1, 1]} : vector<16x128xf32> to vector<1x128xf32>
    %247 = vector.extract_strided_slice %240 {offsets = [6, 0], sizes = [1, 128], strides = [1, 1]} : vector<16x128xf32> to vector<1x128xf32>
    %248 = vector.extract_strided_slice %240 {offsets = [7, 0], sizes = [1, 128], strides = [1, 1]} : vector<16x128xf32> to vector<1x128xf32>
    %249 = vector.extract_strided_slice %240 {offsets = [8, 0], sizes = [1, 128], strides = [1, 1]} : vector<16x128xf32> to vector<1x128xf32>
    %250 = vector.extract_strided_slice %240 {offsets = [9, 0], sizes = [1, 128], strides = [1, 1]} : vector<16x128xf32> to vector<1x128xf32>
    %251 = arith.truncf %238 : vector<128x128xf32> to vector<128x128xbf16>
    %c1_73 = arith.constant 1 : index
    %c0_74 = arith.constant 0 : index
    %c0_75 = arith.constant 0 : index
    %252 = vector.load %arg2[%c1_73, %c0_74, %c0_75] : memref<2x128x384xbf16, #tpu.memory_space<vmem>>, vector<1x128x384xbf16>
    %253 = vector.shape_cast %252 : vector<1x128x384xbf16> to vector<128x384xbf16>
    %cst_76 = arith.constant dense<0.000000e+00> : vector<128x384xf32>
    %254 = tpu.matmul %251, %253, %cst_76 {dimension_numbers = #tpu.dot_dimension_numbers<[1], [0], [0], [1], [0, 0, 1, 1], [], []>} : vector<128x128xbf16>, vector<128x384xbf16>, vector<128x384xf32> -> vector<128x384xf32>
    %255 = vector.extract_strided_slice %254 {offsets = [0, 0], sizes = [128, 128], strides = [1, 1]} : vector<128x384xf32> to vector<128x128xf32>
    %256 = vector.broadcast %241 : vector<1x128xf32> to vector<128x128xf32>
    %257 = arith.addf %255, %256 : vector<128x128xf32>
    %cst_77 = arith.constant 0.176776692 : f32
    %258 = vector.broadcast %cst_77 : f32 to vector<128x128xf32>
    %259 = arith.mulf %257, %258 : vector<128x128xf32>
    %260 = vector.extract_strided_slice %254 {offsets = [0, 128], sizes = [128, 128], strides = [1, 1]} : vector<128x384xf32> to vector<128x128xf32>
    %261 = vector.broadcast %242 : vector<1x128xf32> to vector<128x128xf32>
    %262 = arith.addf %260, %261 : vector<128x128xf32>
    %263 = vector.extract_strided_slice %254 {offsets = [0, 256], sizes = [128, 128], strides = [1, 1]} : vector<128x384xf32> to vector<128x128xf32>
    %264 = vector.broadcast %243 : vector<1x128xf32> to vector<128x128xf32>
    %265 = arith.addf %263, %264 : vector<128x128xf32>
    %c1_78 = arith.constant 1 : index
    %c0_79 = arith.constant 0 : index
    %c0_80 = arith.constant 0 : index
    %266 = vector.load %arg3[%c1_78, %c0_79, %c0_80] : memref<2x128x128xbf16, #tpu.memory_space<vmem>>, vector<1x128x128xbf16>
    %267 = vector.shape_cast %266 : vector<1x128x128xbf16> to vector<128x128xbf16>
    %cst_81 = arith.constant 0.000000e+00 : f32
    %268 = vector.broadcast %cst_81 : f32 to vector<128x128xf32>
    %269 = vector.extract_strided_slice %259 {offsets = [0, 0], sizes = [128, 32], strides = [1, 1]} : vector<128x128xf32> to vector<128x32xf32>
    %270 = arith.truncf %269 : vector<128x32xf32> to vector<128x32xbf16>
    %271 = vector.extract_strided_slice %262 {offsets = [0, 0], sizes = [128, 32], strides = [1, 1]} : vector<128x128xf32> to vector<128x32xf32>
    %272 = arith.truncf %271 : vector<128x32xf32> to vector<128x32xbf16>
    %273 = vector.extract_strided_slice %265 {offsets = [0, 0], sizes = [128, 32], strides = [1, 1]} : vector<128x128xf32> to vector<128x32xf32>
    %274 = arith.truncf %273 : vector<128x32xf32> to vector<128x32xbf16>
    %cst_82 = arith.constant dense<0.000000e+00> : vector<128x128xf32>
    %275 = tpu.matmul %270, %272, %cst_82 {dimension_numbers = #tpu.dot_dimension_numbers<[1], [1], [0], [0], [0, 0, 1, 0], [], []>} : vector<128x32xbf16>, vector<128x32xbf16>, vector<128x128xf32> -> vector<128x128xf32>
    %276 = arith.addf %275, %46 : vector<128x128xf32>
    %cst_83 = arith.constant dense<0xFF800000> : vector<128xf32>
    %277 = vector.multi_reduction <maximumf>, %276, %cst_83 [1] : vector<128x128xf32> to vector<128xf32>
    %278 = vector.shape_cast %277 : vector<128xf32> to vector<128x1xf32>
    %279 = vector.broadcast %278 : vector<128x1xf32> to vector<128x128xf32>
    %280 = arith.subf %276, %279 : vector<128x128xf32>
    %281 = math.exp %280 : vector<128x128xf32>
    %cst_84 = arith.constant dense<0.000000e+00> : vector<128xf32>
    %282 = vector.multi_reduction <add>, %281, %cst_84 [1] : vector<128x128xf32> to vector<128xf32>
    %283 = vector.shape_cast %282 : vector<128xf32> to vector<128x1xf32>
    %cst_85 = arith.constant 1.000000e+00 : f32
    %284 = vector.broadcast %cst_85 : f32 to vector<128x1xf32>
    %285 = arith.divf %284, %283 : vector<128x1xf32>
    %286 = vector.broadcast %285 : vector<128x1xf32> to vector<128x128xf32>
    %287 = arith.mulf %281, %286 : vector<128x128xf32>
    %288 = arith.truncf %287 : vector<128x128xf32> to vector<128x128xbf16>
    %cst_86 = arith.constant dense<0.000000e+00> : vector<128x32xf32>
    %289 = tpu.matmul %288, %274, %cst_86 {dimension_numbers = #tpu.dot_dimension_numbers<[1], [0], [0], [1], [0, 0, 1, 1], [], []>} : vector<128x128xbf16>, vector<128x32xbf16>, vector<128x32xf32> -> vector<128x32xf32>
    %290 = arith.truncf %289 : vector<128x32xf32> to vector<128x32xbf16>
    %291 = vector.extract_strided_slice %267 {offsets = [0, 0], sizes = [32, 128], strides = [1, 1]} : vector<128x128xbf16> to vector<32x128xbf16>
    %cst_87 = arith.constant dense<0.000000e+00> : vector<128x128xf32>
    %292 = tpu.matmul %290, %291, %cst_87 {dimension_numbers = #tpu.dot_dimension_numbers<[1], [0], [0], [1], [0, 0, 1, 1], [], []>} : vector<128x32xbf16>, vector<32x128xbf16>, vector<128x128xf32> -> vector<128x128xf32>
    %293 = arith.addf %268, %292 : vector<128x128xf32>
    %294 = vector.extract_strided_slice %259 {offsets = [0, 32], sizes = [128, 32], strides = [1, 1]} : vector<128x128xf32> to vector<128x32xf32>
    %295 = arith.truncf %294 : vector<128x32xf32> to vector<128x32xbf16>
    %296 = vector.extract_strided_slice %262 {offsets = [0, 32], sizes = [128, 32], strides = [1, 1]} : vector<128x128xf32> to vector<128x32xf32>
    %297 = arith.truncf %296 : vector<128x32xf32> to vector<128x32xbf16>
    %298 = vector.extract_strided_slice %265 {offsets = [0, 32], sizes = [128, 32], strides = [1, 1]} : vector<128x128xf32> to vector<128x32xf32>
    %299 = arith.truncf %298 : vector<128x32xf32> to vector<128x32xbf16>
    %cst_88 = arith.constant dense<0.000000e+00> : vector<128x128xf32>
    %300 = tpu.matmul %295, %297, %cst_88 {dimension_numbers = #tpu.dot_dimension_numbers<[1], [1], [0], [0], [0, 0, 1, 0], [], []>} : vector<128x32xbf16>, vector<128x32xbf16>, vector<128x128xf32> -> vector<128x128xf32>
    %301 = arith.addf %300, %46 : vector<128x128xf32>
    %cst_89 = arith.constant dense<0xFF800000> : vector<128xf32>
    %302 = vector.multi_reduction <maximumf>, %301, %cst_89 [1] : vector<128x128xf32> to vector<128xf32>
    %303 = vector.shape_cast %302 : vector<128xf32> to vector<128x1xf32>
    %304 = vector.broadcast %303 : vector<128x1xf32> to vector<128x128xf32>
    %305 = arith.subf %301, %304 : vector<128x128xf32>
    %306 = math.exp %305 : vector<128x128xf32>
    %cst_90 = arith.constant dense<0.000000e+00> : vector<128xf32>
    %307 = vector.multi_reduction <add>, %306, %cst_90 [1] : vector<128x128xf32> to vector<128xf32>
    %308 = vector.shape_cast %307 : vector<128xf32> to vector<128x1xf32>
    %cst_91 = arith.constant 1.000000e+00 : f32
    %309 = vector.broadcast %cst_91 : f32 to vector<128x1xf32>
    %310 = arith.divf %309, %308 : vector<128x1xf32>
    %311 = vector.broadcast %310 : vector<128x1xf32> to vector<128x128xf32>
    %312 = arith.mulf %306, %311 : vector<128x128xf32>
    %313 = arith.truncf %312 : vector<128x128xf32> to vector<128x128xbf16>
    %cst_92 = arith.constant dense<0.000000e+00> : vector<128x32xf32>
    %314 = tpu.matmul %313, %299, %cst_92 {dimension_numbers = #tpu.dot_dimension_numbers<[1], [0], [0], [1], [0, 0, 1, 1], [], []>} : vector<128x128xbf16>, vector<128x32xbf16>, vector<128x32xf32> -> vector<128x32xf32>
    %315 = arith.truncf %314 : vector<128x32xf32> to vector<128x32xbf16>
    %316 = vector.extract_strided_slice %267 {offsets = [32, 0], sizes = [32, 128], strides = [1, 1]} : vector<128x128xbf16> to vector<32x128xbf16>
    %cst_93 = arith.constant dense<0.000000e+00> : vector<128x128xf32>
    %317 = tpu.matmul %315, %316, %cst_93 {dimension_numbers = #tpu.dot_dimension_numbers<[1], [0], [0], [1], [0, 0, 1, 1], [], []>} : vector<128x32xbf16>, vector<32x128xbf16>, vector<128x128xf32> -> vector<128x128xf32>
    %318 = arith.addf %293, %317 : vector<128x128xf32>
    %319 = vector.extract_strided_slice %259 {offsets = [0, 64], sizes = [128, 32], strides = [1, 1]} : vector<128x128xf32> to vector<128x32xf32>
    %320 = arith.truncf %319 : vector<128x32xf32> to vector<128x32xbf16>
    %321 = vector.extract_strided_slice %262 {offsets = [0, 64], sizes = [128, 32], strides = [1, 1]} : vector<128x128xf32> to vector<128x32xf32>
    %322 = arith.truncf %321 : vector<128x32xf32> to vector<128x32xbf16>
    %323 = vector.extract_strided_slice %265 {offsets = [0, 64], sizes = [128, 32], strides = [1, 1]} : vector<128x128xf32> to vector<128x32xf32>
    %324 = arith.truncf %323 : vector<128x32xf32> to vector<128x32xbf16>
    %cst_94 = arith.constant dense<0.000000e+00> : vector<128x128xf32>
    %325 = tpu.matmul %320, %322, %cst_94 {dimension_numbers = #tpu.dot_dimension_numbers<[1], [1], [0], [0], [0, 0, 1, 0], [], []>} : vector<128x32xbf16>, vector<128x32xbf16>, vector<128x128xf32> -> vector<128x128xf32>
    %326 = arith.addf %325, %46 : vector<128x128xf32>
    %cst_95 = arith.constant dense<0xFF800000> : vector<128xf32>
    %327 = vector.multi_reduction <maximumf>, %326, %cst_95 [1] : vector<128x128xf32> to vector<128xf32>
    %328 = vector.shape_cast %327 : vector<128xf32> to vector<128x1xf32>
    %329 = vector.broadcast %328 : vector<128x1xf32> to vector<128x128xf32>
    %330 = arith.subf %326, %329 : vector<128x128xf32>
    %331 = math.exp %330 : vector<128x128xf32>
    %cst_96 = arith.constant dense<0.000000e+00> : vector<128xf32>
    %332 = vector.multi_reduction <add>, %331, %cst_96 [1] : vector<128x128xf32> to vector<128xf32>
    %333 = vector.shape_cast %332 : vector<128xf32> to vector<128x1xf32>
    %cst_97 = arith.constant 1.000000e+00 : f32
    %334 = vector.broadcast %cst_97 : f32 to vector<128x1xf32>
    %335 = arith.divf %334, %333 : vector<128x1xf32>
    %336 = vector.broadcast %335 : vector<128x1xf32> to vector<128x128xf32>
    %337 = arith.mulf %331, %336 : vector<128x128xf32>
    %338 = arith.truncf %337 : vector<128x128xf32> to vector<128x128xbf16>
    %cst_98 = arith.constant dense<0.000000e+00> : vector<128x32xf32>
    %339 = tpu.matmul %338, %324, %cst_98 {dimension_numbers = #tpu.dot_dimension_numbers<[1], [0], [0], [1], [0, 0, 1, 1], [], []>} : vector<128x128xbf16>, vector<128x32xbf16>, vector<128x32xf32> -> vector<128x32xf32>
    %340 = arith.truncf %339 : vector<128x32xf32> to vector<128x32xbf16>
    %341 = vector.extract_strided_slice %267 {offsets = [64, 0], sizes = [32, 128], strides = [1, 1]} : vector<128x128xbf16> to vector<32x128xbf16>
    %cst_99 = arith.constant dense<0.000000e+00> : vector<128x128xf32>
    %342 = tpu.matmul %340, %341, %cst_99 {dimension_numbers = #tpu.dot_dimension_numbers<[1], [0], [0], [1], [0, 0, 1, 1], [], []>} : vector<128x32xbf16>, vector<32x128xbf16>, vector<128x128xf32> -> vector<128x128xf32>
    %343 = arith.addf %318, %342 : vector<128x128xf32>
    %344 = vector.extract_strided_slice %259 {offsets = [0, 96], sizes = [128, 32], strides = [1, 1]} : vector<128x128xf32> to vector<128x32xf32>
    %345 = arith.truncf %344 : vector<128x32xf32> to vector<128x32xbf16>
    %346 = vector.extract_strided_slice %262 {offsets = [0, 96], sizes = [128, 32], strides = [1, 1]} : vector<128x128xf32> to vector<128x32xf32>
    %347 = arith.truncf %346 : vector<128x32xf32> to vector<128x32xbf16>
    %348 = vector.extract_strided_slice %265 {offsets = [0, 96], sizes = [128, 32], strides = [1, 1]} : vector<128x128xf32> to vector<128x32xf32>
    %349 = arith.truncf %348 : vector<128x32xf32> to vector<128x32xbf16>
    %cst_100 = arith.constant dense<0.000000e+00> : vector<128x128xf32>
    %350 = tpu.matmul %345, %347, %cst_100 {dimension_numbers = #tpu.dot_dimension_numbers<[1], [1], [0], [0], [0, 0, 1, 0], [], []>} : vector<128x32xbf16>, vector<128x32xbf16>, vector<128x128xf32> -> vector<128x128xf32>
    %351 = arith.addf %350, %46 : vector<128x128xf32>
    %cst_101 = arith.constant dense<0xFF800000> : vector<128xf32>
    %352 = vector.multi_reduction <maximumf>, %351, %cst_101 [1] : vector<128x128xf32> to vector<128xf32>
    %353 = vector.shape_cast %352 : vector<128xf32> to vector<128x1xf32>
    %354 = vector.broadcast %353 : vector<128x1xf32> to vector<128x128xf32>
    %355 = arith.subf %351, %354 : vector<128x128xf32>
    %356 = math.exp %355 : vector<128x128xf32>
    %cst_102 = arith.constant dense<0.000000e+00> : vector<128xf32>
    %357 = vector.multi_reduction <add>, %356, %cst_102 [1] : vector<128x128xf32> to vector<128xf32>
    %358 = vector.shape_cast %357 : vector<128xf32> to vector<128x1xf32>
    %cst_103 = arith.constant 1.000000e+00 : f32
    %359 = vector.broadcast %cst_103 : f32 to vector<128x1xf32>
    %360 = arith.divf %359, %358 : vector<128x1xf32>
    %361 = vector.broadcast %360 : vector<128x1xf32> to vector<128x128xf32>
    %362 = arith.mulf %356, %361 : vector<128x128xf32>
    %363 = arith.truncf %362 : vector<128x128xf32> to vector<128x128xbf16>
    %cst_104 = arith.constant dense<0.000000e+00> : vector<128x32xf32>
    %364 = tpu.matmul %363, %349, %cst_104 {dimension_numbers = #tpu.dot_dimension_numbers<[1], [0], [0], [1], [0, 0, 1, 1], [], []>} : vector<128x128xbf16>, vector<128x32xbf16>, vector<128x32xf32> -> vector<128x32xf32>
    %365 = arith.truncf %364 : vector<128x32xf32> to vector<128x32xbf16>
    %366 = vector.extract_strided_slice %267 {offsets = [96, 0], sizes = [32, 128], strides = [1, 1]} : vector<128x128xbf16> to vector<32x128xbf16>
    %cst_105 = arith.constant dense<0.000000e+00> : vector<128x128xf32>
    %367 = tpu.matmul %365, %366, %cst_105 {dimension_numbers = #tpu.dot_dimension_numbers<[1], [0], [0], [1], [0, 0, 1, 1], [], []>} : vector<128x32xbf16>, vector<32x128xbf16>, vector<128x128xf32> -> vector<128x128xf32>
    %368 = arith.addf %343, %367 : vector<128x128xf32>
    %369 = vector.broadcast %244 : vector<1x128xf32> to vector<128x128xf32>
    %370 = arith.addf %368, %369 : vector<128x128xf32>
    %371 = arith.addf %238, %370 : vector<128x128xf32>
    %cst_106 = arith.constant dense<0.000000e+00> : vector<128xf32>
    %372 = vector.multi_reduction <add>, %371, %cst_106 [1] : vector<128x128xf32> to vector<128xf32>
    %373 = vector.shape_cast %372 : vector<128xf32> to vector<128x1xf32>
    %cst_107 = arith.constant 1.280000e+02 : f32
    %374 = vector.broadcast %cst_107 : f32 to vector<128x1xf32>
    %375 = arith.divf %373, %374 : vector<128x1xf32>
    %376 = vector.broadcast %375 : vector<128x1xf32> to vector<128x128xf32>
    %377 = arith.subf %371, %376 : vector<128x128xf32>
    %378 = arith.mulf %377, %377 : vector<128x128xf32>
    %cst_108 = arith.constant dense<0.000000e+00> : vector<128xf32>
    %379 = vector.multi_reduction <add>, %378, %cst_108 [1] : vector<128x128xf32> to vector<128xf32>
    %380 = vector.shape_cast %379 : vector<128xf32> to vector<128x1xf32>
    %cst_109 = arith.constant 1.280000e+02 : f32
    %381 = vector.broadcast %cst_109 : f32 to vector<128x1xf32>
    %382 = arith.divf %380, %381 : vector<128x1xf32>
    %383 = vector.broadcast %375 : vector<128x1xf32> to vector<128x128xf32>
    %384 = arith.subf %371, %383 : vector<128x128xf32>
    %cst_110 = arith.constant 9.99999974E-6 : f32
    %385 = vector.broadcast %cst_110 : f32 to vector<128x1xf32>
    %386 = arith.addf %382, %385 : vector<128x1xf32>
    %387 = math.rsqrt %386 : vector<128x1xf32>
    %388 = vector.broadcast %387 : vector<128x1xf32> to vector<128x128xf32>
    %389 = arith.mulf %384, %388 : vector<128x128xf32>
    %390 = vector.broadcast %247 : vector<1x128xf32> to vector<128x128xf32>
    %391 = arith.mulf %389, %390 : vector<128x128xf32>
    %392 = vector.broadcast %248 : vector<1x128xf32> to vector<128x128xf32>
    %393 = arith.addf %391, %392 : vector<128x128xf32>
    %394 = arith.truncf %393 : vector<128x128xf32> to vector<128x128xbf16>
    %c1_111 = arith.constant 1 : index
    %c0_112 = arith.constant 0 : index
    %c0_113 = arith.constant 0 : index
    %395 = vector.load %arg4[%c1_111, %c0_112, %c0_113] : memref<2x128x128xbf16, #tpu.memory_space<vmem>>, vector<1x128x128xbf16>
    %396 = vector.shape_cast %395 : vector<1x128x128xbf16> to vector<128x128xbf16>
    %cst_114 = arith.constant dense<0.000000e+00> : vector<128x128xf32>
    %397 = tpu.matmul %394, %396, %cst_114 {dimension_numbers = #tpu.dot_dimension_numbers<[1], [0], [0], [1], [0, 0, 1, 1], [], []>} : vector<128x128xbf16>, vector<128x128xbf16>, vector<128x128xf32> -> vector<128x128xf32>
    %398 = vector.broadcast %245 : vector<1x128xf32> to vector<128x128xf32>
    %399 = arith.addf %397, %398 : vector<128x128xf32>
    %cst_115 = arith.constant 0.000000e+00 : f32
    %400 = vector.broadcast %cst_115 : f32 to vector<128x128xf32>
    %401 = arith.maximumf %399, %400 : vector<128x128xf32>
    %402 = arith.truncf %401 : vector<128x128xf32> to vector<128x128xbf16>
    %c1_116 = arith.constant 1 : index
    %c0_117 = arith.constant 0 : index
    %c0_118 = arith.constant 0 : index
    %403 = vector.load %arg5[%c1_116, %c0_117, %c0_118] : memref<2x128x128xbf16, #tpu.memory_space<vmem>>, vector<1x128x128xbf16>
    %404 = vector.shape_cast %403 : vector<1x128x128xbf16> to vector<128x128xbf16>
    %cst_119 = arith.constant dense<0.000000e+00> : vector<128x128xf32>
    %405 = tpu.matmul %402, %404, %cst_119 {dimension_numbers = #tpu.dot_dimension_numbers<[1], [0], [0], [1], [0, 0, 1, 1], [], []>} : vector<128x128xbf16>, vector<128x128xbf16>, vector<128x128xf32> -> vector<128x128xf32>
    %406 = vector.broadcast %246 : vector<1x128xf32> to vector<128x128xf32>
    %407 = arith.addf %405, %406 : vector<128x128xf32>
    %408 = arith.addf %393, %407 : vector<128x128xf32>
    %cst_120 = arith.constant dense<0.000000e+00> : vector<128xf32>
    %409 = vector.multi_reduction <add>, %408, %cst_120 [1] : vector<128x128xf32> to vector<128xf32>
    %410 = vector.shape_cast %409 : vector<128xf32> to vector<128x1xf32>
    %cst_121 = arith.constant 1.280000e+02 : f32
    %411 = vector.broadcast %cst_121 : f32 to vector<128x1xf32>
    %412 = arith.divf %410, %411 : vector<128x1xf32>
    %413 = vector.broadcast %412 : vector<128x1xf32> to vector<128x128xf32>
    %414 = arith.subf %408, %413 : vector<128x128xf32>
    %415 = arith.mulf %414, %414 : vector<128x128xf32>
    %cst_122 = arith.constant dense<0.000000e+00> : vector<128xf32>
    %416 = vector.multi_reduction <add>, %415, %cst_122 [1] : vector<128x128xf32> to vector<128xf32>
    %417 = vector.shape_cast %416 : vector<128xf32> to vector<128x1xf32>
    %cst_123 = arith.constant 1.280000e+02 : f32
    %418 = vector.broadcast %cst_123 : f32 to vector<128x1xf32>
    %419 = arith.divf %417, %418 : vector<128x1xf32>
    %420 = vector.broadcast %412 : vector<128x1xf32> to vector<128x128xf32>
    %421 = arith.subf %408, %420 : vector<128x128xf32>
    %cst_124 = arith.constant 9.99999974E-6 : f32
    %422 = vector.broadcast %cst_124 : f32 to vector<128x1xf32>
    %423 = arith.addf %419, %422 : vector<128x1xf32>
    %424 = math.rsqrt %423 : vector<128x1xf32>
    %425 = vector.broadcast %424 : vector<128x1xf32> to vector<128x128xf32>
    %426 = arith.mulf %421, %425 : vector<128x128xf32>
    %427 = vector.broadcast %249 : vector<1x128xf32> to vector<128x128xf32>
    %428 = arith.mulf %426, %427 : vector<128x128xf32>
    %429 = vector.broadcast %250 : vector<1x128xf32> to vector<128x128xf32>
    %430 = arith.addf %428, %429 : vector<128x128xf32>
    %431 = vector.shape_cast %430 : vector<128x128xf32> to vector<8x16x128xf32>
    %c0_125 = arith.constant 0 : index
    %c0_126 = arith.constant 0 : index
    %c0_127 = arith.constant 0 : index
    %432 = vector.load %arg7[%c0_125, %c0_126, %c0_127] : memref<8x16x128xf32, #tpu.memory_space<vmem>>, vector<8x16x128xf32>
    tpu.vector_store %arg7[%c0_125, %c0_126, %c0_127], %431 {strides = array<i32>} : memref<8x16x128xf32, #tpu.memory_space<vmem>>, vector<8x16x128xf32>,
    return
  }
  func.func @transform_0(%arg0: i32) -> (i32, i32, i32) {
    %c0_i32 = arith.constant 0 : i32
    %c0_i32_0 = arith.constant 0 : i32
    %c0_i32_1 = arith.constant 0 : i32
    return %c0_i32, %arg0, %c0_i32_0 : i32, i32, i32
  }
  func.func @transform_1(%arg0: i32) -> (i32, i32, i32) {
    %c0_i32 = arith.constant 0 : i32
    %c0_i32_0 = arith.constant 0 : i32
    %c0_i32_1 = arith.constant 0 : i32
    %c0_i32_2 = arith.constant 0 : i32
    return %c0_i32, %c0_i32_0, %c0_i32_1 : i32, i32, i32
  }
  func.func @transform_2(%arg0: i32) -> (i32, i32, i32) {
    %c0_i32 = arith.constant 0 : i32
    %c0_i32_0 = arith.constant 0 : i32
    %c0_i32_1 = arith.constant 0 : i32
    %c0_i32_2 = arith.constant 0 : i32
    return %c0_i32, %c0_i32_0, %c0_i32_1 : i32, i32, i32
  }
  func.func @transform_3(%arg0: i32) -> (i32, i32, i32) {
    %c0_i32 = arith.constant 0 : i32
    %c0_i32_0 = arith.constant 0 : i32
    %c0_i32_1 = arith.constant 0 : i32
    %c0_i32_2 = arith.constant 0 : i32
    return %c0_i32, %c0_i32_0, %c0_i32_1 : i32, i32, i32
  }
  func.func @transform_4(%arg0: i32) -> (i32, i32, i32) {
    %c0_i32 = arith.constant 0 : i32
    %c0_i32_0 = arith.constant 0 : i32
    %c0_i32_1 = arith.constant 0 : i32
    %c0_i32_2 = arith.constant 0 : i32
    return %c0_i32, %c0_i32_0, %c0_i32_1 : i32, i32, i32
  }
  func.func @transform_5(%arg0: i32) -> (i32, i32, i32) {
    %c0_i32 = arith.constant 0 : i32
    %c0_i32_0 = arith.constant 0 : i32
    %c0_i32_1 = arith.constant 0 : i32
    %c0_i32_2 = arith.constant 0 : i32
    return %c0_i32, %c0_i32_0, %c0_i32_1 : i32, i32, i32
  }
  func.func @transform_6(%arg0: i32) -> (i32, i32, i32) {
    %c0_i32 = arith.constant 0 : i32
    %c0_i32_0 = arith.constant 0 : i32
    %c0_i32_1 = arith.constant 0 : i32
    return %c0_i32, %arg0, %c0_i32_0 : i32, i32, i32
  }
}

</mosaic_0001>

<bundles_post_ra>
// kernel: tpu_custom_call.1
= control target key start
LH: loop header
LB: loop body
LE: loop exit
PB: predicated region body
PF: predicated region fallthrough
CT: control target
= control target key end

     0   :  { %s14935_s0 = inlined_call_operand.hbm [shape: f32[8,32,128], index: 0, kind: input, shape index: {}]   ;;  %s14936_s1 = inlined_call_operand.hbm [shape: bf16[2,128,384], index: 1, kind: input, shape index: {}]   ;;  %s14937_s2 = inlined_call_operand.hbm [shape: bf16[2,128,128], index: 2, kind: input, shape index: {}]   ;;  %s14938_s3 = inlined_call_operand.hbm [shape: bf16[2,128,128], index: 3, kind: input, shape index: {}]   ;;  %s14939_s4 = inlined_call_operand.hbm [shape: bf16[2,128,128], index: 4, kind: input, shape index: {}]   ;;  %s14940_s5 = inlined_call_operand.hbm [shape: f32[2,16,128], index: 5, kind: input, shape index: {}]   ;;  %s14941_s6 = inlined_call_operand.hbm [shape: f32[8,32,128], index: 6, kind: output, shape index: {}]  }
   0x1   :  { %15105 = sst [smem:[#allocation88_spill]] %s14936_s1 }
   0x2   :  { %15106 = sst [smem:[#allocation89_spill]] %s14941_s6 }
   0x3   :  { %11 = vsyncpa [#allocation3], 0 }
   0x4   :  { %13 = vsyncpa [#allocation3 + $0x1], 0 }
   0x5   :  { %14 = vsyncpa [#allocation6], 0 }
   0x6   :  { %15 = vsyncpa [#allocation9], 0 }
   0x7   :  { %16 = vsyncpa [#allocation12], 0 }
   0x8   :  { %17 = vsyncpa [#allocation4], 0 }
   0x9   :  { %19 = vsyncpa [#allocation4 + $0x1], 0  ;;  %s11253_s21 = smov 0   ;;  %s11255_s22 = smov 0  }
   0xa   :  { %s11257_s23 = smov 0   ;;  %s11259_s24 = smov 0  }
   0xb LB: > { %15107 = sst [smem:[#allocation24_spill]] %s11175_s21  ;;  %s11274_s25 = sadd.s32 4294967295, %s11187_s24   ;;  %s11187_s24 = sphi %s11259_s24, %s15397_s24   ;;  %s11183_s23 = sphi %s11257_s23, %s15401_s23   ;;  %s11179_s22 = sphi %s11255_s22, %s15400_s22   ;;  %s11175_s21 = sphi %s11253_s21, %s15399_s21  }
   0xc   : > { %s8405_s26 = sadd.s32 4294967294, %s11187_s24   ;;  %s11278_s27 = sadd.s32 1, %s11187_s24  }
   0xd   : > { %15108 = sst [smem:[#allocation25_spill]] %s11278_s27  ;;  %s32_s28 = sadd.s32 1, %s11183_s23 }
   0xe   : > { %s29_s29 = ssub.s32 %s11187_s24, %s11278_s27  ;;  %p39_p0 = scmp.ne.s32.totalorder %s11183_s23, %s11179_s22 }
   0xf   : > { %p30_p1 = scmp.eq.s32.totalorder %s29_s29, 0  ;;  %p40_p2 = scmp.eq.s32.totalorder %s11187_s24, 0 }
  0x10   : > { %p45_p3 = scmp.ne.s32.totalorder %s11179_s22, %s11175_s21  ;;  %p14942_p4 = scmp.eq.s32.totalorder %s11274_s25, 0 }
  0x11   : > { %s11290_s30 = scalar_select %p30_p1, %s11183_s23, %s32_s28  }
  0x12   : > { %p11292_p5 = por %p40_p2, %p39_p0  ;;  %p11298_p6 = por %p14942_p4, %p45_p3 }
  0x13   : > { %15109 = sst [smem:[#allocation26_spill]] %s11290_s30  ;;  %p174_p7 = scmp.eq.s32.totalorder %s11274_s25, 1 }
  0x14   : > { %s15110_s7 = scalar_select %p11292_p5, 1, 0 }
  0x15   : > { %s15111_s8 = scalar_select %p11298_p6, 1, 0 }
  0x16   : > { %p180_p8 = scmp.eq.s32.totalorder %s8405_s26, 1  ;;  %p8406_p9 = scmp.ge.s32.totalorder %s11187_s24, 1 }
  0x17   : > { %p187_p10 = scmp.lt.s32.totalorder %s11187_s24, 3  ;;  %p11305_p11 = por %p174_p7, %p39_p0 }
  0x18   : > { %p11309_p12 = por %p180_p8, %p45_p3  ;;  %s11189_s12 = smov [#allocation5]  }
  0x19   : > { %s15112_s9 = scalar_select %p11305_p11, 1, 0 }
  0x1a   : > { %s15113_s10 = scalar_select %p11309_p12, 1, 0 }
  0x1b   : > { %p11313_p13 = pnand %p8406_p9, %p187_p10  ;;  %s199_s13 = sshll.u32 %s11189_s12, 4  ;;  %s200_s13 = int_to_ptr.vmem [resolvable:$true] %s199_s13 }
  0x1c   : > { %15114 = sst [smem:[#allocation27_spill]] %s15113_s10  ;;  %s11190_s15 = smov [#allocation8]  }
  0x1d   : > { %s15115_s11 = scalar_select %p11313_p13, 1, 0 }
  0x1e   : > { %p10150_p1 = pneg %p11313_p13  ;;  %s225_s16 = sshll.u32 %s11190_s15, 4  ;;  %s226_s16 = int_to_ptr.vmem [resolvable:$true] %s225_s16 }
  0x1f   : > { %s15117_s1 = sld [smem:[#allocation88_spill]] }
  0x20   : > { %p11321_p2 = pnand %p10150_p1, %p14942_p4 }
  0x22   : > { %p11333_p3 = pneg %p11321_p2 }
  0x25   : > { %s10997_s19 = scalar_lea.hbm %s15117_s1, 6144 }
  0x26   : > { %p10998_p0 = scmp.ne.s32.totalorder %s15117_s1, %s10997_s19  ;;  %p11004_p9 = scmp.lt.u32.totalorder %s10997_s19, %s15117_s1 }
  0x28   : > { %p11000_p7 = pnand %p11333_p3, %p10998_p0 }
  0x2a   : > { %p11001_p8 = pneg %p11000_p7 }
  0x2c   : > { %p11006_p10 = pnand %p11004_p9, %p11001_p8 }
  0x2e   : > { %11009 = shalt.err (!%p11006_p10)
}
  0x2f   : > { %s11010_s15 = scalar_lea.vmem %s200_s13, 6144  ;;  %p11018_p11 = scmp.lt.s32.totalorder %s200_s13, %s200_s13 }
  0x30   : > { %p11011_p1 = scmp.ne.s32.totalorder %s200_s13, %s11010_s15  ;;  %p11019_p6 = scmp.lt.s32.totalorder %s11010_s15, %s11010_s15 }
  0x32   : > { %p11013_p4 = pnand %p11011_p1, %p11333_p3  ;;  %p11020_p13 = por %p11019_p6, %p11018_p11 }
  0x34   : > { %p11014_p12 = pneg %p11013_p4 }
  0x36   : > { %p11021_p5 = pnand %p11020_p13, %p11014_p12 }
  0x38   : > { %11024 = shalt.err (!%p11021_p5)
}
  0x39   : > { %s11191_s17 = smov 192   ;;  %s11192_s18 = smov 12  }
  0x3a   : > { %10153 = dma.hbm_to_vmem [thread:$0]  (!%p11321_p2), %s15117_s1, 6144, %s200_s13, [#allocation6], %s11191_s17, %s11191_s17, %s11192_s18  }
  0x3b   : > { %s11025_s12 = scalar_lea.hbm %s14938_s3, 2048 }
  0x3c   : > { %p11026_p4 = scmp.ne.s32.totalorder %s14938_s3, %s11025_s12  ;;  %p11032_p11 = scmp.lt.u32.totalorder %s11025_s12, %s14938_s3 }
  0x3e   : > { %p11028_p5 = pnand %p11026_p4, %p11333_p3 }
  0x40   : > { %p11029_p6 = pneg %p11028_p5 }
  0x42   : > { %p11034_p12 = pnand %p11032_p11, %p11029_p6 }
  0x44   : > { %11037 = shalt.err (!%p11034_p12)
}
  0x45   : > { %s11038_s20 = scalar_lea.vmem %s226_s16, 2048  ;;  %p11046_p8 = scmp.lt.s32.totalorder %s226_s16, %s226_s16 }
  0x46   : > { %p11039_p13 = scmp.ne.s32.totalorder %s226_s16, %s11038_s20  ;;  %p11047_p9 = scmp.lt.s32.totalorder %s11038_s20, %s11038_s20 }
  0x48   : > { %p11041_p0 = pnand %p11039_p13, %p11333_p3  ;;  %p11048_p10 = por %p11047_p9, %p11046_p8 }
  0x4a   : > { %p11042_p7 = pneg %p11041_p0 }
  0x4c   : > { %p11049_p1 = pnand %p11048_p10, %p11042_p7 }
  0x4e   : > { %11052 = shalt.err (!%p11049_p1)
}
  0x4f   : > { %s11193_s27 = smov 64   ;;  %s11194_s30 = smov 4  }
  0x50   : > { %10159 = dma.hbm_to_vmem [thread:$0]  (!%p11321_p2), %s14938_s3, 2048, %s226_s16, [#allocation9], %s11193_s27, %s11193_s27, %s11194_s30  }
  0x51   : > { %s11195_s17 = smov [#allocation7]   ;;  %s11196_s19 = smov [#allocation10]  }
  0x52   : > { %s212_s18 = sshll.u32 %s11195_s17, 4  ;;  %s238_s26 = sshll.u32 %s11196_s19, 4  ;;  %s213_s18 = int_to_ptr.vmem [resolvable:$true] %s212_s18  ;;  %s239_s26 = int_to_ptr.vmem [resolvable:$true] %s238_s26 }
  0x53   : > { %s11053_s15 = scalar_lea.hbm %s14937_s2, 2048 }
  0x54   : > { %p11054_p4 = scmp.ne.s32.totalorder %s14937_s2, %s11053_s15  ;;  %p11060_p11 = scmp.lt.u32.totalorder %s11053_s15, %s14937_s2 }
  0x56   : > { %p11056_p5 = pnand %p11054_p4, %p11333_p3 }
  0x58   : > { %p11057_p6 = pneg %p11056_p5 }
  0x5a   : > { %p11062_p12 = pnand %p11060_p11, %p11057_p6 }
  0x5c   : > { %11065 = shalt.err (!%p11062_p12)
}
  0x5d   : > { %s11066_s16 = scalar_lea.vmem %s213_s18, 2048  ;;  %p11074_p8 = scmp.lt.s32.totalorder %s213_s18, %s213_s18 }
  0x5e   : > { %p11067_p13 = scmp.ne.s32.totalorder %s213_s18, %s11066_s16  ;;  %p11075_p9 = scmp.lt.s32.totalorder %s11066_s16, %s11066_s16 }
  0x60   : > { %p11069_p0 = pnand %p11067_p13, %p11333_p3  ;;  %p11076_p10 = por %p11075_p9, %p11074_p8 }
  0x62   : > { %p11070_p7 = pneg %p11069_p0 }
  0x64   : > { %p11077_p1 = pnand %p11076_p10, %p11070_p7 }
  0x66   : > { %11080 = shalt.err (!%p11077_p1)
}
  0x67   : > { %10156 = dma.hbm_to_vmem [thread:$0]  (!%p11321_p2), %s14937_s2, 2048, %s213_s18, [#allocation6], %s11193_s27, %s11193_s27, %s11194_s30  }
  0x68   : > { %s11081_s13 = scalar_lea.hbm %s14939_s4, 2048 }
  0x69   : > { %p11082_p4 = scmp.ne.s32.totalorder %s14939_s4, %s11081_s13  ;;  %p11088_p11 = scmp.lt.u32.totalorder %s11081_s13, %s14939_s4 }
  0x6b   : > { %p11084_p5 = pnand %p11082_p4, %p11333_p3 }
  0x6d   : > { %p11085_p6 = pneg %p11084_p5 }
  0x6f   : > { %p11090_p12 = pnand %p11088_p11, %p11085_p6 }
  0x71   : > { %11093 = shalt.err (!%p11090_p12)
}
  0x72   : > { %s11094_s15 = scalar_lea.vmem %s239_s26, 2048  ;;  %p11102_p8 = scmp.lt.s32.totalorder %s239_s26, %s239_s26 }
  0x73   : > { %p11095_p13 = scmp.ne.s32.totalorder %s239_s26, %s11094_s15  ;;  %p11103_p9 = scmp.lt.s32.totalorder %s11094_s15, %s11094_s15 }
  0x75   : > { %p11097_p0 = pnand %p11095_p13, %p11333_p3  ;;  %p11104_p10 = por %p11103_p9, %p11102_p8 }
  0x77   : > { %p11098_p7 = pneg %p11097_p0 }
  0x79   : > { %p11105_p1 = pnand %p11104_p10, %p11098_p7 }
  0x7b   : > { %11108 = shalt.err (!%p11105_p1)
}
  0x7c   : > { %10162 = dma.hbm_to_vmem [thread:$0]  (!%p11321_p2), %s14939_s4, 2048, %s239_s26, [#allocation9], %s11193_s27, %s11193_s27, %s11194_s30  }
  0x7d   : > { %s11197_s16 = smov [#allocation11]   ;;  %s11109_s10 = scalar_lea.hbm %s14940_s5, 512 }
  0x7e   : > { %s251_s1 = sshll.u32 %s11197_s16, 4  ;;  %p11110_p4 = scmp.ne.s32.totalorder %s14940_s5, %s11109_s10  ;;  %s252_s1 = int_to_ptr.vmem [resolvable:$true] %s251_s1 }
  0x7f   : > { %p11116_p11 = scmp.lt.u32.totalorder %s11109_s10, %s14940_s5 }
  0x80   : > { %p11112_p5 = pnand %p11110_p4, %p11333_p3 }
  0x82   : > { %p11113_p6 = pneg %p11112_p5 }
  0x84   : > { %p11118_p12 = pnand %p11116_p11, %p11113_p6 }
  0x86   : > { %11121 = shalt.err (!%p11118_p12)
}
  0x87   : > { %s11122_s27 = scalar_lea.vmem %s252_s1, 512  ;;  %p11130_p8 = scmp.lt.s32.totalorder %s252_s1, %s252_s1 }
  0x88   : > { %p11123_p13 = scmp.ne.s32.totalorder %s252_s1, %s11122_s27  ;;  %p11131_p9 = scmp.lt.s32.totalorder %s11122_s27, %s11122_s27 }
  0x8a   : > { %p11125_p0 = pnand %p11123_p13, %p11333_p3  ;;  %p11132_p10 = por %p11131_p9, %p11130_p8 }
  0x8c   : > { %p11126_p7 = pneg %p11125_p0 }
  0x8e   : > { %p11133_p1 = pnand %p11132_p10, %p11126_p7 }
  0x90   : > { %11136 = shalt.err (!%p11133_p1)
}
  0x91   : > { %s11198_s30 = smov 128   ;;  %s11199_s26 = smov 8  }
  0x92   : > { %10165 = dma.hbm_to_vmem [thread:$0]  (!%p11321_p2), %s14940_s5, 512, %s252_s1, [#allocation12], %s11198_s30, %s11198_s30, %s11199_s26  }
  0x93   : > { %p8412_p4 = scmp.ge.s32.totalorder %s11187_s24, 2 }
  0x95   : > { %261 = sbr.rel (%p8412_p4) target bundleno = 171 (0xab), region = 36 }
  0x9c   : > { %s265_s28 = sand.u32 1, %s11183_s23   ;;  %s8655_s18 = sshll.u32 %s11187_s24, 8 }
  0x9d   : > { %s8413_s14 = sshll.u32 %s265_s28, 7  ;;  %s275_s1 = scalar_lea.hbm %s14935_s0, %s8655_s18 }
  0x9e   : > { %p15119_p2 = scmp.ne.s32.totalorder %s15110_s7, 0  ;;  %s269_s21 = scalar_lea.vmem [#allocation2], %s8413_s14 }
  0x9f   : > { %s288_s10 = sshll.u32 %s269_s21, 4  ;;  %s11200_s17 = smov 512   ;;  %s289_s10 = int_to_ptr.vmem [resolvable:$true] %s288_s10 }
  0xa0   : > { %s10123_s6 = scalar_select %p15119_p2, [#allocation0], [#allocation18] }
  0xa1   : > { %10124 = sst [smem:[#allocation15]] (%p15119_p2), %s11200_s17  ;;  %s11201_s19 = smov 256  }
  0xa2   : > { %s280_s13 = sld [smem:[%s10123_s6]]   ;;  %s11202_s29 = smov 2  }
  0xa3   : > { %10125 = sst [smem:[#allocation15 + $0x1]] (%p15119_p2), %s11201_s19  ;;  %s11203_s27 = smov 128  }
  0xa4   : > { %10126 = sst [smem:[#allocation15 + $0x2]] (%p15119_p2), %s11202_s29  ;;  %s11204_s26 = smov 8  }
  0xa5   : > { %10127 = sst [smem:[#allocation15 + $0x3]] (%p15119_p2), %s11203_s27  ;;  %s266_s15 = scalar_lea.sflag [#allocation3], %s265_s28 }
  0xa6   : > { %10128 = sst [smem:[#allocation15 + $0x4]] (%p15119_p2), %s11203_s27  ;;  %s11205_s18 = smov [#allocation14]  }
  0xa7   : > { %10129 = sst [smem:[#allocation15 + $0x5]] (%p15119_p2), %s11204_s26 }
  0xa8   : > { %s8416_s30 = sshll.u32 %s280_s13, 26 }
  0xa9   : > { %s8417_s12 = sadd.s32 134217728, %s8416_s30 }
  0xaa   : > { %10130 = dma.general (%p15119_p2), %s275_s1, 2048, %s289_s10, %s266_s15, %s11205_s18, [#allocation15], %s8417_s12, 0  }
  0xab PF: > { %p15120_p3 = scmp.ne.s32.totalorder %s15115_s11, 0 }
  0xad   : > { %313 = sbr.rel (%p15120_p3) target bundleno = 7527 (0x1d67), region = 44 }
  0xb4   : > { %s11457_s14 = sand.u32 1, %s11179_s22   ;;  %p15121_p5 = scmp.ne.s32.totalorder %s15111_s8, 0 }
  0xb5   : > { %s8419_s20 = sshll.u32 %s11457_s14, 7  ;;  %s316_s16 = scalar_lea.sflag [#allocation3], %s11457_s14 }
  0xb6   : > { %s11463_s6 = scalar_lea.vmem [#allocation2], %s8419_s20 }
  0xb7   : > { %11154 = dma.done.wait (%p15121_p5), %s316_s16, 2048  }
  0xb8   : > { %11156 = vsyncadd (%p15121_p5), %s316_s16, 4294965248  ;;  %p15122_p6 = scmp.eq.s32.totalorder %s11274_s25, 0 }
  0xba   : > { %11158 = dma.done.wait (%p15122_p6), [#allocation6], 8192   ;;  %p15123_p11 = pmov %p15122_p6 }
  0xbb   : > { %p15124_p12 = pmov %p15122_p6 }
  0xbc   : > { %11160 = vsyncadd (%p15123_p11), [#allocation6], 4294959104 }
  0xbd   : > { %11162 = dma.done.wait (%p15124_p12), [#allocation9], 4096   ;;  %p15125_p13 = pmov %p15122_p6 }
  0xbe   : > { %p15126_p0 = pmov %p15122_p6 }
  0xbf   : > { %11164 = vsyncadd (%p15125_p13), [#allocation9], 4294963200 }
  0xc0   : > { %11166 = dma.done.wait (%p15126_p0), [#allocation12], 512   ;;  %p15127_p7 = pmov %p15126_p0 }
  0xc1   : > { %v14951_v0 = vmov 0   ;;  %v405_v1 = vlaneseq  ;;  %v10242_v2 = vld [vmem:[#allocation5 + $0x4] ss:$12 sps:$4 sm:$0xff]   ;;  %v10244_v3 = vld [vmem:[#allocation5] ss:$12 sps:$4 sm:$0xff]   ;;  %v376_v24 = vld [vmem:[%s11463_s6 + $0x18] sm:$0xff] }
  0xc2   : > { %11168 = vsyncadd (%p15127_p7), [#allocation12], 4294966784  ;;  %880 = vmatprep.mubr.bf16.mxu0 %v14951_v0  ;;  %848 = vmatprep.subr.bf16.mxu0 %v10242_v2  ;;  %v10245_v4 = vld [vmem:[#allocation5 + $0x1c] ss:$12 sps:$4 sm:$0xff]   ;;  %v10247_v5 = vld [vmem:[#allocation5 + $0x18] ss:$12 sps:$4 sm:$0xff]  }
  0xc3   : > { %849 = vmatpush1.bf16.msra.mxu0 %v10244_v3  ;;  %v11483_v6 = vshrl.u32 %v405_v1, 7  ;;  %v10248_v7 = vld [vmem:[#allocation5 + $0x34] ss:$12 sps:$4 sm:$0xff]   ;;  %v10250_v8 = vld [vmem:[#allocation5 + $0x30] ss:$12 sps:$4 sm:$0xff]   ;;  %v372_v11 = vld [vmem:[#allocation11 + $0x8] sm:$0xff] }
  0xc4   : > { %850 = vmatprep.subr.bf16.mxu0 %v10245_v4  ;;  %v10251_v10 = vld [vmem:[#allocation5 + $0x4c] ss:$12 sps:$4 sm:$0xff]   ;;  %v10253_v12 = vld [vmem:[#allocation5 + $0x48] ss:$12 sps:$4 sm:$0xff]   ;;  %v373_v13 = vld [vmem:[%s11463_s6] sm:$0xff]  ;;  %vm1174_vm0 = vcmask 261120  }
  0xc5   : > { %15128 = vst [vmem:[#allocation28_spill] sm:$0xff] %v11483_v6  ;;  %v11486_v9 = vsub.s32 2, %v11483_v6  ;;  %v374_v14 = vld [vmem:[%s11463_s6 + $0x8] sm:$0xff]  ;;  %v10254_v16 = vld [vmem:[#allocation5 + $0x64] ss:$12 sps:$4 sm:$0xff]   ;;  %v380_v30 = vld [vmem:[%s11463_s6 + $0x38] sm:$0xff] }
  0xc6   : > { %v389_v17 = vmul.f32 11.313708, %v373_v13  ;;  %v390_v18 = vmul.f32 11.313708, %v374_v14  ;;  %v10256_v19 = vld [vmem:[#allocation5 + $0x60] ss:$12 sps:$4 sm:$0xff]  }
  0xc7   : > { %851 = vmatpush1.bf16.msra.mxu0 %v10247_v5  ;;  %15129 = vst [vmem:[#allocation29_spill] sm:$0xff] %v11486_v9  ;;  %v11491_v15 = vrot.slane %v372_v11, %v11486_v9  ;;  %v10257_v22 = vld [vmem:[#allocation5 + $0x7c] ss:$12 sps:$4 sm:$0xff]   ;;  %v375_v23 = vld [vmem:[%s11463_s6 + $0x10] sm:$0xff]  ;;  %v377_v26 = vld [vmem:[%s11463_s6 + $0x20] sm:$0xff]  ;;  %s11207_s7 = smov 96  }
  0xc8   : > { %852 = vmatprep.subr.bf16.mxu0 %v10248_v7  ;;  %v378_v27 = vld [vmem:[%s11463_s6 + $0x28] sm:$0xff]  ;;  %v379_v28 = vld [vmem:[%s11463_s6 + $0x30] sm:$0xff]  ;;  %v10259_v29 = vld [vmem:[#allocation5 + $0x78] ss:$12 sps:$4 sm:$0xff]   ;;  %v391_v32 = vmul.f32 11.313708, %v375_v23 }
  0xc9   : > { %v11494_v20 = vadd.f32 %v11491_v15, %v389_v17  ;;  %v11497_v21 = vadd.f32 %v11491_v15, %v390_v18  ;;  %v10260_v31 = vld [vmem:[#allocation5 + $0x94] ss:$12 sps:$4 sm:$0xff]   ;;  %v392_v34 = vmul.f32 11.313708, %v376_v24  ;;  %v393_v35 = vmul.f32 11.313708, %v377_v26 }
  0xca   : > { %v10266_v33 = vld [vmem:[#allocation5 + $0x8] ss:$12 sps:$4 sm:$0xff]   ;;  %v394_v36 = vmul.f32 11.313708, %v378_v27  ;;  %v395_v37 = vmul.f32 11.313708, %v379_v28  ;;  %v11511_v53 = vadd.f32 %v11491_v15, %v391_v32 }
  0xcb   : > { %853 = vmatpush1.bf16.msra.mxu0 %v10250_v8  ;;  %15130 = vst [vmem:[#allocation30_spill] sm:$0xff] %v11494_v20  ;;  %15131 = vst [vmem:[#allocation31_spill] sm:$0xff] %v11497_v21  ;;  %v680_v25 = vpack.c.bf16 %v11497_v21, %v11494_v20  ;;  %v396_v38 = vmul.f32 11.313708, %v380_v30  ;;  %v381_v39 = vld [vmem:[%s11463_s6 + $0x40] sm:$0xff]  ;;  %9089 = vmatprep.subr.bf16.mxu1 %v10266_v33  ;;  %v382_v44 = vld [vmem:[%s11463_s6 + $0x48] sm:$0xff]  ;;  %v11514_v54 = vadd.f32 %v11491_v15, %v392_v34 }
  0xcc   : > { %854 = vmatprep.subr.bf16.mxu0 %v10251_v10  ;;  %v10262_v40 = vld [vmem:[#allocation5 + $0x90] ss:$12 sps:$4 sm:$0xff]   ;;  %9090 = vmatpush3.bf16.msra.mxu1 %v10266_v33  ;;  %v10267_v41 = vld [vmem:[#allocation5 + $0x20] ss:$12 sps:$4 sm:$0xff]   ;;  %v10268_v43 = vld [vmem:[#allocation5 + $0x38] ss:$12 sps:$4 sm:$0xff]   ;;  %v11522_v60 = vadd.f32 %v11491_v15, %v393_v35  ;;  %v11525_v61 = vadd.f32 %v11491_v15, %v394_v36  ;;  %v11534_v8 = vadd.f32 %v11491_v15, %v395_v37 }
  0xcd   : > { %9105 = vmatprep.mubr.bf16.mxu1 %v680_v25  ;;  %v10263_v42 = vld [vmem:[#allocation5 + $0xac] ss:$12 sps:$4 sm:$0xff]   ;;  %9091 = vmatprep.subr.bf16.mxu1 %v10267_v41  ;;  %v383_v45 = vld [vmem:[%s11463_s6 + $0x50] sm:$0xff]  ;;  %v397_v47 = vmul.f32 11.313708, %v381_v39  ;;  %15132 = vst [vmem:[#allocation32_spill] sm:$0xff] %v11511_v53  ;;  %v681_v56 = vpack.c.bf16 %v11514_v54, %v11511_v53  ;;  %v11537_v10 = vadd.f32 %v11491_v15, %v396_v38 }
  0xce   : > { %v10265_v46 = vld [vmem:[#allocation5 + $0xa8] ss:$12 sps:$4 sm:$0xff]   ;;  %v10269_v48 = vld [vmem:[#allocation5 + $0x50] ss:$12 sps:$4 sm:$0xff]   ;;  %v398_v49 = vmul.f32 11.313708, %v382_v44  ;;  %v682_v3 = vpack.c.bf16 %v11525_v61, %v11522_v60 }
  0xcf   : > { %855 = vmatpush1.bf16.msra.mxu0 %v10253_v12  ;;  %v399_v50 = vmul.f32 11.313708, %v383_v45  ;;  %v10270_v51 = vld [vmem:[#allocation5 + $0x68] ss:$12 sps:$4 sm:$0xff]   ;;  %v10271_v52 = vld [vmem:[#allocation5 + $0x80] ss:$12 sps:$4 sm:$0xff]   ;;  %v683_v13 = vpack.c.bf16 %v11537_v10, %v11534_v8  ;;  %v11543_v14 = vadd.f32 %v11491_v15, %v397_v47 }
  0xd0   : > { %856 = vmatprep.subr.bf16.mxu0 %v10254_v16  ;;  %9092 = vmatpush3.bf16.msra.mxu1 %v10267_v41  ;;  %15133 = vst [vmem:[#allocation33_spill] sm:$0xff] %v11514_v54  ;;  %v10272_v55 = vld [vmem:[#allocation5 + $0x98] ss:$12 sps:$4 sm:$0xff]   ;;  %v10273_v58 = vld [vmem:[#allocation5 + $0xb0] ss:$12 sps:$4 sm:$0xff]   ;;  %15134 = vst [vmem:[#allocation34_spill] sm:$0xff] %v11522_v60  ;;  %v11546_v16 = vadd.f32 %v11491_v15, %v398_v49 }
  0xd1   : > { %9093 = vmatprep.subr.bf16.mxu1 %v10268_v43  ;;  %v384_v57 = vld [vmem:[%s11463_s6 + $0x58] sm:$0xff]  ;;  %v385_v59 = vld [vmem:[%s11463_s6 + $0x60] sm:$0xff]  ;;  %15135 = vst [vmem:[#allocation35_spill] sm:$0xff] %v11525_v61  ;;  %v386_v62 = vld [vmem:[%s11463_s6 + $0x68] sm:$0xff]  ;;  %v11552_v18 = vadd.f32 %v11491_v15, %v399_v50  ;;  %v15168_v21 = vmov -1e+30  }
  0xd2   : > { %v400_v63 = vmul.f32 11.313708, %v384_v57  ;;  %v387_v2 = vld [vmem:[%s11463_s6 + $0x70] sm:$0xff]  ;;  %v401_v4 = vmul.f32 11.313708, %v385_v59  ;;  %v388_v5 = vld [vmem:[%s11463_s6 + $0x78] sm:$0xff]  ;;  %v684_v17 = vpack.c.bf16 %v11546_v16, %v11543_v14 }
  0xd3   : > { %857 = vmatpush1.bf16.msra.mxu0 %v10256_v19  ;;  %v402_v7 = vmul.f32 11.313708, %v386_v62  ;;  %15136 = vst [vmem:[#allocation36_spill] sm:$0xff] %v11534_v8  ;;  %15137 = vst [vmem:[#allocation37_spill] sm:$0xff] %v11537_v10  ;;  %v403_v11 = vmul.f32 11.313708, %v387_v2 }
  0xd4   : > { %858 = vmatprep.subr.bf16.mxu0 %v10257_v22  ;;  %9094 = vmatpush3.bf16.msra.mxu1 %v10268_v43  ;;  %v404_v12 = vmul.f32 11.313708, %v388_v5  ;;  %15138 = vst [vmem:[#allocation38_spill] sm:$0xff] %v11543_v14  ;;  %15139 = vst [vmem:[#allocation39_spill] sm:$0xff] %v11546_v16  ;;  %v11555_v19 = vadd.f32 %v11491_v15, %v400_v63  ;;  %v11558_v22 = vadd.f32 %v11491_v15, %v401_v4  ;;  %v371_v30 = vld [vmem:[#allocation11] sm:$0xff]  ;;  %s11209_s8 = smov 64  }
  0xd5   : > { %9095 = vmatprep.subr.bf16.mxu1 %v10269_v48  ;;  %15140 = vst [vmem:[#allocation40_spill] sm:$0xff] %v11552_v18  ;;  %v11561_v23 = vadd.f32 %v11491_v15, %v402_v7  ;;  %v11569_v26 = vadd.f32 %v11491_v15, %v403_v11  ;;  %v11621_v2 = vrot.slane %v371_v30, %v11486_v9  ;;  %s11210_s11 = smov 32   ;;  %s14837_s28 = scalar_lea.vmem [#allocation13], %s8419_s20 }
  0xd6   : > { %15141 = vst [vmem:[#allocation41_spill] sm:$0xff] %v11555_v19  ;;  %15142 = vst [vmem:[#allocation42_spill] sm:$0xff] %v11558_v22  ;;  %v685_v24 = vpack.c.bf16 %v11555_v19, %v11552_v18  ;;  %v11572_v27 = vadd.f32 %v11491_v15, %v404_v12  ;;  %s8242_s1 = scalar_lea.sflag [#allocation4], %s11457_s14 }
  0xd7   : > { %859 = vmatpush1.bf16.msra.mxu0 %v10259_v29  ;;  %15143 = vst [vmem:[#allocation43_spill] sm:$0xff] %v11561_v23  ;;  %15144 = vst [vmem:[#allocation44_spill] sm:$0xff] %v11569_v26  ;;  %v11579_v29 = vsub.s32 0, %v11483_v6 }
  0xd8   : > { %860 = vmatprep.subr.bf16.mxu0 %v10260_v31  ;;  %9096 = vmatpush3.bf16.msra.mxu1 %v10269_v48  ;;  %15145 = vst [vmem:[#allocation45_spill] sm:$0xff] %v11572_v27  ;;  %v687_v28 = vpack.c.bf16 %v11572_v27, %v11569_v26  ;;  %v11582_v31 = vsub.s32 1, %v11483_v6  ;;  %v435_v27 = vadd.s32 72, %v11483_v6 }
  0xd9   : > { %9097 = vmatprep.subr.bf16.mxu1 %v10270_v51  ;;  %15146 = vst [vmem:[#allocation46_spill] sm:$0xff] %v11579_v29  ;;  %v11585_v15 = vrot.slane %v371_v30, %v11579_v29 }
  0xda   : > { %15147 = vst [vmem:[#allocation47_spill] sm:$0xff] %v11582_v31  ;;  %v11588_v33 = vrot.slane %v371_v30, %v11582_v31 }
  0xdb   : > { %861 = vmatpush1.bf16.msra.mxu0 %v10262_v40 }
  0xdc   : > { %862 = vmatprep.subr.bf16.mxu0 %v10263_v42  ;;  %9098 = vmatpush3.bf16.msra.mxu1 %v10270_v51 }
  0xdd   : > { %9099 = vmatprep.subr.bf16.mxu1 %v10271_v52 }
  0xdf   : > { %863 = vmatpush1.bf16.msra.mxu0 %v10265_v46 }
  0xe0   : > { %9100 = vmatpush3.bf16.msra.mxu1 %v10271_v52 }
  0xe1   : > { %9101 = vmatprep.subr.bf16.mxu1 %v10272_v55 }
  0xe2   : > { %881 = vmatmul.mubr.bf16.vlgmr.msra.gmra.mrb[0].mxu0 %v680_v25  ;;  %v686_v25 = vpack.c.bf16 %v11561_v23, %v11558_v22  ;;  %v440_v22 = vadd.s32 112, %v11483_v6 }
  0xe3   : > { %890 = vmatprep.mubr.bf16.mxu0 %v14951_v0 }
  0xe4   : > { %9102 = vmatpush3.bf16.msra.mxu1 %v10272_v55  ;;  %v546_v18 = vand.u32 15, %v440_v22 }
  0xe5   : > { %9103 = vmatprep.subr.bf16.mxu1 %v10273_v58 }
  0xe8   : > { %9104 = vmatpush3.bf16.msra.mxu1 %v10273_v58 }
  0xea   : > { %891 = vmatmul.mubr.bf16.gmra.mrb[4].mxu0 %v681_v56 }
  0xeb   : > { %900 = vmatprep.mubr.bf16.mxu0 %v14951_v0  ;;  %9106 = vmatmul.mubr.bf16.vlgmr.msra.gmra.mrb[0].mxu1 %v681_v56 }
  0xec   : > { %9109 = vmatprep.mubr.bf16.mxu1 %v682_v3 }
  0xf2   : > { %901 = vmatmul.mubr.bf16.gmra.mrb[8].mxu0 %v682_v3 }
  0xf3   : > { %910 = vmatprep.mubr.bf16.mxu0 %v14951_v0  ;;  %9110 = vmatmul.mubr.bf16.gmra.mrb[4].mxu1 %v683_v13 }
  0xf4   : > { %9113 = vmatprep.mubr.bf16.mxu1 %v684_v17 }
  0xfa   : > { %911 = vmatmul.mubr.bf16.gmra.mrb[12].mxu0 %v683_v13 }
  0xfb   : > { %920 = vmatprep.mubr.bf16.mxu0 %v14951_v0  ;;  %9114 = vmatmul.mubr.bf16.gmra.mrb[8].mxu1 %v685_v24 }
  0xfc   : > { %9117 = vmatprep.mubr.bf16.mxu1 %v686_v25 }
 0x102   : > { %921 = vmatmul.mubr.bf16.gmra.mrb[16].mxu0 %v684_v17 }
 0x103   : > { %930 = vmatprep.mubr.bf16.mxu0 %v14951_v0  ;;  %9118 = vmatmul.mubr.bf16.gmra.mrb[12].mxu1 %v687_v28 }
 0x10a   : > { %931 = vmatmul.mubr.bf16.gmra.mrb[20].mxu0 %v685_v24 }
 0x10b   : > { %940 = vmatprep.mubr.bf16.mxu0 %v14951_v0 }
 0x112   : > { %941 = vmatmul.mubr.bf16.gmra.mrb[24].mxu0 %v686_v25 }
 0x113   : > { %950 = vmatprep.mubr.bf16.mxu0 %v14951_v0  ;;  %v437_v0 = vadd.s32 88, %v11483_v6 }
 0x11a   : > { %951 = vmatmul.mubr.bf16.gmra.mrb[28].mxu0 %v687_v28 }
 0x1b5   : > { %v882_v32 = vpop.f32.mrb[0].mxu0 }
 0x1b6   : > { %v1062_v34 = vadd.f32 %v11585_v15, %v882_v32  ;;  %v884_v35 = vpop.f32.mrb[1].mxu0 }
 0x1b7   : > { %v886_v36 = vpop.f32.mrb[2].mxu0  ;;  %v1098_v39 = vadd.f32 %v11588_v33, %v884_v35 }
 0x1b8   : > { %v1063_v37 = vadd.f32 %v11585_v15, %v886_v36  ;;  %v888_v38 = vpop.f32.mrb[3].mxu0  ;;  %v1078_v41 = vmul.f32 0.17677669, %v1062_v34 }
 0x1b9   : > { %v1099_v40 = vadd.f32 %v11588_v33, %v888_v38 }
 0x1ba   : > { %v1079_v42 = vmul.f32 0.17677669, %v1063_v37 }
 0x1bb   : > { %v11594_v43 = vpack.c.bf16 %v1099_v40, %v1098_v39 }
 0x1bc   : > { %v11596_v44 = vpack.c.bf16 %v1079_v42, %v1078_v41 }
 0x1bd   : > { %v892_v45 = vpop.f32.mrb[4].mxu0  ;;  %1625 = vrot.lane.b32.xlu0 %v11594_v43, %s11207_s7  ;;  %10049 = vmatprep.subr.msk.bf16.mxu0 %vm1174_vm0, %v11594_v43  ;;  %v1200_v46 = vsel %vm1174_vm0, %v11594_v43, 0 }
 0x1be   : > { %v1064_v47 = vadd.f32 %v11585_v15, %v892_v45  ;;  %v894_v48 = vpop.f32.mrb[5].mxu0  ;;  %9122 = vmatpush3.bf16.xpose.msra.mxu0 %v1200_v46  ;;  %9137 = vmatprep.mubr.msk.bf16.mxu0 %vm1174_vm0, %v11596_v44  ;;  %v9107_v7 = vpop.f32.mrb[0].mxu1 }
 0x1bf   : > { %v896_v49 = vpop.f32.mrb[6].mxu0  ;;  %v1100_v52 = vadd.f32 %v11588_v33, %v894_v48  ;;  %v1120_v13 = vadd.f32 %v9107_v7, %v11621_v2  ;;  %v995_v17 = vpop.f32.mrb[1].mxu1 }
 0x1c0   : > { %v1065_v50 = vadd.f32 %v11585_v15, %v896_v49  ;;  %v898_v51 = vpop.f32.mrb[7].mxu0  ;;  %v1080_v56 = vmul.f32 0.17677669, %v1064_v47  ;;  %v1118_v28 = vadd.f32 %v11621_v2, %v995_v17  ;;  %v9108_v30 = vpop.f32.mrb[2].mxu1 }
 0x1c1   : > { %v1101_v55 = vadd.f32 %v11588_v33, %v898_v51  ;;  %v1121_v35 = vadd.f32 %v9108_v30, %v11621_v2  ;;  %v998_v36 = vpop.f32.mrb[3].mxu1 }
 0x1c2   : > { %v1081_v57 = vmul.f32 0.17677669, %v1065_v50  ;;  %v1119_v38 = vadd.f32 %v11621_v2, %v998_v36 }
 0x1c3   : > { %v11610_v58 = vpack.c.bf16 %v1101_v55, %v1100_v52  ;;  %v11635_v40 = vpack.c.bf16 %v1121_v35, %v1120_v13 }
 0x1c4   : > { %v11612_v59 = vpack.c.bf16 %v1081_v57, %v1080_v56  ;;  %v11641_v45 = vpack.c.bf16 %v1119_v38, %v1118_v28 }
 0x1c5   : > { %v902_v62 = vpop.f32.mrb[8].mxu0  ;;  %1627 = vrot.lane.b32.xlu1 %v11610_v58, %s11207_s7  ;;  %10050 = vmatprep.subr.msk.bf16.mxu0 %vm1174_vm0, %v11610_v58  ;;  %v1203_v63 = vsel %vm1174_vm0, %v11610_v58, 0  ;;  %15148 = vst [vmem:[#allocation48_spill] sm:$0xff] %v11635_v40 }
 0x1c6   : > { %v1066_v3 = vadd.f32 %v11585_v15, %v902_v62  ;;  %v904_v4 = vpop.f32.mrb[9].mxu0  ;;  %9124 = vmatpush3.bf16.xpose.msra.mxu0 %v1203_v63  ;;  %15149 = vst [vmem:[#allocation49_spill] sm:$0xff] %v11641_v45  ;;  %v9111_v49 = vpop.f32.mrb[4].mxu1  ;;  %9153 = vmatprep.subr.bf16.mxu1 %v11641_v45 }
 0x1c7   : > { %v906_v5 = vpop.f32.mrb[10].mxu0  ;;  %v1102_v24 = vadd.f32 %v11588_v33, %v904_v4  ;;  %v1124_v52 = vadd.f32 %v9111_v49, %v11621_v2  ;;  %v1011_v55 = vpop.f32.mrb[5].mxu1  ;;  %9154 = vmatpush3.bf16.msra.mxu1 %v11641_v45 }
 0x1c8   : > { %v1067_v11 = vadd.f32 %v11585_v15, %v906_v5  ;;  %v908_v12 = vpop.f32.mrb[11].mxu0  ;;  %v1082_v32 = vmul.f32 0.17677669, %v1066_v3  ;;  %v1122_v62 = vadd.f32 %v11621_v2, %v1011_v55  ;;  %v9112_v63 = vpop.f32.mrb[6].mxu1  ;;  %9155 = vmatprep.subr.bf16.mxu1 %v11635_v40 }
 0x1c9   : > { %v1103_v25 = vadd.f32 %v11588_v33, %v908_v12  ;;  %v1125_v5 = vadd.f32 %v9112_v63, %v11621_v2  ;;  %v1014_v7 = vpop.f32.mrb[7].mxu1 }
 0x1ca   : > { %v1083_v34 = vmul.f32 0.17677669, %v1067_v11  ;;  %v1123_v12 = vadd.f32 %v11621_v2, %v1014_v7 }
 0x1cb   : > { %v11630_v37 = vpack.c.bf16 %v1103_v25, %v1102_v24  ;;  %v11658_v17 = vpack.c.bf16 %v1125_v5, %v1124_v52  ;;  %9156 = vmatpush3.bf16.msra.mxu1 %v11635_v40 }
 0x1cc   : > { %v11633_v39 = vpack.c.bf16 %v1083_v34, %v1082_v32  ;;  %v11665_v28 = vpack.c.bf16 %v1123_v12, %v1122_v62 }
 0x1cd   : > { %v912_v41 = vpop.f32.mrb[12].mxu0  ;;  %10051 = vmatprep.subr.msk.bf16.mxu0 %vm1174_vm0, %v11630_v37  ;;  %v1206_v42 = vsel %vm1174_vm0, %v11630_v37, 0  ;;  %15150 = vst [vmem:[#allocation50_spill] sm:$0xff] %v11658_v17 }
 0x1ce   : > { %v1068_v46 = vadd.f32 %v11585_v15, %v912_v41  ;;  %v914_v47 = vpop.f32.mrb[13].mxu0  ;;  %9126 = vmatpush3.bf16.xpose.msra.mxu0 %v1206_v42  ;;  %15151 = vst [vmem:[#allocation51_spill] sm:$0xff] %v11665_v28  ;;  %v9115_v35 = vpop.f32.mrb[8].mxu1  ;;  %9157 = vmatprep.subr.bf16.mxu1 %v11665_v28 }
 0x1cf   : > { %v916_v48 = vpop.f32.mrb[14].mxu0  ;;  %v1104_v56 = vadd.f32 %v11588_v33, %v914_v47  ;;  %v1128_v41 = vadd.f32 %v9115_v35, %v11621_v2  ;;  %v1027_v42 = vpop.f32.mrb[9].mxu1  ;;  %9158 = vmatpush3.bf16.msra.mxu1 %v11665_v28 }
 0x1d0   : > { %v1069_v50 = vadd.f32 %v11585_v15, %v916_v48  ;;  %v918_v51 = vpop.f32.mrb[15].mxu0  ;;  %v1084_v3 = vmul.f32 0.17677669, %v1068_v46  ;;  %v1126_v48 = vadd.f32 %v11621_v2, %v1027_v42  ;;  %v9116_v49 = vpop.f32.mrb[10].mxu1  ;;  %9159 = vmatprep.subr.bf16.mxu1 %v11658_v17 }
 0x1d1   : > { %v1105_v57 = vadd.f32 %v11588_v33, %v918_v51  ;;  %v1129_v52 = vadd.f32 %v9116_v49, %v11621_v2  ;;  %v1030_v55 = vpop.f32.mrb[11].mxu1 }
 0x1d2   : > { %v1085_v4 = vmul.f32 0.17677669, %v1069_v50 }
 0x1d3   : > { %v11653_v11 = vpack.c.bf16 %v1105_v57, %v1104_v56  ;;  %v1127_v57 = vadd.f32 %v11621_v2, %v1030_v55  ;;  %v11682_v63 = vpack.c.bf16 %v1129_v52, %v1128_v41  ;;  %9160 = vmatpush3.bf16.msra.mxu1 %v11658_v17 }
 0x1d4   : > { %v11656_v13 = vpack.c.bf16 %v1085_v4, %v1084_v3 }
 0x1d5   : > { %v922_v24 = vpop.f32.mrb[16].mxu0  ;;  %10052 = vmatprep.subr.msk.bf16.mxu0 %vm1174_vm0, %v11653_v11  ;;  %v1209_v25 = vsel %vm1174_vm0, %v11653_v11, 0  ;;  %15152 = vst [vmem:[#allocation52_spill] sm:$0xff] %v11682_v63  ;;  %v11689_v5 = vpack.c.bf16 %v1127_v57, %v1126_v48 }
 0x1d6   : > { %v1070_v30 = vadd.f32 %v11585_v15, %v922_v24  ;;  %v924_v32 = vpop.f32.mrb[17].mxu0  ;;  %9128 = vmatpush3.bf16.xpose.msra.mxu0 %v1209_v25  ;;  %v9119_v25 = vpop.f32.mrb[12].mxu1 }
 0x1d7   : > { %v926_v34 = vpop.f32.mrb[18].mxu0  ;;  %v1106_v46 = vadd.f32 %v11588_v33, %v924_v32  ;;  %15153 = vst [vmem:[#allocation53_spill] sm:$0xff] %v11689_v5  ;;  %9161 = vmatprep.subr.bf16.mxu1 %v11689_v5  ;;  %v1043_v35 = vpop.f32.mrb[13].mxu1 }
 0x1d8   : > { %v1071_v36 = vadd.f32 %v11585_v15, %v926_v34  ;;  %v928_v38 = vpop.f32.mrb[19].mxu0  ;;  %v1086_v50 = vmul.f32 0.17677669, %v1070_v30  ;;  %v1132_v34 = vadd.f32 %v9119_v25, %v11621_v2  ;;  %9162 = vmatpush3.bf16.msra.mxu1 %v11689_v5  ;;  %v1130_v41 = vadd.f32 %v11621_v2, %v1043_v35  ;;  %v9120_v42 = vpop.f32.mrb[14].mxu1 }
 0x1d9   : > { %v1107_v47 = vadd.f32 %v11588_v33, %v928_v38  ;;  %9163 = vmatprep.subr.bf16.mxu1 %v11682_v63  ;;  %v1133_v48 = vadd.f32 %v9120_v42, %v11621_v2  ;;  %v1046_v49 = vpop.f32.mrb[15].mxu1 }
 0x1da   : > { %v1087_v51 = vmul.f32 0.17677669, %v1071_v36 }
 0x1db   : > { %v11677_v56 = vpack.c.bf16 %v1107_v47, %v1106_v46  ;;  %v11706_v55 = vpack.c.bf16 %v1133_v48, %v1132_v34 }
 0x1dc   : > { %v11680_v62 = vpack.c.bf16 %v1087_v51, %v1086_v50  ;;  %v1131_v51 = vadd.f32 %v11621_v2, %v1046_v49  ;;  %9164 = vmatpush3.bf16.msra.mxu1 %v11682_v63 }
 0x1dd   : > { %v932_v3 = vpop.f32.mrb[20].mxu0  ;;  %10053 = vmatprep.subr.msk.bf16.mxu0 %vm1174_vm0, %v11677_v56  ;;  %v1212_v4 = vsel %vm1174_vm0, %v11677_v56, 0  ;;  %15154 = vst [vmem:[#allocation54_spill] sm:$0xff] %v11706_v55 }
 0x1de   : > { %v1072_v7 = vadd.f32 %v11585_v15, %v932_v3  ;;  %v934_v12 = vpop.f32.mrb[21].mxu0  ;;  %9130 = vmatpush3.bf16.xpose.msra.mxu0 %v1212_v4  ;;  %v11713_v4 = vpack.c.bf16 %v1131_v51, %v1130_v41 }
 0x1df   : > { %v936_v24 = vpop.f32.mrb[22].mxu0  ;;  %v1108_v36 = vadd.f32 %v11588_v33, %v934_v12 }
 0x1e0   : > { %v1073_v30 = vadd.f32 %v11585_v15, %v936_v24  ;;  %v938_v32 = vpop.f32.mrb[23].mxu0  ;;  %v1088_v46 = vmul.f32 0.17677669, %v1072_v7  ;;  %15155 = vst [vmem:[#allocation55_spill] sm:$0xff] %v11713_v4  ;;  %9165 = vmatprep.subr.bf16.mxu1 %v11713_v4 }
 0x1e1   : > { %v1109_v38 = vadd.f32 %v11588_v33, %v938_v32  ;;  %9166 = vmatpush3.bf16.msra.mxu1 %v11713_v4 }
 0x1e2   : > { %v1089_v47 = vmul.f32 0.17677669, %v1073_v30  ;;  %9167 = vmatprep.subr.bf16.mxu1 %v11706_v55 }
 0x1e3   : > { %v11701_v50 = vpack.c.bf16 %v1109_v38, %v1108_v36 }
 0x1e4   : > { %v11704_v52 = vpack.c.bf16 %v1089_v47, %v1088_v46 }
 0x1e5   : > { %v942_v57 = vpop.f32.mrb[24].mxu0  ;;  %10054 = vmatprep.subr.msk.bf16.mxu0 %vm1174_vm0, %v11701_v50  ;;  %v1215_v3 = vsel %vm1174_vm0, %v11701_v50, 0  ;;  %9168 = vmatpush3.bf16.msra.mxu1 %v11706_v55 }
 0x1e6   : > { %v1074_v7 = vadd.f32 %v11585_v15, %v942_v57  ;;  %v944_v12 = vpop.f32.mrb[25].mxu0  ;;  %9132 = vmatpush3.bf16.xpose.msra.mxu0 %v1215_v3 }
 0x1e7   : > { %v946_v2 = vpop.f32.mrb[26].mxu0  ;;  %v1110_v30 = vadd.f32 %v11588_v33, %v944_v12 }
 0x1e8   : > { %v1075_v24 = vadd.f32 %v11585_v15, %v946_v2  ;;  %v948_v25 = vpop.f32.mrb[27].mxu0  ;;  %v1090_v34 = vmul.f32 0.17677669, %v1074_v7 }
 0x1e9   : > { %v1111_v32 = vadd.f32 %v11588_v33, %v948_v25 }
 0x1ea   : > { %v1091_v35 = vmul.f32 0.17677669, %v1075_v24 }
 0x1eb   : > { %v11722_v36 = vpack.c.bf16 %v1111_v32, %v1110_v30  ;;  %v443_v30 = vand.u32 127, %v405_v1  ;;  %v14971_v1 = vmov -1e+30  }
 0x1ec   : > { %v11724_v38 = vpack.c.bf16 %v1091_v35, %v1090_v34  ;;  %v429_v35 = vadd.s32 24, %v11483_v6 }
 0x1ed   : > { %v952_v41 = vpop.f32.mrb[28].mxu0  ;;  %10055 = vmatprep.subr.msk.bf16.mxu0 %vm1174_vm0, %v11722_v36  ;;  %v1218_v42 = vsel %vm1174_vm0, %v11722_v36, 0  ;;  %v11763_v34 = vand.u32 15, %v443_v30 }
 0x1ee   : > { %v1076_v46 = vadd.f32 %v11585_v15, %v952_v41  ;;  %v954_v47 = vpop.f32.mrb[29].mxu0  ;;  %9134 = vmatpush3.bf16.xpose.msra.mxu0 %v1218_v42  ;;  %v448_v41 = vand.u32 15, %v11483_v6  ;;  %v427_v42 = vadd.s32 8, %v11483_v6 }
 0x1ef   : > { %v956_v48 = vpop.f32.mrb[30].mxu0  ;;  %v1112_v57 = vadd.f32 %v11588_v33, %v954_v47  ;;  %v432_v47 = vadd.s32 48, %v11483_v6  ;;  %vm662_vm13 = vcmp.eq.s32.totalorder %v546_v18, %v11763_v34 }
 0x1f0   : > { %v1077_v49 = vadd.f32 %v11585_v15, %v956_v48  ;;  %v958_v51 = vpop.f32.mrb[31].mxu0  ;;  %v1092_v7 = vmul.f32 0.17677669, %v1076_v46  ;;  %v469_v46 = vand.u32 15, %v429_v35  ;;  %vm648_vm2 = vcmp.eq.s32.totalorder %v448_v41, %v11763_v34 }
 0x1f1   : > { %v1113_v3 = vadd.f32 %v11588_v33, %v958_v51  ;;  %v428_v33 = vadd.s32 16, %v11483_v6  ;;  %v455_v48 = vand.u32 15, %v427_v42  ;;  %v11871_v8 = vsel %vm662_vm13, 0.0, %v14971_v1 }
 0x1f2   : > { %v1093_v12 = vmul.f32 0.17677669, %v1077_v49  ;;  %v433_v49 = vadd.s32 56, %v11483_v6  ;;  %vm651_vm3 = vcmp.eq.s32.totalorder %v469_v46, %v11763_v34  ;;  %15166 = vst [vmem:[#allocation66_spill] sm:$0xff] %v11871_v8 }
 0x1f3   : > { %v11735_v2 = vpack.c.bf16 %v1113_v3, %v1112_v57  ;;  %v462_v32 = vand.u32 15, %v428_v33  ;;  %v11776_v57 = vsel %vm648_vm2, 0.0, %v14971_v1  ;;  %v490_v3 = vand.u32 15, %v432_v47 }
 0x1f4   : > { %v11737_v24 = vpack.c.bf16 %v1093_v12, %v1092_v7  ;;  %vm649_vm4 = vcmp.eq.s32.totalorder %v455_v48, %v11763_v34  ;;  %v430_v12 = vadd.s32 32, %v11483_v6  ;;  %v497_v30 = vand.u32 15, %v433_v49 }
 0x1f5   : > { %10056 = vmatprep.subr.msk.bf16.mxu0 %vm1174_vm0, %v11735_v2  ;;  %v1221_v25 = vsel %vm1174_vm0, %v11735_v2, 0  ;;  %vm650_vm1 = vcmp.eq.s32.totalorder %v462_v32, %v11763_v34  ;;  %v431_v32 = vadd.s32 40, %v11483_v6  ;;  %v11789_v41 = vsel %vm651_vm3, 0.0, %v14971_v1 }
 0x1f6   : > { %9136 = vmatpush3.bf16.xpose.msra.mxu0 %v1221_v25  ;;  %v11773_v51 = vsel %vm650_vm1, 0.0, %v14971_v1  ;;  %15157 = vst [vmem:[#allocation57_spill] sm:$0xff] %v11789_v41  ;;  %v11793_v46 = vsel %vm649_vm4, 0.0, %v14971_v1  ;;  %vm654_vm5 = vcmp.eq.s32.totalorder %v490_v3, %v11763_v34  ;;  %v436_v48 = vadd.s32 80, %v11483_v6 }
 0x1f7   : > { %15156 = vst [vmem:[#allocation56_spill] sm:$0xff] %v11773_v51  ;;  %v476_v49 = vand.u32 15, %v430_v12  ;;  %vm655_vm6 = vcmp.eq.s32.totalorder %v497_v30, %v11763_v34  ;;  %v11807_v31 = vsel %vm654_vm5, 0.0, %v14971_v1  ;;  %v434_v30 = vadd.s32 64, %v11483_v6 }
 0x1f8   : > { %15158 = vst [vmem:[#allocation58_spill] sm:$0xff] %v11807_v31  ;;  %v518_v3 = vand.u32 15, %v436_v48  ;;  %v11813_v12 = vsel %vm655_vm6, 0.0, %v14971_v1 }
 0x1f9   : > { %vm652_vm7 = vcmp.eq.s32.totalorder %v476_v49, %v11763_v34  ;;  %15159 = vst [vmem:[#allocation59_spill] sm:$0xff] %v11813_v12 }
 0x1fa   : > { %v11822_v26 = vsel %vm652_vm7, 0.0, %v14971_v1  ;;  %vm658_vm9 = vcmp.eq.s32.totalorder %v518_v3, %v11763_v34 }
 0x1fb   : > { %15160 = vst [vmem:[#allocation60_spill] sm:$0xff] %v11822_v26 }
 0x1fd   : > { %9138 = vmatmul.mubr.msk.bf16.vlgmr.msra.gmra.mrb[32].mxu0 %vm1174_vm0, %v11612_v59 }
 0x1fe   : > { %9141 = vmatprep.mubr.msk.bf16.mxu0 %vm1174_vm0, %v11633_v39 }
 0x205   : > { %9142 = vmatmul.mubr.msk.bf16.gmra.mrb[36].mxu0 %vm1174_vm0, %v11656_v13 }
 0x206   : > { %9145 = vmatprep.mubr.msk.bf16.mxu0 %vm1174_vm0, %v11680_v62 }
 0x20d   : > { %9146 = vmatmul.mubr.msk.bf16.gmra.mrb[40].mxu0 %vm1174_vm0, %v11704_v52 }
 0x20e   : > { %9149 = vmatprep.mubr.msk.bf16.mxu0 %vm1174_vm0, %v11724_v38 }
 0x215   : > { %9150 = vmatmul.mubr.msk.bf16.gmra.mrb[44].mxu0 %vm1174_vm0, %v11737_v24 }
 0x22f   : > { %v11757_v15 = vpop.permute.xlu0 %1625 }
 0x230   : > { %10057 = vmatprep.subr.msk.bf16.mxu1 %vm1174_vm0, %v11757_v15 }
 0x2d0   : > { %v9139_v7 = vpop.f32.mrb[32].mxu0 }
 0x2d1   : > { %v11782_v25 = vadd.f32 %v9139_v7, %v11773_v51  ;;  %v1257_v33 = vpop.f32.mrb[33].mxu0 }
 0x2d2   : > { %v11786_v35 = vadd.f32 %v1257_v33, %v11776_v57  ;;  %v9140_v42 = vpop.f32.mrb[34].mxu0  ;;  %v483_v33 = vand.u32 15, %v431_v32 }
 0x2d3   : > { %1324 = vmax.xlane.f32.xlu1 %v11782_v25  ;;  %v1260_v47 = vpop.f32.mrb[35].mxu0  ;;  %v11799_v7 = vadd.f32 %v9140_v42, %v11789_v41 }
 0x2d4   : > { %1320 = vmax.xlane.f32.xlu0 %v11786_v35  ;;  %v11804_v9 = vadd.f32 %v1260_v47, %v11793_v46  ;;  %vm653_vm8 = vcmp.eq.s32.totalorder %v483_v33, %v11763_v34  ;;  %v525_v47 = vand.u32 15, %v437_v0  ;;  %v504_v0 = vand.u32 15, %v434_v30 }
 0x2d5   : > { %v511_v33 = vand.u32 15, %v435_v27  ;;  %v438_v27 = vadd.s32 96, %v11483_v6 }
 0x2d6   : > { %vm659_vm10 = vcmp.eq.s32.totalorder %v525_v47, %v11763_v34  ;;  %vm656_vm11 = vcmp.eq.s32.totalorder %v504_v0, %v11763_v34 }
 0x2d7   : > { %1326 = vmax.xlane.f32.xlu1 %v11799_v7  ;;  %v11847_v30 = vsel %vm659_vm10, 0.0, %v14971_v1  ;;  %vm657_vm12 = vcmp.eq.s32.totalorder %v511_v33, %v11763_v34  ;;  %v11856_v22 = vsel %vm656_vm11, 0.0, %v14971_v1 }
 0x2d8   : > { %v9143_v29 = vpop.f32.mrb[36].mxu0  ;;  %1322 = vmax.xlane.f32.xlu0 %v11804_v9  ;;  %15163 = vst [vmem:[#allocation63_spill] sm:$0xff] %v11847_v30  ;;  %15164 = vst [vmem:[#allocation64_spill] sm:$0xff] %v11856_v22  ;;  %v11863_v10 = vsel %vm657_vm12, 0.0, %v14971_v1 }
 0x2d9   : > { %v11817_v32 = vadd.f32 %v9143_v29, %v11807_v31  ;;  %v1273_v42 = vpop.f32.mrb[37].mxu0  ;;  %v11830_v29 = vsel %vm653_vm8, 0.0, %v14971_v1  ;;  %15165 = vst [vmem:[#allocation65_spill] sm:$0xff] %v11863_v10 }
 0x2da   : > { %v9144_v48 = vpop.f32.mrb[38].mxu0  ;;  %15161 = vst [vmem:[#allocation61_spill] sm:$0xff] %v11830_v29  ;;  %v11836_v19 = vadd.f32 %v1273_v42, %v11822_v26 }
 0x2db   : > { %v11825_v49 = vadd.f32 %v9144_v48, %v11813_v12  ;;  %v1276_v23 = vpop.f32.mrb[39].mxu0  ;;  %v11839_v48 = vsel %vm658_vm9, 0.0, %v14971_v1 }
 0x2dc   : > { %1332 = vmax.xlane.f32.xlu0 %v11817_v32  ;;  %15162 = vst [vmem:[#allocation62_spill] sm:$0xff] %v11839_v48  ;;  %v11842_v3 = vadd.f32 %v1276_v23, %v11830_v29 }
 0x2dd   : > { %1334 = vmax.xlane.f32.xlu1 %v11825_v49 }
 0x2e0   : > { %v9147_v16 = vpop.f32.mrb[40].mxu0  ;;  %1328 = vmax.xlane.f32.xlu0 %v11836_v19 }
 0x2e1   : > { %v11851_v42 = vadd.f32 %v9147_v16, %v11839_v48  ;;  %v1289_v47 = vpop.f32.mrb[41].mxu0  ;;  %1330 = vmax.xlane.f32.xlu1 %v11842_v3  ;;  %v532_v16 = vand.u32 15, %v438_v27 }
 0x2e2   : > { %v9148_v23 = vpop.f32.mrb[42].mxu0  ;;  %v11868_v33 = vadd.f32 %v1289_v47, %v11856_v22 }
 0x2e3   : > { %v11859_v14 = vadd.f32 %v9148_v23, %v11847_v30  ;;  %v1292_v0 = vpop.f32.mrb[43].mxu0  ;;  %vm660_vm14 = vcmp.eq.s32.totalorder %v532_v16, %v11763_v34 }
 0x2e4   : > { %1340 = vmax.xlane.f32.xlu0 %v11851_v42  ;;  %v11874_v23 = vadd.f32 %v1292_v0, %v11863_v10  ;;  %v11883_v47 = vsel %vm660_vm14, 0.0, %v14971_v1  ;;  %v439_v1 = vadd.s32 104, %v11483_v6 }
 0x2e5   : > { %1342 = vmax.xlane.f32.xlu1 %v11859_v14  ;;  %15167 = vst [vmem:[#allocation67_spill] sm:$0xff] %v11883_v47 }
 0x2e6   : > { %v539_v53 = vand.u32 15, %v439_v1 }
 0x2e8   : > { %v9151_v61 = vpop.f32.mrb[44].mxu0  ;;  %1336 = vmax.xlane.f32.xlu0 %v11868_v33  ;;  %vm661_vm1 = vcmp.eq.s32.totalorder %v539_v53, %v11763_v34 }
 0x2e9   : > { %v11879_v18 = vadd.f32 %v9151_v61, %v11871_v8  ;;  %v1305_v27 = vpop.f32.mrb[45].mxu0  ;;  %1338 = vmax.xlane.f32.xlu1 %v11874_v23  ;;  %v441_v61 = vadd.s32 120, %v11483_v6  ;;  %v11905_v8 = vsel %vm661_vm1, 0.0, %v15168_v21 }
 0x2ea   : > { %v9152_v60 = vpop.f32.mrb[46].mxu0  ;;  %v11887_v0 = vadd.f32 %v1305_v27, %v11883_v47  ;;  %15170 = vst [vmem:[#allocation69_spill] sm:$0xff] %v11905_v8 }
 0x2eb   : > { %v1308_v54 = vpop.f32.mrb[47].mxu0  ;;  %v553_v16 = vand.u32 15, %v441_v61 }
 0x2ec   : > { %1348 = vmax.xlane.f32.xlu0 %v11879_v18  ;;  %v11909_v61 = vadd.f32 %v1308_v54, %v11905_v8 }
 0x2ed   : > { %vm663_vm15 = vcmp.eq.s32.totalorder %v553_v16, %v11763_v34  ;;  %v11912_v16 = vpop.permute.xlu1 %1627 }
 0x2ee   : > { %v11898_v20 = vsel %vm663_vm15, 0.0, %v15168_v21 }
 0x2ef   : > { %15169 = vst [vmem:[#allocation68_spill] sm:$0xff] %v11898_v20  ;;  %v11902_v27 = vadd.f32 %v9152_v60, %v11898_v20 }
 0x2f0   : > { %1344 = vmax.xlane.f32.xlu0 %v11887_v0 }
 0x2fa   : > { %1631 = vrot.lane.b32.xlu1 %v11653_v11, %s11207_s7 }
 0x306   : > { %1629 = vrot.lane.b32.xlu0 %v11630_v37, %s11207_s7 }
 0x31e   : > { %1350 = vmax.xlane.f32.xlu1 %v11902_v27 }
 0x322   : > { %1346 = vmax.xlane.f32.xlu1 %v11909_v61 }
 0x360   : > { %v1325_v1 = vpop.xlane.xlu1 %1324 }
 0x361   : > { %v1354_v6 = vsub.f32 %v11782_v25, %v1325_v1  ;;  %v1321_v47 = vpop.xlane.xlu0 %1320 }
 0x362   : > { %v1352_v53 = vsub.f32 %v11786_v35, %v1321_v47 }
 0x363   : > { %v1372_v60 = vmul.f32 1.442695, %v1354_v6 }
 0x364   : > { %v1368_v34 = vmul.f32 1.442695, %v1352_v53  ;;  %v1327_v20 = vpop.xlane.xlu1 %1326 }
 0x365   : > { %10354 = vpow2.f32 %v1372_v60  ;;  %v1355_v21 = vsub.f32 %v11799_v7, %v1327_v20  ;;  %v1323_v10 = vpop.xlane.xlu0 %1322 }
 0x366   : > { %v1353_v54 = vsub.f32 %v11804_v9, %v1323_v10  ;;  %10356 = vpow2.f32 %v1368_v34 }
 0x367   : > { %v1374_v8 = vmul.f32 1.442695, %v1355_v21 }
 0x368   : > { %v1370_v30 = vmul.f32 1.442695, %v1353_v54 }
 0x369   : > { %10358 = vpow2.f32 %v1374_v8  ;;  %v1333_v9 = vpop.xlane.xlu0 %1332 }
 0x36a   : > { %10360 = vpow2.f32 %v1370_v30  ;;  %v1335_v35 = vpop.xlane.xlu1 %1334  ;;  %v1358_v47 = vsub.f32 %v11817_v32, %v1333_v9 }
 0x36b   : > { %v1359_v54 = vsub.f32 %v11825_v49, %v1335_v35 }
 0x36c   : > { %v1380_v60 = vmul.f32 1.442695, %v1358_v47 }
 0x36d   : > { %v1329_v8 = vpop.xlane.xlu0 %1328  ;;  %v1382_v26 = vmul.f32 1.442695, %v1359_v54 }
 0x36e   : > { %v1331_v30 = vpop.xlane.xlu1 %1330  ;;  %v1356_v1 = vsub.f32 %v11836_v19, %v1329_v8  ;;  %10362 = vpow2.f32 %v1380_v60 }
 0x36f   : > { %v11918_v48 = vpop.eup %10354  ;;  %v1357_v34 = vsub.f32 %v11842_v3, %v1331_v30 }
 0x370   : > { %1404 = vadd.xlane.f32.xlu0 %v11918_v48  ;;  %v11921_v25 = vpop.eup %10356  ;;  %v1376_v22 = vmul.f32 1.442695, %v1356_v1 }
 0x371   : > { %v1341_v10 = vpop.xlane.xlu0 %1340  ;;  %v1378_v29 = vmul.f32 1.442695, %v1357_v34 }
 0x372   : > { %v1343_v21 = vpop.xlane.xlu1 %1342  ;;  %10364 = vpow2.f32 %v1376_v22  ;;  %v1362_v41 = vsub.f32 %v11851_v42, %v1341_v10 }
 0x373   : > { %v11923_v6 = vpop.eup %10358  ;;  %10366 = vpow2.f32 %v1378_v29  ;;  %v1363_v42 = vsub.f32 %v11859_v14, %v1343_v21 }
 0x374   : > { %1406 = vadd.xlane.f32.xlu1 %v11923_v6  ;;  %1400 = vadd.xlane.f32.xlu0 %v11921_v25  ;;  %v11927_v20 = vpop.eup %10360  ;;  %10368 = vpow2.f32 %v1382_v26  ;;  %v1388_v3 = vmul.f32 1.442695, %v1362_v41 }
 0x375   : > { %v1337_v7 = vpop.xlane.xlu0 %1336  ;;  %v1390_v29 = vmul.f32 1.442695, %v1363_v42 }
 0x376   : > { %v1339_v32 = vpop.xlane.xlu1 %1338  ;;  %v1360_v8 = vsub.f32 %v11868_v33, %v1337_v7 }
 0x377   : > { %v1361_v33 = vsub.f32 %v11874_v23, %v1339_v32 }
 0x378   : > { %1402 = vadd.xlane.f32.xlu1 %v11927_v20  ;;  %v11944_v30 = vpop.eup %10362  ;;  %v1384_v22 = vmul.f32 1.442695, %v1360_v8 }
 0x379   : > { %v1349_v53 = vpop.xlane.xlu0 %1348 }
 0x37a   : > { %v1366_v12 = vsub.f32 %v11879_v18, %v1349_v53  ;;  %v11942_v35 = vpop.permute.xlu1 %1631 }
 0x37c   : > { %v1396_v19 = vmul.f32 1.442695, %v1366_v12  ;;  %v11948_v12 = vpop.eup %10364 }
 0x37d   : > { %v1345_v31 = vpop.xlane.xlu0 %1344  ;;  %v11950_v26 = vpop.eup %10366 }
 0x37e   : > { %v1364_v9 = vsub.f32 %v11887_v0, %v1345_v31  ;;  %10370 = vpow2.f32 %v1396_v19  ;;  %v11956_v0 = vpop.eup %10368 }
 0x37f   : > { %10372 = vpow2.f32 %v1388_v3 }
 0x380   : > { %v1392_v49 = vmul.f32 1.442695, %v1364_v9 }
 0x381   : > { %v1630_v54 = vpop.permute.xlu0 %1629 }
 0x382   : > { %10374 = vpow2.f32 %v1392_v49 }
 0x383   : > { %10376 = vpow2.f32 %v1384_v22 }
 0x388   : > { %v11958_v10 = vpop.eup %10370 }
 0x389   : > { %1635 = vrot.lane.b32.xlu1 %v11701_v50, %s11207_s7  ;;  %v11963_v47 = vpop.eup %10372 }
 0x38a   : > { %1633 = vrot.lane.b32.xlu0 %v11677_v56, %s11207_s7 }
 0x38c   : > { %v11965_v1 = vpop.eup %10374 }
 0x38d   : > { %v11969_v53 = vpop.eup %10376 }
 0x3a9   : > { %1412 = vadd.xlane.f32.xlu0 %v11944_v30 }
 0x3ab   : > { %v1351_v31 = vpop.xlane.xlu1 %1350 }
 0x3ac   : > { %v1367_v41 = vsub.f32 %v11902_v27, %v1351_v31  ;;  %v1386_v27 = vmul.f32 1.442695, %v1361_v33 }
 0x3ad   : > { %1410 = vadd.xlane.f32.xlu0 %v11950_v26  ;;  %1408 = vadd.xlane.f32.xlu1 %v11948_v12 }
 0x3ae   : > { %v1398_v18 = vmul.f32 1.442695, %v1367_v41 }
 0x3af   : > { %v1347_v14 = vpop.xlane.xlu1 %1346 }
 0x3b0   : > { %10378 = vpow2.f32 %v1398_v18  ;;  %v1365_v7 = vsub.f32 %v11909_v61, %v1347_v14 }
 0x3b1   : > { %1414 = vadd.xlane.f32.xlu1 %v11956_v0  ;;  %1428 = vadd.xlane.f32.xlu0 %v11958_v10  ;;  %10380 = vpow2.f32 %v1390_v29 }
 0x3b2   : > { %10382 = vpow2.f32 %v1386_v27  ;;  %v1394_v23 = vmul.f32 1.442695, %v1365_v7 }
 0x3b4   : > { %10384 = vpow2.f32 %v1394_v23 }
 0x3b5   : > { %1420 = vadd.xlane.f32.xlu1 %v11963_v47  ;;  %1424 = vadd.xlane.f32.xlu0 %v11965_v1 }
 0x3b9   : > { %1416 = vadd.xlane.f32.xlu1 %v11969_v53 }
 0x3ba   : > { %v11972_v60 = vpop.eup %10378 }
 0x3bb   : > { %1430 = vadd.xlane.f32.xlu0 %v11972_v60  ;;  %v11975_v61 = vpop.eup %10380 }
 0x3bc   : > { %v11978_v34 = vpop.eup %10382 }
 0x3bd   : > { %1422 = vadd.xlane.f32.xlu1 %v11975_v61 }
 0x3be   : > { %v11981_v21 = vpop.eup %10384 }
 0x3c1   : > { %1418 = vadd.xlane.f32.xlu1 %v11978_v34 }
 0x3c5   : > { %1426 = vadd.xlane.f32.xlu1 %v11981_v21 }
 0x3d1   : > { %1637 = vrot.lane.b32.xlu0 %v11722_v36, %s11207_s7 }
 0x3d5   : > { %1601 = vrot.lane.b32.xlu0 %v11596_v44, %s11207_s7 }
 0x3d6   : > { %1639 = vrot.lane.b32.xlu1 %v11735_v2, %s11207_s7 }
 0x3d9   : > { %1605 = vrot.lane.b32.xlu0 %v11633_v39, %s11207_s7 }
 0x3da   : > { %1603 = vrot.lane.b32.xlu1 %v11612_v59, %s11207_s7 }
 0x3dd   : > { %1609 = vrot.lane.b32.xlu0 %v11680_v62, %s11207_s7 }
 0x3de   : > { %1607 = vrot.lane.b32.xlu1 %v11656_v13, %s11207_s7 }
 0x3e1   : > { %1613 = vrot.lane.b32.xlu0 %v11724_v38, %s11207_s7 }
 0x3e2   : > { %1611 = vrot.lane.b32.xlu1 %v11704_v52, %s11207_s7 }
 0x3e5   : > { %2373 = vrot.lane.b32.xlu0 %v11594_v43, %s11209_s8 }
 0x3e6   : > { %1615 = vrot.lane.b32.xlu1 %v11737_v24, %s11207_s7 }
 0x3e9   : > { %2377 = vrot.lane.b32.xlu0 %v11630_v37, %s11209_s8 }
 0x3ea   : > { %2375 = vrot.lane.b32.xlu1 %v11610_v58, %s11209_s8 }
 0x3ed   : > { %2381 = vrot.lane.b32.xlu0 %v11677_v56, %s11209_s8 }
 0x3ee   : > { %2379 = vrot.lane.b32.xlu1 %v11653_v11, %s11209_s8 }
 0x3f1   : > { %2385 = vrot.lane.b32.xlu0 %v11722_v36, %s11209_s8 }
 0x3f2   : > { %2383 = vrot.lane.b32.xlu1 %v11701_v50, %s11209_s8 }
 0x3f5   : > { %2357 = vrot.lane.b32.xlu0 %v11596_v44, %s11209_s8 }
 0x3f6   : > { %2387 = vrot.lane.b32.xlu1 %v11735_v2, %s11209_s8 }
 0x3f9   : > { %2361 = vrot.lane.b32.xlu0 %v11633_v39, %s11209_s8 }
 0x3fa   : > { %2359 = vrot.lane.b32.xlu1 %v11612_v59, %s11209_s8 }
 0x3fd   : > { %2365 = vrot.lane.b32.xlu0 %v11680_v62, %s11209_s8  ;;  %v1405_v32 = vpop.xlane.xlu0 %1404 }
 0x3fe   : > { %2363 = vrot.lane.b32.xlu1 %v11656_v13, %s11209_s8 }
 0x401   : > { %v1407_v19 = vpop.xlane.xlu1 %1406  ;;  %2369 = vrot.lane.b32.xlu0 %v11724_v38, %s11209_s8  ;;  %v1401_v9 = vpop.xlane.xlu0 %1400 }
 0x402   : > { %2367 = vrot.lane.b32.xlu1 %v11704_v52, %s11209_s8  ;;  %10386 = vrcp.f32 %v1407_v19 }
 0x403   : > { %10388 = vrcp.f32 %v1401_v9 }
 0x404   : > { %10390 = vrcp.f32 %v1405_v32 }
 0x405   : > { %v1403_v3 = vpop.xlane.xlu1 %1402  ;;  %1966 = vrot.lane.b32.xlu0 %v11665_v28, %s11207_s7 }
 0x406   : > { %10392 = vrcp.f32 %v1403_v3  ;;  %2371 = vrot.lane.b32.xlu1 %v11737_v24, %s11209_s8 }
 0x409   : > { %1970 = vrot.lane.b32.xlu0 %v11689_v5, %s11207_s7 }
 0x40a   : > { %1962 = vrot.lane.b32.xlu1 %v11641_v45, %s11207_s7 }
 0x40c   : > { %v10387_v8 = vpop.eup %10386 }
 0x40d   : > { %1974 = vrot.lane.b32.xlu0 %v11713_v4, %s11207_s7  ;;  %v10389_v49 = vpop.eup %10388  ;;  %v1467_v31 = vmul.f32 %v10387_v8, %v11923_v6 }
 0x40e   : > { %1964 = vrot.lane.b32.xlu1 %v11635_v40, %s11207_s7  ;;  %v10391_v42 = vpop.eup %10390  ;;  %v1464_v41 = vmul.f32 %v10389_v49, %v11921_v25 }
 0x40f   : > { %v1466_v33 = vmul.f32 %v10391_v42, %v11918_v48 }
 0x410   : > { %v10393_v22 = vpop.eup %10392 }
 0x411   : > { %2996 = vrot.lane.b32.xlu0 %v11594_v43, %s11210_s11  ;;  %v1465_v29 = vmul.f32 %v10393_v22, %v11927_v20  ;;  %v1481_v14 = vpack.c.bf16 %v1467_v31, %v1466_v33  ;;  %v1666_v43 = vsel %vm1174_vm0, %v11757_v15, 0  ;;  %v1634_v15 = vpop.permute.xlu0 %1633 }
 0x412   : > { %1968 = vrot.lane.b32.xlu1 %v11658_v17, %s11207_s7 }
 0x413   : > { %v1480_v18 = vpack.c.bf16 %v1465_v29, %v1464_v41 }
 0x415   : > { %3004 = vrot.lane.b32.xlu0 %v11677_v56, %s11210_s11  ;;  %9169 = vmatprep.mubr.bf16.mxu1 %v1480_v18  ;;  %v1669_v56 = vsel %vm1174_vm0, %v11912_v16, 0 }
 0x416   : > { %1972 = vrot.lane.b32.xlu1 %v11682_v63, %s11207_s7  ;;  %9170 = vmatmul.mubr.bf16.vlgmr.msra.gmra.mrb[16].mxu1 %v1481_v14 }
 0x417   : > { %9186 = vmatpush3.bf16.xpose.msra.mxu1 %v1666_v43 }
 0x418   : > { %10058 = vmatprep.subr.msk.bf16.mxu1 %vm1174_vm0, %v11912_v16 }
 0x419   : > { %3008 = vrot.lane.b32.xlu0 %v11722_v36, %s11210_s11  ;;  %v1672_v36 = vsel %vm1174_vm0, %v1630_v54, 0 }
 0x41a   : > { %1976 = vrot.lane.b32.xlu1 %v11706_v55, %s11207_s7 }
 0x41e   : > { %2998 = vrot.lane.b32.xlu1 %v11610_v58, %s11210_s11  ;;  %v1675_v58 = vsel %vm1174_vm0, %v11942_v35, 0 }
 0x41f   : > { %9188 = vmatpush3.bf16.xpose.msra.mxu1 %v1669_v56 }
 0x420   : > { %10059 = vmatprep.subr.msk.bf16.mxu1 %vm1174_vm0, %v1630_v54 }
 0x422   : > { %3000 = vrot.lane.b32.xlu1 %v11630_v37, %s11210_s11  ;;  %v1636_v37 = vpop.permute.xlu1 %1635 }
 0x426   : > { %3002 = vrot.lane.b32.xlu1 %v11653_v11, %s11210_s11  ;;  %v1678_v11 = vsel %vm1174_vm0, %v1634_v15, 0 }
 0x427   : > { %9190 = vmatpush3.bf16.xpose.msra.mxu1 %v1672_v36 }
 0x428   : > { %10060 = vmatprep.subr.msk.bf16.mxu1 %vm1174_vm0, %v11942_v35 }
 0x42a   : > { %3006 = vrot.lane.b32.xlu1 %v11701_v50, %s11210_s11 }
 0x42e   : > { %3010 = vrot.lane.b32.xlu1 %v11735_v2, %s11210_s11  ;;  %v1681_v2 = vsel %vm1174_vm0, %v1636_v37, 0 }
 0x42f   : > { %9192 = vmatpush3.bf16.xpose.msra.mxu1 %v1675_v58 }
 0x430   : > { %10061 = vmatprep.subr.msk.bf16.mxu1 %vm1174_vm0, %v1634_v15 }
 0x436   : > { %v1413_v48 = vpop.xlane.xlu0 %1412 }
 0x437   : > { %9194 = vmatpush3.bf16.xpose.msra.mxu1 %v1678_v11 }
 0x438   : > { %10062 = vmatprep.subr.msk.bf16.mxu1 %vm1174_vm0, %v1636_v37 }
 0x43a   : > { %v1409_v16 = vpop.xlane.xlu1 %1408  ;;  %v1411_v25 = vpop.xlane.xlu0 %1410 }
 0x43b   : > { %10394 = vrcp.f32 %v1409_v16 }
 0x43c   : > { %10396 = vrcp.f32 %v1411_v25 }
 0x43d   : > { %10398 = vrcp.f32 %v1413_v48 }
 0x43e   : > { %v1415_v50 = vpop.xlane.xlu1 %1414  ;;  %v1429_v6 = vpop.xlane.xlu0 %1428 }
 0x43f   : > { %10400 = vrcp.f32 %v1415_v50  ;;  %9196 = vmatpush3.bf16.xpose.msra.mxu1 %v1681_v2 }
 0x442   : > { %v1421_v20 = vpop.xlane.xlu1 %1420  ;;  %v1425_v35 = vpop.xlane.xlu0 %1424 }
 0x445   : > { %v10395_v27 = vpop.eup %10394 }
 0x446   : > { %v10397_v7 = vpop.eup %10396  ;;  %v1417_v23 = vpop.xlane.xlu1 %1416  ;;  %v1468_v54 = vmul.f32 %v10395_v27, %v11948_v12 }
 0x447   : > { %v10399_v32 = vpop.eup %10398  ;;  %v1469_v19 = vmul.f32 %v10397_v7, %v11950_v26 }
 0x448   : > { %v1431_v9 = vpop.xlane.xlu0 %1430  ;;  %v1470_v42 = vmul.f32 %v10399_v32, %v11944_v30 }
 0x449   : > { %v10401_v3 = vpop.eup %10400  ;;  %v1482_v8 = vpack.c.bf16 %v1469_v19, %v1468_v54 }
 0x44a   : > { %v1423_v49 = vpop.xlane.xlu1 %1422  ;;  %v1471_v22 = vmul.f32 %v10401_v3, %v11956_v0 }
 0x44b   : > { %9173 = vmatprep.mubr.bf16.mxu1 %v1482_v8  ;;  %10402 = vrcp.f32 %v1423_v49 }
 0x44c   : > { %v1638_v31 = vpop.permute.xlu0 %1637  ;;  %v1483_v41 = vpack.c.bf16 %v1471_v22, %v1470_v42  ;;  %10404 = vrcp.f32 %v1417_v23 }
 0x44d   : > { %10063 = vmatprep.subr.msk.bf16.mxu1 %vm1174_vm0, %v1638_v31  ;;  %v1684_v12 = vsel %vm1174_vm0, %v1638_v31, 0  ;;  %10406 = vrcp.f32 %v1421_v20 }
 0x44e   : > { %v1419_v29 = vpop.xlane.xlu1 %1418  ;;  %9174 = vmatmul.mubr.bf16.gmra.mrb[20].mxu1 %v1483_v41 }
 0x44f   : > { %10408 = vrcp.f32 %v1419_v29  ;;  %9198 = vmatpush3.bf16.xpose.msra.mxu1 %v1684_v12 }
 0x450   : > { %v1602_v26 = vpop.permute.xlu0 %1601  ;;  %10410 = vrcp.f32 %v1425_v35 }
 0x452   : > { %v1427_v33 = vpop.xlane.xlu1 %1426 }
 0x453   : > { %10412 = vrcp.f32 %v1427_v33 }
 0x454   : > { %10414 = vrcp.f32 %v1431_v9  ;;  %v1606_v30 = vpop.permute.xlu0 %1605 }
 0x455   : > { %v10403_v0 = vpop.eup %10402  ;;  %10416 = vrcp.f32 %v1429_v6 }
 0x456   : > { %v1640_v18 = vpop.permute.xlu1 %1639  ;;  %v10405_v14 = vpop.eup %10404  ;;  %v1475_v15 = vmul.f32 %v10403_v0, %v11975_v61 }
 0x457   : > { %10064 = vmatprep.subr.msk.bf16.mxu1 %vm1174_vm0, %v1640_v18  ;;  %v1687_v43 = vsel %vm1174_vm0, %v1640_v18, 0  ;;  %v10407_v56 = vpop.eup %10406  ;;  %v1472_v11 = vmul.f32 %v10405_v14, %v11969_v53 }
 0x458   : > { %9200 = vmatpush3.bf16.xpose.msra.mxu1 %v1687_v43  ;;  %v1610_v36 = vpop.permute.xlu0 %1609  ;;  %v1474_v25 = vmul.f32 %v10407_v56, %v11963_v47 }
 0x459   : > { %v10409_v58 = vpop.eup %10408 }
 0x45a   : > { %v1604_v37 = vpop.permute.xlu1 %1603  ;;  %v1473_v48 = vmul.f32 %v10409_v58, %v11978_v34  ;;  %v10411_v16 = vpop.eup %10410  ;;  %v1485_v20 = vpack.c.bf16 %v1475_v15, %v1474_v25 }
 0x45b   : > { %v1476_v7 = vmul.f32 %v10411_v16, %v11965_v1 }
 0x45c   : > { %v1614_v50 = vpop.permute.xlu0 %1613  ;;  %v1484_v2 = vpack.c.bf16 %v1473_v48, %v1472_v11 }
 0x45d   : > { %v10413_v6 = vpop.eup %10412 }
 0x45e   : > { %v10415_v35 = vpop.eup %10414  ;;  %v1608_v27 = vpop.permute.xlu1 %1607  ;;  %9177 = vmatprep.mubr.bf16.mxu1 %v1484_v2  ;;  %v1477_v23 = vmul.f32 %v10413_v6, %v11981_v21 }
 0x45f   : > { %9178 = vmatmul.mubr.bf16.gmra.mrb[24].mxu1 %v1485_v20  ;;  %v10417_v61 = vpop.eup %10416  ;;  %v1479_v34 = vmul.f32 %v10415_v35, %v11972_v60 }
 0x460   : > { %v2374_v54 = vpop.permute.xlu0 %2373  ;;  %v1486_v53 = vpack.c.bf16 %v1477_v23, %v1476_v7  ;;  %v1478_v32 = vmul.f32 %v10417_v61, %v11958_v10 }
 0x461   : > { %10065 = vmatprep.subr.msk.bf16.mxu1 %vm1174_vm0, %v2374_v54  ;;  %v2414_v49 = vsel %vm1174_vm0, %v2374_v54, 0 }
 0x462   : > { %v1612_v47 = vpop.permute.xlu1 %1611  ;;  %9181 = vmatprep.mubr.bf16.mxu1 %v1486_v53  ;;  %v1487_v19 = vpack.c.bf16 %v1479_v34, %v1478_v32 }
 0x464   : > { %v2378_v9 = vpop.permute.xlu0 %2377 }
 0x466   : > { %v1616_v3 = vpop.permute.xlu1 %1615 }
 0x467   : > { %9182 = vmatmul.mubr.bf16.gmra.mrb[28].mxu1 %v1487_v19 }
 0x468   : > { %9201 = vmatprep.mubr.msk.bf16.mxu1 %vm1174_vm0, %v1602_v26  ;;  %v2382_v21 = vpop.permute.xlu0 %2381  ;;  %v2420_v26 = vsel %vm1174_vm0, %v2378_v9, 0 }
 0x46a   : > { %v2376_v1 = vpop.permute.xlu1 %2375 }
 0x46b   : > { %v2417_v22 = vsel %vm1174_vm0, %v2376_v1, 0 }
 0x46c   : > { %v2386_v60 = vpop.permute.xlu0 %2385 }
 0x46d   : > { %v2432_v16 = vsel %vm1174_vm0, %v2386_v60, 0 }
 0x46e   : > { %v2380_v8 = vpop.permute.xlu1 %2379 }
 0x46f   : > { %9202 = vmatmul.mubr.msk.bf16.vlgmr.msra.gmra.mrb[32].mxu1 %vm1174_vm0, %v1604_v37  ;;  %v2423_v18 = vsel %vm1174_vm0, %v2380_v8, 0 }
 0x470   : > { %9290 = vmatpush3.bf16.xpose.msra.mxu1 %v2414_v49  ;;  %9205 = vmatprep.mubr.msk.bf16.mxu1 %vm1174_vm0, %v1606_v30  ;;  %v2358_v31 = vpop.permute.xlu0 %2357 }
 0x471   : > { %10066 = vmatprep.subr.msk.bf16.mxu1 %vm1174_vm0, %v2376_v1 }
 0x472   : > { %v2384_v10 = vpop.permute.xlu1 %2383 }
 0x473   : > { %v2429_v37 = vsel %vm1174_vm0, %v2384_v10, 0 }
 0x474   : > { %v2362_v12 = vpop.permute.xlu0 %2361 }
 0x476   : > { %v2388_v42 = vpop.permute.xlu1 %2387 }
 0x477   : > { %9206 = vmatmul.mubr.msk.bf16.gmra.mrb[36].mxu1 %vm1174_vm0, %v1608_v27  ;;  %v2435_v2 = vsel %vm1174_vm0, %v2388_v42, 0 }
 0x478   : > { %9292 = vmatpush3.bf16.xpose.msra.mxu1 %v2417_v22  ;;  %9209 = vmatprep.mubr.msk.bf16.mxu1 %vm1174_vm0, %v1610_v36  ;;  %v2366_v30 = vpop.permute.xlu0 %2365  ;;  %v2426_v36 = vsel %vm1174_vm0, %v2382_v21, 0 }
 0x479   : > { %10067 = vmatprep.subr.msk.bf16.mxu1 %vm1174_vm0, %v2378_v9 }
 0x47a   : > { %v2360_v41 = vpop.permute.xlu1 %2359 }
 0x47c   : > { %v2370_v14 = vpop.permute.xlu0 %2369 }
 0x47e   : > { %v2364_v29 = vpop.permute.xlu1 %2363 }
 0x47f   : > { %9210 = vmatmul.mubr.msk.bf16.gmra.mrb[40].mxu1 %vm1174_vm0, %v1612_v47 }
 0x480   : > { %9294 = vmatpush3.bf16.xpose.msra.mxu1 %v2420_v26  ;;  %9213 = vmatprep.mubr.msk.bf16.mxu1 %vm1174_vm0, %v1614_v50  ;;  %v1967_v58 = vpop.permute.xlu0 %1966  ;;  %v15196_v26 = vld [vmem:[#allocation67_spill] sm:$0xff] }
 0x481   : > { %10068 = vmatprep.subr.msk.bf16.mxu1 %vm1174_vm0, %v2380_v8 }
 0x482   : > { %v2368_v33 = vpop.permute.xlu1 %2367 }
 0x484   : > { %v1971_v11 = vpop.permute.xlu0 %1970 }
 0x486   : > { %v2372_v0 = vpop.permute.xlu1 %2371 }
 0x487   : > { %9214 = vmatmul.mubr.msk.bf16.gmra.mrb[44].mxu1 %vm1174_vm0, %v1616_v3 }
 0x488   : > { %9296 = vmatpush3.bf16.xpose.msra.mxu1 %v2423_v18  ;;  %9305 = vmatprep.mubr.msk.bf16.mxu1 %vm1174_vm0, %v2358_v31  ;;  %v1975_v25 = vpop.permute.xlu0 %1974 }
 0x489   : > { %10069 = vmatprep.subr.msk.bf16.mxu1 %vm1174_vm0, %v2382_v21 }
 0x48a   : > { %v1963_v43 = vpop.permute.xlu1 %1962 }
 0x48b   : > { %9217 = vmatprep.subr.bf16.mxu0 %v1963_v43 }
 0x48c   : > { %9218 = vmatpush3.bf16.msra.mxu0 %v1963_v43  ;;  %v2997_v6 = vpop.permute.xlu0 %2996  ;;  %v15195_v43 = vld [vmem:[#allocation65_spill] sm:$0xff] }
 0x48d   : > { %v3037_v20 = vsel %vm1174_vm0, %v2997_v6, 0 }
 0x48e   : > { %v1965_v56 = vpop.permute.xlu1 %1964 }
 0x48f   : > { %9219 = vmatprep.subr.bf16.mxu0 %v1965_v56 }
 0x490   : > { %9298 = vmatpush3.bf16.xpose.msra.mxu1 %v2426_v36  ;;  %9220 = vmatpush3.bf16.msra.mxu0 %v1965_v56  ;;  %v3005_v53 = vpop.permute.xlu0 %3004 }
 0x491   : > { %10070 = vmatprep.subr.msk.bf16.mxu1 %vm1174_vm0, %v2384_v10  ;;  %9221 = vmatprep.subr.bf16.mxu0 %v1967_v58  ;;  %v3049_v34 = vsel %vm1174_vm0, %v3005_v53, 0 }
 0x492   : > { %v1969_v15 = vpop.permute.xlu1 %1968 }
 0x494   : > { %9222 = vmatpush3.bf16.msra.mxu0 %v1967_v58  ;;  %v3009_v19 = vpop.permute.xlu0 %3008 }
 0x495   : > { %9223 = vmatprep.subr.bf16.mxu0 %v1969_v15  ;;  %v3055_v9 = vsel %vm1174_vm0, %v3009_v19, 0 }
 0x496   : > { %v1973_v48 = vpop.permute.xlu1 %1972 }
 0x498   : > { %9300 = vmatpush3.bf16.xpose.msra.mxu1 %v2429_v37  ;;  %9224 = vmatpush3.bf16.msra.mxu0 %v1969_v15 }
 0x499   : > { %10071 = vmatprep.subr.msk.bf16.mxu1 %vm1174_vm0, %v2386_v60  ;;  %9225 = vmatprep.subr.bf16.mxu0 %v1971_v11 }
 0x49a   : > { %v1977_v50 = vpop.permute.xlu1 %1976 }
 0x49c   : > { %9226 = vmatpush3.bf16.msra.mxu0 %v1971_v11  ;;  %v15194_v11 = vld [vmem:[#allocation63_spill] sm:$0xff] }
 0x49d   : > { %9227 = vmatprep.subr.bf16.mxu0 %v1973_v48 }
 0x49e   : > { %v2999_v35 = vpop.permute.xlu1 %2998 }
 0x49f   : > { %v3040_v27 = vsel %vm1174_vm0, %v2999_v35, 0 }
 0x4a0   : > { %9302 = vmatpush3.bf16.xpose.msra.mxu1 %v2432_v16  ;;  %9228 = vmatpush3.bf16.msra.mxu0 %v1973_v48 }
 0x4a1   : > { %10072 = vmatprep.subr.msk.bf16.mxu1 %vm1174_vm0, %v2388_v42  ;;  %9229 = vmatprep.subr.bf16.mxu0 %v1975_v25 }
 0x4a2   : > { %v3001_v7 = vpop.permute.xlu1 %3000 }
 0x4a3   : > { %v3043_v23 = vsel %vm1174_vm0, %v3001_v7, 0 }
 0x4a4   : > { %9230 = vmatpush3.bf16.msra.mxu0 %v1975_v25 }
 0x4a5   : > { %9231 = vmatprep.subr.bf16.mxu0 %v1977_v50 }
 0x4a6   : > { %v3003_v61 = vpop.permute.xlu1 %3002 }
 0x4a7   : > { %v3046_v54 = vsel %vm1174_vm0, %v3003_v61, 0 }
 0x4a8   : > { %9304 = vmatpush3.bf16.xpose.msra.mxu1 %v2435_v2  ;;  %9232 = vmatpush3.bf16.msra.mxu0 %v1977_v50 }
 0x4a9   : > { %10073 = vmatprep.subr.msk.bf16.mxu1 %vm1174_vm0, %v2997_v6 }
 0x4aa   : > { %v3007_v47 = vpop.permute.xlu1 %3006 }
 0x4ab   : > { %v3052_v32 = vsel %vm1174_vm0, %v3007_v47, 0 }
 0x4ae   : > { %v3011_v3 = vpop.permute.xlu1 %3010 }
 0x4af   : > { %9306 = vmatmul.mubr.msk.bf16.vlgmr.msra.gmra.mrb[48].mxu1 %vm1174_vm0, %v2360_v41  ;;  %v3058_v1 = vsel %vm1174_vm0, %v3011_v3, 0 }
 0x4b0   : > { %9309 = vmatprep.mubr.msk.bf16.mxu1 %vm1174_vm0, %v2362_v12  ;;  %9374 = vmatpush3.bf16.xpose.msra.mxu1 %v3037_v20 }
 0x4b1   : > { %10074 = vmatprep.subr.msk.bf16.mxu1 %vm1174_vm0, %v2999_v35 }
 0x4b7   : > { %9310 = vmatmul.mubr.msk.bf16.gmra.mrb[52].mxu1 %vm1174_vm0, %v2364_v29 }
 0x4b8   : > { %9313 = vmatprep.mubr.msk.bf16.mxu1 %vm1174_vm0, %v2366_v30  ;;  %9376 = vmatpush3.bf16.xpose.msra.mxu1 %v3040_v27  ;;  %v15187_v27 = vld [vmem:[#allocation57_spill] sm:$0xff] }
 0x4b9   : > { %10075 = vmatprep.subr.msk.bf16.mxu1 %vm1174_vm0, %v3001_v7 }
 0x4bf   : > { %9314 = vmatmul.mubr.msk.bf16.gmra.mrb[56].mxu1 %vm1174_vm0, %v2368_v33 }
 0x4c0   : > { %9317 = vmatprep.mubr.msk.bf16.mxu1 %vm1174_vm0, %v2370_v14  ;;  %9378 = vmatpush3.bf16.xpose.msra.mxu1 %v3043_v23 }
 0x4c1   : > { %10076 = vmatprep.subr.msk.bf16.mxu1 %vm1174_vm0, %v3003_v61  ;;  %v15188_v61 = vld [vmem:[#allocation60_spill] sm:$0xff] }
 0x4c7   : > { %9318 = vmatmul.mubr.msk.bf16.gmra.mrb[60].mxu1 %vm1174_vm0, %v2372_v0 }
 0x4c8   : > { %9380 = vmatpush3.bf16.xpose.msra.mxu1 %v3046_v54 }
 0x4c9   : > { %10077 = vmatprep.subr.msk.bf16.mxu1 %vm1174_vm0, %v3005_v53 }
 0x4d0   : > { %9382 = vmatpush3.bf16.xpose.msra.mxu1 %v3049_v34 }
 0x4d1   : > { %10078 = vmatprep.subr.msk.bf16.mxu1 %vm1174_vm0, %v3007_v47  ;;  %v15189_v47 = vld [vmem:[#allocation58_spill] sm:$0xff] }
 0x4d8   : > { %9384 = vmatpush3.bf16.xpose.msra.mxu1 %v3052_v32 }
 0x4d9   : > { %10079 = vmatprep.subr.msk.bf16.mxu1 %vm1174_vm0, %v3009_v19  ;;  %v15190_v19 = vld [vmem:[#allocation59_spill] sm:$0xff] }
 0x4e0   : > { %9386 = vmatpush3.bf16.xpose.msra.mxu1 %v3055_v9 }
 0x4e1   : > { %10080 = vmatprep.subr.msk.bf16.mxu1 %vm1174_vm0, %v3011_v3 }
 0x4e8   : > { %9388 = vmatpush3.bf16.xpose.msra.mxu1 %v3058_v1  ;;  %v15191_v1 = vld [vmem:[#allocation61_spill] sm:$0xff] }
 0x4e9   : > { %v12152_v21 = vpop.f32.mrb[16].mxu1 }
 0x4ea   : > { %15171 = vst [vmem:[#allocation70_spill] sm:$0xff] %v12152_v21  ;;  %v12154_v8 = vpop.f32.mrb[17].mxu1 }
 0x4eb   : > { %15172 = vst [vmem:[#allocation71_spill] sm:$0xff] %v12154_v8  ;;  %v12156_v49 = vpop.f32.mrb[18].mxu1 }
 0x4ec   : > { %15173 = vst [vmem:[#allocation72_spill] sm:$0xff] %v12156_v49  ;;  %v12160_v10 = vpop.f32.mrb[19].mxu1 }
 0x4ed   : > { %15174 = vst [vmem:[#allocation73_spill] sm:$0xff] %v12160_v10 }
 0x521   : > { %v12164_v22 = vpop.f32.mrb[20].mxu1 }
 0x522   : > { %15175 = vst [vmem:[#allocation74_spill] sm:$0xff] %v12164_v22  ;;  %v12166_v31 = vpop.f32.mrb[21].mxu1 }
 0x523   : > { %15176 = vst [vmem:[#allocation75_spill] sm:$0xff] %v12166_v31  ;;  %v12168_v41 = vpop.f32.mrb[22].mxu1 }
 0x524   : > { %15177 = vst [vmem:[#allocation76_spill] sm:$0xff] %v12168_v41  ;;  %v12172_v29 = vpop.f32.mrb[23].mxu1 }
 0x525   : > { %15178 = vst [vmem:[#allocation77_spill] sm:$0xff] %v12172_v29 }
 0x532   : > { %v12176_v33 = vpop.f32.mrb[24].mxu1 }
 0x533   : > { %15179 = vst [vmem:[#allocation78_spill] sm:$0xff] %v12176_v33  ;;  %v12178_v30 = vpop.f32.mrb[25].mxu1 }
 0x534   : > { %15180 = vst [vmem:[#allocation79_spill] sm:$0xff] %v12178_v30  ;;  %v12180_v0 = vpop.f32.mrb[26].mxu1 }
 0x535   : > { %15181 = vst [vmem:[#allocation80_spill] sm:$0xff] %v12180_v0  ;;  %v12184_v14 = vpop.f32.mrb[27].mxu1 }
 0x536   : > { %15182 = vst [vmem:[#allocation81_spill] sm:$0xff] %v12184_v14 }
 0x53a   : > { %v12188_v56 = vpop.f32.mrb[28].mxu1 }
 0x53b   : > { %15183 = vst [vmem:[#allocation82_spill] sm:$0xff] %v12188_v56  ;;  %v12190_v36 = vpop.f32.mrb[29].mxu1 }
 0x53c   : > { %15184 = vst [vmem:[#allocation83_spill] sm:$0xff] %v12190_v36  ;;  %v12192_v58 = vpop.f32.mrb[30].mxu1 }
 0x53d   : > { %15185 = vst [vmem:[#allocation84_spill] sm:$0xff] %v12192_v58  ;;  %v12196_v37 = vpop.f32.mrb[31].mxu1  ;;  %v15198_v58 = vld [vmem:[#allocation68_spill] sm:$0xff] }
 0x53e   : > { %15186 = vst [vmem:[#allocation85_spill] sm:$0xff] %v12196_v37 }
 0x542   : > { %v9203_v48 = vpop.f32.mrb[32].mxu1 }
 0x543   : > { %v12201_v16 = vadd.f32 %v9203_v48, %v11773_v51  ;;  %v1723_v25 = vpop.f32.mrb[33].mxu1 }
 0x544   : > { %v9204_v50 = vpop.f32.mrb[34].mxu1  ;;  %v12208_v20 = vadd.f32 %v1723_v25, %v11776_v57 }
 0x545   : > { %1790 = vmax.xlane.f32.xlu0 %v12201_v16  ;;  %v1726_v2 = vpop.f32.mrb[35].mxu1  ;;  %v12213_v7 = vadd.f32 %v9204_v50, %v15187_v27  ;;  %v15192_v50 = vld [vmem:[#allocation64_spill] sm:$0xff] }
 0x546   : > { %v12205_v6 = vadd.f32 %v1726_v2, %v11793_v46 }
 0x548   : > { %1788 = vmax.xlane.f32.xlu1 %v12205_v6 }
 0x549   : > { %1786 = vmax.xlane.f32.xlu0 %v12208_v20 }
 0x54a   : > { %v9207_v35 = vpop.f32.mrb[36].mxu1 }
 0x54b   : > { %v1739_v23 = vpop.f32.mrb[37].mxu1  ;;  %v12221_v32 = vadd.f32 %v9207_v35, %v15189_v47 }
 0x54c   : > { %v12216_v54 = vadd.f32 %v1739_v23, %v15188_v61  ;;  %v9208_v53 = vpop.f32.mrb[38].mxu1 }
 0x54d   : > { %1792 = vmax.xlane.f32.xlu0 %v12213_v7  ;;  %v1742_v34 = vpop.f32.mrb[39].mxu1  ;;  %v12224_v9 = vadd.f32 %v9208_v53, %v15190_v19  ;;  %v15193_v53 = vld [vmem:[#allocation62_spill] sm:$0xff] }
 0x54e   : > { %1794 = vmax.xlane.f32.xlu1 %v12216_v54  ;;  %v12229_v48 = vadd.f32 %v1742_v34, %v15191_v1 }
 0x551   : > { %1798 = vmax.xlane.f32.xlu0 %v12221_v32 }
 0x552   : > { %1800 = vmax.xlane.f32.xlu1 %v12224_v9  ;;  %v9211_v3 = vpop.f32.mrb[40].mxu1 }
 0x553   : > { %v1755_v25 = vpop.f32.mrb[41].mxu1  ;;  %v12237_v15 = vadd.f32 %v9211_v3, %v15193_v53 }
 0x554   : > { %v12232_v2 = vadd.f32 %v1755_v25, %v15192_v50  ;;  %v9212_v23 = vpop.f32.mrb[42].mxu1 }
 0x555   : > { %1796 = vmax.xlane.f32.xlu0 %v12229_v48  ;;  %v1758_v35 = vpop.f32.mrb[43].mxu1  ;;  %v12240_v18 = vadd.f32 %v9212_v23, %v15194_v11  ;;  %v15197_v23 = vld [vmem:[#allocation66_spill] sm:$0xff] }
 0x556   : > { %1802 = vmax.xlane.f32.xlu1 %v12232_v2  ;;  %v12245_v25 = vadd.f32 %v1758_v35, %v15195_v43  ;;  %v15199_v35 = vld [vmem:[#allocation69_spill] sm:$0xff] }
 0x559   : > { %1806 = vmax.xlane.f32.xlu0 %v12237_v15 }
 0x55a   : > { %1808 = vmax.xlane.f32.xlu1 %v12240_v18  ;;  %v9215_v34 = vpop.f32.mrb[44].mxu1 }
 0x55b   : > { %v1771_v12 = vpop.f32.mrb[45].mxu1  ;;  %v12253_v56 = vadd.f32 %v9215_v34, %v15197_v23 }
 0x55c   : > { %v12248_v60 = vadd.f32 %v1771_v12, %v15196_v26  ;;  %v9216_v42 = vpop.f32.mrb[46].mxu1 }
 0x55d   : > { %1804 = vmax.xlane.f32.xlu0 %v12245_v25  ;;  %v1774_v3 = vpop.f32.mrb[47].mxu1  ;;  %v12256_v36 = vadd.f32 %v9216_v42, %v15198_v58 }
 0x55e   : > { %1810 = vmax.xlane.f32.xlu1 %v12248_v60  ;;  %v12261_v37 = vadd.f32 %v1774_v3, %v15199_v35 }
 0x561   : > { %1814 = vmax.xlane.f32.xlu0 %v12253_v56 }
 0x562   : > { %1816 = vmax.xlane.f32.xlu1 %v12256_v36 }
 0x565   : > { %1812 = vmax.xlane.f32.xlu0 %v12261_v37 }
 0x573   : > { %2982 = vrot.lane.b32.xlu1 %v11612_v59, %s11210_s11 }
 0x57b   : > { %2980 = vrot.lane.b32.xlu0 %v11596_v44, %s11210_s11 }
 0x582   : > { %v12268_v12 = vpop.f32.mrb[48].mxu1 }
 0x583   : > { %v12270_v34 = vpop.f32.mrb[49].mxu1 }
 0x584   : > { %v12272_v42 = vpop.f32.mrb[50].mxu1 }
 0x585   : > { %v12274_v33 = vpop.f32.mrb[51].mxu1 }
 0x58a   : > { %v12276_v0 = vpop.f32.mrb[52].mxu1 }
 0x58b   : > { %v12278_v3 = vpop.f32.mrb[53].mxu1 }
 0x58c   : > { %v12280_v30 = vpop.f32.mrb[54].mxu1 }
 0x58d   : > { %v12282_v14 = vpop.f32.mrb[55].mxu1 }
 0x592   : > { %v12284_v59 = vpop.f32.mrb[56].mxu1 }
 0x593   : > { %v12286_v22 = vpop.f32.mrb[57].mxu1 }
 0x594   : > { %v12288_v44 = vpop.f32.mrb[58].mxu1 }
 0x595   : > { %v12290_v41 = vpop.f32.mrb[59].mxu1 }
 0x59a   : > { %v12292_v31 = vpop.f32.mrb[60].mxu1 }
 0x59b   : > { %15200 = vst [vmem:[#allocation57_spill] sm:$0xff] %v12292_v31  ;;  %v12294_v29 = vpop.f32.mrb[61].mxu1 }
 0x59c   : > { %v12296_v21 = vpop.f32.mrb[62].mxu1 }
 0x59d   : > { %15201 = vst [vmem:[#allocation86_spill] sm:$0xff] %v12296_v21  ;;  %v12298_v49 = vpop.f32.mrb[63].mxu1 }
 0x59e   : > { %15202 = vst [vmem:[#allocation87_spill] sm:$0xff] %v12298_v49 }
 0x5d2   : > { %v1791_v8 = vpop.xlane.xlu0 %1790 }
 0x5d3   : > { %v1820_v10 = vsub.f32 %v12201_v16, %v1791_v8 }
 0x5d5   : > { %v1838_v55 = vmul.f32 1.442695, %v1820_v10  ;;  %v1789_v17 = vpop.xlane.xlu1 %1788 }
 0x5d6   : > { %v1787_v4 = vpop.xlane.xlu0 %1786  ;;  %v1819_v63 = vsub.f32 %v12205_v6, %v1789_v17 }
 0x5d7   : > { %10418 = vpow2.f32 %v1838_v55  ;;  %v1818_v28 = vsub.f32 %v12208_v20, %v1787_v4 }
 0x5d8   : > { %v1836_v35 = vmul.f32 1.442695, %v1819_v63 }
 0x5d9   : > { %v1834_v45 = vmul.f32 1.442695, %v1818_v28 }
 0x5da   : > { %v1793_v5 = vpop.xlane.xlu0 %1792 }
 0x5db   : > { %10420 = vpow2.f32 %v1834_v45  ;;  %v1821_v40 = vsub.f32 %v12213_v7, %v1793_v5  ;;  %v1795_v31 = vpop.xlane.xlu1 %1794 }
 0x5dc   : > { %v1822_v49 = vsub.f32 %v12216_v54, %v1795_v31 }
 0x5dd   : > { %v1840_v23 = vmul.f32 1.442695, %v1821_v40 }
 0x5de   : > { %v1799_v21 = vpop.xlane.xlu0 %1798  ;;  %v1842_v17 = vmul.f32 1.442695, %v1822_v49 }
 0x5df   : > { %10422 = vpow2.f32 %v1840_v23  ;;  %v1824_v8 = vsub.f32 %v12221_v32, %v1799_v21  ;;  %v1801_v55 = vpop.xlane.xlu1 %1800 }
 0x5e0   : > { %v1825_v10 = vsub.f32 %v12224_v9, %v1801_v55  ;;  %10424 = vpow2.f32 %v1836_v35 }
 0x5e1   : > { %v12307_v4 = vpop.eup %10418  ;;  %v1846_v28 = vmul.f32 1.442695, %v1824_v8 }
 0x5e2   : > { %1870 = vadd.xlane.f32.xlu0 %v12307_v4  ;;  %v1797_v45 = vpop.xlane.xlu0 %1796  ;;  %v1848_v40 = vmul.f32 1.442695, %v1825_v10 }
 0x5e3   : > { %10426 = vpow2.f32 %v1846_v28  ;;  %v1823_v63 = vsub.f32 %v12229_v48, %v1797_v45  ;;  %v1803_v5 = vpop.xlane.xlu1 %1802 }
 0x5e4   : > { %10428 = vpow2.f32 %v1842_v17  ;;  %v1826_v16 = vsub.f32 %v12232_v2, %v1803_v5 }
 0x5e5   : > { %v12311_v31 = vpop.eup %10420  ;;  %v1844_v21 = vmul.f32 1.442695, %v1823_v63  ;;  %10430 = vpow2.f32 %v1848_v40 }
 0x5e6   : > { %1866 = vadd.xlane.f32.xlu1 %v12311_v31  ;;  %v1807_v6 = vpop.xlane.xlu0 %1806  ;;  %v1850_v9 = vmul.f32 1.442695, %v1826_v16 }
 0x5e7   : > { %v1828_v49 = vsub.f32 %v12237_v15, %v1807_v6  ;;  %v1809_v20 = vpop.xlane.xlu1 %1808  ;;  %10432 = vpow2.f32 %v1844_v21 }
 0x5e8   : > { %v1829_v7 = vsub.f32 %v12240_v18, %v1809_v20 }
 0x5e9   : > { %v12317_v54 = vpop.eup %10422  ;;  %v1854_v32 = vmul.f32 1.442695, %v1828_v49 }
 0x5ea   : > { %1872 = vadd.xlane.f32.xlu0 %v12317_v54  ;;  %v1805_v48 = vpop.xlane.xlu0 %1804  ;;  %v1856_v23 = vmul.f32 1.442695, %v1829_v7  ;;  %v12321_v8 = vpop.eup %10424 }
 0x5eb   : > { %10434 = vpow2.f32 %v1854_v32  ;;  %v1827_v2 = vsub.f32 %v12245_v25, %v1805_v48  ;;  %v1811_v35 = vpop.xlane.xlu1 %1810 }
 0x5ec   : > { %10436 = vpow2.f32 %v1850_v9  ;;  %v1830_v18 = vsub.f32 %v12248_v60, %v1811_v35  ;;  %v12372_v35 = vadd.f32 %v12274_v33, %v11793_v46  ;;  %v12401_v33 = vadd.f32 %v12280_v30, %v15190_v19 }
 0x5ed   : > { %v12323_v55 = vpop.eup %10426  ;;  %v1852_v15 = vmul.f32 1.442695, %v1827_v2  ;;  %10438 = vpow2.f32 %v1856_v23 }
 0x5ee   : > { %1868 = vadd.xlane.f32.xlu0 %v12321_v8  ;;  %1878 = vadd.xlane.f32.xlu1 %v12323_v55  ;;  %v1815_v10 = vpop.xlane.xlu0 %1814  ;;  %v12329_v45 = vpop.eup %10428  ;;  %v1858_v5 = vmul.f32 1.442695, %v1830_v18  ;;  %v12382_v18 = vadd.f32 %v12268_v12, %v11773_v51  ;;  %v12406_v12 = vadd.f32 %v12290_v41, %v15195_v43  ;;  %v12421_v41 = vadd.f32 %v12276_v0, %v15189_v47 }
 0x5ef   : > { %v1832_v28 = vsub.f32 %v12253_v56, %v1815_v10  ;;  %v1817_v17 = vpop.xlane.xlu1 %1816  ;;  %v12332_v40 = vpop.eup %10430  ;;  %10440 = vpow2.f32 %v1852_v15  ;;  %v12377_v15 = vadd.f32 %v12270_v34, %v11776_v57  ;;  %v12415_v34 = vadd.f32 %v12288_v44, %v15194_v11 }
 0x5f0   : > { %v1833_v25 = vsub.f32 %v12256_v36, %v1817_v17  ;;  %v12431_v0 = vadd.f32 %v12284_v59, %v15193_v53 }
 0x5f1   : > { %v1862_v63 = vmul.f32 1.442695, %v1832_v28  ;;  %v12337_v56 = vpop.eup %10432 }
 0x5f2   : > { %1880 = vadd.xlane.f32.xlu0 %v12332_v40  ;;  %1874 = vadd.xlane.f32.xlu1 %v12329_v45  ;;  %v1813_v60 = vpop.xlane.xlu0 %1812  ;;  %v1864_v21 = vmul.f32 1.442695, %v1833_v25 }
 0x5f3   : > { %10442 = vpow2.f32 %v1862_v63  ;;  %v1831_v16 = vsub.f32 %v12261_v37, %v1813_v60  ;;  %v2983_v20 = vpop.permute.xlu1 %2982 }
 0x5f4   : > { %10444 = vpow2.f32 %v1858_v5 }
 0x5f5   : > { %v12339_v6 = vpop.eup %10434  ;;  %10446 = vpow2.f32 %v1864_v21  ;;  %v1860_v49 = vmul.f32 1.442695, %v1831_v16 }
 0x5f6   : > { %1876 = vadd.xlane.f32.xlu0 %v12337_v56  ;;  %1886 = vadd.xlane.f32.xlu1 %v12339_v6  ;;  %v2981_v36 = vpop.permute.xlu0 %2980  ;;  %v12344_v7 = vpop.eup %10436 }
 0x5f7   : > { %9389 = vmatprep.mubr.msk.bf16.mxu1 %vm1174_vm0, %v2981_v36  ;;  %v12347_v37 = vpop.eup %10438  ;;  %10448 = vpow2.f32 %v1860_v49 }
 0x5f8   : > { %9390 = vmatmul.mubr.msk.bf16.vlgmr.msra.gmra.mrb[64].mxu1 %vm1174_vm0, %v2983_v20 }
 0x5f9   : > { %v12351_v32 = vpop.eup %10440 }
 0x5fa   : > { %1888 = vadd.xlane.f32.xlu0 %v12347_v37  ;;  %1882 = vadd.xlane.f32.xlu1 %v12344_v7 }
 0x5fd   : > { %v12353_v9 = vpop.eup %10442 }
 0x5fe   : > { %1884 = vadd.xlane.f32.xlu0 %v12351_v32  ;;  %1894 = vadd.xlane.f32.xlu1 %v12353_v9  ;;  %v12357_v48 = vpop.eup %10444 }
 0x5ff   : > { %v12359_v23 = vpop.eup %10446 }
 0x601   : > { %v12363_v2 = vpop.eup %10448 }
 0x602   : > { %1896 = vadd.xlane.f32.xlu0 %v12359_v23  ;;  %1890 = vadd.xlane.f32.xlu1 %v12357_v48 }
 0x606   : > { %1892 = vadd.xlane.f32.xlu0 %v12363_v2 }
 0x613   : > { %2986 = vrot.lane.b32.xlu1 %v11656_v13, %s11210_s11  ;;  %v12396_v13 = vadd.f32 %v12278_v3, %v15188_v61 }
 0x61c   : > { %2984 = vrot.lane.b32.xlu0 %v11633_v39, %s11210_s11  ;;  %v12387_v39 = vadd.f32 %v12272_v42, %v15187_v27 }
 0x637   : > { %2536 = vmax.xlane.f32.xlu1 %v12372_v35 }
 0x63b   : > { %2534 = vmax.xlane.f32.xlu0 %v12377_v15 }
 0x63f   : > { %2538 = vmax.xlane.f32.xlu0 %v12382_v18 }
 0x643   : > { %2540 = vmax.xlane.f32.xlu0 %v12387_v39 }
 0x648   : > { %2990 = vrot.lane.b32.xlu1 %v11704_v52, %s11210_s11 }
 0x659   : > { %2988 = vrot.lane.b32.xlu0 %v11680_v62, %s11210_s11  ;;  %v12411_v62 = vadd.f32 %v12282_v14, %v15191_v1  ;;  %v12426_v14 = vadd.f32 %v12286_v22, %v15192_v50 }
 0x66c   : > { %2542 = vmax.xlane.f32.xlu1 %v12396_v13 }
 0x66f   : > { %v1871_v52 = vpop.xlane.xlu0 %1870 }
 0x670   : > { %2548 = vmax.xlane.f32.xlu1 %v12401_v33 }
 0x673   : > { %v1867_v42 = vpop.xlane.xlu1 %1866 }
 0x674   : > { %2552 = vmax.xlane.f32.xlu1 %v12406_v12 }
 0x677   : > { %v1873_v30 = vpop.xlane.xlu0 %1872 }
 0x678   : > { %2556 = vmax.xlane.f32.xlu1 %v12415_v34  ;;  %2544 = vmax.xlane.f32.xlu0 %v12411_v62  ;;  %10450 = vrcp.f32 %v1873_v30 }
 0x679   : > { %10452 = vrcp.f32 %v1867_v42 }
 0x67a   : > { %10454 = vrcp.f32 %v1871_v52 }
 0x67b   : > { %v1879_v3 = vpop.xlane.xlu1 %1878  ;;  %v1869_v10 = vpop.xlane.xlu0 %1868 }
 0x67c   : > { %2546 = vmax.xlane.f32.xlu0 %v12421_v41  ;;  %10456 = vrcp.f32 %v1869_v10 }
 0x67f   : > { %v1875_v44 = vpop.xlane.xlu1 %1874  ;;  %v1881_v28 = vpop.xlane.xlu0 %1880 }
 0x680   : > { %2550 = vmax.xlane.f32.xlu0 %v12426_v14  ;;  %10458 = vrcp.f32 %v1881_v28 }
 0x681   : > { %10460 = vrcp.f32 %v1875_v44 }
 0x682   : > { %v10451_v63 = vpop.eup %10450  ;;  %10462 = vrcp.f32 %v1879_v3 }
 0x683   : > { %v1887_v17 = vpop.xlane.xlu1 %1886  ;;  %v1877_v25 = vpop.xlane.xlu0 %1876  ;;  %v1933_v21 = vmul.f32 %v10451_v63, %v12317_v54 }
 0x684   : > { %2554 = vmax.xlane.f32.xlu0 %v12431_v0  ;;  %v10453_v5 = vpop.eup %10452  ;;  %10464 = vrcp.f32 %v1877_v25 }
 0x685   : > { %v10455_v22 = vpop.eup %10454  ;;  %v1930_v49 = vmul.f32 %v10453_v5, %v12311_v31 }
 0x686   : > { %v10457_v60 = vpop.eup %10456  ;;  %v1932_v20 = vmul.f32 %v10455_v22, %v12307_v4 }
 0x687   : > { %v1883_v16 = vpop.xlane.xlu1 %1882  ;;  %v1889_v36 = vpop.xlane.xlu0 %1888  ;;  %v1931_v59 = vmul.f32 %v10457_v60, %v12321_v8 }
 0x688   : > { %10466 = vrcp.f32 %v1889_v36  ;;  %v1947_v3 = vpack.c.bf16 %v1933_v21, %v1932_v20 }
 0x689   : > { %2994 = vrot.lane.b32.xlu1 %v11737_v24, %s11210_s11  ;;  %v1946_v52 = vpack.c.bf16 %v1931_v59, %v1930_v49  ;;  %10468 = vrcp.f32 %v1883_v16 }
 0x68a   : > { %v10459_v10 = vpop.eup %10458  ;;  %10470 = vrcp.f32 %v1887_v17 }
 0x68b   : > { %v1895_v42 = vpop.xlane.xlu1 %1894  ;;  %v1885_v30 = vpop.xlane.xlu0 %1884  ;;  %9233 = vmatprep.mubr.bf16.mxu0 %v1946_v52  ;;  %v1937_v4 = vmul.f32 %v10459_v10, %v12332_v40 }
 0x68c   : > { %v10461_v54 = vpop.eup %10460  ;;  %10472 = vrcp.f32 %v1885_v30  ;;  %9234 = vmatmul.mubr.bf16.vlgmr.msra.gmra.mrb[48].mxu0 %v1947_v3 }
 0x68d   : > { %v10463_v31 = vpop.eup %10462  ;;  %v1934_v24 = vmul.f32 %v10461_v54, %v12329_v45 }
 0x68e   : > { %v10465_v44 = vpop.eup %10464  ;;  %v1936_v63 = vmul.f32 %v10463_v31, %v12323_v55 }
 0x68f   : > { %v1891_v8 = vpop.xlane.xlu1 %1890  ;;  %v1897_v28 = vpop.xlane.xlu0 %1896  ;;  %v1935_v25 = vmul.f32 %v10465_v44, %v12337_v56  ;;  %v15203_v44 = vld [vmem:[#allocation86_spill] sm:$0xff] }
 0x690   : > { %10474 = vrcp.f32 %v1891_v8  ;;  %v1949_v22 = vpack.c.bf16 %v1937_v4, %v1936_v63  ;;  %v12463_v8 = vadd.f32 %v15203_v44, %v15198_v58  ;;  %v15210_v63 = vld [vmem:[#allocation52_spill] sm:$0xff] }
 0x691   : > { %10476 = vrcp.f32 %v1897_v28  ;;  %v1948_v5 = vpack.c.bf16 %v1935_v25, %v1934_v24  ;;  %v15207_v28 = vld [vmem:[#allocation57_spill] sm:$0xff] }
 0x692   : > { %10478 = vrcp.f32 %v1895_v42  ;;  %v10467_v60 = vpop.eup %10466  ;;  %v15209_v24 = vld [vmem:[#allocation53_spill] sm:$0xff] }
 0x693   : > { %v1893_v17 = vpop.xlane.xlu0 %1892  ;;  %9237 = vmatprep.mubr.bf16.mxu0 %v1948_v5  ;;  %v10469_v21 = vpop.eup %10468  ;;  %v1941_v45 = vmul.f32 %v10467_v60, %v12347_v37 }
 0x694   : > { %10480 = vrcp.f32 %v1893_v17  ;;  %9238 = vmatmul.mubr.bf16.gmra.mrb[52].mxu0 %v1949_v22  ;;  %v10471_v16 = vpop.eup %10470  ;;  %v2987_v49 = vpop.permute.xlu1 %2986  ;;  %v1938_v55 = vmul.f32 %v10469_v21, %v12344_v7 }
 0x695   : > { %v1940_v59 = vmul.f32 %v10471_v16, %v12339_v6 }
 0x696   : > { %v10473_v36 = vpop.eup %10472 }
 0x697   : > { %v2985_v40 = vpop.permute.xlu0 %2984  ;;  %v1939_v56 = vmul.f32 %v10473_v36, %v12351_v32  ;;  %v1951_v42 = vpack.c.bf16 %v1941_v45, %v1940_v59 }
 0x698   : > { %9393 = vmatprep.mubr.msk.bf16.mxu1 %vm1174_vm0, %v2985_v40  ;;  %v15211_v40 = vld [vmem:[#allocation49_spill] sm:$0xff] }
 0x699   : > { %9394 = vmatmul.mubr.msk.bf16.gmra.mrb[68].mxu1 %vm1174_vm0, %v2987_v49  ;;  %v1950_v20 = vpack.c.bf16 %v1939_v56, %v1938_v55  ;;  %v15212_v55 = vld [vmem:[#allocation51_spill] sm:$0xff]  ;;  %v10274_v56 = vld [vmem:[#allocation7 + $0x10] sm:$0xff]  }
 0x69a   : > { %2992 = vrot.lane.b32.xlu0 %v11724_v38, %s11210_s11  ;;  %v10475_v52 = vpop.eup %10474  ;;  %v12458_v38 = vadd.f32 %v12294_v29, %v15196_v26  ;;  %v15208_v29 = vld [vmem:[#allocation48_spill] sm:$0xff]  ;;  %9249 = vmatprep.subr.bf16.mxu0 %v10274_v56 }
 0x69b   : > { %v10477_v30 = vpop.eup %10476  ;;  %9241 = vmatprep.mubr.bf16.mxu0 %v1950_v20  ;;  %v1942_v10 = vmul.f32 %v10475_v52, %v12357_v48  ;;  %v15204_v48 = vld [vmem:[#allocation69_spill] sm:$0xff]  ;;  %v15213_v20 = vld [vmem:[#allocation50_spill] sm:$0xff]  ;;  %9250 = vmatpush3.bf16.msra.mxu0 %v10274_v56 }
 0x69c   : > { %v10479_v37 = vpop.eup %10478  ;;  %9242 = vmatmul.mubr.bf16.gmra.mrb[56].mxu0 %v1951_v42  ;;  %v1945_v32 = vmul.f32 %v10477_v30, %v12359_v23  ;;  %v15205_v23 = vld [vmem:[#allocation87_spill] sm:$0xff] }
 0x69d   : > { %v1944_v6 = vmul.f32 %v10479_v37, %v12353_v9  ;;  %v15206_v9 = vld [vmem:[#allocation66_spill] sm:$0xff]  ;;  %v10275_v30 = vld [vmem:[#allocation7 + $0x18] sm:$0xff]  }
 0x69e   : > { %v10481_v3 = vpop.eup %10480  ;;  %v12473_v4 = vadd.f32 %v15207_v28, %v15206_v9  ;;  %9251 = vmatprep.subr.bf16.mxu0 %v10275_v30 }
 0x69f   : > { %v1943_v7 = vmul.f32 %v10481_v3, %v12363_v2  ;;  %v1953_v31 = vpack.c.bf16 %v1945_v32, %v1944_v6  ;;  %v12468_v2 = vadd.f32 %v15205_v23, %v15204_v48  ;;  %9252 = vmatpush3.bf16.msra.mxu0 %v10275_v30 }
 0x6a1   : > { %v1952_v54 = vpack.c.bf16 %v1943_v7, %v1942_v10  ;;  %v12501_v10 = vld [vmem:[#allocation7] sm:$0xff]  }
 0x6a2   : > { %9269 = vmatprep.subr.bf16.mxu0 %v12501_v10 }
 0x6a3   : > { %9245 = vmatprep.mubr.bf16.mxu0 %v1952_v54 }
 0x6a4   : > { %9246 = vmatmul.mubr.bf16.gmra.mrb[60].mxu0 %v1953_v31 }
 0x6ad   : > { %2558 = vmax.xlane.f32.xlu1 %v12458_v38 }
 0x6b1   : > { %2564 = vmax.xlane.f32.xlu1 %v12463_v8 }
 0x6b9   : > { %2560 = vmax.xlane.f32.xlu0 %v12468_v2 }
 0x6bd   : > { %2562 = vmax.xlane.f32.xlu0 %v12473_v4 }
 0x6c2   : > { %2704 = vrot.lane.b32.xlu1 %v15208_v29, %s11209_s8 }
 0x6c4   : > { %v2537_v16 = vpop.xlane.xlu1 %2536 }
 0x6c6   : > { %2710 = vrot.lane.b32.xlu1 %v15209_v24, %s11209_s8 }
 0x6c8   : > { %v2535_v25 = vpop.xlane.xlu0 %2534  ;;  %v2991_v49 = vpop.permute.xlu1 %2990 }
 0x6c9   : > { %v2566_v52 = vsub.f32 %v12377_v15, %v2535_v25 }
 0x6ca   : > { %2712 = vrot.lane.b32.xlu1 %v15210_v63, %s11209_s8 }
 0x6cb   : > { %v12482_v5 = vpop.f32.mrb[64].mxu1  ;;  %v2582_v37 = vmul.f32 1.442695, %v2566_v52 }
 0x6cc   : > { %v12484_v17 = vpop.f32.mrb[65].mxu1  ;;  %v2539_v22 = vpop.xlane.xlu0 %2538 }
 0x6cd   : > { %v12486_v60 = vpop.f32.mrb[66].mxu1  ;;  %v2568_v59 = vsub.f32 %v12382_v18, %v2539_v22  ;;  %v2567_v18 = vsub.f32 %v12372_v35, %v2537_v16 }
 0x6ce   : > { %v12488_v21 = vpop.f32.mrb[67].mxu1 }
 0x6cf   : > { %v2586_v42 = vmul.f32 1.442695, %v2568_v59  ;;  %v2584_v32 = vmul.f32 1.442695, %v2567_v18 }
 0x6d0   : > { %v2541_v36 = vpop.xlane.xlu0 %2540 }
 0x6d1   : > { %10482 = vpow2.f32 %v2586_v42  ;;  %v2569_v3 = vsub.f32 %v12387_v39, %v2541_v36 }
 0x6d2   : > { %10484 = vpow2.f32 %v2582_v37 }
 0x6d3   : > { %2702 = vrot.lane.b32.xlu0 %v15211_v40, %s11209_s8  ;;  %v2588_v7 = vmul.f32 1.442695, %v2569_v3 }
 0x6d4   : > { %v2989_v45 = vpop.permute.xlu0 %2988 }
 0x6d5   : > { %9397 = vmatprep.mubr.msk.bf16.mxu1 %vm1174_vm0, %v2989_v45  ;;  %10486 = vpow2.f32 %v2588_v7 }
 0x6d6   : > { %9398 = vmatmul.mubr.msk.bf16.gmra.mrb[72].mxu1 %vm1174_vm0, %v2991_v49  ;;  %10488 = vpow2.f32 %v2584_v32 }
 0x6d7   : > { %2706 = vrot.lane.b32.xlu0 %v15212_v55, %s11209_s8 }
 0x6db   : > { %2708 = vrot.lane.b32.xlu0 %v15213_v20, %s11209_s8  ;;  %v12505_v54 = vpop.eup %10482 }
 0x6dc   : > { %v12508_v15 = vpop.eup %10484 }
 0x6df   : > { %v12511_v39 = vpop.eup %10486 }
 0x6e0   : > { %v12514_v6 = vpop.eup %10488 }
 0x6ee   : > { %2618 = vadd.xlane.f32.xlu1 %v12505_v54 }
 0x6f2   : > { %2614 = vadd.xlane.f32.xlu1 %v12508_v15 }
 0x6f6   : > { %2620 = vadd.xlane.f32.xlu1 %v12511_v39 }
 0x6f9   : > { %v2543_v35 = vpop.xlane.xlu1 %2542 }
 0x6fa   : > { %2616 = vadd.xlane.f32.xlu1 %v12514_v6  ;;  %v2570_v25 = vsub.f32 %v12396_v13, %v2543_v35 }
 0x6fc   : > { %v2590_v49 = vmul.f32 1.442695, %v2570_v25  ;;  %v15214_v25 = vld [vmem:[#allocation55_spill] sm:$0xff] }
 0x6fd   : > { %v2549_v31 = vpop.xlane.xlu1 %2548 }
 0x6fe   : > { %v2573_v59 = vsub.f32 %v12401_v33, %v2549_v31 }
 0x700   : > { %v2596_v37 = vmul.f32 1.442695, %v2573_v59 }
 0x701   : > { %v2553_v16 = vpop.xlane.xlu1 %2552 }
 0x705   : > { %v2545_v44 = vpop.xlane.xlu0 %2544  ;;  %v2557_v42 = vpop.xlane.xlu1 %2556 }
 0x706   : > { %v2571_v23 = vsub.f32 %v12411_v62, %v2545_v44  ;;  %v2577_v18 = vsub.f32 %v12415_v34, %v2557_v42 }
 0x708   : > { %v2592_v28 = vmul.f32 1.442695, %v2571_v23 }
 0x709   : > { %v2547_v22 = vpop.xlane.xlu0 %2546  ;;  %v2995_v7 = vpop.permute.xlu1 %2994 }
 0x70a   : > { %v2572_v36 = vsub.f32 %v12421_v41, %v2547_v22  ;;  %10490 = vpow2.f32 %v2592_v28 }
 0x70c   : > { %v2594_v45 = vmul.f32 1.442695, %v2572_v36 }
 0x70d   : > { %v2551_v56 = vpop.xlane.xlu0 %2550 }
 0x70e   : > { %10492 = vpow2.f32 %v2594_v45  ;;  %v2574_v52 = vsub.f32 %v12426_v14, %v2551_v56  ;;  %v2575_v14 = vsub.f32 %v12406_v12, %v2553_v16 }
 0x70f   : > { %10494 = vpow2.f32 %v2590_v49 }
 0x710   : > { %v2598_v30 = vmul.f32 1.442695, %v2574_v52  ;;  %v2600_v34 = vmul.f32 1.442695, %v2575_v14 }
 0x711   : > { %v2555_v62 = vpop.xlane.xlu0 %2554 }
 0x712   : > { %10496 = vpow2.f32 %v2598_v30  ;;  %v2576_v13 = vsub.f32 %v12431_v0, %v2555_v62  ;;  %v2604_v0 = vmul.f32 1.442695, %v2577_v18 }
 0x713   : > { %10498 = vpow2.f32 %v2596_v37 }
 0x714   : > { %v12523_v3 = vpop.eup %10490  ;;  %v2602_v32 = vmul.f32 1.442695, %v2576_v13 }
 0x715   : > { %v2993_v41 = vpop.permute.xlu0 %2992  ;;  %2624 = vadd.xlane.f32.xlu1 %v12523_v3 }
 0x716   : > { %9401 = vmatprep.mubr.msk.bf16.mxu1 %vm1174_vm0, %v2993_v41  ;;  %10500 = vpow2.f32 %v2602_v32 }
 0x717   : > { %9402 = vmatmul.mubr.msk.bf16.gmra.mrb[76].mxu1 %vm1174_vm0, %v2995_v7  ;;  %10502 = vpow2.f32 %v2604_v0  ;;  %v10277_v0 = vld [vmem:[#allocation7 + $0x8] sm:$0xff]  }
 0x718   : > { %v12529_v33 = vpop.eup %10492  ;;  %10504 = vpow2.f32 %v2600_v34  ;;  %v12573_v34 = vadd.f32 %v12484_v17, %v11776_v57 }
 0x719   : > { %2626 = vadd.xlane.f32.xlu0 %v12529_v33  ;;  %v12533_v35 = vpop.eup %10494 }
 0x71c   : > { %v12535_v31 = vpop.eup %10496 }
 0x71d   : > { %2622 = vadd.xlane.f32.xlu0 %v12533_v35  ;;  %2630 = vadd.xlane.f32.xlu1 %v12535_v31  ;;  %v12539_v44 = vpop.eup %10498 }
 0x720   : > { %v12542_v23 = vpop.eup %10500 }
 0x721   : > { %2628 = vadd.xlane.f32.xlu0 %v12539_v44  ;;  %v12545_v12 = vpop.eup %10502 }
 0x722   : > { %v12548_v28 = vpop.eup %10504 }
 0x725   : > { %2634 = vadd.xlane.f32.xlu0 %v12542_v23 }
 0x729   : > { %2636 = vadd.xlane.f32.xlu0 %v12545_v12 }
 0x72d   : > { %2632 = vadd.xlane.f32.xlu0 %v12548_v28 }
 0x73a   : > { %v2559_v16 = vpop.xlane.xlu1 %2558 }
 0x73b   : > { %v2578_v45 = vsub.f32 %v12458_v38, %v2559_v16 }
 0x73d   : > { %v2606_v59 = vmul.f32 1.442695, %v2578_v45 }
 0x73e   : > { %v2565_v42 = vpop.xlane.xlu1 %2564 }
 0x73f   : > { %v2581_v30 = vsub.f32 %v12463_v8, %v2565_v42 }
 0x741   : > { %v2612_v37 = vmul.f32 1.442695, %v2581_v30 }
 0x742   : > { %v2705_v45 = vpop.permute.xlu1 %2704 }
 0x743   : > { %2714 = vrot.lane.b32.xlu0 %v15214_v25, %s11209_s8 }
 0x746   : > { %v2561_v22 = vpop.xlane.xlu0 %2560 }
 0x747   : > { %v2579_v52 = vsub.f32 %v12468_v2, %v2561_v22 }
 0x749   : > { %v2608_v62 = vmul.f32 1.442695, %v2579_v52 }
 0x74a   : > { %v2563_v36 = vpop.xlane.xlu0 %2562 }
 0x74b   : > { %v2580_v49 = vsub.f32 %v12473_v4, %v2563_v36 }
 0x74d   : > { %v2610_v56 = vmul.f32 1.442695, %v2580_v49 }
 0x74e   : > { %v2703_v52 = vpop.permute.xlu0 %2702 }
 0x74f   : > { %10506 = vpow2.f32 %v2610_v56 }
 0x750   : > { %10508 = vpow2.f32 %v2606_v59  ;;  %v12579_v59 = vadd.f32 %v12488_v21, %v11793_v46  ;;  %v12588_v21 = vadd.f32 %v12482_v5, %v11773_v51 }
 0x751   : > { %10510 = vpow2.f32 %v2608_v62 }
 0x752   : > { %10512 = vpow2.f32 %v2612_v37  ;;  %v15215_v37 = vld [vmem:[#allocation54_spill] sm:$0xff] }
 0x759   : > { %v12557_v13 = vpop.eup %10506 }
 0x75a   : > { %2642 = vadd.xlane.f32.xlu1 %v12557_v13  ;;  %v12560_v38 = vpop.eup %10508 }
 0x75b   : > { %v12563_v41 = vpop.eup %10510 }
 0x75c   : > { %v12566_v14 = vpop.eup %10512 }
 0x75e   : > { %2638 = vadd.xlane.f32.xlu1 %v12560_v38 }
 0x75f   : > { %v9235_v4 = vpop.f32.mrb[48].mxu0 }
 0x760   : > { %v2020_v2 = vpop.f32.mrb[49].mxu0 }
 0x761   : > { %v9236_v18 = vpop.f32.mrb[50].mxu0 }
 0x762   : > { %2640 = vadd.xlane.f32.xlu0 %v12563_v41  ;;  %v2084_v8 = vpack.c.bf16 %v9236_v18, %v9235_v4  ;;  %v2023_v7 = vpop.f32.mrb[51].mxu0 }
 0x763   : > { %v2083_v32 = vpack.c.bf16 %v2023_v7, %v2020_v2  ;;  %v2711_v2 = vpop.permute.xlu1 %2710 }
 0x765   : > { %9253 = vmatprep.mubr.msk.bf16.mxu0 %vm1174_vm0, %v2083_v32 }
 0x766   : > { %2644 = vadd.xlane.f32.xlu0 %v12566_v14  ;;  %9254 = vmatmul.mubr.msk.bf16.vlgmr.msra.gmra.mrb[64].mxu0 %vm1174_vm0, %v2084_v8 }
 0x767   : > { %9270 = vmatpush3.bf16.msra.mxu0 %v12501_v10  ;;  %v9239_v22 = vpop.f32.mrb[52].mxu0 }
 0x768   : > { %v2036_v16 = vpop.f32.mrb[53].mxu0  ;;  %9271 = vmatprep.subr.bf16.mxu0 %v10277_v0 }
 0x769   : > { %v9240_v36 = vpop.f32.mrb[54].mxu0 }
 0x76a   : > { %3157 = vmax.xlane.f32.xlu0 %v12573_v34  ;;  %v2086_v49 = vpack.c.bf16 %v9240_v36, %v9239_v22  ;;  %v2039_v56 = vpop.f32.mrb[55].mxu0 }
 0x76b   : > { %v2085_v42 = vpack.c.bf16 %v2039_v56, %v2036_v16  ;;  %9272 = vmatpush3.bf16.msra.mxu0 %v10277_v0  ;;  %v12593_v0 = vadd.f32 %v12486_v60, %v15187_v27  ;;  %v2713_v16 = vpop.permute.xlu1 %2712 }
 0x76c   : > { %v9395_v17 = vpop.f32.mrb[68].mxu1  ;;  %9321 = vmatprep.subr.bf16.mxu0 %v2703_v52 }
 0x76d   : > { %v3110_v30 = vpop.f32.mrb[69].mxu1  ;;  %9257 = vmatprep.mubr.msk.bf16.mxu0 %vm1174_vm0, %v2085_v42 }
 0x76e   : > { %v9396_v10 = vpop.f32.mrb[70].mxu1  ;;  %3159 = vmax.xlane.f32.xlu0 %v12579_v59  ;;  %9258 = vmatmul.mubr.msk.bf16.gmra.mrb[68].mxu0 %vm1174_vm0, %v2086_v49 }
 0x76f   : > { %v3113_v62 = vpop.f32.mrb[71].mxu1  ;;  %2716 = vrot.lane.b32.xlu1 %v15215_v37, %s11209_s8  ;;  %v9243_v4 = vpop.f32.mrb[56].mxu0 }
 0x770   : > { %v2052_v18 = vpop.f32.mrb[57].mxu0  ;;  %v12599_v5 = vadd.f32 %v3113_v62, %v15191_v1 }
 0x771   : > { %v9244_v8 = vpop.f32.mrb[58].mxu0 }
 0x772   : > { %3161 = vmax.xlane.f32.xlu0 %v12588_v21  ;;  %v2088_v7 = vpack.c.bf16 %v9244_v8, %v9243_v4  ;;  %v2055_v32 = vpop.f32.mrb[59].mxu0 }
 0x773   : > { %v2087_v22 = vpack.c.bf16 %v2055_v32, %v2052_v18  ;;  %v12605_v18 = vadd.f32 %v9395_v17, %v15189_v47  ;;  %v15216_v32 = vld [vmem:[#allocation73_spill] sm:$0xff] }
 0x775   : > { %9261 = vmatprep.mubr.msk.bf16.mxu0 %vm1174_vm0, %v2087_v22  ;;  %v15217_v22 = vld [vmem:[#allocation71_spill] sm:$0xff] }
 0x776   : > { %3163 = vmax.xlane.f32.xlu0 %v12593_v0  ;;  %9262 = vmatmul.mubr.msk.bf16.gmra.mrb[72].mxu0 %vm1174_vm0, %v2088_v7  ;;  %v12611_v7 = vadd.f32 %v9396_v10, %v15190_v19  ;;  %v2707_v10 = vpop.permute.xlu0 %2706 }
 0x777   : > { %v9247_v36 = vpop.f32.mrb[60].mxu0 }
 0x778   : > { %v2068_v49 = vpop.f32.mrb[61].mxu0 }
 0x779   : > { %v9248_v56 = vpop.f32.mrb[62].mxu0 }
 0x77a   : > { %3167 = vmax.xlane.f32.xlu0 %v12599_v5  ;;  %v2090_v42 = vpack.c.bf16 %v9248_v56, %v9247_v36  ;;  %v2071_v4 = vpop.f32.mrb[63].mxu0  ;;  %v15218_v36 = vpack.c.bf16 %v15216_v32, %v15217_v22  ;;  %v15219_v56 = vld [vmem:[#allocation72_spill] sm:$0xff]  ;;  %v15226_v22 = vld [vmem:[#allocation74_spill] sm:$0xff] }
 0x77b   : > { %v12602_v60 = vpop.xlane.xlu1 %2618  ;;  %v2089_v8 = vpack.c.bf16 %v2071_v4, %v2068_v49  ;;  %v15220_v49 = vld [vmem:[#allocation70_spill] sm:$0xff]  ;;  %v15225_v32 = vld [vmem:[#allocation76_spill] sm:$0xff] }
 0x77c   : > { %v15221_v4 = vpack.c.bf16 %v15219_v56, %v15220_v49  ;;  %v2709_v56 = vpop.permute.xlu0 %2708  ;;  %v15229_v49 = vld [vmem:[#allocation79_spill] sm:$0xff] }
 0x77d   : > { %9265 = vmatprep.mubr.msk.bf16.mxu0 %vm1174_vm0, %v2089_v8  ;;  %v15222_v8 = vld [vmem:[#allocation77_spill] sm:$0xff] }
 0x77e   : > { %3169 = vmax.xlane.f32.xlu0 %v12605_v18  ;;  %9266 = vmatmul.mubr.msk.bf16.gmra.mrb[76].mxu0 %vm1174_vm0, %v2090_v42  ;;  %v15223_v42 = vld [vmem:[#allocation75_spill] sm:$0xff] }
 0x77f   : > { %v2615_v62 = vpop.xlane.xlu1 %2614  ;;  %9273 = vmatprep.mubr.msk.bf16.mxu0 %vm1174_vm0, %v15218_v36  ;;  %v15224_v1 = vpack.c.bf16 %v15222_v8, %v15223_v42  ;;  %v15227_v36 = vpack.c.bf16 %v15225_v32, %v15226_v22  ;;  %v15234_v42 = vld [vmem:[#allocation85_spill] sm:$0xff] }
 0x782   : > { %3171 = vmax.xlane.f32.xlu0 %v12611_v7 }
 0x783   : > { %v2621_v17 = vpop.xlane.xlu1 %2620 }
 0x786   : > { %9274 = vmatmul.mubr.msk.bf16.vlgmr.msra.gmra.mrb[64].mxu0 %vm1174_vm0, %v15221_v4 }
 0x787   : > { %9322 = vmatpush3.bf16.msra.mxu0 %v2703_v52  ;;  %9277 = vmatprep.mubr.msk.bf16.mxu0 %vm1174_vm0, %v15224_v1  ;;  %v2617_v19 = vpop.xlane.xlu1 %2616  ;;  %v15228_v52 = vld [vmem:[#allocation81_spill] sm:$0xff]  ;;  %v12635_v1 = vadd.f32 %v3110_v30, %v15188_v61 }
 0x788   : > { %9323 = vmatprep.subr.bf16.mxu0 %v2705_v45  ;;  %10514 = vrcp.f32 %v2617_v19  ;;  %v15230_v4 = vpack.c.bf16 %v15228_v52, %v15229_v49  ;;  %v15237_v52 = vld [vmem:[#allocation84_spill] sm:$0xff]  ;;  %v15238_v49 = vld [vmem:[#allocation82_spill] sm:$0xff] }
 0x789   : > { %10516 = vrcp.f32 %v2615_v62  ;;  %v15232_v62 = vld [vmem:[#allocation78_spill] sm:$0xff] }
 0x78a   : > { %10518 = vrcp.f32 %v2621_v17 }
 0x78b   : > { %9324 = vmatpush3.bf16.msra.mxu0 %v2705_v45  ;;  %v15231_v45 = vld [vmem:[#allocation80_spill] sm:$0xff] }
 0x78c   : > { %9325 = vmatprep.subr.bf16.mxu0 %v2707_v10  ;;  %v15233_v8 = vpack.c.bf16 %v15231_v45, %v15232_v62 }
 0x78e   : > { %9278 = vmatmul.mubr.msk.bf16.gmra.mrb[68].mxu0 %vm1174_vm0, %v15227_v36 }
 0x78f   : > { %9326 = vmatpush3.bf16.msra.mxu0 %v2707_v10  ;;  %9281 = vmatprep.mubr.msk.bf16.mxu0 %vm1174_vm0, %v15230_v4  ;;  %v15235_v10 = vld [vmem:[#allocation83_spill] sm:$0xff]  ;;  %v15239_v4 = vpack.c.bf16 %v15237_v52, %v15238_v49 }
 0x790   : > { %9327 = vmatprep.subr.bf16.mxu0 %v2709_v56  ;;  %v15236_v32 = vpack.c.bf16 %v15234_v42, %v15235_v10 }
 0x792   : > { %v10515_v19 = vpop.eup %10514 }
 0x793   : > { %3165 = vmax.xlane.f32.xlu1 %v12635_v1  ;;  %9328 = vmatpush3.bf16.msra.mxu0 %v2709_v56  ;;  %v10517_v22 = vpop.eup %10516  ;;  %v2679_v30 = vmul.f32 %v10515_v19, %v12514_v6 }
 0x794   : > { %9329 = vmatprep.subr.bf16.mxu0 %v2711_v2  ;;  %v2678_v36 = vmul.f32 %v10517_v22, %v12508_v15 }
 0x796   : > { %9282 = vmatmul.mubr.msk.bf16.gmra.mrb[72].mxu0 %vm1174_vm0, %v15233_v8  ;;  %v2694_v56 = vpack.c.bf16 %v2679_v30, %v2678_v36 }
 0x797   : > { %9330 = vmatpush3.bf16.msra.mxu0 %v2711_v2  ;;  %9285 = vmatprep.mubr.msk.bf16.mxu0 %vm1174_vm0, %v15236_v32 }
 0x798   : > { %9331 = vmatprep.subr.bf16.mxu0 %v2713_v16 }
 0x79b   : > { %9332 = vmatpush3.bf16.msra.mxu0 %v2713_v16 }
 0x79e   : > { %9286 = vmatmul.mubr.msk.bf16.gmra.mrb[76].mxu0 %vm1174_vm0, %v15239_v4 }
 0x79f   : > { %9337 = vmatprep.mubr.bf16.mxu0 %v2694_v56 }
 0x7a2   : > { %v2625_v52 = vpop.xlane.xlu1 %2624 }
 0x7a6   : > { %v2627_v2 = vpop.xlane.xlu0 %2626 }
 0x7a9   : > { %v9399_v45 = vpop.f32.mrb[72].mxu1 }
 0x7aa   : > { %v3126_v62 = vpop.f32.mrb[73].mxu1  ;;  %v2623_v42 = vpop.xlane.xlu0 %2622  ;;  %v12661_v16 = vadd.f32 %v9399_v45, %v15193_v53 }
 0x7ab   : > { %v12653_v8 = vadd.f32 %v3126_v62, %v15192_v50  ;;  %v9400_v10 = vpop.f32.mrb[74].mxu1  ;;  %10520 = vrcp.f32 %v2623_v42  ;;  %v2631_v49 = vpop.xlane.xlu1 %2630 }
 0x7ac   : > { %v3129_v32 = vpop.f32.mrb[75].mxu1  ;;  %v12665_v22 = vadd.f32 %v9400_v10, %v15194_v11  ;;  %10522 = vrcp.f32 %v12602_v60  ;;  %v10519_v62 = vpop.eup %10518 }
 0x7ad   : > { %3173 = vmax.xlane.f32.xlu0 %v12653_v8  ;;  %v12657_v15 = vadd.f32 %v3129_v32, %v15195_v43  ;;  %10524 = vrcp.f32 %v2625_v52 }
 0x7ae   : > { %v2629_v6 = vpop.xlane.xlu0 %2628 }
 0x7af   : > { %10526 = vrcp.f32 %v2629_v6 }
 0x7b1   : > { %3175 = vmax.xlane.f32.xlu0 %v12657_v15 }
 0x7b2   : > { %v2635_v19 = vpop.xlane.xlu0 %2634 }
 0x7b5   : > { %3177 = vmax.xlane.f32.xlu0 %v12661_v16  ;;  %v10521_v11 = vpop.eup %10520 }
 0x7b6   : > { %v2637_v30 = vpop.xlane.xlu0 %2636  ;;  %v10523_v60 = vpop.eup %10522 }
 0x7b7   : > { %v10525_v6 = vpop.eup %10524 }
 0x7b9   : > { %3179 = vmax.xlane.f32.xlu0 %v12665_v22 }
 0x7ba   : > { %v2633_v36 = vpop.xlane.xlu0 %2632 }
 0x7bb   : > { %10528 = vrcp.f32 %v2633_v36  ;;  %v2681_v36 = vmul.f32 %v10519_v62, %v12511_v39  ;;  %v10527_v62 = vpop.eup %10526 }
 0x7bc   : > { %10530 = vrcp.f32 %v2627_v2 }
 0x7bd   : > { %10532 = vrcp.f32 %v2631_v49 }
 0x7be   : > { %v2715_v56 = vpop.permute.xlu0 %2714  ;;  %10534 = vrcp.f32 %v2637_v30 }
 0x7bf   : > { %9333 = vmatprep.subr.bf16.mxu0 %v2715_v56 }
 0x7c0   : > { %9334 = vmatpush3.bf16.msra.mxu0 %v2715_v56 }
 0x7c5   : > { %v10529_v50 = vpop.eup %10528 }
 0x7e7   : > { %v2643_v4 = vpop.xlane.xlu1 %2642 }
 0x7ea   : > { %v9403_v45 = vpop.f32.mrb[76].mxu1 }
 0x7eb   : > { %v12670_v10 = vadd.f32 %v9403_v45, %v15206_v9  ;;  %v3142_v32 = vpop.f32.mrb[77].mxu1  ;;  %v2639_v43 = vpop.xlane.xlu1 %2638  ;;  %v2682_v45 = vmul.f32 %v10521_v11, %v12533_v35  ;;  %v2680_v9 = vmul.f32 %v10523_v60, %v12505_v54  ;;  %v2687_v60 = vmul.f32 %v10529_v50, %v12548_v28 }
 0x7ec   : > { %v12673_v17 = vadd.f32 %v3142_v32, %v15196_v26  ;;  %v9404_v42 = vpop.f32.mrb[78].mxu1  ;;  %v2683_v32 = vmul.f32 %v10525_v6, %v12523_v3  ;;  %v10531_v35 = vpop.eup %10530  ;;  %v2685_v3 = vmul.f32 %v10527_v62, %v12539_v44  ;;  %v10279_v44 = vld [vmem:[#allocation7 + $0x28] sm:$0xff]  }
 0x7ed   : > { %v3145_v56 = vpop.f32.mrb[79].mxu1  ;;  %3185 = vmax.xlane.f32.xlu1 %v12670_v10  ;;  %v2695_v39 = vpack.c.bf16 %v2681_v36, %v2680_v9  ;;  %v12686_v11 = vadd.f32 %v9404_v42, %v15198_v58  ;;  %v10533_v30 = vpop.eup %10532  ;;  %v2684_v9 = vmul.f32 %v10531_v35, %v12529_v33 }
 0x7ee   : > { %3181 = vmax.xlane.f32.xlu0 %v12673_v17  ;;  %v12681_v49 = vadd.f32 %v3145_v56, %v15204_v48  ;;  %v2696_v26 = vpack.c.bf16 %v2683_v32, %v2682_v45  ;;  %v10535_v6 = vpop.eup %10534 }
 0x7ef   : > { %v2717_v2 = vpop.permute.xlu1 %2716  ;;  %v2641_v52 = vpop.xlane.xlu0 %2640  ;;  %v2697_v42 = vpack.c.bf16 %v2685_v3, %v2684_v9  ;;  %v2689_v50 = vmul.f32 %v10535_v6, %v12545_v12 }
 0x7f0   : > { %9335 = vmatprep.subr.bf16.mxu0 %v2717_v2  ;;  %10536 = vrcp.f32 %v2641_v52 }
 0x7f1   : > { %9336 = vmatpush3.bf16.msra.mxu0 %v2717_v2  ;;  %10538 = vrcp.f32 %v2635_v19  ;;  %v10278_v19 = vld [vmem:[#allocation7 + $0x20] sm:$0xff]  }
 0x7f2   : > { %3183 = vmax.xlane.f32.xlu0 %v12681_v49  ;;  %10540 = vrcp.f32 %v2639_v43  ;;  %v2686_v43 = vmul.f32 %v10533_v30, %v12535_v31  ;;  %9353 = vmatprep.subr.bf16.mxu0 %v10278_v19 }
 0x7f3   : > { %v2645_v54 = vpop.xlane.xlu0 %2644 }
 0x7f4   : > { %9338 = vmatmul.mubr.bf16.vlgmr.msra.gmra.mrb[80].mxu0 %v2695_v39  ;;  %10542 = vrcp.f32 %v2645_v54  ;;  %v2698_v36 = vpack.c.bf16 %v2687_v60, %v2686_v43 }
 0x7f5   : > { %9341 = vmatprep.mubr.bf16.mxu0 %v2696_v26  ;;  %10544 = vrcp.f32 %v2643_v4  ;;  %9354 = vmatpush3.bf16.msra.mxu0 %v10278_v19 }
 0x7f6   : > { %3187 = vmax.xlane.f32.xlu0 %v12686_v11  ;;  %9355 = vmatprep.subr.bf16.mxu0 %v10279_v44 }
 0x7f7   : > { %v3158_v56 = vpop.xlane.xlu0 %3157 }
 0x7f9   : > { %9356 = vmatpush3.bf16.msra.mxu0 %v10279_v44 }
 0x7fa   : > { %v10537_v26 = vpop.eup %10536 }
 0x7fb   : > { %v10539_v2 = vpop.eup %10538  ;;  %v2691_v33 = vmul.f32 %v10537_v26, %v12563_v41  ;;  %v3160_v31 = vpop.xlane.xlu0 %3159 }
 0x7fc   : > { %9342 = vmatmul.mubr.bf16.gmra.mrb[84].mxu0 %v2697_v42  ;;  %v10541_v52 = vpop.eup %10540  ;;  %v2688_v28 = vmul.f32 %v10539_v2, %v12542_v23 }
 0x7fd   : > { %9345 = vmatprep.mubr.bf16.mxu0 %v2698_v36  ;;  %v2690_v4 = vmul.f32 %v10541_v52, %v12560_v38 }
 0x7fe   : > { %3325 = vrot.lane.b32.xlu1 %v15211_v40, %s11210_s11  ;;  %v2699_v45 = vpack.c.bf16 %v2689_v50, %v2688_v28  ;;  %v10543_v32 = vpop.eup %10542 }
 0x7ff   : > { %v2700_v39 = vpack.c.bf16 %v2691_v33, %v2690_v4  ;;  %v10545_v62 = vpop.eup %10544  ;;  %v3162_v40 = vpop.xlane.xlu0 %3161  ;;  %v2693_v12 = vmul.f32 %v10543_v32, %v12566_v14 }
 0x800   : > { %v2692_v23 = vmul.f32 %v10545_v62, %v12557_v13  ;;  %v3191_v54 = vsub.f32 %v12588_v21, %v3162_v40  ;;  %v3190_v21 = vsub.f32 %v12579_v59, %v3160_v31 }
 0x802   : > { %3327 = vrot.lane.b32.xlu1 %v15208_v29, %s11210_s11  ;;  %v2701_v38 = vpack.c.bf16 %v2693_v12, %v2692_v23  ;;  %v3209_v14 = vmul.f32 1.442695, %v3191_v54 }
 0x803   : > { %v3164_v41 = vpop.xlane.xlu0 %3163 }
 0x804   : > { %9346 = vmatmul.mubr.bf16.gmra.mrb[88].mxu0 %v2699_v45  ;;  %10546 = vpow2.f32 %v3209_v14 }
 0x805   : > { %9349 = vmatprep.mubr.bf16.mxu0 %v2700_v39 }
 0x806   : > { %3331 = vrot.lane.b32.xlu1 %v15213_v20, %s11210_s11  ;;  %v3189_v20 = vsub.f32 %v12573_v34, %v3158_v56  ;;  %v3207_v34 = vmul.f32 1.442695, %v3190_v21 }
 0x807   : > { %v3168_v29 = vpop.xlane.xlu0 %3167 }
 0x808   : > { %v3205_v13 = vmul.f32 1.442695, %v3189_v20  ;;  %v3194_v56 = vsub.f32 %v12599_v5, %v3168_v29 }
 0x80a   : > { %3333 = vrot.lane.b32.xlu1 %v15209_v24, %s11210_s11  ;;  %v3192_v24 = vsub.f32 %v12593_v0, %v3164_v41  ;;  %v3215_v0 = vmul.f32 1.442695, %v3194_v56 }
 0x80b   : > { %v3170_v35 = vpop.xlane.xlu0 %3169 }
 0x80c   : > { %3329 = vrot.lane.b32.xlu0 %v15212_v55, %s11210_s11  ;;  %9350 = vmatmul.mubr.bf16.gmra.mrb[92].mxu0 %v2701_v38  ;;  %v3195_v30 = vsub.f32 %v12605_v18, %v3170_v35  ;;  %v3211_v18 = vmul.f32 1.442695, %v3192_v24 }
 0x80e   : > { %v3217_v3 = vmul.f32 1.442695, %v3195_v30  ;;  %v12717_v6 = vpop.eup %10546 }
 0x80f   : > { %v3172_v60 = vpop.xlane.xlu0 %3171 }
 0x810   : > { %10548 = vpow2.f32 %v3217_v3  ;;  %v3196_v55 = vsub.f32 %v12611_v7, %v3172_v60 }
 0x811   : > { %10550 = vpow2.f32 %v3205_v13 }
 0x812   : > { %v3219_v42 = vmul.f32 1.442695, %v3196_v55 }
 0x820   : > { %v3166_v9 = vpop.xlane.xlu1 %3165 }
 0x821   : > { %v3193_v19 = vsub.f32 %v12635_v1, %v3166_v9  ;;  %v12720_v1 = vpop.eup %10548 }
 0x822   : > { %v12722_v7 = vpop.eup %10550 }
 0x823   : > { %v3213_v43 = vmul.f32 1.442695, %v3193_v19 }
 0x825   : > { %10552 = vpow2.f32 %v3213_v43 }
 0x826   : > { %10554 = vpow2.f32 %v3211_v18 }
 0x827   : > { %10556 = vpow2.f32 %v3219_v42 }
 0x828   : > { %10558 = vpow2.f32 %v3207_v34 }
 0x829   : > { %10560 = vpow2.f32 %v3215_v0 }
 0x82b   : > { %3241 = vadd.xlane.f32.xlu0 %v12717_v6 }
 0x82e   : > { %3249 = vadd.xlane.f32.xlu1 %v12720_v1 }
 0x82f   : > { %3237 = vadd.xlane.f32.xlu0 %v12722_v7  ;;  %v12726_v59 = vpop.eup %10552 }
 0x830   : > { %v12728_v36 = vpop.eup %10554 }
 0x831   : > { %v12732_v5 = vpop.eup %10556 }
 0x832   : > { %3245 = vadd.xlane.f32.xlu1 %v12726_v59  ;;  %v12734_v26 = vpop.eup %10558 }
 0x833   : > { %3243 = vadd.xlane.f32.xlu0 %v12728_v36  ;;  %v12738_v2 = vpop.eup %10560 }
 0x836   : > { %3251 = vadd.xlane.f32.xlu1 %v12732_v5 }
 0x837   : > { %3239 = vadd.xlane.f32.xlu0 %v12734_v26 }
 0x83a   : > { %v3174_v44 = vpop.xlane.xlu0 %3173 }
 0x83b   : > { %3247 = vadd.xlane.f32.xlu0 %v12738_v2  ;;  %v3197_v31 = vsub.f32 %v12653_v8, %v3174_v44 }
 0x83d   : > { %v3221_v4 = vmul.f32 1.442695, %v3197_v31 }
 0x83e   : > { %v3176_v52 = vpop.xlane.xlu0 %3175 }
 0x83f   : > { %v3198_v50 = vsub.f32 %v12657_v15, %v3176_v52 }
 0x841   : > { %v3223_v28 = vmul.f32 1.442695, %v3198_v50 }
 0x842   : > { %v3178_v33 = vpop.xlane.xlu0 %3177 }
 0x843   : > { %v3199_v45 = vsub.f32 %v12661_v16, %v3178_v33  ;;  %10562 = vpow2.f32 %v3223_v28 }
 0x844   : > { %10564 = vpow2.f32 %v3221_v4 }
 0x846   : > { %v3180_v32 = vpop.xlane.xlu0 %3179 }
 0x847   : > { %3337 = vrot.lane.b32.xlu1 %v15214_v25, %s11210_s11  ;;  %v3225_v25 = vmul.f32 1.442695, %v3199_v45 }
 0x849   : > { %10566 = vpow2.f32 %v3225_v25 }
 0x84b   : > { %3339 = vrot.lane.b32.xlu1 %v15215_v37, %s11210_s11  ;;  %v3200_v37 = vsub.f32 %v12665_v22, %v3180_v32 }
 0x84d   : > { %v3227_v39 = vmul.f32 1.442695, %v3200_v37 }
 0x84f   : > { %10568 = vpow2.f32 %v3227_v39 }
 0x851   : > { %3335 = vrot.lane.b32.xlu0 %v15210_v63, %s11210_s11  ;;  %v12751_v63 = vpop.eup %10562 }
 0x852   : > { %v12753_v62 = vpop.eup %10564 }
 0x853   : > { %v12757_v8 = vpop.eup %10566 }
 0x859   : > { %v12760_v15 = vpop.eup %10568 }
 0x86f   : > { %3255 = vadd.xlane.f32.xlu1 %v12751_v63 }
 0x870   : > { %3253 = vadd.xlane.f32.xlu0 %v12753_v62 }
 0x874   : > { %3257 = vadd.xlane.f32.xlu0 %v12757_v8 }
 0x878   : > { %3259 = vadd.xlane.f32.xlu0 %v12760_v15 }
 0x87a   : > { %v3186_v16 = vpop.xlane.xlu1 %3185 }
 0x87b   : > { %v3203_v22 = vsub.f32 %v12670_v10, %v3186_v16  ;;  %v3182_v40 = vpop.xlane.xlu0 %3181 }
 0x87c   : > { %v3201_v12 = vsub.f32 %v12673_v17, %v3182_v40 }
 0x87d   : > { %v3233_v41 = vmul.f32 1.442695, %v3203_v22 }
 0x87e   : > { %v3229_v23 = vmul.f32 1.442695, %v3201_v12  ;;  %v3326_v38 = vpop.permute.xlu1 %3325 }
 0x87f   : > { %9405 = vmatprep.subr.bf16.mxu0 %v3326_v38  ;;  %v3184_v29 = vpop.xlane.xlu0 %3183 }
 0x880   : > { %10570 = vpow2.f32 %v3229_v23  ;;  %v3202_v54 = vsub.f32 %v12681_v49, %v3184_v29 }
 0x881   : > { %10572 = vpow2.f32 %v3233_v41 }
 0x882   : > { %v3231_v35 = vmul.f32 1.442695, %v3202_v54 }
 0x883   : > { %v3188_v30 = vpop.xlane.xlu0 %3187 }
 0x884   : > { %10574 = vpow2.f32 %v3231_v35  ;;  %v3204_v20 = vsub.f32 %v12686_v11, %v3188_v30  ;;  %v3328_v11 = vpop.permute.xlu1 %3327 }
 0x886   : > { %v3235_v14 = vmul.f32 1.442695, %v3204_v20 }
 0x887   : > { %v3330_v13 = vpop.permute.xlu0 %3329 }
 0x888   : > { %10576 = vpow2.f32 %v3235_v14  ;;  %v3332_v60 = vpop.permute.xlu1 %3331 }
 0x88a   : > { %v12767_v10 = vpop.eup %10570 }
 0x88b   : > { %3261 = vadd.xlane.f32.xlu1 %v12767_v10  ;;  %v12770_v17 = vpop.eup %10572 }
 0x88c   : > { %v3334_v42 = vpop.permute.xlu1 %3333 }
 0x88e   : > { %v12772_v3 = vpop.eup %10574 }
 0x88f   : > { %3265 = vadd.xlane.f32.xlu1 %v12770_v17  ;;  %3263 = vadd.xlane.f32.xlu0 %v12772_v3 }
 0x892   : > { %v12776_v49 = vpop.eup %10576 }
 0x893   : > { %3267 = vadd.xlane.f32.xlu0 %v12776_v49 }
 0x8b8   : > { %v3242_v24 = vpop.xlane.xlu0 %3241 }
 0x8bb   : > { %v3250_v0 = vpop.xlane.xlu1 %3249 }
 0x8bc   : > { %v3238_v9 = vpop.xlane.xlu0 %3237 }
 0x8bf   : > { %v3246_v45 = vpop.xlane.xlu1 %3245 }
 0x8c0   : > { %v3244_v34 = vpop.xlane.xlu0 %3243 }
 0x8c3   : > { %v3252_v40 = vpop.xlane.xlu1 %3251 }
 0x8c4   : > { %v3240_v50 = vpop.xlane.xlu0 %3239 }
 0x8c5   : > { %10578 = vrcp.f32 %v3240_v50 }
 0x8c6   : > { %10580 = vrcp.f32 %v3238_v9 }
 0x8c7   : > { %v9339_v19 = vpop.f32.mrb[80].mxu0  ;;  %10582 = vrcp.f32 %v3244_v34  ;;  %v3338_v35 = vpop.permute.xlu1 %3337 }
 0x8c8   : > { %v2760_v55 = vpop.f32.mrb[81].mxu0  ;;  %v3248_v37 = vpop.xlane.xlu0 %3247 }
 0x8c9   : > { %v9340_v43 = vpop.f32.mrb[82].mxu0  ;;  %10584 = vrcp.f32 %v3248_v37 }
 0x8ca   : > { %v2824_v21 = vpack.c.bf16 %v9340_v43, %v9339_v19  ;;  %v2763_v18 = vpop.f32.mrb[83].mxu0  ;;  %10586 = vrcp.f32 %v3242_v24 }
 0x8cb   : > { %v2823_v56 = vpack.c.bf16 %v2763_v18, %v2760_v55  ;;  %10588 = vrcp.f32 %v3246_v45  ;;  %v3340_v43 = vpop.permute.xlu1 %3339  ;;  %v10280_v18 = vld [vmem:[#allocation7 + $0x30] sm:$0xff]  }
 0x8cc   : > { %10590 = vrcp.f32 %v3252_v40 }
 0x8cd   : > { %9357 = vmatprep.mubr.msk.bf16.mxu0 %vm1174_vm0, %v2823_v56  ;;  %10592 = vrcp.f32 %v3250_v0 }
 0x8ce   : > { %9358 = vmatmul.mubr.msk.bf16.vlgmr.msra.gmra.mrb[64].mxu0 %vm1174_vm0, %v2824_v21 }
 0x8cf   : > { %9406 = vmatpush3.bf16.msra.mxu0 %v3326_v38  ;;  %v9343_v44 = vpop.f32.mrb[84].mxu0  ;;  %v10579_v23 = vpop.eup %10578 }
 0x8d0   : > { %9407 = vmatprep.subr.bf16.mxu0 %v3328_v11  ;;  %v2776_v52 = vpop.f32.mrb[85].mxu0  ;;  %v3336_v38 = vpop.permute.xlu0 %3335  ;;  %v3302_v20 = vmul.f32 %v10579_v23, %v12734_v26 }
 0x8d1   : > { %v9344_v33 = vpop.f32.mrb[86].mxu0  ;;  %v10581_v29 = vpop.eup %10580 }
 0x8d2   : > { %v2826_v31 = vpack.c.bf16 %v9344_v33, %v9343_v44  ;;  %v2779_v28 = vpop.f32.mrb[87].mxu0  ;;  %v3301_v24 = vmul.f32 %v10581_v29, %v12722_v7 }
 0x8d3   : > { %v2825_v4 = vpack.c.bf16 %v2779_v28, %v2776_v52  ;;  %9408 = vmatpush3.bf16.msra.mxu0 %v3328_v11 }
 0x8d4   : > { %9409 = vmatprep.subr.bf16.mxu0 %v3330_v13  ;;  %v3317_v9 = vpack.c.bf16 %v3302_v20, %v3301_v24  ;;  %v10281_v20 = vld [vmem:[#allocation7 + $0x38] sm:$0xff]  }
 0x8d5   : > { %9361 = vmatprep.mubr.msk.bf16.mxu0 %vm1174_vm0, %v2825_v4 }
 0x8d6   : > { %9362 = vmatmul.mubr.msk.bf16.gmra.mrb[68].mxu0 %vm1174_vm0, %v2826_v31 }
 0x8d7   : > { %9410 = vmatpush3.bf16.msra.mxu0 %v3330_v13  ;;  %v9347_v32 = vpop.f32.mrb[88].mxu0 }
 0x8d8   : > { %9411 = vmatprep.subr.bf16.mxu0 %v3332_v60  ;;  %v2792_v25 = vpop.f32.mrb[89].mxu0 }
 0x8d9   : > { %v9348_v39 = vpop.f32.mrb[90].mxu0 }
 0x8da   : > { %v2828_v16 = vpack.c.bf16 %v9348_v39, %v9347_v32  ;;  %v2795_v22 = vpop.f32.mrb[91].mxu0 }
 0x8db   : > { %v2827_v12 = vpack.c.bf16 %v2795_v22, %v2792_v25  ;;  %9412 = vmatpush3.bf16.msra.mxu0 %v3332_v60  ;;  %v10583_v60 = vpop.eup %10582 }
 0x8dc   : > { %9413 = vmatprep.subr.bf16.mxu0 %v3334_v42  ;;  %v10585_v19 = vpop.eup %10584  ;;  %v3304_v21 = vmul.f32 %v10583_v60, %v12728_v36 }
 0x8dd   : > { %9365 = vmatprep.mubr.msk.bf16.mxu0 %vm1174_vm0, %v2827_v12  ;;  %v10587_v55 = vpop.eup %10586  ;;  %v3306_v7 = vmul.f32 %v10585_v19, %v12738_v2 }
 0x8de   : > { %9366 = vmatmul.mubr.msk.bf16.gmra.mrb[72].mxu0 %vm1174_vm0, %v2828_v16  ;;  %v10589_v26 = vpop.eup %10588 }
 0x8df   : > { %9414 = vmatpush3.bf16.msra.mxu0 %v3334_v42  ;;  %v9351_v41 = vpop.f32.mrb[92].mxu0  ;;  %v3303_v42 = vmul.f32 %v10587_v55, %v12717_v6  ;;  %v3305_v34 = vmul.f32 %v10589_v26, %v12726_v59  ;;  %v10591_v0 = vpop.eup %10590 }
 0x8e0   : > { %9415 = vmatprep.subr.bf16.mxu0 %v3336_v38  ;;  %v2808_v54 = vpop.f32.mrb[93].mxu0  ;;  %v10593_v52 = vpop.eup %10592  ;;  %v3308_v50 = vmul.f32 %v10591_v0, %v12732_v5 }
 0x8e1   : > { %v9352_v30 = vpop.f32.mrb[94].mxu0  ;;  %v3318_v56 = vpack.c.bf16 %v3304_v21, %v3303_v42  ;;  %v3319_v44 = vpack.c.bf16 %v3306_v7, %v3305_v34  ;;  %v3307_v36 = vmul.f32 %v10593_v52, %v12720_v1 }
 0x8e2   : > { %v2830_v14 = vpack.c.bf16 %v9352_v30, %v9351_v41  ;;  %v2811_v13 = vpop.f32.mrb[95].mxu0 }
 0x8e3   : > { %v2829_v11 = vpack.c.bf16 %v2811_v13, %v2808_v54  ;;  %9416 = vmatpush3.bf16.msra.mxu0 %v3336_v38  ;;  %v3320_v33 = vpack.c.bf16 %v3308_v50, %v3307_v36  ;;  %v15240_v36 = vmov 0  }
 0x8e4   : > { %9417 = vmatprep.subr.bf16.mxu0 %v3338_v35 }
 0x8e5   : > { %9369 = vmatprep.mubr.msk.bf16.mxu0 %vm1174_vm0, %v2829_v11 }
 0x8e6   : > { %9370 = vmatmul.mubr.msk.bf16.gmra.mrb[76].mxu0 %vm1174_vm0, %v2830_v14 }
 0x8e7   : > { %9418 = vmatpush3.bf16.msra.mxu0 %v3338_v35  ;;  %9421 = vmatprep.mubr.bf16.mxu0 %v3317_v9 }
 0x8e8   : > { %9419 = vmatprep.subr.bf16.mxu0 %v3340_v43 }
 0x8eb   : > { %9420 = vmatpush3.bf16.msra.mxu0 %v3340_v43 }
 0x8ec   : > { %9437 = vmatprep.subr.bf16.mxu0 %v10280_v18 }
 0x8ee   : > { %9422 = vmatmul.mubr.bf16.vlgmr.msra.gmra.mrb[96].mxu0 %v3318_v56 }
 0x8ef   : > { %9425 = vmatprep.mubr.bf16.mxu0 %v3319_v44  ;;  %9438 = vmatpush3.bf16.msra.mxu0 %v10280_v18 }
 0x8f0   : > { %9439 = vmatprep.subr.bf16.mxu0 %v10281_v20 }
 0x8f3   : > { %9440 = vmatpush3.bf16.msra.mxu0 %v10281_v20 }
 0x8f6   : > { %9426 = vmatmul.mubr.bf16.gmra.mrb[100].mxu0 %v3320_v33  ;;  %v15241_v33 = vld [vmem:[#allocation28_spill] sm:$0xff] }
 0x8fc   : > { %v3256_v2 = vpop.xlane.xlu1 %3255 }
 0x8fd   : > { %10594 = vrcp.f32 %v3256_v2  ;;  %v3254_v6 = vpop.xlane.xlu0 %3253  ;;  %v15047_v2 = vsub.s32 3, %v15241_v33 }
 0x8fe   : > { %10596 = vrcp.f32 %v3254_v6  ;;  %v12813_v6 = vld [vmem:[#allocation11] sm:$0xff] }
 0x901   : > { %v3258_v31 = vpop.xlane.xlu0 %3257 }
 0x902   : > { %10598 = vrcp.f32 %v3258_v31  ;;  %v3606_v31 = vrot.slane %v12813_v6, %v15047_v2 }
 0x905   : > { %v3260_v59 = vpop.xlane.xlu0 %3259 }
 0x906   : > { %10600 = vrcp.f32 %v3260_v59 }
 0x907   : > { %v10595_v28 = vpop.eup %10594 }
 0x908   : > { %v10597_v4 = vpop.eup %10596  ;;  %v3310_v45 = vmul.f32 %v10595_v28, %v12751_v63 }
 0x909   : > { %v3309_v32 = vmul.f32 %v10597_v4, %v12753_v62 }
 0x90b   : > { %v3321_v25 = vpack.c.bf16 %v3310_v45, %v3309_v32 }
 0x90c   : > { %v10599_v5 = vpop.eup %10598 }
 0x90d   : > { %9429 = vmatprep.mubr.bf16.mxu0 %v3321_v25  ;;  %v3311_v37 = vmul.f32 %v10599_v5, %v12757_v8  ;;  %v15242_v5 = vld [vmem:[#allocation30_spill] sm:$0xff] }
 0x910   : > { %v10601_v1 = vpop.eup %10600 }
 0x911   : > { %v3312_v39 = vmul.f32 %v10601_v1, %v12760_v15 }
 0x913   : > { %v3322_v16 = vpack.c.bf16 %v3312_v39, %v3311_v37 }
 0x915   : > { %9430 = vmatmul.mubr.bf16.gmra.mrb[104].mxu0 %v3322_v16  ;;  %v15243_v16 = vld [vmem:[#allocation31_spill] sm:$0xff] }
 0x918   : > { %v3262_v22 = vpop.xlane.xlu1 %3261 }
 0x919   : > { %10602 = vrcp.f32 %v3262_v22 }
 0x91c   : > { %v3266_v40 = vpop.xlane.xlu1 %3265  ;;  %v3264_v12 = vpop.xlane.xlu0 %3263 }
 0x91d   : > { %10604 = vrcp.f32 %v3264_v12 }
 0x91e   : > { %10606 = vrcp.f32 %v3266_v40  ;;  %v15244_v40 = vld [vmem:[#allocation32_spill] sm:$0xff] }
 0x920   : > { %v3268_v23 = vpop.xlane.xlu0 %3267 }
 0x921   : > { %10608 = vrcp.f32 %v3268_v23 }
 0x923   : > { %v10603_v63 = vpop.eup %10602 }
 0x924   : > { %v3313_v41 = vmul.f32 %v10603_v63, %v12767_v10 }
 0x927   : > { %v10605_v62 = vpop.eup %10604 }
 0x928   : > { %v10607_v38 = vpop.eup %10606  ;;  %v3314_v29 = vmul.f32 %v10605_v62, %v12772_v3  ;;  %v15245_v62 = vld [vmem:[#allocation33_spill] sm:$0xff] }
 0x929   : > { %v3315_v15 = vmul.f32 %v10607_v38, %v12770_v17 }
 0x92a   : > { %v3323_v54 = vpack.c.bf16 %v3314_v29, %v3313_v41 }
 0x92b   : > { %v10609_v8 = vpop.eup %10608 }
 0x92c   : > { %v3316_v35 = vmul.f32 %v10609_v8, %v12776_v49  ;;  %9433 = vmatprep.mubr.bf16.mxu0 %v3323_v54 }
 0x92e   : > { %v3324_v30 = vpack.c.bf16 %v3316_v35, %v3315_v15  ;;  %v15246_v15 = vld [vmem:[#allocation34_spill] sm:$0xff] }
 0x930   : > { %9434 = vmatmul.mubr.bf16.gmra.mrb[108].mxu0 %v3324_v30 }
 0x9c1   : > { %v9423_v14 = vpop.f32.mrb[96].mxu0 }
 0x9c2   : > { %v3383_v13 = vpop.f32.mrb[97].mxu0 }
 0x9c3   : > { %v9424_v11 = vpop.f32.mrb[98].mxu0 }
 0x9c4   : > { %v3447_v24 = vpack.c.bf16 %v9424_v11, %v9423_v14  ;;  %v3386_v60 = vpop.f32.mrb[99].mxu0  ;;  %v15247_v14 = vld [vmem:[#allocation35_spill] sm:$0xff]  ;;  %v15248_v11 = vld [vmem:[#allocation36_spill] sm:$0xff] }
 0x9c5   : > { %v3446_v10 = vpack.c.bf16 %v3386_v60, %v3383_v13  ;;  %v15249_v60 = vld [vmem:[#allocation37_spill] sm:$0xff] }
 0x9c7   : > { %9441 = vmatprep.mubr.msk.bf16.mxu0 %vm1174_vm0, %v3446_v10 }
 0x9c8   : > { %9442 = vmatmul.mubr.msk.bf16.vlgmr.msra.gmra.mrb[64].mxu0 %vm1174_vm0, %v3447_v24 }
 0x9c9   : > { %v9427_v3 = vpop.f32.mrb[100].mxu0 }
 0x9ca   : > { %v3399_v17 = vpop.f32.mrb[101].mxu0 }
 0x9cb   : > { %v9428_v9 = vpop.f32.mrb[102].mxu0 }
 0x9cc   : > { %v3449_v49 = vpack.c.bf16 %v9428_v9, %v9427_v3  ;;  %v3402_v19 = vpop.f32.mrb[103].mxu0 }
 0x9cd   : > { %v3448_v55 = vpack.c.bf16 %v3402_v19, %v3399_v17 }
 0x9cf   : > { %9445 = vmatprep.mubr.msk.bf16.mxu0 %vm1174_vm0, %v3448_v55 }
 0x9d0   : > { %9446 = vmatmul.mubr.msk.bf16.gmra.mrb[68].mxu0 %vm1174_vm0, %v3449_v49 }
 0x9e8   : > { %v9431_v43 = vpop.f32.mrb[104].mxu0 }
 0x9e9   : > { %v3415_v26 = vpop.f32.mrb[105].mxu0 }
 0x9ea   : > { %v9432_v21 = vpop.f32.mrb[106].mxu0 }
 0x9eb   : > { %v3451_v18 = vpack.c.bf16 %v9432_v21, %v9431_v43  ;;  %v3418_v7 = vpop.f32.mrb[107].mxu0  ;;  %v15250_v43 = vld [vmem:[#allocation38_spill] sm:$0xff] }
 0x9ec   : > { %v3450_v42 = vpack.c.bf16 %v3418_v7, %v3415_v26  ;;  %v15251_v7 = vld [vmem:[#allocation39_spill] sm:$0xff] }
 0x9ee   : > { %9449 = vmatprep.mubr.msk.bf16.mxu0 %vm1174_vm0, %v3450_v42 }
 0x9ef   : > { %9450 = vmatmul.mubr.msk.bf16.gmra.mrb[72].mxu0 %vm1174_vm0, %v3451_v18 }
 0xa03   : > { %v9435_v34 = vpop.f32.mrb[108].mxu0 }
 0xa04   : > { %v3431_v56 = vpop.f32.mrb[109].mxu0 }
 0xa05   : > { %v9436_v0 = vpop.f32.mrb[110].mxu0 }
 0xa06   : > { %v3453_v44 = vpack.c.bf16 %v9436_v0, %v9435_v34  ;;  %v3434_v52 = vpop.f32.mrb[111].mxu0  ;;  %v15252_v34 = vld [vmem:[#allocation40_spill] sm:$0xff]  ;;  %v15253_v0 = vld [vmem:[#allocation41_spill] sm:$0xff] }
 0xa07   : > { %v3452_v50 = vpack.c.bf16 %v3434_v52, %v3431_v56 }
 0xa09   : > { %9453 = vmatprep.mubr.msk.bf16.mxu0 %vm1174_vm0, %v3452_v50 }
 0xa0a   : > { %9454 = vmatmul.mubr.msk.bf16.gmra.mrb[76].mxu0 %vm1174_vm0, %v3453_v44 }
 0xa0b   : > { %4654 = vmatprep.mubr.bf16.mxu0 %v15240_v36 }
 0xa9b   : > { %v9443_v59 = vpop.f32.mrb[64].mxu0 }
 0xa9c   : > { %v3524_v28 = vpop.f32.mrb[65].mxu0  ;;  %v3609_v25 = vadd.f32 %v9443_v59, %v3606_v31 }
 0xa9d   : > { %v3607_v4 = vadd.f32 %v3606_v31, %v3524_v28  ;;  %v9444_v45 = vpop.f32.mrb[66].mxu0 }
 0xa9e   : > { %v3527_v32 = vpop.f32.mrb[67].mxu0  ;;  %v3610_v39 = vadd.f32 %v9444_v45, %v3606_v31  ;;  %v12826_v12 = vadd.f32 %v3609_v25, %v15244_v40  ;;  %v15256_v40 = vld [vmem:[#allocation44_spill] sm:$0xff] }
 0xa9f   : > { %v12819_v1 = vadd.f32 %v3607_v4, %v15242_v5  ;;  %v3608_v37 = vadd.f32 %v3606_v31, %v3527_v32  ;;  %v15254_v32 = vld [vmem:[#allocation42_spill] sm:$0xff] }
 0xaa0   : > { %v12830_v38 = vadd.f32 %v3610_v39, %v15245_v62  ;;  %v15255_v39 = vld [vmem:[#allocation43_spill] sm:$0xff] }
 0xaa1   : > { %v12822_v22 = vadd.f32 %v3608_v37, %v15243_v16  ;;  %3639 = vadd.xlane.f32.xlu1 %v12819_v1 }
 0xaa3   : > { %3641 = vadd.xlane.f32.xlu0 %v12822_v22  ;;  %v9447_v23 = vpop.f32.mrb[68].mxu0 }
 0xaa4   : > { %v3540_v63 = vpop.f32.mrb[69].mxu0  ;;  %v3613_v54 = vadd.f32 %v9447_v23, %v3606_v31 }
 0xaa5   : > { %v3611_v41 = vadd.f32 %v3606_v31, %v3540_v63  ;;  %3643 = vadd.xlane.f32.xlu1 %v12826_v12  ;;  %v9448_v29 = vpop.f32.mrb[70].mxu0  ;;  %v15257_v63 = vld [vmem:[#allocation45_spill] sm:$0xff] }
 0xaa6   : > { %v3543_v8 = vpop.f32.mrb[71].mxu0  ;;  %v3614_v20 = vadd.f32 %v9448_v29, %v3606_v31  ;;  %v12842_v24 = vadd.f32 %v3613_v54, %v15248_v11 }
 0xaa7   : > { %v12834_v35 = vadd.f32 %v3611_v41, %v15246_v15  ;;  %v3612_v30 = vadd.f32 %v3606_v31, %v3543_v8  ;;  %3645 = vadd.xlane.f32.xlu0 %v12830_v38  ;;  %v10282_v41 = vld [vmem:[#allocation8] sm:$0xff]  }
 0xaa8   : > { %v12846_v10 = vadd.f32 %v3614_v20, %v15249_v60  ;;  %9457 = vmatprep.subr.bf16.mxu1 %v10282_v41 }
 0xaa9   : > { %v12838_v13 = vadd.f32 %v3612_v30, %v15247_v14  ;;  %3647 = vadd.xlane.f32.xlu1 %v12834_v35  ;;  %9458 = vmatpush3.bf16.msra.mxu1 %v10282_v41  ;;  %v10288_v41 = vld [vmem:[#allocation8 + $0x30] sm:$0xff]  }
 0xaab   : > { %3649 = vadd.xlane.f32.xlu0 %v12838_v13 }
 0xaad   : > { %3651 = vadd.xlane.f32.xlu1 %v12842_v24 }
 0xaaf   : > { %3653 = vadd.xlane.f32.xlu0 %v12846_v10 }
 0xac2   : > { %v9451_v3 = vpop.f32.mrb[72].mxu0 }
 0xac3   : > { %v3556_v17 = vpop.f32.mrb[73].mxu0  ;;  %v3617_v55 = vadd.f32 %v9451_v3, %v3606_v31 }
 0xac4   : > { %v3615_v9 = vadd.f32 %v3606_v31, %v3556_v17  ;;  %v9452_v49 = vpop.f32.mrb[74].mxu0 }
 0xac5   : > { %v3559_v19 = vpop.f32.mrb[75].mxu0  ;;  %v3618_v18 = vadd.f32 %v9452_v49, %v3606_v31  ;;  %v12858_v56 = vadd.f32 %v3617_v55, %v15252_v34 }
 0xac6   : > { %v12851_v26 = vadd.f32 %v3615_v9, %v15250_v43  ;;  %v3616_v21 = vadd.f32 %v3606_v31, %v3559_v19 }
 0xac7   : > { %v12862_v44 = vadd.f32 %v3618_v18, %v15253_v0 }
 0xac8   : > { %v12854_v42 = vadd.f32 %v3616_v21, %v15251_v7  ;;  %3655 = vadd.xlane.f32.xlu1 %v12851_v26 }
 0xaca   : > { %3657 = vadd.xlane.f32.xlu0 %v12854_v42 }
 0xacc   : > { %3659 = vadd.xlane.f32.xlu1 %v12858_v56 }
 0xace   : > { %3661 = vadd.xlane.f32.xlu0 %v12862_v44 }
 0xadd   : > { %v9455_v52 = vpop.f32.mrb[76].mxu0 }
 0xade   : > { %v3572_v50 = vpop.f32.mrb[77].mxu0  ;;  %v3621_v45 = vadd.f32 %v9455_v52, %v3606_v31 }
 0xadf   : > { %v3619_v59 = vadd.f32 %v3606_v31, %v3572_v50  ;;  %v9456_v28 = vpop.f32.mrb[78].mxu0 }
 0xae0   : > { %v3575_v4 = vpop.f32.mrb[79].mxu0  ;;  %v3622_v37 = vadd.f32 %v9456_v28, %v3606_v31  ;;  %v12874_v23 = vadd.f32 %v3621_v45, %v15256_v40  ;;  %v10285_v45 = vld [vmem:[#allocation8 + $0x18] sm:$0xff]  }
 0xae1   : > { %v12867_v25 = vadd.f32 %v3619_v59, %v15254_v32  ;;  %v3620_v5 = vadd.f32 %v3606_v31, %v3575_v4  ;;  %v10283_v4 = vld [vmem:[#allocation8 + $0x8] sm:$0xff]  }
 0xae2   : > { %v12878_v62 = vadd.f32 %v3622_v37, %v15257_v63  ;;  %9459 = vmatprep.subr.bf16.mxu1 %v10283_v4  ;;  %v10287_v32 = vld [vmem:[#allocation8 + $0x28] sm:$0xff]  }
 0xae3   : > { %v12870_v16 = vadd.f32 %v3620_v5, %v15255_v39  ;;  %3663 = vadd.xlane.f32.xlu1 %v12867_v25  ;;  %9460 = vmatpush3.bf16.msra.mxu1 %v10283_v4 }
 0xae5   : > { %3665 = vadd.xlane.f32.xlu0 %v12870_v16 }
 0xae7   : > { %3667 = vadd.xlane.f32.xlu1 %v12874_v23 }
 0xae9   : > { %3669 = vadd.xlane.f32.xlu0 %v12878_v62 }
 0xb2e   : > { %v3640_v31 = vpop.xlane.xlu1 %3639 }
 0xb2f   : > { %v3672_v29 = vmul.f32 0.0078125, %v3640_v31 }
 0xb30   : > { %v3642_v8 = vpop.xlane.xlu0 %3641 }
 0xb31   : > { %v12883_v54 = vsub.f32 %v12819_v1, %v3672_v29  ;;  %v3673_v15 = vmul.f32 0.0078125, %v3642_v8 }
 0xb32   : > { %v3644_v30 = vpop.xlane.xlu1 %3643 }
 0xb33   : > { %v12886_v20 = vsub.f32 %v12822_v22, %v3673_v15  ;;  %v3674_v14 = vmul.f32 0.0078125, %v3644_v30  ;;  %v3704_v11 = vmul.f32 %v12883_v54, %v12883_v54  ;;  %v10289_v30 = vld [vmem:[#allocation8 + $0x38] sm:$0xff]  }
 0xb34   : > { %v3646_v60 = vpop.xlane.xlu0 %3645 }
 0xb35   : > { %v12891_v3 = vsub.f32 %v12826_v12, %v3674_v14  ;;  %v3675_v17 = vmul.f32 0.0078125, %v3646_v60  ;;  %3720 = vadd.xlane.f32.xlu1 %v3704_v11  ;;  %v3705_v9 = vmul.f32 %v12886_v20, %v12886_v20 }
 0xb36   : > { %v3648_v1 = vpop.xlane.xlu1 %3647 }
 0xb37   : > { %v12896_v49 = vsub.f32 %v12830_v38, %v3675_v17  ;;  %v3676_v19 = vmul.f32 0.0078125, %v3648_v1  ;;  %3722 = vadd.xlane.f32.xlu0 %v3705_v9  ;;  %v3706_v22 = vmul.f32 %v12891_v3, %v12891_v3 }
 0xb38   : > { %v3650_v55 = vpop.xlane.xlu0 %3649 }
 0xb39   : > { %v12901_v43 = vsub.f32 %v12834_v35, %v3676_v19  ;;  %v3677_v12 = vmul.f32 0.0078125, %v3650_v55  ;;  %3724 = vadd.xlane.f32.xlu1 %v3706_v22  ;;  %v3707_v21 = vmul.f32 %v12896_v49, %v12896_v49 }
 0xb3a   : > { %v3652_v18 = vpop.xlane.xlu1 %3651 }
 0xb3b   : > { %v12906_v7 = vsub.f32 %v12838_v13, %v3677_v12  ;;  %v3678_v38 = vmul.f32 0.0078125, %v3652_v18  ;;  %3726 = vadd.xlane.f32.xlu0 %v3707_v21  ;;  %v3708_v34 = vmul.f32 %v12901_v43, %v12901_v43 }
 0xb3c   : > { %v3654_v0 = vpop.xlane.xlu0 %3653 }
 0xb3d   : > { %v12911_v52 = vsub.f32 %v12842_v24, %v3678_v38  ;;  %v3679_v35 = vmul.f32 0.0078125, %v3654_v0  ;;  %3728 = vadd.xlane.f32.xlu1 %v3708_v34  ;;  %v3709_v50 = vmul.f32 %v12906_v7, %v12906_v7  ;;  %v10284_v24 = vld [vmem:[#allocation8 + $0x10] sm:$0xff]  }
 0xb3e   : > { %9461 = vmatprep.subr.bf16.mxu1 %v10284_v24 }
 0xb3f   : > { %v12916_v59 = vsub.f32 %v12846_v10, %v3679_v35  ;;  %3730 = vadd.xlane.f32.xlu0 %v3709_v50  ;;  %v3710_v13 = vmul.f32 %v12911_v52, %v12911_v52  ;;  %9462 = vmatpush3.bf16.msra.mxu1 %v10284_v24  ;;  %v10286_v10 = vld [vmem:[#allocation8 + $0x20] sm:$0xff]  }
 0xb40   : > { %9463 = vmatprep.subr.bf16.mxu1 %v10285_v45 }
 0xb41   : > { %3732 = vadd.xlane.f32.xlu1 %v3710_v13  ;;  %v3711_v28 = vmul.f32 %v12916_v59, %v12916_v59  ;;  %v12962_v13 = vld [vmem:[#allocation10] sm:$0xff]  }
 0xb43   : > { %3734 = vadd.xlane.f32.xlu0 %v3711_v28  ;;  %9464 = vmatpush3.bf16.msra.mxu1 %v10285_v45 }
 0xb44   : > { %9465 = vmatprep.subr.bf16.mxu1 %v10286_v10 }
 0xb47   : > { %9466 = vmatpush3.bf16.msra.mxu1 %v10286_v10 }
 0xb48   : > { %9467 = vmatprep.subr.bf16.mxu1 %v10287_v32 }
 0xb4b   : > { %9468 = vmatpush3.bf16.msra.mxu1 %v10287_v32 }
 0xb4c   : > { %9469 = vmatprep.subr.bf16.mxu1 %v10288_v41 }
 0xb4f   : > { %9470 = vmatpush3.bf16.msra.mxu1 %v10288_v41 }
 0xb50   : > { %9471 = vmatprep.subr.bf16.mxu1 %v10289_v30 }
 0xb53   : > { %9472 = vmatpush3.bf16.msra.mxu1 %v10289_v30 }
 0xb54   : > { %9489 = vmatprep.subr.bf16.mxu1 %v12962_v13 }
 0xb55   : > { %v3656_v5 = vpop.xlane.xlu1 %3655 }
 0xb56   : > { %v3680_v37 = vmul.f32 0.0078125, %v3656_v5 }
 0xb57   : > { %v3658_v39 = vpop.xlane.xlu0 %3657 }
 0xb58   : > { %v12923_v40 = vsub.f32 %v12851_v26, %v3680_v37  ;;  %v3681_v63 = vmul.f32 0.0078125, %v3658_v39 }
 0xb59   : > { %v3660_v31 = vpop.xlane.xlu1 %3659 }
 0xb5a   : > { %v12926_v29 = vsub.f32 %v12854_v42, %v3681_v63  ;;  %v3682_v8 = vmul.f32 0.0078125, %v3660_v31  ;;  %v3712_v15 = vmul.f32 %v12923_v40, %v12923_v40 }
 0xb5b   : > { %v3662_v14 = vpop.xlane.xlu0 %3661 }
 0xb5c   : > { %v12931_v11 = vsub.f32 %v12858_v56, %v3682_v8  ;;  %v3683_v60 = vmul.f32 0.0078125, %v3662_v14  ;;  %3736 = vadd.xlane.f32.xlu1 %v3712_v15  ;;  %v3713_v26 = vmul.f32 %v12926_v29, %v12926_v29  ;;  %v15046_v8 = vsub.s32 6, %v15241_v33 }
 0xb5e   : > { %v12936_v42 = vsub.f32 %v12862_v44, %v3683_v60  ;;  %3738 = vadd.xlane.f32.xlu0 %v3713_v26  ;;  %v3714_v17 = vmul.f32 %v12931_v11, %v12931_v11 }
 0xb60   : > { %3740 = vadd.xlane.f32.xlu1 %v3714_v17  ;;  %v3715_v9 = vmul.f32 %v12936_v42, %v12936_v42 }
 0xb62   : > { %3742 = vadd.xlane.f32.xlu0 %v3715_v9  ;;  %v12969_v9 = vrot.slane %v12813_v6, %v15046_v8 }
 0xb70   : > { %v3664_v56 = vpop.xlane.xlu1 %3663 }
 0xb71   : > { %v3684_v1 = vmul.f32 0.0078125, %v3664_v56 }
 0xb72   : > { %v3666_v19 = vpop.xlane.xlu0 %3665 }
 0xb73   : > { %v12943_v22 = vsub.f32 %v12867_v25, %v3684_v1  ;;  %v3685_v55 = vmul.f32 0.0078125, %v3666_v19  ;;  %v15045_v1 = vsub.s32 7, %v15241_v33 }
 0xb74   : > { %v3668_v12 = vpop.xlane.xlu1 %3667 }
 0xb75   : > { %v12946_v44 = vsub.f32 %v12870_v16, %v3685_v55  ;;  %v3686_v21 = vmul.f32 0.0078125, %v3668_v12  ;;  %v3716_v18 = vmul.f32 %v12943_v22, %v12943_v22 }
 0xb76   : > { %v3670_v38 = vpop.xlane.xlu0 %3669 }
 0xb77   : > { %v12951_v34 = vsub.f32 %v12874_v23, %v3686_v21  ;;  %v3687_v0 = vmul.f32 0.0078125, %v3670_v38  ;;  %3744 = vadd.xlane.f32.xlu1 %v3716_v18  ;;  %v3717_v35 = vmul.f32 %v12946_v44, %v12946_v44 }
 0xb79   : > { %v12956_v25 = vsub.f32 %v12878_v62, %v3687_v0  ;;  %3746 = vadd.xlane.f32.xlu0 %v3717_v35  ;;  %v3718_v16 = vmul.f32 %v12951_v34, %v12951_v34 }
 0xb7b   : > { %3748 = vadd.xlane.f32.xlu1 %v3718_v16  ;;  %v3719_v50 = vmul.f32 %v12956_v25, %v12956_v25  ;;  %v12978_v16 = vrot.slane %v12813_v6, %v15045_v1 }
 0xb7d   : > { %3750 = vadd.xlane.f32.xlu0 %v3719_v50 }
 0xbc2   : > { %v3721_v23 = vpop.xlane.xlu1 %3720 }
 0xbc3   : > { %v3752_v28 = vmul.f32 0.0078125, %v3721_v23 }
 0xbc4   : > { %v3723_v4 = vpop.xlane.xlu0 %3722 }
 0xbc5   : > { %v3768_v24 = vadd.f32 1e-05, %v3752_v28  ;;  %v3753_v45 = vmul.f32 0.0078125, %v3723_v4 }
 0xbc6   : > { %v3725_v62 = vpop.xlane.xlu1 %3724 }
 0xbc7   : > { %10610 = vrsqrt.f32 %v3768_v24  ;;  %v3769_v10 = vadd.f32 1e-05, %v3753_v45  ;;  %v3754_v32 = vmul.f32 0.0078125, %v3725_v62 }
 0xbc8   : > { %v3727_v5 = vpop.xlane.xlu0 %3726 }
 0xbc9   : > { %10612 = vrsqrt.f32 %v3769_v10  ;;  %v3770_v37 = vadd.f32 1e-05, %v3754_v32  ;;  %v3755_v39 = vmul.f32 0.0078125, %v3727_v5 }
 0xbca   : > { %v3729_v63 = vpop.xlane.xlu1 %3728 }
 0xbcb   : > { %10614 = vrsqrt.f32 %v3770_v37  ;;  %v3771_v41 = vadd.f32 1e-05, %v3755_v39  ;;  %v3756_v31 = vmul.f32 0.0078125, %v3729_v63 }
 0xbcc   : > { %v3731_v15 = vpop.xlane.xlu0 %3730 }
 0xbcd   : > { %10616 = vrsqrt.f32 %v3771_v41  ;;  %v3772_v30 = vadd.f32 1e-05, %v3756_v31  ;;  %v3757_v14 = vmul.f32 0.0078125, %v3731_v15 }
 0xbce   : > { %v3733_v60 = vpop.xlane.xlu1 %3732 }
 0xbcf   : > { %10618 = vrsqrt.f32 %v3772_v30  ;;  %v3773_v26 = vadd.f32 1e-05, %v3757_v14  ;;  %v3758_v17 = vmul.f32 0.0078125, %v3733_v60  ;;  %v10291_v30 = vld [vmem:[#allocation10 + $0x8] sm:$0xff]  }
 0xbd0   : > { %v3735_v56 = vpop.xlane.xlu0 %3734 }
 0xbd1   : > { %v10611_v19 = vpop.eup %10610  ;;  %10620 = vrsqrt.f32 %v3773_v26  ;;  %v3774_v55 = vadd.f32 1e-05, %v3758_v17  ;;  %v3759_v12 = vmul.f32 0.0078125, %v3735_v56 }
 0xbd2   : > { %v3800_v21 = vmul.f32 %v10611_v19, %v12883_v54  ;;  %v10292_v19 = vld [vmem:[#allocation10 + $0x10] sm:$0xff]  }
 0xbd3   : > { %v10613_v18 = vpop.eup %10612  ;;  %10622 = vrsqrt.f32 %v3774_v55  ;;  %v3775_v38 = vadd.f32 1e-05, %v3759_v12 }
 0xbd4   : > { %v3801_v0 = vmul.f32 %v10613_v18, %v12886_v20  ;;  %v3820_v35 = vmul.f32 %v12969_v9, %v3800_v21 }
 0xbd5   : > { %v10615_v50 = vpop.eup %10614  ;;  %10624 = vrsqrt.f32 %v3775_v38  ;;  %v10294_v38 = vld [vmem:[#allocation10 + $0x20] sm:$0xff]  }
 0xbd6   : > { %v3802_v23 = vmul.f32 %v10615_v50, %v12891_v3  ;;  %v3821_v28 = vmul.f32 %v12969_v9, %v3801_v0  ;;  %v12985_v20 = vadd.f32 %v12978_v16, %v3820_v35 }
 0xbd7   : > { %v10617_v4 = vpop.eup %10616 }
 0xbd8   : > { %v3822_v54 = vmul.f32 %v12969_v9, %v3802_v23  ;;  %v3803_v24 = vmul.f32 %v10617_v4, %v12896_v49  ;;  %v12988_v45 = vadd.f32 %v12978_v16, %v3821_v28 }
 0xbd9   : > { %v10619_v62 = vpop.eup %10618 }
 0xbda   : > { %v3823_v10 = vmul.f32 %v12969_v9, %v3803_v24  ;;  %v3856_v32 = vpack.c.bf16 %v12988_v45, %v12985_v20  ;;  %v3804_v3 = vmul.f32 %v10619_v62, %v12901_v43  ;;  %v12995_v37 = vadd.f32 %v12978_v16, %v3822_v54  ;;  %v10295_v54 = vld [vmem:[#allocation10 + $0x28] sm:$0xff]  }
 0xbdb   : > { %v10621_v5 = vpop.eup %10620 }
 0xbdc   : > { %9473 = vmatprep.mubr.bf16.mxu1 %v3856_v32  ;;  %v12998_v49 = vadd.f32 %v12978_v16, %v3823_v10  ;;  %v3805_v39 = vmul.f32 %v10621_v5, %v12906_v7  ;;  %v3824_v63 = vmul.f32 %v12969_v9, %v3804_v3 }
 0xbdd   : > { %v10623_v41 = vpop.eup %10622 }
 0xbde   : > { %v3857_v31 = vpack.c.bf16 %v12998_v49, %v12995_v37  ;;  %v3825_v15 = vmul.f32 %v12969_v9, %v3805_v39  ;;  %v3806_v43 = vmul.f32 %v10623_v41, %v12911_v52  ;;  %v13007_v60 = vadd.f32 %v12978_v16, %v3824_v63 }
 0xbdf   : > { %v10625_v14 = vpop.eup %10624 }
 0xbe0   : > { %9474 = vmatmul.mubr.bf16.vlgmr.msra.gmra.mrb[80].mxu1 %v3857_v31  ;;  %v13010_v26 = vadd.f32 %v12978_v16, %v3825_v15  ;;  %v3807_v7 = vmul.f32 %v10625_v14, %v12916_v59  ;;  %v3826_v17 = vmul.f32 %v12969_v9, %v3806_v43 }
 0xbe1   : > { %9490 = vmatpush3.bf16.msra.mxu1 %v12962_v13  ;;  %v10293_v13 = vld [vmem:[#allocation10 + $0x18] sm:$0xff]  }
 0xbe2   : > { %v3858_v56 = vpack.c.bf16 %v13010_v26, %v13007_v60  ;;  %v3827_v52 = vmul.f32 %v12969_v9, %v3807_v7  ;;  %9491 = vmatprep.subr.bf16.mxu1 %v10291_v30  ;;  %v13019_v55 = vadd.f32 %v12978_v16, %v3826_v17 }
 0xbe4   : > { %9477 = vmatprep.mubr.bf16.mxu1 %v3858_v56  ;;  %v13022_v12 = vadd.f32 %v12978_v16, %v3827_v52 }
 0xbe5   : > { %9492 = vmatpush3.bf16.msra.mxu1 %v10291_v30 }
 0xbe6   : > { %v3859_v59 = vpack.c.bf16 %v13022_v12, %v13019_v55  ;;  %9493 = vmatprep.subr.bf16.mxu1 %v10292_v19 }
 0xbe8   : > { %9478 = vmatmul.mubr.bf16.gmra.mrb[84].mxu1 %v3859_v59 }
 0xbe9   : > { %v3737_v21 = vpop.xlane.xlu1 %3736  ;;  %9494 = vmatpush3.bf16.msra.mxu1 %v10292_v19 }
 0xbea   : > { %v3760_v18 = vmul.f32 0.0078125, %v3737_v21  ;;  %9495 = vmatprep.subr.bf16.mxu1 %v10293_v13 }
 0xbeb   : > { %v3739_v0 = vpop.xlane.xlu0 %3738 }
 0xbec   : > { %v3776_v35 = vadd.f32 1e-05, %v3760_v18  ;;  %v3761_v50 = vmul.f32 0.0078125, %v3739_v0 }
 0xbed   : > { %v3741_v23 = vpop.xlane.xlu1 %3740  ;;  %9496 = vmatpush3.bf16.msra.mxu1 %v10293_v13 }
 0xbee   : > { %10626 = vrsqrt.f32 %v3776_v35  ;;  %v3777_v28 = vadd.f32 1e-05, %v3761_v50  ;;  %v3762_v4 = vmul.f32 0.0078125, %v3741_v23  ;;  %9497 = vmatprep.subr.bf16.mxu1 %v10294_v38 }
 0xbef   : > { %v3743_v24 = vpop.xlane.xlu0 %3742 }
 0xbf0   : > { %10628 = vrsqrt.f32 %v3777_v28  ;;  %v3778_v62 = vadd.f32 1e-05, %v3762_v4  ;;  %v3763_v10 = vmul.f32 0.0078125, %v3743_v24 }
 0xbf1   : > { %9498 = vmatpush3.bf16.msra.mxu1 %v10294_v38 }
 0xbf2   : > { %10630 = vrsqrt.f32 %v3778_v62  ;;  %v3779_v32 = vadd.f32 1e-05, %v3763_v10  ;;  %9499 = vmatprep.subr.bf16.mxu1 %v10295_v54 }
 0xbf4   : > { %10632 = vrsqrt.f32 %v3779_v32 }
 0xbf5   : > { %9500 = vmatpush3.bf16.msra.mxu1 %v10295_v54 }
 0xbf8   : > { %v10627_v3 = vpop.eup %10626 }
 0xbf9   : > { %v3808_v5 = vmul.f32 %v10627_v3, %v12923_v40 }
 0xbfa   : > { %v10629_v39 = vpop.eup %10628 }
 0xbfb   : > { %v3809_v63 = vmul.f32 %v10629_v39, %v12926_v29  ;;  %v3828_v41 = vmul.f32 %v12969_v9, %v3808_v5 }
 0xbfc   : > { %v10631_v31 = vpop.eup %10630 }
 0xbfd   : > { %v3829_v15 = vmul.f32 %v12969_v9, %v3809_v63  ;;  %v3810_v43 = vmul.f32 %v10631_v31, %v12931_v11  ;;  %v13032_v14 = vadd.f32 %v12978_v16, %v3828_v41 }
 0xbfe   : > { %v10633_v30 = vpop.eup %10632 }
 0xbff   : > { %v13035_v7 = vadd.f32 %v12978_v16, %v3829_v15  ;;  %v3811_v17 = vmul.f32 %v10633_v30, %v12936_v42  ;;  %v3830_v40 = vmul.f32 %v12969_v9, %v3810_v43 }
 0xc01   : > { %v3860_v29 = vpack.c.bf16 %v13035_v7, %v13032_v14  ;;  %v3831_v56 = vmul.f32 %v12969_v9, %v3811_v17  ;;  %v13043_v52 = vadd.f32 %v12978_v16, %v3830_v40  ;;  %v10296_v40 = vld [vmem:[#allocation10 + $0x30] sm:$0xff]  }
 0xc02   : > { %9501 = vmatprep.subr.bf16.mxu1 %v10296_v40 }
 0xc03   : > { %9481 = vmatprep.mubr.bf16.mxu1 %v3860_v29  ;;  %v13046_v11 = vadd.f32 %v12978_v16, %v3831_v56  ;;  %9502 = vmatpush3.bf16.msra.mxu1 %v10296_v40  ;;  %v15044_v29 = vsub.s32 4, %v15241_v33 }
 0xc04   : > { %v3745_v19 = vpop.xlane.xlu1 %3744 }
 0xc05   : > { %v3764_v59 = vmul.f32 0.0078125, %v3745_v19  ;;  %v3861_v13 = vpack.c.bf16 %v13046_v11, %v13043_v52 }
 0xc06   : > { %v3747_v42 = vpop.xlane.xlu0 %3746 }
 0xc07   : > { %v3780_v21 = vadd.f32 1e-05, %v3764_v59  ;;  %v3765_v18 = vmul.f32 0.0078125, %v3747_v42  ;;  %9482 = vmatmul.mubr.bf16.gmra.mrb[88].mxu1 %v3861_v13 }
 0xc08   : > { %v3749_v38 = vpop.xlane.xlu1 %3748 }
 0xc09   : > { %10634 = vrsqrt.f32 %v3780_v21  ;;  %v3781_v0 = vadd.f32 1e-05, %v3765_v18  ;;  %v3766_v35 = vmul.f32 0.0078125, %v3749_v38 }
 0xc0a   : > { %v3751_v50 = vpop.xlane.xlu0 %3750 }
 0xc0b   : > { %10636 = vrsqrt.f32 %v3781_v0  ;;  %v3782_v23 = vadd.f32 1e-05, %v3766_v35  ;;  %v3767_v28 = vmul.f32 0.0078125, %v3751_v50 }
 0xc0d   : > { %10638 = vrsqrt.f32 %v3782_v23  ;;  %v3783_v4 = vadd.f32 1e-05, %v3767_v28 }
 0xc0f   : > { %10640 = vrsqrt.f32 %v3783_v4 }
 0xc13   : > { %v10635_v54 = vpop.eup %10634 }
 0xc14   : > { %v3812_v24 = vmul.f32 %v10635_v54, %v12943_v22 }
 0xc15   : > { %v10637_v62 = vpop.eup %10636 }
 0xc16   : > { %v3813_v10 = vmul.f32 %v10637_v62, %v12946_v44  ;;  %v3832_v32 = vmul.f32 %v12969_v9, %v3812_v24 }
 0xc17   : > { %v10639_v3 = vpop.eup %10638 }
 0xc18   : > { %v3833_v5 = vmul.f32 %v12969_v9, %v3813_v10  ;;  %v3814_v39 = vmul.f32 %v10639_v3, %v12951_v34  ;;  %v13056_v41 = vadd.f32 %v12978_v16, %v3832_v32 }
 0xc19   : > { %v10641_v63 = vpop.eup %10640 }
 0xc1a   : > { %v13059_v31 = vadd.f32 %v12978_v16, %v3833_v5  ;;  %v3815_v15 = vmul.f32 %v10641_v63, %v12956_v25  ;;  %v3834_v22 = vmul.f32 %v12969_v9, %v3814_v39  ;;  %v10297_v25 = vld [vmem:[#allocation10 + $0x38] sm:$0xff]  }
 0xc1b   : > { %9503 = vmatprep.subr.bf16.mxu1 %v10297_v25 }
 0xc1c   : > { %v3862_v44 = vpack.c.bf16 %v13059_v31, %v13056_v41  ;;  %v3835_v43 = vmul.f32 %v12969_v9, %v3815_v15  ;;  %v13067_v30 = vadd.f32 %v12978_v16, %v3834_v22  ;;  %9504 = vmatpush3.bf16.msra.mxu1 %v10297_v25  ;;  %v3883_v9 = vrot.slane %v12813_v6, %v15044_v29 }
 0xc1e   : > { %9485 = vmatprep.mubr.bf16.mxu1 %v3862_v44  ;;  %v13070_v34 = vadd.f32 %v12978_v16, %v3835_v43 }
 0xc20   : > { %v3863_v17 = vpack.c.bf16 %v13070_v34, %v13067_v30 }
 0xc22   : > { %9486 = vmatmul.mubr.bf16.gmra.mrb[92].mxu1 %v3863_v17 }
 0xcb3   : > { %v9475_v56 = vpop.f32.mrb[80].mxu1 }
 0xcb4   : > { %v3975_v19 = vadd.f32 %v9475_v56, %v3883_v9  ;;  %v3966_v16 = vpop.f32.mrb[81].mxu1 }
 0xcb5   : > { %v3967_v59 = vadd.f32 %v3966_v16, %v3883_v9  ;;  %v9476_v13 = vpop.f32.mrb[82].mxu1 }
 0xcb6   : > { %v3978_v42 = vadd.f32 %v9476_v13, %v3883_v9  ;;  %v3969_v21 = vpop.f32.mrb[83].mxu1  ;;  %v4031_v38 = vmax.f32 %v3975_v19, 0.0 }
 0xcb7   : > { %v3970_v18 = vadd.f32 %v3969_v21, %v3883_v9  ;;  %v4029_v35 = vmax.f32 %v3967_v59, 0.0 }
 0xcb8   : > { %v4032_v0 = vmax.f32 %v3978_v42, 0.0 }
 0xcb9   : > { %v4030_v50 = vmax.f32 %v3970_v18, 0.0 }
 0xcba   : > { %v4046_v23 = vpack.c.bf16 %v4032_v0, %v4031_v38 }
 0xcbb   : > { %v4045_v28 = vpack.c.bf16 %v4030_v50, %v4029_v35  ;;  %v9479_v4 = vpop.f32.mrb[84].mxu1 }
 0xcbc   : > { %v3991_v54 = vadd.f32 %v9479_v4, %v3883_v9  ;;  %v3982_v24 = vpop.f32.mrb[85].mxu1 }
 0xcbd   : > { %v3983_v62 = vadd.f32 %v3982_v24, %v3883_v9  ;;  %v9480_v10 = vpop.f32.mrb[86].mxu1  ;;  %9505 = vmatprep.mubr.bf16.mxu1 %v4045_v28 }
 0xcbe   : > { %v3994_v32 = vadd.f32 %v9480_v10, %v3883_v9  ;;  %v3985_v3 = vpop.f32.mrb[87].mxu1  ;;  %9506 = vmatmul.mubr.bf16.vlgmr.msra.gmra.mrb[96].mxu1 %v4046_v23  ;;  %v4035_v39 = vmax.f32 %v3991_v54, 0.0 }
 0xcbf   : > { %v3986_v5 = vadd.f32 %v3985_v3, %v3883_v9  ;;  %v4033_v15 = vmax.f32 %v3983_v62, 0.0 }
 0xcc0   : > { %v4036_v63 = vmax.f32 %v3994_v32, 0.0 }
 0xcc1   : > { %v4034_v22 = vmax.f32 %v3986_v5, 0.0 }
 0xcc2   : > { %v4048_v44 = vpack.c.bf16 %v4036_v63, %v4035_v39 }
 0xcc3   : > { %v4047_v43 = vpack.c.bf16 %v4034_v22, %v4033_v15  ;;  %v15043_v22 = vsub.s32 5, %v15241_v33 }
 0xcc5   : > { %9509 = vmatprep.mubr.bf16.mxu1 %v4047_v43 }
 0xcc6   : > { %9510 = vmatmul.mubr.bf16.gmra.mrb[100].mxu1 %v4048_v44  ;;  %v4072_v44 = vrot.slane %v12813_v6, %v15043_v22 }
 0xcda   : > { %v9483_v17 = vpop.f32.mrb[88].mxu1 }
 0xcdb   : > { %v4007_v40 = vadd.f32 %v9483_v17, %v3883_v9  ;;  %v3998_v25 = vpop.f32.mrb[89].mxu1 }
 0xcdc   : > { %v3999_v56 = vadd.f32 %v3998_v25, %v3883_v9  ;;  %v9484_v19 = vpop.f32.mrb[90].mxu1 }
 0xcdd   : > { %v4010_v16 = vadd.f32 %v9484_v19, %v3883_v9  ;;  %v4001_v59 = vpop.f32.mrb[91].mxu1  ;;  %v4039_v42 = vmax.f32 %v4007_v40, 0.0 }
 0xcde   : > { %v4002_v13 = vadd.f32 %v4001_v59, %v3883_v9  ;;  %v4037_v18 = vmax.f32 %v3999_v56, 0.0 }
 0xcdf   : > { %v4040_v21 = vmax.f32 %v4010_v16, 0.0 }
 0xce0   : > { %v4038_v38 = vmax.f32 %v4002_v13, 0.0 }
 0xce1   : > { %v4050_v0 = vpack.c.bf16 %v4040_v21, %v4039_v42 }
 0xce2   : > { %v4049_v35 = vpack.c.bf16 %v4038_v38, %v4037_v18 }
 0xce4   : > { %9513 = vmatprep.mubr.bf16.mxu1 %v4049_v35 }
 0xce5   : > { %9514 = vmatmul.mubr.bf16.gmra.mrb[104].mxu1 %v4050_v0 }
 0xcf5   : > { %v9487_v50 = vpop.f32.mrb[92].mxu1 }
 0xcf6   : > { %v4023_v23 = vadd.f32 %v9487_v50, %v3883_v9  ;;  %v4014_v28 = vpop.f32.mrb[93].mxu1 }
 0xcf7   : > { %v4015_v4 = vadd.f32 %v4014_v28, %v3883_v9  ;;  %v9488_v54 = vpop.f32.mrb[94].mxu1 }
 0xcf8   : > { %v4026_v24 = vadd.f32 %v9488_v54, %v3883_v9  ;;  %v4017_v62 = vpop.f32.mrb[95].mxu1  ;;  %v4043_v32 = vmax.f32 %v4023_v23, 0.0 }
 0xcf9   : > { %v4018_v10 = vadd.f32 %v4017_v62, %v3883_v9  ;;  %v4041_v5 = vmax.f32 %v4015_v4, 0.0 }
 0xcfa   : > { %v4044_v3 = vmax.f32 %v4026_v24, 0.0 }
 0xcfb   : > { %v4042_v39 = vmax.f32 %v4018_v10, 0.0 }
 0xcfc   : > { %v4052_v63 = vpack.c.bf16 %v4044_v3, %v4043_v32 }
 0xcfd   : > { %v4051_v15 = vpack.c.bf16 %v4042_v39, %v4041_v5 }
 0xcff   : > { %9517 = vmatprep.mubr.bf16.mxu1 %v4051_v15 }
 0xd00   : > { %9518 = vmatmul.mubr.bf16.gmra.mrb[108].mxu1 %v4052_v63 }
 0xd91   : > { %v9507_v43 = vpop.f32.mrb[96].mxu1 }
 0xd92   : > { %v4155_v17 = vpop.f32.mrb[97].mxu1  ;;  %v4164_v9 = vadd.f32 %v9507_v43, %v4072_v44 }
 0xd93   : > { %v4156_v40 = vadd.f32 %v4155_v17, %v4072_v44  ;;  %v9508_v25 = vpop.f32.mrb[98].mxu1 }
 0xd94   : > { %v4158_v56 = vpop.f32.mrb[99].mxu1  ;;  %v4167_v59 = vadd.f32 %v9508_v25, %v4072_v44  ;;  %v13090_v42 = vadd.f32 %v4164_v9, %v12995_v37  ;;  %v10300_v9 = vld [vmem:[#allocation5 + $0xc4] ss:$12 sps:$4 sm:$0xff]  }
 0xd95   : > { %v13083_v19 = vadd.f32 %v4156_v40, %v12985_v20  ;;  %v4159_v16 = vadd.f32 %v4158_v56, %v4072_v44  ;;  %4622 = vmatprep.subr.bf16.mxu0 %v10300_v9  ;;  %v10311_v9 = vld [vmem:[#allocation5 + $0x10c] ss:$12 sps:$4 sm:$0xff]  }
 0xd96   : > { %v13094_v18 = vadd.f32 %v4167_v59, %v12998_v49 }
 0xd97   : > { %v13086_v13 = vadd.f32 %v4159_v16, %v12988_v45  ;;  %4234 = vadd.xlane.f32.xlu1 %v13083_v19  ;;  %v10304_v16 = vld [vmem:[#allocation5 + $0xc8] ss:$12 sps:$4 sm:$0xff]  }
 0xd98   : > { %9521 = vmatprep.subr.bf16.mxu1 %v10304_v16 }
 0xd99   : > { %v9511_v6 = vpop.f32.mrb[100].mxu1  ;;  %4236 = vadd.xlane.f32.xlu0 %v13086_v13  ;;  %9522 = vmatpush3.bf16.msra.mxu1 %v10304_v16  ;;  %v10315_v16 = vld [vmem:[#allocation5 + $0x124] ss:$12 sps:$4 sm:$0xff]  }
 0xd9a   : > { %v4171_v21 = vpop.f32.mrb[101].mxu1  ;;  %v4180_v35 = vadd.f32 %v9511_v6, %v4072_v44 }
 0xd9b   : > { %v4172_v38 = vadd.f32 %v4171_v21, %v4072_v44  ;;  %v9512_v20 = vpop.f32.mrb[102].mxu1  ;;  %4238 = vadd.xlane.f32.xlu1 %v13090_v42 }
 0xd9c   : > { %v4174_v0 = vpop.f32.mrb[103].mxu1  ;;  %v4183_v37 = vadd.f32 %v9512_v20, %v4072_v44  ;;  %v13106_v49 = vadd.f32 %v4180_v35, %v13019_v55 }
 0xd9d   : > { %v13098_v45 = vadd.f32 %v4172_v38, %v13007_v60  ;;  %v4175_v50 = vadd.f32 %v4174_v0, %v4072_v44  ;;  %4240 = vadd.xlane.f32.xlu0 %v13094_v18 }
 0xd9e   : > { %v13110_v28 = vadd.f32 %v4183_v37, %v13022_v12 }
 0xd9f   : > { %v13102_v23 = vadd.f32 %v4175_v50, %v13010_v26  ;;  %4242 = vadd.xlane.f32.xlu1 %v13098_v45 }
 0xda1   : > { %4244 = vadd.xlane.f32.xlu0 %v13102_v23 }
 0xda3   : > { %4246 = vadd.xlane.f32.xlu1 %v13106_v49 }
 0xda5   : > { %4248 = vadd.xlane.f32.xlu0 %v13110_v28 }
 0xdb8   : > { %v9515_v60 = vpop.f32.mrb[104].mxu1 }
 0xdb9   : > { %v4187_v4 = vpop.f32.mrb[105].mxu1  ;;  %v4196_v62 = vadd.f32 %v9515_v60, %v4072_v44 }
 0xdba   : > { %v4188_v54 = vadd.f32 %v4187_v4, %v4072_v44  ;;  %v9516_v24 = vpop.f32.mrb[106].mxu1 }
 0xdbb   : > { %v4190_v26 = vpop.f32.mrb[107].mxu1  ;;  %v4199_v32 = vadd.f32 %v9516_v24, %v4072_v44  ;;  %v13122_v12 = vadd.f32 %v4196_v62, %v13043_v52 }
 0xdbc   : > { %v13115_v10 = vadd.f32 %v4188_v54, %v13032_v14  ;;  %v4191_v55 = vadd.f32 %v4190_v26, %v4072_v44 }
 0xdbd   : > { %v13126_v5 = vadd.f32 %v4199_v32, %v13046_v11 }
 0xdbe   : > { %v13118_v3 = vadd.f32 %v4191_v55, %v13035_v7  ;;  %4250 = vadd.xlane.f32.xlu1 %v13115_v10 }
 0xdc0   : > { %4252 = vadd.xlane.f32.xlu0 %v13118_v3 }
 0xdc2   : > { %4254 = vadd.xlane.f32.xlu1 %v13122_v12 }
 0xdc4   : > { %4256 = vadd.xlane.f32.xlu0 %v13126_v5 }
 0xdd3   : > { %v9519_v14 = vpop.f32.mrb[108].mxu1 }
 0xdd4   : > { %v4203_v39 = vpop.f32.mrb[109].mxu1  ;;  %v4212_v43 = vadd.f32 %v9519_v14, %v4072_v44 }
 0xdd5   : > { %v4204_v63 = vadd.f32 %v4203_v39, %v4072_v44  ;;  %v9520_v15 = vpop.f32.mrb[110].mxu1 }
 0xdd6   : > { %v4206_v7 = vpop.f32.mrb[111].mxu1  ;;  %v4215_v40 = vadd.f32 %v9520_v15, %v4072_v44  ;;  %v13138_v11 = vadd.f32 %v4212_v43, %v13067_v30 }
 0xdd7   : > { %v13131_v17 = vadd.f32 %v4204_v63, %v13056_v41  ;;  %v4207_v52 = vadd.f32 %v4206_v7, %v4072_v44  ;;  %v10298_v41 = vld [vmem:[#allocation5 + $0xc0] ss:$12 sps:$4 sm:$0xff]   ;;  %v10303_v44 = vld [vmem:[#allocation5 + $0xdc] ss:$12 sps:$4 sm:$0xff]  }
 0xdd8   : > { %v13142_v56 = vadd.f32 %v4215_v40, %v13070_v34  ;;  %4623 = vmatpush1.bf16.msra.mxu0 %v10298_v41  ;;  %v10307_v40 = vld [vmem:[#allocation5 + $0xf4] ss:$12 sps:$4 sm:$0xff]   ;;  %v10305_v41 = vld [vmem:[#allocation5 + $0xf0] ss:$12 sps:$4 sm:$0xff]  }
 0xdd9   : > { %v13134_v25 = vadd.f32 %v4207_v52, %v13059_v31  ;;  %4258 = vadd.xlane.f32.xlu1 %v13131_v17  ;;  %v10301_v31 = vld [vmem:[#allocation5 + $0xd8] ss:$12 sps:$4 sm:$0xff]   ;;  %4624 = vmatprep.subr.bf16.mxu0 %v10303_v44 }
 0xdda   : > { %v10312_v44 = vld [vmem:[#allocation5 + $0xf8] ss:$12 sps:$4 sm:$0xff]  }
 0xddb   : > { %4260 = vadd.xlane.f32.xlu0 %v13134_v25 }
 0xddc   : > { %4625 = vmatpush1.bf16.msra.mxu0 %v10301_v31  ;;  %v10316_v31 = vld [vmem:[#allocation5 + $0x110] ss:$12 sps:$4 sm:$0xff]  }
 0xddd   : > { %4262 = vadd.xlane.f32.xlu1 %v13138_v11  ;;  %4626 = vmatprep.subr.bf16.mxu0 %v10307_v40 }
 0xddf   : > { %4264 = vadd.xlane.f32.xlu0 %v13142_v56 }
 0xde0   : > { %4627 = vmatpush1.bf16.msra.mxu0 %v10305_v41 }
 0xde1   : > { %4628 = vmatprep.subr.bf16.mxu0 %v10311_v9 }
 0xe24   : > { %v4235_v30 = vpop.xlane.xlu1 %4234 }
 0xe25   : > { %v4266_v59 = vmul.f32 0.0078125, %v4235_v30  ;;  %v10313_v30 = vld [vmem:[#allocation5 + $0x120] ss:$12 sps:$4 sm:$0xff]  }
 0xe26   : > { %v4237_v6 = vpop.xlane.xlu0 %4236 }
 0xe27   : > { %v13147_v34 = vsub.f32 %v13083_v19, %v4266_v59  ;;  %v4267_v21 = vmul.f32 0.0078125, %v4237_v6  ;;  %v10319_v59 = vld [vmem:[#allocation5 + $0x13c] ss:$12 sps:$4 sm:$0xff]  }
 0xe28   : > { %v4239_v38 = vpop.xlane.xlu1 %4238  ;;  %v10320_v6 = vld [vmem:[#allocation5 + $0x128] ss:$12 sps:$4 sm:$0xff]  }
 0xe29   : > { %v13150_v20 = vsub.f32 %v13086_v13, %v4267_v21  ;;  %v4268_v0 = vmul.f32 0.0078125, %v4239_v38  ;;  %v4298_v35 = vmul.f32 %v13147_v34, %v13147_v34  ;;  %v10317_v21 = vld [vmem:[#allocation5 + $0x138] ss:$12 sps:$4 sm:$0xff]   ;;  %v10323_v38 = vld [vmem:[#allocation5 + $0x154] ss:$12 sps:$4 sm:$0xff]  }
 0xe2a   : > { %v4241_v50 = vpop.xlane.xlu0 %4240 }
 0xe2b   : > { %v13155_v37 = vsub.f32 %v13090_v42, %v4268_v0  ;;  %v4269_v60 = vmul.f32 0.0078125, %v4241_v50  ;;  %4314 = vadd.xlane.f32.xlu1 %v4298_v35  ;;  %v4299_v4 = vmul.f32 %v13150_v20, %v13150_v20  ;;  %v10324_v0 = vld [vmem:[#allocation5 + $0x140] ss:$12 sps:$4 sm:$0xff]   ;;  %v10321_v50 = vld [vmem:[#allocation5 + $0x150] ss:$12 sps:$4 sm:$0xff]  }
 0xe2c   : > { %v4243_v19 = vpop.xlane.xlu1 %4242 }
 0xe2d   : > { %v13160_v54 = vsub.f32 %v13094_v18, %v4269_v60  ;;  %v4270_v24 = vmul.f32 0.0078125, %v4243_v19  ;;  %4316 = vadd.xlane.f32.xlu0 %v4299_v4  ;;  %v4300_v13 = vmul.f32 %v13155_v37, %v13155_v37 }
 0xe2e   : > { %v4245_v26 = vpop.xlane.xlu0 %4244 }
 0xe2f   : > { %v13165_v62 = vsub.f32 %v13098_v45, %v4270_v24  ;;  %v4271_v42 = vmul.f32 0.0078125, %v4245_v26  ;;  %4318 = vadd.xlane.f32.xlu1 %v4300_v13  ;;  %v4301_v55 = vmul.f32 %v13160_v54, %v13160_v54  ;;  %v10327_v13 = vld [vmem:[#allocation5 + $0x16c] ss:$12 sps:$4 sm:$0xff]  }
 0xe30   : > { %v4247_v32 = vpop.xlane.xlu1 %4246  ;;  %v10328_v26 = vld [vmem:[#allocation5 + $0x158] ss:$12 sps:$4 sm:$0xff]  }
 0xe31   : > { %v13170_v14 = vsub.f32 %v13102_v23, %v4271_v42  ;;  %v4272_v18 = vmul.f32 0.0078125, %v4247_v32  ;;  %4320 = vadd.xlane.f32.xlu0 %v4301_v55  ;;  %v4302_v39 = vmul.f32 %v13165_v62, %v13165_v62  ;;  %v10325_v55 = vld [vmem:[#allocation5 + $0x168] ss:$12 sps:$4 sm:$0xff]  }
 0xe32   : > { %v4249_v63 = vpop.xlane.xlu0 %4248 }
 0xe33   : > { %v13175_v15 = vsub.f32 %v13106_v49, %v4272_v18  ;;  %v4273_v45 = vmul.f32 0.0078125, %v4249_v63  ;;  %4322 = vadd.xlane.f32.xlu1 %v4302_v39  ;;  %v4303_v7 = vmul.f32 %v13170_v14, %v13170_v14  ;;  %v10308_v49 = vld [vmem:[#allocation5 + $0xe0] ss:$12 sps:$4 sm:$0xff]  }
 0xe34   : > { %9523 = vmatprep.subr.bf16.mxu1 %v10308_v49 }
 0xe35   : > { %v13180_v43 = vsub.f32 %v13110_v28, %v4273_v45  ;;  %4324 = vadd.xlane.f32.xlu0 %v4303_v7  ;;  %v4304_v23 = vmul.f32 %v13175_v15, %v13175_v15  ;;  %9524 = vmatpush3.bf16.msra.mxu1 %v10308_v49  ;;  %v10309_v28 = vld [vmem:[#allocation5 + $0x108] ss:$12 sps:$4 sm:$0xff]  }
 0xe36   : > { %9525 = vmatprep.subr.bf16.mxu1 %v10312_v44  ;;  %4629 = vmatpush1.bf16.msra.mxu0 %v10309_v28 }
 0xe37   : > { %4326 = vadd.xlane.f32.xlu1 %v4304_v23  ;;  %v4305_v52 = vmul.f32 %v13180_v43, %v13180_v43  ;;  %4630 = vmatprep.subr.bf16.mxu0 %v10315_v16  ;;  %v10329_v23 = vld [vmem:[#allocation5 + $0x170] ss:$12 sps:$4 sm:$0xff]  }
 0xe39   : > { %4328 = vadd.xlane.f32.xlu0 %v4305_v52  ;;  %9526 = vmatpush3.bf16.msra.mxu1 %v10312_v44 }
 0xe3a   : > { %9527 = vmatprep.subr.bf16.mxu1 %v10316_v31  ;;  %4631 = vmatpush1.bf16.msra.mxu0 %v10313_v30 }
 0xe3b   : > { %4632 = vmatprep.subr.bf16.mxu0 %v10319_v59 }
 0xe3d   : > { %9528 = vmatpush3.bf16.msra.mxu1 %v10316_v31 }
 0xe3e   : > { %9529 = vmatprep.subr.bf16.mxu1 %v10320_v6  ;;  %4633 = vmatpush1.bf16.msra.mxu0 %v10317_v21 }
 0xe3f   : > { %4634 = vmatprep.subr.bf16.mxu0 %v10323_v38 }
 0xe41   : > { %9530 = vmatpush3.bf16.msra.mxu1 %v10320_v6 }
 0xe42   : > { %9531 = vmatprep.subr.bf16.mxu1 %v10324_v0  ;;  %4635 = vmatpush1.bf16.msra.mxu0 %v10321_v50 }
 0xe43   : > { %4636 = vmatprep.subr.bf16.mxu0 %v10327_v13 }
 0xe45   : > { %9532 = vmatpush3.bf16.msra.mxu1 %v10324_v0 }
 0xe46   : > { %9533 = vmatprep.subr.bf16.mxu1 %v10328_v26  ;;  %4637 = vmatpush1.bf16.msra.mxu0 %v10325_v55 }
 0xe49   : > { %9534 = vmatpush3.bf16.msra.mxu1 %v10328_v26 }
 0xe4a   : > { %9535 = vmatprep.subr.bf16.mxu1 %v10329_v23 }
 0xe4b   : > { %v4251_v35 = vpop.xlane.xlu1 %4250 }
 0xe4c   : > { %v4274_v60 = vmul.f32 0.0078125, %v4251_v35 }
 0xe4d   : > { %v4253_v4 = vpop.xlane.xlu0 %4252  ;;  %9536 = vmatpush3.bf16.msra.mxu1 %v10329_v23 }
 0xe4e   : > { %v13187_v19 = vsub.f32 %v13115_v10, %v4274_v60  ;;  %v4275_v24 = vmul.f32 0.0078125, %v4253_v4 }
 0xe4f   : > { %v4255_v42 = vpop.xlane.xlu1 %4254 }
 0xe50   : > { %v13190_v32 = vsub.f32 %v13118_v3, %v4275_v24  ;;  %v4276_v18 = vmul.f32 0.0078125, %v4255_v42  ;;  %v4306_v39 = vmul.f32 %v13187_v19, %v13187_v19 }
 0xe51   : > { %v4257_v63 = vpop.xlane.xlu0 %4256 }
 0xe52   : > { %v13195_v10 = vsub.f32 %v13122_v12, %v4276_v18  ;;  %v4277_v45 = vmul.f32 0.0078125, %v4257_v63  ;;  %4330 = vadd.xlane.f32.xlu1 %v4306_v39  ;;  %v4307_v7 = vmul.f32 %v13190_v32, %v13190_v32 }
 0xe54   : > { %v13200_v3 = vsub.f32 %v13126_v5, %v4277_v45  ;;  %4332 = vadd.xlane.f32.xlu0 %v4307_v7  ;;  %v4308_v52 = vmul.f32 %v13195_v10, %v13195_v10 }
 0xe56   : > { %4334 = vadd.xlane.f32.xlu1 %v4308_v52  ;;  %v4309_v12 = vmul.f32 %v13200_v3, %v13200_v3 }
 0xe58   : > { %4336 = vadd.xlane.f32.xlu0 %v4309_v12 }
 0xe66   : > { %v4259_v40 = vpop.xlane.xlu1 %4258 }
 0xe67   : > { %v4278_v49 = vmul.f32 0.0078125, %v4259_v40  ;;  %v10995_v40 = vld [vmem:[#allocation11 + $0x8] sm:$0xff] }
 0xe68   : > { %v4261_v41 = vpop.xlane.xlu0 %4260 }
 0xe69   : > { %v13207_v9 = vsub.f32 %v13131_v17, %v4278_v49  ;;  %v4279_v44 = vmul.f32 0.0078125, %v4261_v41  ;;  %v15258_v49 = vld [vmem:[#allocation46_spill] sm:$0xff] }
 0xe6a   : > { %v4263_v5 = vpop.xlane.xlu1 %4262  ;;  %v13227_v41 = vrot.slane %v10995_v40, %v15258_v49 }
 0xe6b   : > { %v13210_v28 = vsub.f32 %v13134_v25, %v4279_v44  ;;  %v4280_v16 = vmul.f32 0.0078125, %v4263_v5  ;;  %v4310_v31 = vmul.f32 %v13207_v9, %v13207_v9 }
 0xe6c   : > { %v4265_v30 = vpop.xlane.xlu0 %4264 }
 0xe6d   : > { %v13215_v59 = vsub.f32 %v13138_v11, %v4280_v16  ;;  %v4281_v6 = vmul.f32 0.0078125, %v4265_v30  ;;  %4338 = vadd.xlane.f32.xlu1 %v4310_v31  ;;  %v4311_v21 = vmul.f32 %v13210_v28, %v13210_v28 }
 0xe6f   : > { %v13220_v17 = vsub.f32 %v13142_v56, %v4281_v6  ;;  %4340 = vadd.xlane.f32.xlu0 %v4311_v21  ;;  %v4312_v25 = vmul.f32 %v13215_v59, %v13215_v59 }
 0xe71   : > { %4342 = vadd.xlane.f32.xlu1 %v4312_v25  ;;  %v4313_v38 = vmul.f32 %v13220_v17, %v13220_v17 }
 0xe73   : > { %4344 = vadd.xlane.f32.xlu0 %v4313_v38 }
 0xeb8   : > { %v4315_v0 = vpop.xlane.xlu1 %4314 }
 0xeb9   : > { %v4346_v11 = vmul.f32 0.0078125, %v4315_v0  ;;  %v15259_v0 = vld [vmem:[#allocation47_spill] sm:$0xff] }
 0xeba   : > { %v4317_v35 = vpop.xlane.xlu0 %4316 }
 0xebb   : > { %v4362_v50 = vadd.f32 1e-05, %v4346_v11  ;;  %v4347_v60 = vmul.f32 0.0078125, %v4317_v35  ;;  %v13233_v11 = vrot.slane %v10995_v40, %v15259_v0 }
 0xebc   : > { %v4319_v4 = vpop.xlane.xlu1 %4318 }
 0xebd   : > { %10642 = vrsqrt.f32 %v4362_v50  ;;  %v4363_v24 = vadd.f32 1e-05, %v4347_v60  ;;  %v4348_v13 = vmul.f32 0.0078125, %v4319_v4 }
 0xebe   : > { %v4321_v56 = vpop.xlane.xlu0 %4320 }
 0xebf   : > { %10644 = vrsqrt.f32 %v4363_v24  ;;  %v4364_v26 = vadd.f32 1e-05, %v4348_v13  ;;  %v4349_v42 = vmul.f32 0.0078125, %v4321_v56 }
 0xec0   : > { %v4323_v55 = vpop.xlane.xlu1 %4322 }
 0xec1   : > { %10646 = vrsqrt.f32 %v4364_v26  ;;  %v4365_v18 = vadd.f32 1e-05, %v4349_v42  ;;  %v4350_v39 = vmul.f32 0.0078125, %v4323_v55 }
 0xec2   : > { %v4325_v63 = vpop.xlane.xlu0 %4324 }
 0xec3   : > { %10648 = vrsqrt.f32 %v4365_v18  ;;  %v4366_v45 = vadd.f32 1e-05, %v4350_v39  ;;  %v4351_v7 = vmul.f32 0.0078125, %v4325_v63 }
 0xec4   : > { %v4327_v23 = vpop.xlane.xlu1 %4326 }
 0xec5   : > { %10650 = vrsqrt.f32 %v4366_v45  ;;  %v4367_v52 = vadd.f32 1e-05, %v4351_v7  ;;  %v4352_v12 = vmul.f32 0.0078125, %v4327_v23 }
 0xec6   : > { %v4329_v44 = vpop.xlane.xlu0 %4328 }
 0xec7   : > { %v10643_v5 = vpop.eup %10642  ;;  %10652 = vrsqrt.f32 %v4367_v52  ;;  %v4368_v16 = vadd.f32 1e-05, %v4352_v12  ;;  %v4353_v31 = vmul.f32 0.0078125, %v4329_v44 }
 0xec8   : > { %v4394_v30 = vmul.f32 %v10643_v5, %v13147_v34 }
 0xec9   : > { %v10645_v6 = vpop.eup %10644  ;;  %10654 = vrsqrt.f32 %v4368_v16  ;;  %v4369_v21 = vadd.f32 1e-05, %v4353_v31 }
 0xeca   : > { %v4414_v25 = vmul.f32 %v13227_v41, %v4394_v30  ;;  %v4395_v38 = vmul.f32 %v10645_v6, %v13150_v20 }
 0xecb   : > { %v10647_v35 = vpop.eup %10646  ;;  %10656 = vrsqrt.f32 %v4369_v21 }
 0xecc   : > { %v4415_v50 = vmul.f32 %v13227_v41, %v4395_v38  ;;  %v4396_v60 = vmul.f32 %v10647_v35, %v13155_v37  ;;  %v13240_v13 = vadd.f32 %v13233_v11, %v4414_v25 }
 0xecd   : > { %v10649_v4 = vpop.eup %10648 }
 0xece   : > { %v4416_v24 = vmul.f32 %v13227_v41, %v4396_v60  ;;  %v4397_v34 = vmul.f32 %v10649_v4, %v13160_v54  ;;  %15260 = vst [vmem:[#allocation86_spill] sm:$0xff] %v13240_v13  ;;  %v13243_v56 = vadd.f32 %v13233_v11, %v4415_v50 }
 0xecf   : > { %v10651_v20 = vpop.eup %10650 }
 0xed0   : > { %15261 = vst [vmem:[#allocation87_spill] sm:$0xff] %v13243_v56  ;;  %v4417_v26 = vmul.f32 %v13227_v41, %v4397_v34  ;;  %v4453_v42 = vpack.c.bf16 %v13243_v56, %v13240_v13  ;;  %v4398_v55 = vmul.f32 %v10651_v20, %v13165_v62  ;;  %v13250_v18 = vadd.f32 %v13233_v11, %v4416_v24  ;;  %v15289_v56 = vld [vmem:[#allocation63_spill] sm:$0xff] }
 0xed1   : > { %v10653_v37 = vpop.eup %10652 }
 0xed2   : > { %15262 = vst [vmem:[#allocation57_spill] sm:$0xff] %v13250_v18  ;;  %4655 = vmatmul.mubr.bf16.vlgmr.msra.gmra.mrb[112].mxu0 %v4453_v42  ;;  %9537 = vmatprep.mubr.bf16.mxu1 %v4453_v42  ;;  %v13253_v54 = vadd.f32 %v13233_v11, %v4417_v26  ;;  %v4399_v39 = vmul.f32 %v10653_v37, %v13170_v14 }
 0xed3   : > { %v4418_v63 = vmul.f32 %v13227_v41, %v4398_v55  ;;  %v10655_v45 = vpop.eup %10654  ;;  %4664 = vmatprep.mubr.bf16.mxu0 %v15240_v36 }
 0xed4   : > { %15263 = vst [vmem:[#allocation48_spill] sm:$0xff] %v13253_v54  ;;  %v4454_v7 = vpack.c.bf16 %v13253_v54, %v13250_v18  ;;  %v4419_v62 = vmul.f32 %v13227_v41, %v4399_v39  ;;  %v4400_v23 = vmul.f32 %v10655_v45, %v13175_v15 }
 0xed5   : > { %v10657_v52 = vpop.eup %10656  ;;  %v13263_v12 = vadd.f32 %v13233_v11, %v4418_v63 }
 0xed6   : > { %9538 = vmatmul.mubr.bf16.vlgmr.msra.gmra.mrb[112].mxu1 %v4454_v7  ;;  %v13266_v40 = vadd.f32 %v13233_v11, %v4419_v62  ;;  %v4401_v14 = vmul.f32 %v10657_v52, %v13180_v43  ;;  %v4420_v44 = vmul.f32 %v13227_v41, %v4400_v23 }
 0xed7   : > { %15264 = vst [vmem:[#allocation53_spill] sm:$0xff] %v13263_v12 }
 0xed8   : > { %15265 = vst [vmem:[#allocation52_spill] sm:$0xff] %v13266_v40  ;;  %v4455_v5 = vpack.c.bf16 %v13266_v40, %v13263_v12  ;;  %v4421_v16 = vmul.f32 %v13227_v41, %v4401_v14  ;;  %v13274_v15 = vadd.f32 %v13233_v11, %v4420_v44 }
 0xeda   : > { %4665 = vmatmul.mubr.bf16.gmra.mrb[116].mxu0 %v4454_v7  ;;  %9541 = vmatprep.mubr.bf16.mxu1 %v4455_v5  ;;  %15266 = vst [vmem:[#allocation49_spill] sm:$0xff] %v13274_v15  ;;  %v13277_v31 = vadd.f32 %v13233_v11, %v4421_v16 }
 0xedb   : > { %4674 = vmatprep.mubr.bf16.mxu0 %v15240_v36 }
 0xedc   : > { %15267 = vst [vmem:[#allocation51_spill] sm:$0xff] %v13277_v31  ;;  %v4456_v43 = vpack.c.bf16 %v13277_v31, %v13274_v15 }
 0xede   : > { %9542 = vmatmul.mubr.bf16.gmra.mrb[116].mxu1 %v4456_v43 }
 0xedf   : > { %v4331_v30 = vpop.xlane.xlu1 %4330 }
 0xee0   : > { %v4354_v6 = vmul.f32 0.0078125, %v4331_v30 }
 0xee1   : > { %v4333_v21 = vpop.xlane.xlu0 %4332 }
 0xee2   : > { %v4370_v25 = vadd.f32 1e-05, %v4354_v6  ;;  %v4355_v38 = vmul.f32 0.0078125, %v4333_v21  ;;  %4675 = vmatmul.mubr.bf16.gmra.mrb[120].mxu0 %v4455_v5 }
 0xee3   : > { %v4335_v35 = vpop.xlane.xlu1 %4334  ;;  %4684 = vmatprep.mubr.bf16.mxu0 %v15240_v36 }
 0xee4   : > { %10658 = vrsqrt.f32 %v4370_v25  ;;  %v4371_v50 = vadd.f32 1e-05, %v4355_v38  ;;  %v4356_v60 = vmul.f32 0.0078125, %v4335_v35 }
 0xee5   : > { %v4337_v4 = vpop.xlane.xlu0 %4336 }
 0xee6   : > { %10660 = vrsqrt.f32 %v4371_v50  ;;  %v4372_v24 = vadd.f32 1e-05, %v4356_v60  ;;  %v4357_v34 = vmul.f32 0.0078125, %v4337_v4 }
 0xee8   : > { %10662 = vrsqrt.f32 %v4372_v24  ;;  %v4373_v20 = vadd.f32 1e-05, %v4357_v34 }
 0xeea   : > { %10664 = vrsqrt.f32 %v4373_v20  ;;  %4685 = vmatmul.mubr.bf16.gmra.mrb[124].mxu0 %v4456_v43 }
 0xeeb   : > { %4694 = vmatprep.mubr.bf16.mxu0 %v15240_v36 }
 0xeee   : > { %v10659_v26 = vpop.eup %10658 }
 0xeef   : > { %v4402_v42 = vmul.f32 %v10659_v26, %v13187_v19 }
 0xef0   : > { %v10661_v55 = vpop.eup %10660 }
 0xef1   : > { %v4403_v37 = vmul.f32 %v10661_v55, %v13190_v32  ;;  %v4422_v39 = vmul.f32 %v13227_v41, %v4402_v42 }
 0xef2   : > { %v10663_v63 = vpop.eup %10662 }
 0xef3   : > { %v4423_v45 = vmul.f32 %v13227_v41, %v4403_v37  ;;  %v4404_v7 = vmul.f32 %v10663_v63, %v13195_v10  ;;  %v13290_v23 = vadd.f32 %v13233_v11, %v4422_v39 }
 0xef4   : > { %v10665_v62 = vpop.eup %10664 }
 0xef5   : > { %15268 = vst [vmem:[#allocation50_spill] sm:$0xff] %v13290_v23  ;;  %v13293_v52 = vadd.f32 %v13233_v11, %v4423_v45  ;;  %v4405_v14 = vmul.f32 %v10665_v62, %v13200_v3  ;;  %v4424_v19 = vmul.f32 %v13227_v41, %v4404_v7 }
 0xef7   : > { %15269 = vst [vmem:[#allocation55_spill] sm:$0xff] %v13293_v52  ;;  %v4457_v32 = vpack.c.bf16 %v13293_v52, %v13290_v23  ;;  %v4425_v44 = vmul.f32 %v13227_v41, %v4405_v14  ;;  %v13301_v10 = vadd.f32 %v13233_v11, %v4424_v19 }
 0xef9   : > { %4695 = vmatmul.mubr.bf16.gmra.mrb[128].mxu0 %v4457_v32  ;;  %9545 = vmatprep.mubr.bf16.mxu1 %v4457_v32  ;;  %15270 = vst [vmem:[#allocation54_spill] sm:$0xff] %v13301_v10  ;;  %v13304_v5 = vadd.f32 %v13233_v11, %v4425_v44  ;;  %v4451_v44 = vld [vmem:[#allocation11 + $0x10] sm:$0xff] }
 0xefa   : > { %v4339_v16 = vpop.xlane.xlu1 %4338  ;;  %4704 = vmatprep.mubr.bf16.mxu0 %v15240_v36 }
 0xefb   : > { %15271 = vst [vmem:[#allocation73_spill] sm:$0xff] %v13304_v5  ;;  %v4358_v43 = vmul.f32 0.0078125, %v4339_v16  ;;  %v4458_v3 = vpack.c.bf16 %v13304_v5, %v13301_v10  ;;  %v13336_v16 = vrot.slane %v4451_v44, %v15258_v49  ;;  %v15285_v5 = vld [vmem:[#allocation66_spill] sm:$0xff] }
 0xefc   : > { %v4341_v30 = vpop.xlane.xlu0 %4340 }
 0xefd   : > { %v4374_v6 = vadd.f32 1e-05, %v4358_v43  ;;  %v4359_v21 = vmul.f32 0.0078125, %v4341_v30  ;;  %9546 = vmatmul.mubr.bf16.gmra.mrb[120].mxu1 %v4458_v3  ;;  %v13339_v43 = vrot.slane %v4451_v44, %v15259_v0 }
 0xefe   : > { %v4343_v25 = vpop.xlane.xlu1 %4342 }
 0xeff   : > { %10666 = vrsqrt.f32 %v4374_v6  ;;  %v4375_v38 = vadd.f32 1e-05, %v4359_v21  ;;  %v4360_v35 = vmul.f32 0.0078125, %v4343_v25  ;;  %v15276_v21 = vld [vmem:[#allocation29_spill] sm:$0xff] }
 0xf00   : > { %v4345_v50 = vpop.xlane.xlu0 %4344  ;;  %v13344_v25 = vrot.slane %v4451_v44, %v15276_v21 }
 0xf01   : > { %10668 = vrsqrt.f32 %v4375_v38  ;;  %v4376_v60 = vadd.f32 1e-05, %v4360_v35  ;;  %v4361_v4 = vmul.f32 0.0078125, %v4345_v50  ;;  %4705 = vmatmul.mubr.bf16.gmra.mrb[132].mxu0 %v4458_v3 }
 0xf02   : > { %4714 = vmatprep.mubr.bf16.mxu0 %v15240_v36 }
 0xf03   : > { %10670 = vrsqrt.f32 %v4376_v60  ;;  %v4377_v24 = vadd.f32 1e-05, %v4361_v4 }
 0xf05   : > { %10672 = vrsqrt.f32 %v4377_v24 }
 0xf09   : > { %v10667_v34 = vpop.eup %10666 }
 0xf0a   : > { %v4406_v20 = vmul.f32 %v10667_v34, %v13207_v9 }
 0xf0b   : > { %v10669_v26 = vpop.eup %10668 }
 0xf0c   : > { %v4407_v42 = vmul.f32 %v10669_v26, %v13210_v28  ;;  %v4426_v55 = vmul.f32 %v13227_v41, %v4406_v20 }
 0xf0d   : > { %v10671_v37 = vpop.eup %10670 }
 0xf0e   : > { %v4427_v39 = vmul.f32 %v13227_v41, %v4407_v42  ;;  %v4408_v63 = vmul.f32 %v10671_v37, %v13215_v59  ;;  %v13316_v7 = vadd.f32 %v13233_v11, %v4426_v55 }
 0xf0f   : > { %v10673_v45 = vpop.eup %10672 }
 0xf10   : > { %15272 = vst [vmem:[#allocation71_spill] sm:$0xff] %v13316_v7  ;;  %v13319_v62 = vadd.f32 %v13233_v11, %v4427_v39  ;;  %v4409_v14 = vmul.f32 %v10673_v45, %v13220_v17  ;;  %v4428_v9 = vmul.f32 %v13227_v41, %v4408_v63 }
 0xf12   : > { %15273 = vst [vmem:[#allocation72_spill] sm:$0xff] %v13319_v62  ;;  %v4459_v28 = vpack.c.bf16 %v13319_v62, %v13316_v7  ;;  %v4429_v19 = vmul.f32 %v13227_v41, %v4409_v14  ;;  %v13327_v59 = vadd.f32 %v13233_v11, %v4428_v9 }
 0xf14   : > { %4715 = vmatmul.mubr.bf16.gmra.mrb[136].mxu0 %v4459_v28  ;;  %9549 = vmatprep.mubr.bf16.mxu1 %v4459_v28  ;;  %15274 = vst [vmem:[#allocation70_spill] sm:$0xff] %v13327_v59  ;;  %v13330_v32 = vadd.f32 %v13233_v11, %v4429_v19 }
 0xf15   : > { %4724 = vmatprep.mubr.bf16.mxu0 %v15240_v36 }
 0xf16   : > { %15275 = vst [vmem:[#allocation77_spill] sm:$0xff] %v13330_v32  ;;  %v4460_v17 = vpack.c.bf16 %v13330_v32, %v13327_v59 }
 0xf18   : > { %9550 = vmatmul.mubr.bf16.gmra.mrb[124].mxu1 %v4460_v17 }
 0xf1c   : > { %4725 = vmatmul.mubr.bf16.gmra.mrb[140].mxu0 %v4460_v17 }
 0xfa5   : > { %v4656_v41 = vpop.f32.mrb[112].mxu0 }
 0xfa6   : > { %v4836_v3 = vadd.f32 %v13336_v16, %v4656_v41  ;;  %v4658_v30 = vpop.f32.mrb[113].mxu0 }
 0xfa7   : > { %v4660_v11 = vpop.f32.mrb[114].mxu0  ;;  %v4872_v38 = vadd.f32 %v13339_v43, %v4658_v30 }
 0xfa8   : > { %v4837_v6 = vadd.f32 %v13336_v16, %v4660_v11  ;;  %v4662_v36 = vpop.f32.mrb[115].mxu0  ;;  %v4852_v60 = vmul.f32 0.17677669, %v4836_v3 }
 0xfa9   : > { %v4873_v35 = vadd.f32 %v13339_v43, %v4662_v36  ;;  %v9539_v50 = vpop.f32.mrb[112].mxu1 }
 0xfaa   : > { %v4853_v4 = vmul.f32 0.17677669, %v4837_v6  ;;  %v4769_v24 = vpop.f32.mrb[113].mxu1  ;;  %v4894_v42 = vadd.f32 %v9539_v50, %v13344_v25 }
 0xfab   : > { %v13348_v34 = vpack.c.bf16 %v4873_v35, %v4872_v38  ;;  %v9540_v20 = vpop.f32.mrb[114].mxu1  ;;  %v4892_v39 = vadd.f32 %v13344_v25, %v4769_v24 }
 0xfac   : > { %v13350_v26 = vpack.c.bf16 %v4853_v4, %v4852_v60  ;;  %v4895_v55 = vadd.f32 %v9540_v20, %v13344_v25  ;;  %v4772_v37 = vpop.f32.mrb[115].mxu1 }
 0xfad   : > { %v4893_v63 = vadd.f32 %v13344_v25, %v4772_v37  ;;  %5399 = vrot.lane.b32.xlu1 %v13348_v34, %s11207_s7  ;;  %v4666_v45 = vpop.f32.mrb[116].mxu0  ;;  %10081 = vmatprep.subr.msk.bf16.mxu0 %vm1174_vm0, %v13348_v34  ;;  %v4974_v14 = vsel %vm1174_vm0, %v13348_v34, 0 }
 0xfae   : > { %v13362_v9 = vpack.c.bf16 %v4895_v55, %v4894_v42  ;;  %v4838_v28 = vadd.f32 %v13336_v16, %v4666_v45  ;;  %v4668_v19 = vpop.f32.mrb[117].mxu0  ;;  %9554 = vmatpush3.bf16.xpose.msra.mxu0 %v4974_v14  ;;  %9569 = vmatprep.mubr.msk.bf16.mxu0 %vm1174_vm0, %v13350_v26 }
 0xfaf   : > { %v13367_v17 = vpack.c.bf16 %v4893_v63, %v4892_v39  ;;  %v4670_v44 = vpop.f32.mrb[118].mxu0  ;;  %v4874_v30 = vadd.f32 %v13339_v43, %v4668_v19 }
 0xfb0   : > { %v4839_v41 = vadd.f32 %v13336_v16, %v4670_v44  ;;  %v4672_v3 = vpop.f32.mrb[119].mxu0  ;;  %v4854_v36 = vmul.f32 0.17677669, %v4838_v28 }
 0xfb1   : > { %15277 = vst [vmem:[#allocation75_spill] sm:$0xff] %v13367_v17  ;;  %v4875_v11 = vadd.f32 %v13339_v43, %v4672_v3  ;;  %v9543_v6 = vpop.f32.mrb[116].mxu1  ;;  %9585 = vmatprep.subr.bf16.mxu1 %v13367_v17 }
 0xfb2   : > { %v4855_v21 = vmul.f32 0.17677669, %v4839_v41  ;;  %v4785_v38 = vpop.f32.mrb[117].mxu1  ;;  %9586 = vmatpush3.bf16.msra.mxu1 %v13367_v17  ;;  %v4898_v4 = vadd.f32 %v9543_v6, %v13344_v25 }
 0xfb3   : > { %v13374_v35 = vpack.c.bf16 %v4875_v11, %v4874_v30  ;;  %v9544_v50 = vpop.f32.mrb[118].mxu1  ;;  %9587 = vmatprep.subr.bf16.mxu1 %v13362_v9  ;;  %v4896_v42 = vadd.f32 %v13344_v25, %v4785_v38 }
 0xfb4   : > { %v13377_v60 = vpack.c.bf16 %v4855_v21, %v4854_v36  ;;  %v4899_v24 = vadd.f32 %v9544_v50, %v13344_v25  ;;  %v4788_v20 = vpop.f32.mrb[119].mxu1 }
 0xfb5   : > { %v4897_v55 = vadd.f32 %v13344_v25, %v4788_v20  ;;  %v4676_v37 = vpop.f32.mrb[120].mxu0  ;;  %10082 = vmatprep.subr.msk.bf16.mxu0 %vm1174_vm0, %v13374_v35  ;;  %v4977_v39 = vsel %vm1174_vm0, %v13374_v35, 0 }
 0xfb6   : > { %v13387_v63 = vpack.c.bf16 %v4899_v24, %v4898_v4  ;;  %v4840_v45 = vadd.f32 %v13336_v16, %v4676_v37  ;;  %v4678_v14 = vpop.f32.mrb[121].mxu0  ;;  %9556 = vmatpush3.bf16.xpose.msra.mxu0 %v4977_v39  ;;  %9588 = vmatpush3.bf16.msra.mxu1 %v13362_v9 }
 0xfb7   : > { %v13391_v28 = vpack.c.bf16 %v4897_v55, %v4896_v42  ;;  %v4680_v19 = vpop.f32.mrb[122].mxu0  ;;  %v4876_v3 = vadd.f32 %v13339_v43, %v4678_v14 }
 0xfb8   : > { %15278 = vst [vmem:[#allocation76_spill] sm:$0xff] %v13387_v63  ;;  %v4841_v44 = vadd.f32 %v13336_v16, %v4680_v19  ;;  %v4682_v41 = vpop.f32.mrb[123].mxu0  ;;  %v4856_v11 = vmul.f32 0.17677669, %v4840_v45 }
 0xfb9   : > { %15279 = vst [vmem:[#allocation74_spill] sm:$0xff] %v13391_v28  ;;  %v4877_v30 = vadd.f32 %v13339_v43, %v4682_v41  ;;  %9589 = vmatprep.subr.bf16.mxu1 %v13391_v28 }
 0xfba   : > { %v4857_v6 = vmul.f32 0.17677669, %v4841_v44  ;;  %9590 = vmatpush3.bf16.msra.mxu1 %v13391_v28 }
 0xfbb   : > { %v13398_v36 = vpack.c.bf16 %v4877_v30, %v4876_v3  ;;  %9591 = vmatprep.subr.bf16.mxu1 %v13387_v63 }
 0xfbc   : > { %v13401_v21 = vpack.c.bf16 %v4857_v6, %v4856_v11 }
 0xfbd   : > { %v4686_v38 = vpop.f32.mrb[124].mxu0  ;;  %10083 = vmatprep.subr.msk.bf16.mxu0 %vm1174_vm0, %v13398_v36  ;;  %v4980_v50 = vsel %vm1174_vm0, %v13398_v36, 0 }
 0xfbe   : > { %v4842_v4 = vadd.f32 %v13336_v16, %v4686_v38  ;;  %v4688_v24 = vpop.f32.mrb[125].mxu0  ;;  %9558 = vmatpush3.bf16.xpose.msra.mxu0 %v4980_v50  ;;  %9592 = vmatpush3.bf16.msra.mxu1 %v13387_v63 }
 0xfbf   : > { %v4690_v20 = vpop.f32.mrb[126].mxu0  ;;  %v4878_v37 = vadd.f32 %v13339_v43, %v4688_v24 }
 0xfc0   : > { %v4843_v42 = vadd.f32 %v13336_v16, %v4690_v20  ;;  %v4692_v55 = vpop.f32.mrb[127].mxu0  ;;  %v4858_v45 = vmul.f32 0.17677669, %v4842_v4 }
 0xfc1   : > { %v4879_v39 = vadd.f32 %v13339_v43, %v4692_v55 }
 0xfc2   : > { %v4859_v14 = vmul.f32 0.17677669, %v4843_v42 }
 0xfc3   : > { %v13412_v19 = vpack.c.bf16 %v4879_v39, %v4878_v37 }
 0xfc4   : > { %v13414_v44 = vpack.c.bf16 %v4859_v14, %v4858_v45 }
 0xfc5   : > { %10084 = vmatprep.subr.msk.bf16.mxu0 %vm1174_vm0, %v13412_v19  ;;  %v4983_v41 = vsel %vm1174_vm0, %v13412_v19, 0 }
 0xfc6   : > { %9560 = vmatpush3.bf16.xpose.msra.mxu0 %v4983_v41 }
 0xfcc   : > { %v4696_v3 = vpop.f32.mrb[128].mxu0 }
 0xfcd   : > { %v4844_v30 = vadd.f32 %v13336_v16, %v4696_v3  ;;  %v4698_v11 = vpop.f32.mrb[129].mxu0 }
 0xfce   : > { %v4700_v6 = vpop.f32.mrb[130].mxu0  ;;  %v4880_v4 = vadd.f32 %v13339_v43, %v4698_v11 }
 0xfcf   : > { %v4845_v38 = vadd.f32 %v13336_v16, %v4700_v6  ;;  %v4702_v50 = vpop.f32.mrb[131].mxu0  ;;  %v4860_v42 = vmul.f32 0.17677669, %v4844_v30 }
 0xfd0   : > { %v4881_v24 = vadd.f32 %v13339_v43, %v4702_v50  ;;  %v9547_v20 = vpop.f32.mrb[120].mxu1 }
 0xfd1   : > { %v4861_v55 = vmul.f32 0.17677669, %v4845_v38  ;;  %v4801_v37 = vpop.f32.mrb[121].mxu1  ;;  %v4902_v41 = vadd.f32 %v9547_v20, %v13344_v25 }
 0xfd2   : > { %v13424_v39 = vpack.c.bf16 %v4881_v24, %v4880_v4  ;;  %v9548_v45 = vpop.f32.mrb[122].mxu1  ;;  %v4900_v6 = vadd.f32 %v13344_v25, %v4801_v37 }
 0xfd3   : > { %v13426_v14 = vpack.c.bf16 %v4861_v55, %v4860_v42  ;;  %v4903_v3 = vadd.f32 %v9548_v45, %v13344_v25  ;;  %v4804_v22 = vpop.f32.mrb[123].mxu1 }
 0xfd4   : > { %v4901_v11 = vadd.f32 %v13344_v25, %v4804_v22  ;;  %v4706_v29 = vpop.f32.mrb[132].mxu0  ;;  %10085 = vmatprep.subr.msk.bf16.mxu0 %vm1174_vm0, %v13424_v39  ;;  %v4986_v30 = vsel %vm1174_vm0, %v13424_v39, 0 }
 0xfd5   : > { %v13436_v38 = vpack.c.bf16 %v4903_v3, %v4902_v41  ;;  %v4846_v50 = vadd.f32 %v13336_v16, %v4706_v29  ;;  %v4708_v4 = vpop.f32.mrb[133].mxu0  ;;  %9562 = vmatpush3.bf16.xpose.msra.mxu0 %v4986_v30 }
 0xfd6   : > { %v13439_v24 = vpack.c.bf16 %v4901_v11, %v4900_v6  ;;  %v4710_v20 = vpop.f32.mrb[134].mxu0  ;;  %v4882_v22 = vadd.f32 %v13339_v43, %v4708_v4 }
 0xfd7   : > { %15280 = vst [vmem:[#allocation81_spill] sm:$0xff] %v13436_v38  ;;  %v4847_v42 = vadd.f32 %v13336_v16, %v4710_v20  ;;  %v4712_v55 = vpop.f32.mrb[135].mxu0  ;;  %v4862_v45 = vmul.f32 0.17677669, %v4846_v50 }
 0xfd8   : > { %15281 = vst [vmem:[#allocation79_spill] sm:$0xff] %v13439_v24  ;;  %v4883_v37 = vadd.f32 %v13339_v43, %v4712_v55  ;;  %9593 = vmatprep.subr.bf16.mxu1 %v13439_v24 }
 0xfd9   : > { %v4863_v1 = vmul.f32 0.17677669, %v4847_v42  ;;  %9594 = vmatpush3.bf16.msra.mxu1 %v13439_v24 }
 0xfda   : > { %v13446_v41 = vpack.c.bf16 %v4883_v37, %v4882_v22  ;;  %9595 = vmatprep.subr.bf16.mxu1 %v13436_v38 }
 0xfdb   : > { %v13449_v29 = vpack.c.bf16 %v4863_v1, %v4862_v45 }
 0xfdc   : > { %10086 = vmatprep.subr.msk.bf16.mxu0 %vm1174_vm0, %v13446_v41  ;;  %v4989_v3 = vsel %vm1174_vm0, %v13446_v41, 0 }
 0xfdd   : > { %9564 = vmatpush3.bf16.xpose.msra.mxu0 %v4989_v3  ;;  %9596 = vmatpush3.bf16.msra.mxu1 %v13436_v38 }
 0xfe7   : > { %v4716_v6 = vpop.f32.mrb[136].mxu0 }
 0xfe8   : > { %v4848_v11 = vadd.f32 %v13336_v16, %v4716_v6  ;;  %v4718_v30 = vpop.f32.mrb[137].mxu0 }
 0xfe9   : > { %v4720_v50 = vpop.f32.mrb[138].mxu0  ;;  %v4884_v1 = vadd.f32 %v13339_v43, %v4718_v30 }
 0xfea   : > { %v4849_v4 = vadd.f32 %v13336_v16, %v4720_v50  ;;  %v4722_v20 = vpop.f32.mrb[139].mxu0  ;;  %v4864_v22 = vmul.f32 0.17677669, %v4848_v11 }
 0xfeb   : > { %v4885_v42 = vadd.f32 %v13339_v43, %v4722_v20  ;;  %v9551_v55 = vpop.f32.mrb[124].mxu1 }
 0xfec   : > { %v4865_v37 = vmul.f32 0.17677669, %v4849_v4  ;;  %v4817_v45 = vpop.f32.mrb[125].mxu1  ;;  %v4906_v6 = vadd.f32 %v9551_v55, %v13344_v25 }
 0xfed   : > { %v13460_v8 = vpack.c.bf16 %v4885_v42, %v4884_v1  ;;  %v9552_v3 = vpop.f32.mrb[126].mxu1  ;;  %v4904_v50 = vadd.f32 %v13344_v25, %v4817_v45 }
 0xfee   : > { %v13462_v2 = vpack.c.bf16 %v4865_v37, %v4864_v22  ;;  %v4907_v0 = vadd.f32 %v9552_v3, %v13344_v25  ;;  %v4820_v49 = vpop.f32.mrb[127].mxu1 }
 0xfef   : > { %v4905_v30 = vadd.f32 %v13344_v25, %v4820_v49  ;;  %v4726_v32 = vpop.f32.mrb[140].mxu0  ;;  %10087 = vmatprep.subr.msk.bf16.mxu0 %vm1174_vm0, %v13460_v8  ;;  %v4992_v11 = vsel %vm1174_vm0, %v13460_v8, 0 }
 0xff0   : > { %v13472_v4 = vpack.c.bf16 %v4907_v0, %v4906_v6  ;;  %v4850_v20 = vadd.f32 %v13336_v16, %v4726_v32  ;;  %v4728_v1 = vpop.f32.mrb[141].mxu0  ;;  %9566 = vmatpush3.bf16.xpose.msra.mxu0 %v4992_v11 }
 0xff1   : > { %v13475_v42 = vpack.c.bf16 %v4905_v30, %v4904_v50  ;;  %v4730_v55 = vpop.f32.mrb[142].mxu0  ;;  %v4886_v49 = vadd.f32 %v13339_v43, %v4728_v1 }
 0xff2   : > { %15282 = vst [vmem:[#allocation80_spill] sm:$0xff] %v13472_v4  ;;  %v4851_v22 = vadd.f32 %v13336_v16, %v4730_v55  ;;  %v4732_v37 = vpop.f32.mrb[143].mxu0  ;;  %v4866_v45 = vmul.f32 0.17677669, %v4850_v20 }
 0xff3   : > { %15283 = vst [vmem:[#allocation78_spill] sm:$0xff] %v13475_v42  ;;  %v4887_v25 = vadd.f32 %v13339_v43, %v4732_v37  ;;  %9597 = vmatprep.subr.bf16.mxu1 %v13475_v42 }
 0xff4   : > { %v4867_v3 = vmul.f32 0.17677669, %v4851_v22  ;;  %9598 = vmatpush3.bf16.msra.mxu1 %v13475_v42 }
 0xff5   : > { %v13482_v0 = vpack.c.bf16 %v4887_v25, %v4886_v49  ;;  %9599 = vmatprep.subr.bf16.mxu1 %v13472_v4 }
 0xff6   : > { %v13485_v32 = vpack.c.bf16 %v4867_v3, %v4866_v45 }
 0xff7   : > { %10088 = vmatprep.subr.msk.bf16.mxu0 %vm1174_vm0, %v13482_v0  ;;  %v4995_v16 = vsel %vm1174_vm0, %v13482_v0, 0 }
 0xff8   : > { %9568 = vmatpush3.bf16.xpose.msra.mxu0 %v4995_v16  ;;  %9600 = vmatpush3.bf16.msra.mxu1 %v13472_v4 }
 0xfff   : > { %9570 = vmatmul.mubr.msk.bf16.vlgmr.msra.gmra.mrb[144].mxu0 %vm1174_vm0, %v13377_v60 }
0x1000   : > { %9573 = vmatprep.mubr.msk.bf16.mxu0 %vm1174_vm0, %v13401_v21 }
0x1007   : > { %9574 = vmatmul.mubr.msk.bf16.gmra.mrb[148].mxu0 %vm1174_vm0, %v13414_v44 }
0x1008   : > { %9577 = vmatprep.mubr.msk.bf16.mxu0 %vm1174_vm0, %v13426_v14 }
0x100f   : > { %9578 = vmatmul.mubr.msk.bf16.gmra.mrb[152].mxu0 %vm1174_vm0, %v13449_v29 }
0x1010   : > { %9581 = vmatprep.mubr.msk.bf16.mxu0 %vm1174_vm0, %v13462_v2 }
0x1017   : > { %9582 = vmatmul.mubr.msk.bf16.gmra.mrb[156].mxu0 %vm1174_vm0, %v13485_v32 }
0x101f   : > { %v13506_v43 = vpop.permute.xlu1 %5399 }
0x1020   : > { %10089 = vmatprep.subr.msk.bf16.mxu1 %vm1174_vm0, %v13506_v43 }
0x10d2   : > { %v9571_v6 = vpop.f32.mrb[144].mxu0 }
0x10d3   : > { %v5040_v50 = vadd.f32 %v9571_v6, %v11773_v51  ;;  %v5031_v30 = vpop.f32.mrb[145].mxu0 }
0x10d4   : > { %v9572_v11 = vpop.f32.mrb[146].mxu0  ;;  %v5032_v55 = vadd.f32 %v5031_v30, %v11776_v57 }
0x10d5   : > { %v5043_v20 = vadd.f32 %v9572_v11, %v15187_v27  ;;  %5098 = vmax.xlane.f32.xlu1 %v5040_v50  ;;  %v5034_v1 = vpop.f32.mrb[147].mxu0 }
0x10d6   : > { %v5035_v22 = vadd.f32 %v5034_v1, %v11793_v46  ;;  %v15284_v1 = vld [vmem:[#allocation64_spill] sm:$0xff] }
0x10d7   : > { %5100 = vmax.xlane.f32.xlu0 %v5043_v20 }
0x10d9   : > { %5094 = vmax.xlane.f32.xlu1 %v5032_v55 }
0x10da   : > { %v9575_v37 = vpop.f32.mrb[148].mxu0 }
0x10db   : > { %v5056_v49 = vadd.f32 %v9575_v37, %v15189_v47  ;;  %v5047_v25 = vpop.f32.mrb[149].mxu0  ;;  %5096 = vmax.xlane.f32.xlu0 %v5035_v22 }
0x10dc   : > { %v9576_v45 = vpop.f32.mrb[150].mxu0  ;;  %v5048_v16 = vadd.f32 %v5047_v25, %v15188_v61 }
0x10dd   : > { %v5050_v3 = vpop.f32.mrb[151].mxu0  ;;  %5106 = vmax.xlane.f32.xlu1 %v5056_v49 }
0x10e1   : > { %5102 = vmax.xlane.f32.xlu1 %v5048_v16 }
0x10e2   : > { %v9579_v6 = vpop.f32.mrb[152].mxu0 }
0x10e3   : > { %v13517_v11 = vadd.f32 %v9579_v6, %v15193_v53  ;;  %v5063_v30 = vpop.f32.mrb[153].mxu0  ;;  %v15286_v6 = vld [vmem:[#allocation67_spill] sm:$0xff] }
0x10e4   : > { %v9580_v62 = vpop.f32.mrb[154].mxu0  ;;  %v13521_v52 = vadd.f32 %v5063_v30, %v15284_v1  ;;  %v15287_v30 = vld [vmem:[#allocation59_spill] sm:$0xff] }
0x10e5   : > { %v5066_v7 = vpop.f32.mrb[155].mxu0  ;;  %5114 = vmax.xlane.f32.xlu1 %v13517_v11  ;;  %v5059_v15 = vadd.f32 %v9576_v45, %v15287_v30  ;;  %v13539_v40 = vadd.f32 %v9580_v62, %v15289_v56 }
0x10e9   : > { %5110 = vmax.xlane.f32.xlu1 %v13521_v52 }
0x10ea   : > { %v9583_v37 = vpop.f32.mrb[156].mxu0 }
0x10eb   : > { %v13525_v23 = vadd.f32 %v9583_v37, %v15285_v5  ;;  %v5079_v25 = vpop.f32.mrb[157].mxu0  ;;  %v15288_v37 = vld [vmem:[#allocation61_spill] sm:$0xff] }
0x10ec   : > { %v9584_v10 = vpop.f32.mrb[158].mxu0  ;;  %v13529_v31 = vadd.f32 %v5079_v25, %v15286_v6  ;;  %v5051_v12 = vadd.f32 %v5050_v3, %v15288_v37  ;;  %v15290_v25 = vld [vmem:[#allocation65_spill] sm:$0xff] }
0x10ed   : > { %v5082_v59 = vpop.f32.mrb[159].mxu0  ;;  %5122 = vmax.xlane.f32.xlu1 %v13525_v23  ;;  %v13543_v54 = vadd.f32 %v5066_v7, %v15290_v25  ;;  %v13547_v13 = vadd.f32 %v9584_v10, %v15198_v58 }
0x10ee   : > { %v13551_v45 = vadd.f32 %v5082_v59, %v15204_v48 }
0x10f1   : > { %5401 = vrot.lane.b32.xlu0 %v13374_v35, %s11207_s7  ;;  %5118 = vmax.xlane.f32.xlu1 %v13529_v31 }
0x1102   : > { %5403 = vrot.lane.b32.xlu1 %v13398_v36, %s11207_s7 }
0x1110   : > { %5108 = vmax.xlane.f32.xlu0 %v5059_v15 }
0x1114   : > { %5104 = vmax.xlane.f32.xlu0 %v5051_v12 }
0x1118   : > { %5116 = vmax.xlane.f32.xlu0 %v13539_v40 }
0x111c   : > { %5112 = vmax.xlane.f32.xlu0 %v13543_v54 }
0x1120   : > { %5124 = vmax.xlane.f32.xlu0 %v13547_v13 }
0x1124   : > { %5120 = vmax.xlane.f32.xlu0 %v13551_v45 }
0x1162   : > { %v5099_v3 = vpop.xlane.xlu1 %5098 }
0x1163   : > { %v5128_v62 = vsub.f32 %v5040_v50, %v5099_v3 }
0x1164   : > { %v5101_v18 = vpop.xlane.xlu0 %5100 }
0x1165   : > { %v5146_v33 = vmul.f32 1.442695, %v5128_v62  ;;  %v5129_v42 = vsub.f32 %v5043_v20, %v5101_v18 }
0x1166   : > { %v5095_v4 = vpop.xlane.xlu1 %5094 }
0x1167   : > { %10674 = vpow2.f32 %v5146_v33  ;;  %v5148_v7 = vmul.f32 1.442695, %v5129_v42  ;;  %v5126_v24 = vsub.f32 %v5032_v55, %v5095_v4 }
0x1168   : > { %v5097_v38 = vpop.xlane.xlu0 %5096 }
0x1169   : > { %10676 = vpow2.f32 %v5148_v7  ;;  %v5142_v10 = vmul.f32 1.442695, %v5126_v24  ;;  %v5127_v58 = vsub.f32 %v5035_v22, %v5097_v38 }
0x116a   : > { %v5107_v6 = vpop.xlane.xlu1 %5106 }
0x116b   : > { %10678 = vpow2.f32 %v5142_v10  ;;  %v5144_v5 = vmul.f32 1.442695, %v5127_v58  ;;  %v5132_v59 = vsub.f32 %v5056_v49, %v5107_v6 }
0x116d   : > { %10680 = vpow2.f32 %v5144_v5  ;;  %v5154_v48 = vmul.f32 1.442695, %v5132_v59  ;;  %v13578_v5 = vpop.permute.xlu0 %5401 }
0x116e   : > { %v5103_v56 = vpop.xlane.xlu1 %5102 }
0x116f   : > { %10682 = vpow2.f32 %v5154_v48  ;;  %v5130_v50 = vsub.f32 %v5048_v16, %v5103_v56 }
0x1171   : > { %v13554_v3 = vpop.eup %10674  ;;  %v5150_v18 = vmul.f32 1.442695, %v5130_v50 }
0x1172   : > { %5178 = vadd.xlane.f32.xlu1 %v13554_v3  ;;  %v5115_v42 = vpop.xlane.xlu1 %5114 }
0x1173   : > { %v13557_v33 = vpop.eup %10676  ;;  %10684 = vpow2.f32 %v5150_v18  ;;  %v5136_v16 = vsub.f32 %v13517_v11, %v5115_v42 }
0x1174   : > { %5180 = vadd.xlane.f32.xlu0 %v13557_v33 }
0x1175   : > { %v13560_v38 = vpop.eup %10678  ;;  %v5162_v10 = vmul.f32 1.442695, %v5136_v16 }
0x1176   : > { %5174 = vadd.xlane.f32.xlu1 %v13560_v38  ;;  %v5111_v62 = vpop.xlane.xlu1 %5110 }
0x1177   : > { %v13563_v58 = vpop.eup %10680  ;;  %v5134_v59 = vsub.f32 %v13521_v52, %v5111_v62 }
0x1178   : > { %5176 = vadd.xlane.f32.xlu0 %v13563_v58 }
0x1179   : > { %v13566_v48 = vpop.eup %10682 }
0x117a   : > { %5186 = vadd.xlane.f32.xlu1 %v13566_v48 }
0x117d   : > { %v13569_v56 = vpop.eup %10684 }
0x117e   : > { %5182 = vadd.xlane.f32.xlu1 %v13569_v56 }
0x118e   : > { %5407 = vrot.lane.b32.xlu0 %v13424_v39, %s11207_s7 }
0x118f   : > { %5405 = vrot.lane.b32.xlu1 %v13412_v19, %s11207_s7 }
0x1192   : > { %5409 = vrot.lane.b32.xlu0 %v13446_v41, %s11207_s7 }
0x119d   : > { %v5109_v24 = vpop.xlane.xlu0 %5108 }
0x119e   : > { %v5133_v4 = vsub.f32 %v5059_v15, %v5109_v24  ;;  %v5158_v15 = vmul.f32 1.442695, %v5134_v59 }
0x11a0   : > { %v5156_v55 = vmul.f32 1.442695, %v5133_v4  ;;  %v5123_v4 = vpop.xlane.xlu1 %5122 }
0x11a1   : > { %v5105_v20 = vpop.xlane.xlu0 %5104 }
0x11a2   : > { %v5131_v22 = vsub.f32 %v5051_v12, %v5105_v20  ;;  %10686 = vpow2.f32 %v5156_v55 }
0x11a4   : > { %v5152_v6 = vmul.f32 1.442695, %v5131_v22 }
0x11a5   : > { %v5117_v49 = vpop.xlane.xlu0 %5116 }
0x11a6   : > { %10688 = vpow2.f32 %v5152_v6  ;;  %v5137_v50 = vsub.f32 %v13539_v40, %v5117_v49  ;;  %v5140_v40 = vsub.f32 %v13525_v23, %v5123_v4  ;;  %v5119_v49 = vpop.xlane.xlu1 %5118 }
0x11a7   : > { %10690 = vpow2.f32 %v5162_v10 }
0x11a8   : > { %v5164_v12 = vmul.f32 1.442695, %v5137_v50  ;;  %10692 = vpow2.f32 %v5158_v15  ;;  %v5170_v6 = vmul.f32 1.442695, %v5140_v40 }
0x11a9   : > { %v5113_v7 = vpop.xlane.xlu0 %5112 }
0x11aa   : > { %v5135_v42 = vsub.f32 %v13543_v54, %v5113_v7  ;;  %10694 = vpow2.f32 %v5164_v12  ;;  %v5138_v54 = vsub.f32 %v13529_v31, %v5119_v49  ;;  %v5404_v15 = vpop.permute.xlu1 %5403 }
0x11ac   : > { %v13583_v24 = vpop.eup %10686  ;;  %v5160_v22 = vmul.f32 1.442695, %v5135_v42  ;;  %v5166_v62 = vmul.f32 1.442695, %v5138_v54 }
0x11ad   : > { %v5125_v18 = vpop.xlane.xlu0 %5124 }
0x11ae   : > { %v5141_v7 = vsub.f32 %v13547_v13, %v5125_v18 }
0x11b0   : > { %v13588_v55 = vpop.eup %10688  ;;  %v5172_v59 = vmul.f32 1.442695, %v5141_v7 }
0x11b1   : > { %5188 = vadd.xlane.f32.xlu0 %v13583_v24  ;;  %v5121_v11 = vpop.xlane.xlu0 %5120  ;;  %v13592_v16 = vpop.eup %10690 }
0x11b2   : > { %v5139_v20 = vsub.f32 %v13551_v45, %v5121_v11  ;;  %v13596_v45 = vpop.eup %10692 }
0x11b4   : > { %v5168_v52 = vmul.f32 1.442695, %v5139_v20  ;;  %v13600_v23 = vpop.eup %10694 }
0x11b5   : > { %5184 = vadd.xlane.f32.xlu0 %v13588_v55 }
0x11b6   : > { %10696 = vpow2.f32 %v5168_v52 }
0x11b7   : > { %10698 = vpow2.f32 %v5160_v22 }
0x11b8   : > { %10700 = vpow2.f32 %v5170_v6 }
0x11b9   : > { %5194 = vadd.xlane.f32.xlu0 %v13592_v16  ;;  %10702 = vpow2.f32 %v5166_v62 }
0x11ba   : > { %10704 = vpow2.f32 %v5172_v59 }
0x11bd   : > { %5190 = vadd.xlane.f32.xlu0 %v13596_v45 }
0x11c0   : > { %v13602_v10 = vpop.eup %10696 }
0x11c1   : > { %5200 = vadd.xlane.f32.xlu1 %v13602_v10  ;;  %5196 = vadd.xlane.f32.xlu0 %v13600_v23  ;;  %v13606_v31 = vpop.eup %10698 }
0x11c2   : > { %v13609_v50 = vpop.eup %10700 }
0x11c3   : > { %v13612_v13 = vpop.eup %10702 }
0x11c4   : > { %v13615_v18 = vpop.eup %10704 }
0x11c5   : > { %5192 = vadd.xlane.f32.xlu0 %v13606_v31 }
0x11c9   : > { %5202 = vadd.xlane.f32.xlu0 %v13609_v50 }
0x11cd   : > { %5198 = vadd.xlane.f32.xlu0 %v13612_v13 }
0x11d1   : > { %5204 = vadd.xlane.f32.xlu0 %v13615_v18 }
0x11d2   : > { %5413 = vrot.lane.b32.xlu1 %v13482_v0, %s11207_s7 }
0x11d6   : > { %5383 = vrot.lane.b32.xlu1 %v13426_v14, %s11207_s7 }
0x11da   : > { %5387 = vrot.lane.b32.xlu1 %v13462_v2, %s11207_s7 }
0x11de   : > { %6147 = vrot.lane.b32.xlu1 %v13348_v34, %s11209_s8 }
0x11e2   : > { %6151 = vrot.lane.b32.xlu1 %v13398_v36, %s11209_s8 }
0x11e6   : > { %6155 = vrot.lane.b32.xlu1 %v13424_v39, %s11209_s8 }
0x11e7   : > { %5411 = vrot.lane.b32.xlu0 %v13460_v8, %s11207_s7 }
0x11ea   : > { %6159 = vrot.lane.b32.xlu1 %v13460_v8, %s11209_s8 }
0x11eb   : > { %5375 = vrot.lane.b32.xlu0 %v13350_v26, %s11207_s7 }
0x11ee   : > { %6133 = vrot.lane.b32.xlu1 %v13377_v60, %s11209_s8 }
0x11ef   : > { %5377 = vrot.lane.b32.xlu0 %v13377_v60, %s11207_s7 }
0x11f2   : > { %6137 = vrot.lane.b32.xlu1 %v13414_v44, %s11209_s8 }
0x11f3   : > { %5379 = vrot.lane.b32.xlu0 %v13401_v21, %s11207_s7 }
0x11f6   : > { %6141 = vrot.lane.b32.xlu1 %v13449_v29, %s11209_s8 }
0x11f7   : > { %5381 = vrot.lane.b32.xlu0 %v13414_v44, %s11207_s7 }
0x11fa   : > { %6145 = vrot.lane.b32.xlu1 %v13485_v32, %s11209_s8 }
0x11fb   : > { %5385 = vrot.lane.b32.xlu0 %v13449_v29, %s11207_s7 }
0x11fe   : > { %5736 = vrot.lane.b32.xlu1 %v13367_v17, %s11207_s7 }
0x11ff   : > { %5389 = vrot.lane.b32.xlu0 %v13485_v32, %s11207_s7  ;;  %v5179_v4 = vpop.xlane.xlu1 %5178 }
0x1201   : > { %v5181_v12 = vpop.xlane.xlu0 %5180 }
0x1202   : > { %5738 = vrot.lane.b32.xlu1 %v13362_v9, %s11207_s7  ;;  %10706 = vrcp.f32 %v5181_v12 }
0x1203   : > { %6149 = vrot.lane.b32.xlu0 %v13374_v35, %s11209_s8  ;;  %v5175_v11 = vpop.xlane.xlu1 %5174 }
0x1204   : > { %10708 = vrcp.f32 %v5175_v11 }
0x1205   : > { %10710 = vrcp.f32 %v5179_v4  ;;  %v5177_v42 = vpop.xlane.xlu0 %5176  ;;  %v5440_v4 = vsel %vm1174_vm0, %v13506_v43, 0 }
0x1206   : > { %10712 = vrcp.f32 %v5177_v42  ;;  %5742 = vrot.lane.b32.xlu1 %v13387_v63, %s11207_s7 }
0x1207   : > { %6153 = vrot.lane.b32.xlu0 %v13412_v19, %s11209_s8 }
0x1209   : > { %v5408_v11 = vpop.permute.xlu0 %5407 }
0x120b   : > { %6157 = vrot.lane.b32.xlu0 %v13446_v41, %s11209_s8 }
0x120c   : > { %v10707_v20 = vpop.eup %10706 }
0x120d   : > { %v5241_v49 = vmul.f32 %v10707_v20, %v13557_v33  ;;  %v5187_v33 = vpop.xlane.xlu1 %5186  ;;  %v5410_v42 = vpop.permute.xlu0 %5409 }
0x120e   : > { %v10709_v52 = vpop.eup %10708 }
0x120f   : > { %v10711_v40 = vpop.eup %10710  ;;  %6161 = vrot.lane.b32.xlu0 %v13482_v0, %s11209_s8  ;;  %v5238_v6 = vmul.f32 %v10709_v52, %v13560_v38  ;;  %v5446_v38 = vsel %vm1174_vm0, %v5404_v15, 0  ;;  %v5455_v52 = vsel %vm1174_vm0, %v5410_v42, 0 }
0x1210   : > { %v10713_v22 = vpop.eup %10712  ;;  %v5240_v62 = vmul.f32 %v10711_v40, %v13554_v3  ;;  %v5443_v3 = vsel %vm1174_vm0, %v13578_v5, 0 }
0x1211   : > { %v5239_v54 = vmul.f32 %v10713_v22, %v13563_v58  ;;  %v5183_v43 = vpop.xlane.xlu1 %5182 }
0x1212   : > { %v5255_v59 = vpack.c.bf16 %v5241_v49, %v5240_v62 }
0x1213   : > { %6131 = vrot.lane.b32.xlu0 %v13350_v26, %s11209_s8  ;;  %v5254_v7 = vpack.c.bf16 %v5239_v54, %v5238_v6 }
0x1215   : > { %9601 = vmatprep.mubr.bf16.mxu1 %v5254_v7  ;;  %v5406_v58 = vpop.permute.xlu1 %5405 }
0x1216   : > { %9602 = vmatmul.mubr.bf16.vlgmr.msra.gmra.mrb[128].mxu1 %v5255_v59  ;;  %v5449_v12 = vsel %vm1174_vm0, %v5406_v58, 0 }
0x1217   : > { %9618 = vmatpush3.bf16.xpose.msra.mxu1 %v5440_v4  ;;  %6135 = vrot.lane.b32.xlu0 %v13401_v21, %s11209_s8 }
0x1218   : > { %10090 = vmatprep.subr.msk.bf16.mxu1 %vm1174_vm0, %v13578_v5  ;;  %v5452_v5 = vsel %vm1174_vm0, %v5408_v11, 0 }
0x121b   : > { %6139 = vrot.lane.b32.xlu0 %v13426_v14, %s11209_s8 }
0x121f   : > { %9620 = vmatpush3.bf16.xpose.msra.mxu1 %v5443_v3  ;;  %6143 = vrot.lane.b32.xlu0 %v13462_v2, %s11209_s8 }
0x1220   : > { %10091 = vmatprep.subr.msk.bf16.mxu1 %vm1174_vm0, %v5404_v15 }
0x1223   : > { %5740 = vrot.lane.b32.xlu0 %v13391_v28, %s11207_s7 }
0x1227   : > { %9622 = vmatpush3.bf16.xpose.msra.mxu1 %v5446_v38 }
0x1228   : > { %10092 = vmatprep.subr.msk.bf16.mxu1 %vm1174_vm0, %v5406_v58 }
0x122f   : > { %9624 = vmatpush3.bf16.xpose.msra.mxu1 %v5449_v12 }
0x1230   : > { %10093 = vmatprep.subr.msk.bf16.mxu1 %vm1174_vm0, %v5408_v11 }
0x1237   : > { %9626 = vmatpush3.bf16.xpose.msra.mxu1 %v5452_v5 }
0x1238   : > { %10094 = vmatprep.subr.msk.bf16.mxu1 %vm1174_vm0, %v5410_v42 }
0x123e   : > { %v5189_v20 = vpop.xlane.xlu0 %5188 }
0x123f   : > { %9628 = vmatpush3.bf16.xpose.msra.mxu1 %v5455_v52  ;;  %10714 = vrcp.f32 %v5189_v20 }
0x1240   : > { %10716 = vrcp.f32 %v5183_v43 }
0x1241   : > { %10718 = vrcp.f32 %v5187_v33 }
0x1242   : > { %v5185_v15 = vpop.xlane.xlu0 %5184 }
0x1243   : > { %10720 = vrcp.f32 %v5185_v15 }
0x1246   : > { %v5195_v40 = vpop.xlane.xlu0 %5194 }
0x1249   : > { %v10715_v22 = vpop.eup %10714 }
0x124a   : > { %v5191_v49 = vpop.xlane.xlu0 %5190  ;;  %v10717_v6 = vpop.eup %10716  ;;  %v5245_v7 = vmul.f32 %v10715_v22, %v13583_v24 }
0x124b   : > { %v10719_v54 = vpop.eup %10718  ;;  %v5242_v3 = vmul.f32 %v10717_v6, %v13569_v56 }
0x124c   : > { %v5244_v58 = vmul.f32 %v10719_v54, %v13566_v48 }
0x124d   : > { %v10721_v62 = vpop.eup %10720 }
0x124e   : > { %v5197_v59 = vpop.xlane.xlu0 %5196  ;;  %v5201_v4 = vpop.xlane.xlu1 %5200  ;;  %v5243_v38 = vmul.f32 %v10721_v62, %v13588_v55  ;;  %v5257_v43 = vpack.c.bf16 %v5245_v7, %v5244_v58 }
0x124f   : > { %10722 = vrcp.f32 %v5197_v59 }
0x1250   : > { %v5256_v33 = vpack.c.bf16 %v5243_v38, %v5242_v3  ;;  %10724 = vrcp.f32 %v5191_v49 }
0x1251   : > { %10726 = vrcp.f32 %v5195_v40 }
0x1252   : > { %v5193_v12 = vpop.xlane.xlu0 %5192  ;;  %9605 = vmatprep.mubr.bf16.mxu1 %v5256_v33  ;;  %v5414_v11 = vpop.permute.xlu1 %5413 }
0x1253   : > { %10728 = vrcp.f32 %v5193_v12  ;;  %9606 = vmatmul.mubr.bf16.gmra.mrb[132].mxu1 %v5257_v43 }
0x1254   : > { %10730 = vrcp.f32 %v5201_v4 }
0x1256   : > { %v5203_v5 = vpop.xlane.xlu0 %5202  ;;  %v5384_v24 = vpop.permute.xlu1 %5383 }
0x1259   : > { %v10723_v42 = vpop.eup %10722 }
0x125a   : > { %v5199_v20 = vpop.xlane.xlu0 %5198  ;;  %v13700_v56 = vpop.permute.xlu1 %5387  ;;  %v5249_v15 = vmul.f32 %v10723_v42, %v13600_v23 }
0x125b   : > { %v10725_v55 = vpop.eup %10724  ;;  %10732 = vrcp.f32 %v5199_v20 }
0x125c   : > { %v10727_v48 = vpop.eup %10726  ;;  %10734 = vrcp.f32 %v5203_v5  ;;  %v5246_v49 = vmul.f32 %v10725_v55, %v13596_v45 }
0x125d   : > { %v10729_v52 = vpop.eup %10728  ;;  %v5248_v54 = vmul.f32 %v10727_v48, %v13592_v16  ;;  %v5461_v48 = vsel %vm1174_vm0, %v5414_v11, 0 }
0x125e   : > { %v5205_v40 = vpop.xlane.xlu0 %5204  ;;  %v6148_v22 = vpop.permute.xlu1 %6147  ;;  %v5247_v6 = vmul.f32 %v10729_v52, %v13606_v31 }
0x125f   : > { %10736 = vrcp.f32 %v5205_v40  ;;  %v5259_v7 = vpack.c.bf16 %v5249_v15, %v5248_v54  ;;  %v10731_v3 = vpop.eup %10730 }
0x1260   : > { %v5258_v62 = vpack.c.bf16 %v5247_v6, %v5246_v49  ;;  %v5251_v16 = vmul.f32 %v10731_v3, %v13602_v10 }
0x1262   : > { %v5412_v59 = vpop.permute.xlu0 %5411  ;;  %9609 = vmatprep.mubr.bf16.mxu1 %v5258_v62  ;;  %v6152_v4 = vpop.permute.xlu1 %6151 }
0x1263   : > { %9610 = vmatmul.mubr.bf16.gmra.mrb[136].mxu1 %v5259_v7  ;;  %10095 = vmatprep.subr.msk.bf16.mxu1 %vm1174_vm0, %v5412_v59  ;;  %v5458_v23 = vsel %vm1174_vm0, %v5412_v59, 0 }
0x1264   : > { %9630 = vmatpush3.bf16.xpose.msra.mxu1 %v5458_v23 }
0x1265   : > { %v10733_v38 = vpop.eup %10732  ;;  %10096 = vmatprep.subr.msk.bf16.mxu1 %vm1174_vm0, %v5414_v11 }
0x1266   : > { %v5376_v45 = vpop.permute.xlu0 %5375  ;;  %v6156_v31 = vpop.permute.xlu1 %6155  ;;  %v5250_v58 = vmul.f32 %v10733_v38, %v13612_v13 }
0x1267   : > { %v10735_v33 = vpop.eup %10734 }
0x1268   : > { %v5260_v43 = vpack.c.bf16 %v5251_v16, %v5250_v58  ;;  %v5252_v20 = vmul.f32 %v10735_v33, %v13609_v50  ;;  %v6188_v50 = vsel %vm1174_vm0, %v6148_v22, 0 }
0x1269   : > { %v10737_v12 = vpop.eup %10736 }
0x126a   : > { %v5378_v5 = vpop.permute.xlu0 %5377  ;;  %9613 = vmatprep.mubr.bf16.mxu1 %v5260_v43  ;;  %v13711_v42 = vpop.permute.xlu1 %6159  ;;  %v5253_v55 = vmul.f32 %v10737_v12, %v13615_v18 }
0x126c   : > { %9632 = vmatpush3.bf16.xpose.msra.mxu1 %v5461_v48  ;;  %v5261_v52 = vpack.c.bf16 %v5253_v55, %v5252_v20 }
0x126d   : > { %10097 = vmatprep.subr.msk.bf16.mxu1 %vm1174_vm0, %v6148_v22 }
0x126e   : > { %v5380_v13 = vpop.permute.xlu0 %5379  ;;  %9614 = vmatmul.mubr.bf16.gmra.mrb[140].mxu1 %v5261_v52  ;;  %v6134_v10 = vpop.permute.xlu1 %6133 }
0x126f   : > { %9633 = vmatprep.mubr.msk.bf16.mxu1 %vm1174_vm0, %v5376_v45 }
0x1272   : > { %v5382_v15 = vpop.permute.xlu0 %5381  ;;  %v6138_v40 = vpop.permute.xlu1 %6137 }
0x1276   : > { %v5386_v49 = vpop.permute.xlu0 %5385  ;;  %9634 = vmatmul.mubr.msk.bf16.vlgmr.msra.gmra.mrb[144].mxu1 %vm1174_vm0, %v5378_v5  ;;  %v6142_v6 = vpop.permute.xlu1 %6141  ;;  %v6206_v5 = vsel %vm1174_vm0, %v13711_v42, 0 }
0x1277   : > { %9722 = vmatpush3.bf16.xpose.msra.mxu1 %v6188_v50  ;;  %9637 = vmatprep.mubr.msk.bf16.mxu1 %vm1174_vm0, %v5380_v13 }
0x127a   : > { %v5390_v18 = vpop.permute.xlu0 %5389  ;;  %v6146_v11 = vpop.permute.xlu1 %6145 }
0x127e   : > { %v6150_v54 = vpop.permute.xlu0 %6149  ;;  %9638 = vmatmul.mubr.msk.bf16.gmra.mrb[148].mxu1 %vm1174_vm0, %v5382_v15  ;;  %v5737_v62 = vpop.permute.xlu1 %5736 }
0x127f   : > { %9641 = vmatprep.mubr.msk.bf16.mxu1 %vm1174_vm0, %v5384_v24  ;;  %9649 = vmatprep.subr.bf16.mxu0 %v5737_v62  ;;  %v6191_v7 = vsel %vm1174_vm0, %v6150_v54, 0  ;;  %v6194_v24 = vsel %vm1174_vm0, %v6152_v4, 0 }
0x1280   : > { %10098 = vmatprep.subr.msk.bf16.mxu1 %vm1174_vm0, %v6150_v54  ;;  %9650 = vmatpush3.bf16.msra.mxu0 %v5737_v62 }
0x1281   : > { %9724 = vmatpush3.bf16.xpose.msra.mxu1 %v6191_v7 }
0x1282   : > { %10099 = vmatprep.subr.msk.bf16.mxu1 %vm1174_vm0, %v6152_v4  ;;  %v6154_v22 = vpop.permute.xlu0 %6153  ;;  %v5739_v59 = vpop.permute.xlu1 %5738 }
0x1283   : > { %9651 = vmatprep.subr.bf16.mxu0 %v5739_v59  ;;  %v6197_v45 = vsel %vm1174_vm0, %v6154_v22, 0 }
0x1284   : > { %9652 = vmatpush3.bf16.msra.mxu0 %v5739_v59 }
0x1286   : > { %v6158_v3 = vpop.permute.xlu0 %6157  ;;  %9642 = vmatmul.mubr.msk.bf16.gmra.mrb[152].mxu1 %vm1174_vm0, %v5386_v49  ;;  %v5743_v43 = vpop.permute.xlu1 %5742 }
0x1287   : > { %9645 = vmatprep.mubr.msk.bf16.mxu1 %vm1174_vm0, %v13700_v56  ;;  %v6200_v56 = vsel %vm1174_vm0, %v6156_v31, 0  ;;  %v6203_v12 = vsel %vm1174_vm0, %v6158_v3, 0 }
0x1289   : > { %9726 = vmatpush3.bf16.xpose.msra.mxu1 %v6194_v24 }
0x128a   : > { %10100 = vmatprep.subr.msk.bf16.mxu1 %vm1174_vm0, %v6154_v22  ;;  %v6162_v23 = vpop.permute.xlu0 %6161 }
0x128e   : > { %v6132_v38 = vpop.permute.xlu0 %6131  ;;  %9646 = vmatmul.mubr.msk.bf16.gmra.mrb[156].mxu1 %vm1174_vm0, %v5390_v18 }
0x128f   : > { %9737 = vmatprep.mubr.msk.bf16.mxu1 %vm1174_vm0, %v6132_v38 }
0x1291   : > { %9728 = vmatpush3.bf16.xpose.msra.mxu1 %v6197_v45 }
0x1292   : > { %10101 = vmatprep.subr.msk.bf16.mxu1 %vm1174_vm0, %v6156_v31  ;;  %v6136_v58 = vpop.permute.xlu0 %6135  ;;  %v6209_v31 = vsel %vm1174_vm0, %v6162_v23, 0 }
0x1296   : > { %v6140_v16 = vpop.permute.xlu0 %6139 }
0x1299   : > { %9730 = vmatpush3.bf16.xpose.msra.mxu1 %v6200_v56 }
0x129a   : > { %10102 = vmatprep.subr.msk.bf16.mxu1 %vm1174_vm0, %v6158_v3  ;;  %v6144_v4 = vpop.permute.xlu0 %6143 }
0x129e   : > { %v5741_v33 = vpop.permute.xlu0 %5740 }
0x129f   : > { %9653 = vmatprep.subr.bf16.mxu0 %v5741_v33 }
0x12a0   : > { %9654 = vmatpush3.bf16.msra.mxu0 %v5741_v33 }
0x12a1   : > { %9732 = vmatpush3.bf16.xpose.msra.mxu1 %v6203_v12  ;;  %9655 = vmatprep.subr.bf16.mxu0 %v5743_v43 }
0x12a2   : > { %10103 = vmatprep.subr.msk.bf16.mxu1 %vm1174_vm0, %v13711_v42 }
0x12a4   : > { %9656 = vmatpush3.bf16.msra.mxu0 %v5743_v43 }
0x12a9   : > { %9734 = vmatpush3.bf16.xpose.msra.mxu1 %v6206_v5 }
0x12aa   : > { %10104 = vmatprep.subr.msk.bf16.mxu1 %vm1174_vm0, %v6162_v23 }
0x12b1   : > { %9736 = vmatpush3.bf16.xpose.msra.mxu1 %v6209_v31 }
0x12b8   : > { %9738 = vmatmul.mubr.msk.bf16.vlgmr.msra.gmra.mrb[160].mxu1 %vm1174_vm0, %v6134_v10 }
0x12b9   : > { %9741 = vmatprep.mubr.msk.bf16.mxu1 %vm1174_vm0, %v6136_v58 }
0x12c0   : > { %9742 = vmatmul.mubr.msk.bf16.gmra.mrb[164].mxu1 %vm1174_vm0, %v6138_v40 }
0x12c1   : > { %9745 = vmatprep.mubr.msk.bf16.mxu1 %vm1174_vm0, %v6140_v16 }
0x12c8   : > { %9746 = vmatmul.mubr.msk.bf16.gmra.mrb[168].mxu1 %vm1174_vm0, %v6142_v6 }
0x12c9   : > { %9749 = vmatprep.mubr.msk.bf16.mxu1 %vm1174_vm0, %v6144_v4 }
0x12d0   : > { %9750 = vmatmul.mubr.msk.bf16.gmra.mrb[172].mxu1 %vm1174_vm0, %v6146_v11 }
0x12e9   : > { %v13751_v42 = vpop.f32.mrb[128].mxu1 }
0x12ea   : > { %15291 = vst [vmem:[#allocation85_spill] sm:$0xff] %v13751_v42  ;;  %v13753_v20 = vpop.f32.mrb[129].mxu1 }
0x12eb   : > { %15292 = vst [vmem:[#allocation83_spill] sm:$0xff] %v13753_v20  ;;  %v13755_v55 = vpop.f32.mrb[130].mxu1 }
0x12ec   : > { %15293 = vst [vmem:[#allocation84_spill] sm:$0xff] %v13755_v55  ;;  %v13759_v52 = vpop.f32.mrb[131].mxu1 }
0x12ed   : > { %15294 = vst [vmem:[#allocation82_spill] sm:$0xff] %v13759_v52 }
0x1326   : > { %v13763_v10 = vpop.f32.mrb[132].mxu1 }
0x1327   : > { %15295 = vst [vmem:[#allocation30_spill] sm:$0xff] %v13763_v10  ;;  %v13765_v15 = vpop.f32.mrb[133].mxu1 }
0x1328   : > { %15296 = vst [vmem:[#allocation31_spill] sm:$0xff] %v13765_v15  ;;  %v13767_v40 = vpop.f32.mrb[134].mxu1 }
0x1329   : > { %15297 = vst [vmem:[#allocation32_spill] sm:$0xff] %v13767_v40  ;;  %v13771_v50 = vpop.f32.mrb[135].mxu1 }
0x132a   : > { %15298 = vst [vmem:[#allocation33_spill] sm:$0xff] %v13771_v50 }
0x1336   : > { %v13775_v18 = vpop.f32.mrb[136].mxu1 }
0x1337   : > { %15299 = vst [vmem:[#allocation34_spill] sm:$0xff] %v13775_v18  ;;  %v13777_v11 = vpop.f32.mrb[137].mxu1 }
0x1338   : > { %15300 = vst [vmem:[#allocation35_spill] sm:$0xff] %v13777_v11  ;;  %v13779_v54 = vpop.f32.mrb[138].mxu1 }
0x1339   : > { %15301 = vst [vmem:[#allocation36_spill] sm:$0xff] %v13779_v54  ;;  %v13783_v7 = vpop.f32.mrb[139].mxu1  ;;  %v15310_v54 = vld [vmem:[#allocation69_spill] sm:$0xff] }
0x133a   : > { %15302 = vst [vmem:[#allocation37_spill] sm:$0xff] %v13783_v7 }
0x1341   : > { %v13787_v59 = vpop.f32.mrb[140].mxu1 }
0x1342   : > { %15303 = vst [vmem:[#allocation38_spill] sm:$0xff] %v13787_v59  ;;  %v13789_v3 = vpop.f32.mrb[141].mxu1  ;;  %v15308_v59 = vld [vmem:[#allocation66_spill] sm:$0xff] }
0x1343   : > { %15304 = vst [vmem:[#allocation39_spill] sm:$0xff] %v13789_v3  ;;  %v13791_v24 = vpop.f32.mrb[142].mxu1  ;;  %v15309_v3 = vld [vmem:[#allocation67_spill] sm:$0xff] }
0x1344   : > { %15305 = vst [vmem:[#allocation40_spill] sm:$0xff] %v13791_v24  ;;  %v13795_v38 = vpop.f32.mrb[143].mxu1 }
0x1345   : > { %15306 = vst [vmem:[#allocation41_spill] sm:$0xff] %v13795_v38 }
0x1349   : > { %v9635_v58 = vpop.f32.mrb[144].mxu1 }
0x134a   : > { %v13800_v16 = vadd.f32 %v9635_v58, %v11773_v51  ;;  %v5497_v56 = vpop.f32.mrb[145].mxu1 }
0x134b   : > { %v13803_v4 = vadd.f32 %v5497_v56, %v11776_v57  ;;  %v9636_v33 = vpop.f32.mrb[146].mxu1 }
0x134c   : > { %5564 = vmax.xlane.f32.xlu0 %v13800_v16  ;;  %v5500_v43 = vpop.f32.mrb[147].mxu1  ;;  %v13811_v5 = vadd.f32 %v9636_v33, %v15187_v27 }
0x134d   : > { %v13807_v12 = vadd.f32 %v5500_v43, %v11793_v46  ;;  %5560 = vmax.xlane.f32.xlu1 %v13803_v4 }
0x1350   : > { %5562 = vmax.xlane.f32.xlu0 %v13807_v12 }
0x1351   : > { %v9639_v31 = vpop.f32.mrb[148].mxu1  ;;  %5566 = vmax.xlane.f32.xlu1 %v13811_v5 }
0x1352   : > { %v13816_v58 = vadd.f32 %v9639_v31, %v15189_v47  ;;  %v5513_v56 = vpop.f32.mrb[149].mxu1 }
0x1353   : > { %v13819_v23 = vadd.f32 %v5513_v56, %v15188_v61  ;;  %v9640_v45 = vpop.f32.mrb[150].mxu1 }
0x1354   : > { %v5516_v43 = vpop.f32.mrb[151].mxu1  ;;  %5572 = vmax.xlane.f32.xlu0 %v13816_v58  ;;  %v13827_v33 = vadd.f32 %v9640_v45, %v15287_v30  ;;  %v15307_v45 = vld [vmem:[#allocation63_spill] sm:$0xff] }
0x1355   : > { %v13823_v62 = vadd.f32 %v5516_v43, %v15288_v37  ;;  %5568 = vmax.xlane.f32.xlu1 %v13819_v23 }
0x1358   : > { %5570 = vmax.xlane.f32.xlu0 %v13823_v62 }
0x1359   : > { %5574 = vmax.xlane.f32.xlu1 %v13827_v33  ;;  %v9643_v31 = vpop.f32.mrb[152].mxu1 }
0x135a   : > { %v13832_v56 = vadd.f32 %v9643_v31, %v15193_v53  ;;  %v5529_v22 = vpop.f32.mrb[153].mxu1 }
0x135b   : > { %v13835_v49 = vadd.f32 %v5529_v22, %v15284_v1  ;;  %v9644_v6 = vpop.f32.mrb[154].mxu1 }
0x135c   : > { %5580 = vmax.xlane.f32.xlu0 %v13832_v56  ;;  %v5532_v43 = vpop.f32.mrb[155].mxu1  ;;  %v13843_v13 = vadd.f32 %v9644_v6, %v15307_v45  ;;  %v15311_v6 = vld [vmem:[#allocation68_spill] sm:$0xff] }
0x135d   : > { %v13839_v48 = vadd.f32 %v5532_v43, %v15290_v25  ;;  %5576 = vmax.xlane.f32.xlu1 %v13835_v49 }
0x1360   : > { %5578 = vmax.xlane.f32.xlu0 %v13839_v48 }
0x1361   : > { %5582 = vmax.xlane.f32.xlu1 %v13843_v13  ;;  %v9647_v31 = vpop.f32.mrb[156].mxu1 }
0x1362   : > { %v13848_v22 = vadd.f32 %v9647_v31, %v15308_v59  ;;  %v5545_v24 = vpop.f32.mrb[157].mxu1  ;;  %v15312_v31 = vld [vmem:[#allocation81_spill] sm:$0xff] }
0x1363   : > { %v13851_v38 = vadd.f32 %v5545_v24, %v15309_v3  ;;  %v9648_v18 = vpop.f32.mrb[158].mxu1  ;;  %v15313_v24 = vld [vmem:[#allocation79_spill] sm:$0xff] }
0x1364   : > { %5588 = vmax.xlane.f32.xlu0 %v13848_v22  ;;  %v5548_v43 = vpop.f32.mrb[159].mxu1  ;;  %v13859_v7 = vadd.f32 %v9648_v18, %v15311_v6 }
0x1365   : > { %v13855_v11 = vadd.f32 %v5548_v43, %v15310_v54  ;;  %5584 = vmax.xlane.f32.xlu1 %v13851_v38 }
0x1368   : > { %5586 = vmax.xlane.f32.xlu0 %v13855_v11 }
0x1369   : > { %5590 = vmax.xlane.f32.xlu1 %v13859_v7 }
0x137a   : > { %5746 = vrot.lane.b32.xlu1 %v15312_v31, %s11207_s7 }
0x137e   : > { %5744 = vrot.lane.b32.xlu0 %v15313_v24, %s11207_s7 }
0x138b   : > { %v13867_v10 = vpop.f32.mrb[160].mxu1 }
0x138c   : > { %15314 = vst [vmem:[#allocation42_spill] sm:$0xff] %v13867_v10  ;;  %v13869_v40 = vpop.f32.mrb[161].mxu1 }
0x138d   : > { %v13871_v43 = vpop.f32.mrb[162].mxu1 }
0x138e   : > { %v13873_v15 = vpop.f32.mrb[163].mxu1 }
0x138f   : > { %15315 = vst [vmem:[#allocation43_spill] sm:$0xff] %v13873_v15 }
0x1393   : > { %v13875_v18 = vpop.f32.mrb[164].mxu1 }
0x1394   : > { %15316 = vst [vmem:[#allocation44_spill] sm:$0xff] %v13875_v18  ;;  %v13877_v50 = vpop.f32.mrb[165].mxu1 }
0x1395   : > { %15317 = vst [vmem:[#allocation45_spill] sm:$0xff] %v13877_v50  ;;  %v13879_v42 = vpop.f32.mrb[166].mxu1 }
0x1396   : > { %v13881_v55 = vpop.f32.mrb[167].mxu1 }
0x139b   : > { %v13883_v20 = vpop.f32.mrb[168].mxu1 }
0x139c   : > { %15318 = vst [vmem:[#allocation29_spill] sm:$0xff] %v13883_v20  ;;  %v13885_v52 = vpop.f32.mrb[169].mxu1 }
0x139d   : > { %15319 = vst [vmem:[#allocation59_spill] sm:$0xff] %v13885_v52  ;;  %v13887_v63 = vpop.f32.mrb[170].mxu1 }
0x139e   : > { %v13889_v28 = vpop.f32.mrb[171].mxu1 }
0x13a3   : > { %v13891_v17 = vpop.f32.mrb[172].mxu1 }
0x13a4   : > { %15320 = vst [vmem:[#allocation61_spill] sm:$0xff] %v13891_v17  ;;  %v13893_v59 = vpop.f32.mrb[173].mxu1 }
0x13a5   : > { %15321 = vst [vmem:[#allocation65_spill] sm:$0xff] %v13893_v59  ;;  %v13895_v3 = vpop.f32.mrb[174].mxu1 }
0x13a6   : > { %v13897_v53 = vpop.f32.mrb[175].mxu1 }
0x13d9   : > { %v5565_v1 = vpop.xlane.xlu0 %5564 }
0x13da   : > { %v5594_v18 = vsub.f32 %v13800_v16, %v5565_v1  ;;  %v5561_v47 = vpop.xlane.xlu1 %5560 }
0x13db   : > { %v5592_v20 = vsub.f32 %v13803_v4, %v5561_v47 }
0x13dc   : > { %v5612_v50 = vmul.f32 1.442695, %v5594_v18 }
0x13dd   : > { %v5608_v52 = vmul.f32 1.442695, %v5592_v20  ;;  %v5563_v61 = vpop.xlane.xlu0 %5562 }
0x13de   : > { %10738 = vpow2.f32 %v5612_v50  ;;  %v5593_v31 = vsub.f32 %v13807_v12, %v5563_v61  ;;  %v5567_v10 = vpop.xlane.xlu1 %5566 }
0x13df   : > { %v5595_v17 = vsub.f32 %v13811_v5, %v5567_v10  ;;  %10740 = vpow2.f32 %v5608_v52 }
0x13e0   : > { %v5610_v59 = vmul.f32 1.442695, %v5593_v31 }
0x13e1   : > { %v5614_v51 = vmul.f32 1.442695, %v5595_v17  ;;  %v5573_v24 = vpop.xlane.xlu0 %5572 }
0x13e2   : > { %10742 = vpow2.f32 %v5610_v59  ;;  %v5598_v15 = vsub.f32 %v13816_v58, %v5573_v24  ;;  %v5569_v1 = vpop.xlane.xlu1 %5568 }
0x13e3   : > { %v5596_v16 = vsub.f32 %v13819_v23, %v5569_v1  ;;  %10744 = vpow2.f32 %v5614_v51 }
0x13e4   : > { %v5620_v47 = vmul.f32 1.442695, %v5598_v15 }
0x13e5   : > { %v5571_v20 = vpop.xlane.xlu0 %5570  ;;  %v5616_v50 = vmul.f32 1.442695, %v5596_v16 }
0x13e6   : > { %10746 = vpow2.f32 %v5620_v47  ;;  %v5575_v4 = vpop.xlane.xlu1 %5574  ;;  %v5597_v61 = vsub.f32 %v13823_v62, %v5571_v20 }
0x13e7   : > { %v5599_v10 = vsub.f32 %v13827_v33, %v5575_v4  ;;  %10748 = vpow2.f32 %v5616_v50 }
0x13e8   : > { %v13907_v12 = vpop.eup %10738  ;;  %v5618_v51 = vmul.f32 1.442695, %v5597_v61 }
0x13e9   : > { %v5622_v17 = vmul.f32 1.442695, %v5599_v10  ;;  %v5581_v52 = vpop.xlane.xlu0 %5580  ;;  %5644 = vadd.xlane.f32.xlu0 %v13907_v12  ;;  %v13911_v15 = vpop.eup %10740 }
0x13ea   : > { %v5602_v59 = vsub.f32 %v13832_v56, %v5581_v52  ;;  %v5577_v23 = vpop.xlane.xlu1 %5576 }
0x13eb   : > { %10750 = vpow2.f32 %v5622_v17  ;;  %v5600_v5 = vsub.f32 %v13835_v49, %v5577_v23 }
0x13ec   : > { %v13914_v58 = vpop.eup %10742  ;;  %v5628_v62 = vmul.f32 1.442695, %v5602_v59 }
0x13ed   : > { %v5579_v33 = vpop.xlane.xlu0 %5578  ;;  %5642 = vadd.xlane.f32.xlu1 %v13914_v58  ;;  %5640 = vadd.xlane.f32.xlu0 %v13911_v15  ;;  %v5624_v31 = vmul.f32 1.442695, %v5600_v5  ;;  %v13918_v18 = vpop.eup %10744 }
0x13ee   : > { %10752 = vpow2.f32 %v5628_v62  ;;  %v5583_v24 = vpop.xlane.xlu1 %5582  ;;  %v5601_v56 = vsub.f32 %v13839_v48, %v5579_v33 }
0x13ef   : > { %10754 = vpow2.f32 %v5618_v51  ;;  %v5603_v1 = vsub.f32 %v13843_v13, %v5583_v24 }
0x13f0   : > { %v13922_v16 = vpop.eup %10746  ;;  %10756 = vpow2.f32 %v5624_v31  ;;  %v5626_v4 = vmul.f32 1.442695, %v5601_v56  ;;  %v15322_v56 = vld [vmem:[#allocation80_spill] sm:$0xff] }
0x13f1   : > { %v5630_v49 = vmul.f32 1.442695, %v5603_v1  ;;  %v5589_v47 = vpop.xlane.xlu0 %5588  ;;  %5652 = vadd.xlane.f32.xlu1 %v13922_v16  ;;  %5646 = vadd.xlane.f32.xlu0 %v13918_v18  ;;  %v13928_v10 = vpop.eup %10748  ;;  %v15323_v1 = vld [vmem:[#allocation78_spill] sm:$0xff] }
0x13f2   : > { %v5606_v20 = vsub.f32 %v13848_v22, %v5589_v47  ;;  %v5585_v50 = vpop.xlane.xlu1 %5584 }
0x13f3   : > { %10758 = vpow2.f32 %v5630_v49  ;;  %v5604_v61 = vsub.f32 %v13851_v38, %v5585_v50 }
0x13f4   : > { %v5636_v48 = vmul.f32 1.442695, %v5606_v20 }
0x13f5   : > { %v13930_v13 = vpop.eup %10750  ;;  %v5587_v17 = vpop.xlane.xlu0 %5586  ;;  %5648 = vadd.xlane.f32.xlu1 %v13928_v10  ;;  %v5632_v52 = vmul.f32 1.442695, %v5604_v61 }
0x13f6   : > { %10760 = vpow2.f32 %v5636_v48  ;;  %5654 = vadd.xlane.f32.xlu0 %v13930_v13  ;;  %v5591_v59 = vpop.xlane.xlu1 %5590  ;;  %v5605_v49 = vsub.f32 %v13855_v11, %v5587_v17  ;;  %v15325_v48 = vld [vmem:[#allocation79_spill] sm:$0xff]  ;;  %v15327_v17 = vld [vmem:[#allocation42_spill] sm:$0xff] }
0x13f7   : > { %10762 = vpow2.f32 %v5626_v4  ;;  %v5607_v20 = vsub.f32 %v13859_v7, %v5591_v59 }
0x13f8   : > { %v13934_v22 = vpop.eup %10752  ;;  %10764 = vpow2.f32 %v5632_v52  ;;  %v5634_v47 = vmul.f32 1.442695, %v5605_v49  ;;  %v15330_v49 = vld [vmem:[#allocation45_spill] sm:$0xff] }
0x13f9   : > { %v13936_v23 = vpop.eup %10754  ;;  %v5745_v51 = vpop.permute.xlu0 %5744  ;;  %5660 = vadd.xlane.f32.xlu1 %v13934_v22  ;;  %v5638_v50 = vmul.f32 1.442695, %v5607_v20 }
0x13fa   : > { %9657 = vmatprep.subr.bf16.mxu0 %v5745_v51  ;;  %5650 = vadd.xlane.f32.xlu0 %v13936_v23  ;;  %v5747_v38 = vpop.permute.xlu1 %5746  ;;  %v13940_v5 = vpop.eup %10756  ;;  %10766 = vpow2.f32 %v5634_v47 }
0x13fb   : > { %9658 = vmatpush3.bf16.msra.mxu0 %v5745_v51  ;;  %10768 = vpow2.f32 %v5638_v50  ;;  %v15328_v51 = vld [vmem:[#allocation81_spill] sm:$0xff] }
0x13fc   : > { %9659 = vmatprep.subr.bf16.mxu0 %v5747_v38 }
0x13fd   : > { %v13942_v62 = vpop.eup %10758  ;;  %5656 = vadd.xlane.f32.xlu1 %v13940_v5 }
0x13fe   : > { %5662 = vadd.xlane.f32.xlu0 %v13942_v62 }
0x13ff   : > { %9660 = vmatpush3.bf16.msra.mxu0 %v5747_v38  ;;  %v15329_v38 = vld [vmem:[#allocation60_spill] sm:$0xff] }
0x1400   : > { %v13946_v33 = vpop.eup %10760  ;;  %v14061_v47 = vadd.f32 %v15330_v49, %v15329_v38 }
0x1401   : > { %v13948_v31 = vpop.eup %10762  ;;  %5668 = vadd.xlane.f32.xlu1 %v13946_v33 }
0x1402   : > { %5658 = vadd.xlane.f32.xlu0 %v13948_v31  ;;  %v13952_v24 = vpop.eup %10764 }
0x1405   : > { %5664 = vadd.xlane.f32.xlu1 %v13952_v24 }
0x1416   : > { %5750 = vrot.lane.b32.xlu1 %v15322_v56, %s11207_s7 }
0x1418   : > { %5748 = vrot.lane.b32.xlu0 %v15323_v1, %s11207_s7 }
0x141a   : > { %6772 = vrot.lane.b32.xlu1 %v13374_v35, %s11210_s11  ;;  %v13975_v35 = vpop.eup %10766 }
0x141e   : > { %6774 = vrot.lane.b32.xlu1 %v13398_v36, %s11210_s11  ;;  %v14010_v36 = vadd.f32 %v13879_v42, %v15287_v30 }
0x1422   : > { %6778 = vrot.lane.b32.xlu1 %v13424_v39, %s11210_s11 }
0x1426   : > { %6782 = vrot.lane.b32.xlu1 %v13460_v8, %s11210_s11  ;;  %v13980_v8 = vpop.eup %10768 }
0x142a   : > { %6754 = vrot.lane.b32.xlu1 %v13350_v26, %s11210_s11  ;;  %v13989_v26 = vadd.f32 %v13869_v40, %v11776_v57 }
0x142e   : > { %6758 = vrot.lane.b32.xlu1 %v13401_v21, %s11210_s11  ;;  %v14017_v21 = vadd.f32 %v13889_v28, %v15290_v25  ;;  %v14036_v28 = vadd.f32 %v13895_v3, %v15311_v6  ;;  %v15324_v3 = vld [vmem:[#allocation43_spill] sm:$0xff] }
0x1432   : > { %6762 = vrot.lane.b32.xlu1 %v13426_v14, %s11210_s11 }
0x1436   : > { %6766 = vrot.lane.b32.xlu1 %v13462_v2, %s11210_s11  ;;  %v13996_v2 = vadd.f32 %v13871_v43, %v15187_v27  ;;  %v14045_v43 = vadd.f32 %v15324_v3, %v11793_v46  ;;  %v15334_v3 = vld [vmem:[#allocation59_spill] sm:$0xff] }
0x1437   : > { %5666 = vadd.xlane.f32.xlu0 %v13975_v35 }
0x143b   : > { %5670 = vadd.xlane.f32.xlu0 %v13980_v8 }
0x1451   : > { %6770 = vrot.lane.b32.xlu0 %v13348_v34, %s11210_s11  ;;  %v14003_v34 = vadd.f32 %v13881_v55, %v15288_v37 }
0x1455   : > { %6776 = vrot.lane.b32.xlu0 %v13412_v19, %s11210_s11  ;;  %v14031_v19 = vadd.f32 %v13897_v53, %v15310_v54 }
0x1459   : > { %6780 = vrot.lane.b32.xlu0 %v13446_v41, %s11210_s11 }
0x145a   : > { %6308 = vmax.xlane.f32.xlu1 %v13989_v26 }
0x145d   : > { %6784 = vrot.lane.b32.xlu0 %v13482_v0, %s11210_s11 }
0x145e   : > { %6314 = vmax.xlane.f32.xlu1 %v13996_v2 }
0x1461   : > { %6756 = vrot.lane.b32.xlu0 %v13377_v60, %s11210_s11  ;;  %v14024_v60 = vadd.f32 %v13887_v63, %v15307_v45 }
0x1462   : > { %6318 = vmax.xlane.f32.xlu1 %v14003_v34 }
0x1465   : > { %6760 = vrot.lane.b32.xlu0 %v13414_v44, %s11210_s11 }
0x1466   : > { %6322 = vmax.xlane.f32.xlu1 %v14010_v36 }
0x1469   : > { %6764 = vrot.lane.b32.xlu0 %v13449_v29, %s11210_s11 }
0x146a   : > { %6326 = vmax.xlane.f32.xlu1 %v14017_v21 }
0x146d   : > { %6768 = vrot.lane.b32.xlu0 %v13485_v32, %s11210_s11 }
0x146e   : > { %6330 = vmax.xlane.f32.xlu1 %v14024_v60 }
0x1472   : > { %6334 = vmax.xlane.f32.xlu1 %v14031_v19 }
0x1476   : > { %v5645_v44 = vpop.xlane.xlu0 %5644  ;;  %6338 = vmax.xlane.f32.xlu1 %v14036_v28 }
0x147a   : > { %v5641_v63 = vpop.xlane.xlu0 %5640  ;;  %v5643_v39 = vpop.xlane.xlu1 %5642 }
0x147b   : > { %10770 = vrcp.f32 %v5641_v63 }
0x147c   : > { %10772 = vrcp.f32 %v5643_v39 }
0x147e   : > { %v5647_v14 = vpop.xlane.xlu0 %5646  ;;  %v5653_v41 = vpop.xlane.xlu1 %5652 }
0x147f   : > { %10774 = vrcp.f32 %v5647_v14 }
0x1482   : > { %v5649_v29 = vpop.xlane.xlu1 %5648 }
0x1483   : > { %v5655_v0 = vpop.xlane.xlu0 %5654 }
0x1485   : > { %v10771_v32 = vpop.eup %10770 }
0x1486   : > { %v10773_v53 = vpop.eup %10772  ;;  %v5661_v42 = vpop.xlane.xlu1 %5660  ;;  %v5704_v55 = vmul.f32 %v10771_v32, %v13911_v15  ;;  %v15326_v15 = vld [vmem:[#allocation56_spill] sm:$0xff] }
0x1487   : > { %v5651_v40 = vpop.xlane.xlu0 %5650  ;;  %6478 = vrot.lane.b32.xlu1 %v13362_v9, %s11209_s8  ;;  %v5705_v11 = vmul.f32 %v10773_v53, %v13914_v58  ;;  %v14052_v58 = vadd.f32 %v15327_v17, %v15326_v15  ;;  %v15332_v32 = vld [vmem:[#allocation44_spill] sm:$0xff] }
0x1488   : > { %10776 = vrcp.f32 %v5651_v40 }
0x1489   : > { %v5720_v7 = vpack.c.bf16 %v5705_v11, %v5704_v55  ;;  %10778 = vrcp.f32 %v5645_v44  ;;  %v10775_v50 = vpop.eup %10774 }
0x148a   : > { %v5657_v4 = vpop.xlane.xlu1 %5656  ;;  %10780 = vrcp.f32 %v5649_v29  ;;  %v15331_v29 = vld [vmem:[#allocation58_spill] sm:$0xff]  ;;  %v5707_v53 = vmul.f32 %v10775_v50, %v13918_v18 }
0x148b   : > { %9665 = vmatprep.mubr.bf16.mxu0 %v5720_v7  ;;  %v5663_v61 = vpop.xlane.xlu0 %5662  ;;  %6484 = vrot.lane.b32.xlu1 %v15325_v48, %s11209_s8  ;;  %10782 = vrcp.f32 %v5655_v0  ;;  %v14066_v0 = vadd.f32 %v15332_v32, %v15331_v29  ;;  %v15333_v7 = vld [vmem:[#allocation64_spill] sm:$0xff] }
0x148c   : > { %6310 = vmax.xlane.f32.xlu0 %v14045_v43 }
0x148e   : > { %v14054_v52 = vpop.xlane.xlu1 %5668 }
0x148f   : > { %v5659_v59 = vpop.xlane.xlu0 %5658  ;;  %6486 = vrot.lane.b32.xlu1 %v15328_v51, %s11209_s8 }
0x1490   : > { %6312 = vmax.xlane.f32.xlu0 %v14052_v58  ;;  %10784 = vrcp.f32 %v5659_v59 }
0x1491   : > { %10786 = vrcp.f32 %v5653_v41 }
0x1492   : > { %v5665_v20 = vpop.xlane.xlu1 %5664  ;;  %v10777_v63 = vpop.eup %10776  ;;  %10788 = vrcp.f32 %v5657_v4  ;;  %v14075_v4 = vadd.f32 %v15334_v3, %v15333_v7 }
0x1493   : > { %v5749_v44 = vpop.permute.xlu0 %5748  ;;  %v10779_v39 = vpop.eup %10778  ;;  %v5709_v40 = vmul.f32 %v10777_v63, %v13936_v23  ;;  %10790 = vrcp.f32 %v5663_v61  ;;  %v15335_v61 = vld [vmem:[#allocation62_spill] sm:$0xff] }
0x1494   : > { %6316 = vmax.xlane.f32.xlu0 %v14061_v47  ;;  %9661 = vmatprep.subr.bf16.mxu0 %v5749_v44  ;;  %v10781_v14 = vpop.eup %10780  ;;  %v5706_v41 = vmul.f32 %v10779_v39, %v13907_v12  ;;  %10792 = vrcp.f32 %v5661_v42 }
0x1495   : > { %9662 = vmatpush3.bf16.msra.mxu0 %v5749_v44  ;;  %v5708_v11 = vmul.f32 %v10781_v14, %v13928_v10  ;;  %v10783_v49 = vpop.eup %10782  ;;  %v15336_v44 = vld [vmem:[#allocation29_spill] sm:$0xff]  ;;  %10794 = vrcp.f32 %v5665_v20 }
0x1496   : > { %v5751_v55 = vpop.permute.xlu1 %5750  ;;  %v5721_v59 = vpack.c.bf16 %v5707_v53, %v5706_v41  ;;  %v14080_v63 = vadd.f32 %v15336_v44, %v15335_v61  ;;  %v5711_v39 = vmul.f32 %v10783_v49, %v13930_v13  ;;  %v15337_v53 = vld [vmem:[#allocation67_spill] sm:$0xff]  ;;  %v15340_v49 = vld [vmem:[#allocation61_spill] sm:$0xff] }
0x1497   : > { %9663 = vmatprep.subr.bf16.mxu0 %v5751_v55  ;;  %v5722_v18 = vpack.c.bf16 %v5709_v40, %v5708_v11  ;;  %v15341_v44 = vld [vmem:[#allocation75_spill] sm:$0xff] }
0x1498   : > { %6320 = vmax.xlane.f32.xlu0 %v14066_v0 }
0x1499   : > { %9664 = vmatpush3.bf16.msra.mxu0 %v5751_v55  ;;  %v15338_v55 = vld [vmem:[#allocation65_spill] sm:$0xff] }
0x149a   : > { %v6773_v17 = vpop.permute.xlu1 %6772  ;;  %v10785_v50 = vpop.eup %10784  ;;  %v14089_v40 = vadd.f32 %v15338_v55, %v15337_v53 }
0x149b   : > { %v10787_v12 = vpop.eup %10786  ;;  %v5713_v14 = vmul.f32 %v10785_v50, %v13948_v31  ;;  %v15339_v31 = vld [vmem:[#allocation66_spill] sm:$0xff] }
0x149c   : > { %6324 = vmax.xlane.f32.xlu0 %v14075_v4  ;;  %9666 = vmatmul.mubr.bf16.vlgmr.msra.gmra.mrb[160].mxu0 %v5721_v59  ;;  %v10789_v23 = vpop.eup %10788  ;;  %v5710_v42 = vmul.f32 %v10787_v12, %v13922_v16 }
0x149d   : > { %9669 = vmatprep.mubr.bf16.mxu0 %v5722_v18  ;;  %v5712_v32 = vmul.f32 %v10789_v23, %v13940_v5  ;;  %v10791_v3 = vpop.eup %10790  ;;  %v14094_v18 = vadd.f32 %v15340_v49, %v15339_v31 }
0x149e   : > { %v6775_v10 = vpop.permute.xlu1 %6774  ;;  %v5723_v11 = vpack.c.bf16 %v5711_v39, %v5710_v42  ;;  %v10793_v13 = vpop.eup %10792  ;;  %v5715_v5 = vmul.f32 %v10791_v3, %v13942_v62  ;;  %v15342_v39 = vld [vmem:[#allocation74_spill] sm:$0xff]  ;;  %v15343_v62 = vld [vmem:[#allocation76_spill] sm:$0xff] }
0x149f   : > { %v5724_v59 = vpack.c.bf16 %v5713_v14, %v5712_v32  ;;  %v5714_v50 = vmul.f32 %v10793_v13, %v13934_v22  ;;  %v10795_v32 = vpop.eup %10794 }
0x14a0   : > { %6328 = vmax.xlane.f32.xlu0 %v14080_v63 }
0x14a1   : > { %v5725_v23 = vpack.c.bf16 %v5715_v5, %v5714_v50  ;;  %v6814_v50 = vsel %vm1174_vm0, %v6773_v17, 0 }
0x14a2   : > { %v6779_v41 = vpop.permute.xlu1 %6778 }
0x14a4   : > { %6332 = vmax.xlane.f32.xlu0 %v14089_v40  ;;  %9670 = vmatmul.mubr.bf16.gmra.mrb[164].mxu0 %v5723_v11  ;;  %v5716_v11 = vmul.f32 %v10795_v32, %v13952_v24  ;;  %v6817_v24 = vsel %vm1174_vm0, %v6775_v10, 0 }
0x14a5   : > { %9673 = vmatprep.mubr.bf16.mxu0 %v5724_v59 }
0x14a6   : > { %v6783_v16 = vpop.permute.xlu1 %6782 }
0x14a7   : > { %v6829_v32 = vsel %vm1174_vm0, %v6783_v16, 0 }
0x14a8   : > { %6336 = vmax.xlane.f32.xlu0 %v14094_v18 }
0x14aa   : > { %v6755_v12 = vpop.permute.xlu1 %6754 }
0x14ab   : > { %9821 = vmatprep.mubr.msk.bf16.mxu1 %vm1174_vm0, %v6755_v12 }
0x14ac   : > { %9674 = vmatmul.mubr.bf16.gmra.mrb[168].mxu0 %v5725_v23  ;;  %v10330_v23 = vld [vmem:[#allocation7 + $0x50] sm:$0xff]  }
0x14ad   : > { %9681 = vmatprep.subr.bf16.mxu0 %v10330_v23 }
0x14ae   : > { %9682 = vmatpush3.bf16.msra.mxu0 %v10330_v23 }
0x14be   : > { %6476 = vrot.lane.b32.xlu0 %v15341_v44, %s11209_s8 }
0x14c2   : > { %6480 = vrot.lane.b32.xlu0 %v15342_v39, %s11209_s8 }
0x14c4   : > { %v5667_v14 = vpop.xlane.xlu0 %5666 }
0x14c5   : > { %10796 = vrcp.f32 %v5667_v14  ;;  %v10331_v14 = vld [vmem:[#allocation7 + $0x58] sm:$0xff]  }
0x14c6   : > { %6482 = vrot.lane.b32.xlu0 %v15343_v62, %s11209_s8  ;;  %10798 = vrcp.f32 %v14054_v52  ;;  %9683 = vmatprep.subr.bf16.mxu0 %v10331_v14 }
0x14c7   : > { %9684 = vmatpush3.bf16.msra.mxu0 %v10331_v14 }
0x14c8   : > { %v5671_v22 = vpop.xlane.xlu0 %5670 }
0x14c9   : > { %10800 = vrcp.f32 %v5671_v22  ;;  %v14125_v22 = vld [vmem:[#allocation7 + $0x40] sm:$0xff]  }
0x14ca   : > { %6488 = vrot.lane.b32.xlu0 %v15323_v1, %s11209_s8  ;;  %9701 = vmatprep.subr.bf16.mxu0 %v14125_v22 }
0x14cc   : > { %v6771_v42 = vpop.permute.xlu0 %6770 }
0x14cd   : > { %10105 = vmatprep.subr.msk.bf16.mxu1 %vm1174_vm0, %v6771_v42  ;;  %v6811_v55 = vsel %vm1174_vm0, %v6771_v42, 0 }
0x14ce   : > { %9806 = vmatpush3.bf16.xpose.msra.mxu1 %v6811_v55 }
0x14cf   : > { %v10797_v20 = vpop.eup %10796  ;;  %10106 = vmatprep.subr.msk.bf16.mxu1 %vm1174_vm0, %v6773_v17 }
0x14d0   : > { %v5717_v3 = vmul.f32 %v10797_v20, %v13975_v35  ;;  %v10799_v52 = vpop.eup %10798  ;;  %v6777_v35 = vpop.permute.xlu0 %6776 }
0x14d1   : > { %v5718_v49 = vmul.f32 %v10799_v52, %v13946_v33  ;;  %v6820_v33 = vsel %vm1174_vm0, %v6777_v35, 0 }
0x14d2   : > { %v5726_v59 = vpack.c.bf16 %v5717_v3, %v5716_v11 }
0x14d3   : > { %v10801_v13 = vpop.eup %10800 }
0x14d4   : > { %9677 = vmatprep.mubr.bf16.mxu0 %v5726_v59  ;;  %v5719_v5 = vmul.f32 %v10801_v13, %v13980_v8  ;;  %v6823_v8 = vsel %vm1174_vm0, %v6779_v41, 0  ;;  %v6781_v17 = vpop.permute.xlu0 %6780 }
0x14d6   : > { %9808 = vmatpush3.bf16.xpose.msra.mxu1 %v6814_v50  ;;  %v5727_v12 = vpack.c.bf16 %v5719_v5, %v5718_v49 }
0x14d7   : > { %10107 = vmatprep.subr.msk.bf16.mxu1 %vm1174_vm0, %v6775_v10  ;;  %v6826_v10 = vsel %vm1174_vm0, %v6781_v17, 0 }
0x14d8   : > { %9678 = vmatmul.mubr.bf16.gmra.mrb[172].mxu0 %v5727_v12  ;;  %v6785_v42 = vpop.permute.xlu0 %6784 }
0x14d9   : > { %v6832_v20 = vsel %vm1174_vm0, %v6785_v42, 0 }
0x14dc   : > { %v6757_v55 = vpop.permute.xlu0 %6756 }
0x14de   : > { %9810 = vmatpush3.bf16.xpose.msra.mxu1 %v6817_v24 }
0x14df   : > { %10108 = vmatprep.subr.msk.bf16.mxu1 %vm1174_vm0, %v6777_v35 }
0x14e0   : > { %v6761_v3 = vpop.permute.xlu0 %6760 }
0x14e4   : > { %v6765_v59 = vpop.permute.xlu0 %6764 }
0x14e6   : > { %9812 = vmatpush3.bf16.xpose.msra.mxu1 %v6820_v33 }
0x14e7   : > { %10109 = vmatprep.subr.msk.bf16.mxu1 %vm1174_vm0, %v6779_v41  ;;  %v6759_v41 = vpop.permute.xlu1 %6758 }
0x14e8   : > { %v6769_v49 = vpop.permute.xlu0 %6768 }
0x14eb   : > { %v6763_v11 = vpop.permute.xlu1 %6762 }
0x14ee   : > { %9814 = vmatpush3.bf16.xpose.msra.mxu1 %v6823_v8 }
0x14ef   : > { %10110 = vmatprep.subr.msk.bf16.mxu1 %vm1174_vm0, %v6781_v17  ;;  %v6767_v52 = vpop.permute.xlu1 %6766 }
0x14f3   : > { %v6309_v13 = vpop.xlane.xlu1 %6308 }
0x14f4   : > { %v6340_v23 = vsub.f32 %v13989_v26, %v6309_v13 }
0x14f6   : > { %9816 = vmatpush3.bf16.xpose.msra.mxu1 %v6826_v10  ;;  %v6356_v17 = vmul.f32 1.442695, %v6340_v23 }
0x14f7   : > { %10111 = vmatprep.subr.msk.bf16.mxu1 %vm1174_vm0, %v6783_v16  ;;  %v6315_v16 = vpop.xlane.xlu1 %6314 }
0x14f8   : > { %v6343_v33 = vsub.f32 %v13996_v2, %v6315_v16 }
0x14fa   : > { %v6362_v10 = vmul.f32 1.442695, %v6343_v33 }
0x14fb   : > { %v6319_v50 = vpop.xlane.xlu1 %6318 }
0x14fe   : > { %9818 = vmatpush3.bf16.xpose.msra.mxu1 %v6829_v32 }
0x14ff   : > { %10112 = vmatprep.subr.msk.bf16.mxu1 %vm1174_vm0, %v6785_v42  ;;  %v6323_v14 = vpop.xlane.xlu1 %6322 }
0x1503   : > { %v6327_v2 = vpop.xlane.xlu1 %6326 }
0x1504   : > { %v6349_v13 = vsub.f32 %v14017_v21, %v6327_v2 }
0x1506   : > { %9820 = vmatpush3.bf16.xpose.msra.mxu1 %v6832_v20 }
0x150d   : > { %9822 = vmatmul.mubr.msk.bf16.vlgmr.msra.gmra.mrb[176].mxu1 %vm1174_vm0, %v6757_v55  ;;  %v6345_v55 = vsub.f32 %v14003_v34, %v6319_v50 }
0x150e   : > { %9825 = vmatprep.mubr.msk.bf16.mxu1 %vm1174_vm0, %v6759_v41 }
0x1515   : > { %9826 = vmatmul.mubr.msk.bf16.gmra.mrb[180].mxu1 %vm1174_vm0, %v6761_v3  ;;  %v6347_v3 = vsub.f32 %v14010_v36, %v6323_v14  ;;  %v6374_v36 = vmul.f32 1.442695, %v6349_v13 }
0x1516   : > { %9829 = vmatprep.mubr.msk.bf16.mxu1 %vm1174_vm0, %v6763_v11 }
0x1519   : > { %v6311_v5 = vpop.xlane.xlu0 %6310 }
0x151a   : > { %v6341_v42 = vsub.f32 %v14045_v43, %v6311_v5 }
0x151c   : > { %v6358_v20 = vmul.f32 1.442695, %v6341_v42 }
0x151d   : > { %v6313_v12 = vpop.xlane.xlu0 %6312  ;;  %9830 = vmatmul.mubr.msk.bf16.gmra.mrb[184].mxu1 %vm1174_vm0, %v6765_v59  ;;  %v6366_v59 = vmul.f32 1.442695, %v6345_v55 }
0x151e   : > { %v6342_v24 = vsub.f32 %v14052_v58, %v6313_v12  ;;  %9833 = vmatprep.mubr.msk.bf16.mxu1 %vm1174_vm0, %v6767_v52 }
0x1520   : > { %v6360_v35 = vmul.f32 1.442695, %v6342_v24 }
0x1521   : > { %v6317_v8 = vpop.xlane.xlu0 %6316 }
0x1522   : > { %10802 = vpow2.f32 %v6360_v35  ;;  %v6344_v26 = vsub.f32 %v14061_v47, %v6317_v8 }
0x1523   : > { %10804 = vpow2.f32 %v6356_v17 }
0x1524   : > { %10806 = vpow2.f32 %v6362_v10  ;;  %v6364_v52 = vmul.f32 1.442695, %v6344_v26 }
0x1525   : > { %v6321_v32 = vpop.xlane.xlu0 %6320  ;;  %9834 = vmatmul.mubr.msk.bf16.gmra.mrb[188].mxu1 %vm1174_vm0, %v6769_v49  ;;  %v6331_v49 = vpop.xlane.xlu1 %6330 }
0x1526   : > { %v6346_v58 = vsub.f32 %v14066_v0, %v6321_v32  ;;  %v6370_v0 = vmul.f32 1.442695, %v6347_v3  ;;  %v6351_v24 = vsub.f32 %v14024_v60, %v6331_v49 }
0x1528   : > { %v6368_v41 = vmul.f32 1.442695, %v6346_v58  ;;  %v6378_v42 = vmul.f32 1.442695, %v6351_v24 }
0x1529   : > { %v6325_v11 = vpop.xlane.xlu0 %6324 }
0x152a   : > { %10808 = vpow2.f32 %v6368_v41  ;;  %v6348_v5 = vsub.f32 %v14075_v4, %v6325_v11 }
0x152b   : > { %10810 = vpow2.f32 %v6358_v20 }
0x152c   : > { %v14147_v43 = vpop.eup %10802  ;;  %10812 = vpow2.f32 %v6364_v52  ;;  %v6372_v35 = vmul.f32 1.442695, %v6348_v5  ;;  %v10333_v5 = vld [vmem:[#allocation7 + $0x48] sm:$0xff]  }
0x152d   : > { %6392 = vadd.xlane.f32.xlu1 %v14147_v43  ;;  %v6329_v47 = vpop.xlane.xlu0 %6328  ;;  %v14152_v16 = vpop.eup %10804  ;;  %10814 = vpow2.f32 %v6366_v59 }
0x152e   : > { %v6350_v34 = vsub.f32 %v14080_v63, %v6329_v47  ;;  %10816 = vpow2.f32 %v6370_v0  ;;  %v14156_v12 = vpop.eup %10806  ;;  %v6335_v63 = vpop.xlane.xlu1 %6334 }
0x152f   : > { %10818 = vpow2.f32 %v6374_v36  ;;  %v6353_v60 = vsub.f32 %v14031_v19, %v6335_v63 }
0x1530   : > { %v6376_v21 = vmul.f32 1.442695, %v6350_v34 }
0x1531   : > { %v6333_v50 = vpop.xlane.xlu0 %6332  ;;  %6388 = vadd.xlane.f32.xlu1 %v14152_v16 }
0x1532   : > { %10820 = vpow2.f32 %v6376_v21  ;;  %v6352_v4 = vsub.f32 %v14089_v40, %v6333_v50  ;;  %v6339_v40 = vpop.xlane.xlu1 %6338 }
0x1533   : > { %10822 = vpow2.f32 %v6372_v35  ;;  %v6355_v41 = vsub.f32 %v14036_v28, %v6339_v40 }
0x1534   : > { %v14158_v23 = vpop.eup %10808  ;;  %v6380_v32 = vmul.f32 1.442695, %v6352_v4 }
0x1535   : > { %6400 = vadd.xlane.f32.xlu0 %v14158_v23  ;;  %v6337_v33 = vpop.xlane.xlu0 %6336  ;;  %6394 = vadd.xlane.f32.xlu1 %v14156_v12  ;;  %v14165_v17 = vpop.eup %10810  ;;  %v6386_v19 = vmul.f32 1.442695, %v6355_v41 }
0x1536   : > { %v6354_v8 = vsub.f32 %v14094_v18, %v6337_v33  ;;  %v14167_v14 = vpop.eup %10812  ;;  %v6382_v18 = vmul.f32 1.442695, %v6353_v60  ;;  %v6479_v40 = vpop.permute.xlu1 %6478 }
0x1537   : > { %v14172_v26 = vpop.eup %10814 }
0x1538   : > { %v6384_v10 = vmul.f32 1.442695, %v6354_v8  ;;  %v14174_v58 = vpop.eup %10816 }
0x1539   : > { %6396 = vadd.xlane.f32.xlu0 %v14167_v14  ;;  %6390 = vadd.xlane.f32.xlu1 %v14165_v17  ;;  %v14179_v55 = vpop.eup %10818  ;;  %v6477_v33 = vpop.permute.xlu0 %6476 }
0x153a   : > { %10824 = vpow2.f32 %v6384_v10 }
0x153b   : > { %10826 = vpow2.f32 %v6378_v42 }
0x153c   : > { %10828 = vpow2.f32 %v6380_v32  ;;  %v14181_v2 = vpop.eup %10820 }
0x153d   : > { %6398 = vadd.xlane.f32.xlu1 %v14172_v26  ;;  %6402 = vadd.xlane.f32.xlu0 %v14174_v58  ;;  %10830 = vpow2.f32 %v6382_v18  ;;  %v14185_v20 = vpop.eup %10822 }
0x153e   : > { %10832 = vpow2.f32 %v6386_v19 }
0x1541   : > { %6408 = vadd.xlane.f32.xlu0 %v14181_v2  ;;  %6406 = vadd.xlane.f32.xlu1 %v14179_v55 }
0x1544   : > { %v14187_v11 = vpop.eup %10824 }
0x1545   : > { %6404 = vadd.xlane.f32.xlu0 %v14185_v20  ;;  %6416 = vadd.xlane.f32.xlu1 %v14187_v11  ;;  %v14191_v28 = vpop.eup %10826 }
0x1546   : > { %v14193_v3 = vpop.eup %10828 }
0x1547   : > { %v14197_v52 = vpop.eup %10830 }
0x1548   : > { %v14200_v59 = vpop.eup %10832 }
0x1549   : > { %6412 = vadd.xlane.f32.xlu1 %v14193_v3  ;;  %6410 = vadd.xlane.f32.xlu0 %v14191_v28 }
0x154d   : > { %6414 = vadd.xlane.f32.xlu0 %v14197_v52 }
0x1551   : > { %6418 = vadd.xlane.f32.xlu0 %v14200_v59 }
0x155a   : > { %6490 = vrot.lane.b32.xlu1 %v15322_v56, %s11209_s8 }
0x156f   : > { %v9667_v13 = vpop.f32.mrb[160].mxu0 }
0x1570   : > { %v5794_v47 = vpop.f32.mrb[161].mxu0 }
0x1571   : > { %v9668_v0 = vpop.f32.mrb[162].mxu0 }
0x1572   : > { %v5858_v34 = vpack.c.bf16 %v9668_v0, %v9667_v13  ;;  %v5797_v49 = vpop.f32.mrb[163].mxu0 }
0x1573   : > { %v5857_v36 = vpack.c.bf16 %v5797_v49, %v5794_v47  ;;  %v6481_v49 = vpop.permute.xlu0 %6480 }
0x1575   : > { %9685 = vmatprep.mubr.msk.bf16.mxu0 %vm1174_vm0, %v5857_v36  ;;  %v15344_v36 = vld [vmem:[#allocation82_spill] sm:$0xff] }
0x1576   : > { %9686 = vmatmul.mubr.msk.bf16.vlgmr.msra.gmra.mrb[176].mxu0 %vm1174_vm0, %v5858_v34  ;;  %v6485_v34 = vpop.permute.xlu1 %6484 }
0x1577   : > { %9702 = vmatpush3.bf16.msra.mxu0 %v14125_v22  ;;  %v9671_v50 = vpop.f32.mrb[164].mxu0 }
0x1578   : > { %v5810_v21 = vpop.f32.mrb[165].mxu0  ;;  %9703 = vmatprep.subr.bf16.mxu0 %v10333_v5 }
0x1579   : > { %v9672_v24 = vpop.f32.mrb[166].mxu0 }
0x157a   : > { %v5860_v63 = vpack.c.bf16 %v9672_v24, %v9671_v50  ;;  %v5813_v35 = vpop.f32.mrb[167].mxu0  ;;  %v6483_v24 = vpop.permute.xlu0 %6482 }
0x157b   : > { %v5859_v4 = vpack.c.bf16 %v5813_v35, %v5810_v21  ;;  %9704 = vmatpush3.bf16.msra.mxu0 %v10333_v5  ;;  %v15345_v5 = vld [vmem:[#allocation83_spill] sm:$0xff]  ;;  %v6487_v21 = vpop.permute.xlu1 %6486  ;;  %v15348_v35 = vld [vmem:[#allocation85_spill] sm:$0xff] }
0x157c   : > { %9753 = vmatprep.subr.bf16.mxu0 %v6477_v33  ;;  %v15346_v50 = vpack.c.bf16 %v15344_v36, %v15345_v5 }
0x157d   : > { %9689 = vmatprep.mubr.msk.bf16.mxu0 %vm1174_vm0, %v5859_v4 }
0x157e   : > { %9690 = vmatmul.mubr.msk.bf16.gmra.mrb[180].mxu0 %vm1174_vm0, %v5860_v63  ;;  %v15347_v63 = vld [vmem:[#allocation84_spill] sm:$0xff] }
0x157f   : > { %v9675_v8 = vpop.f32.mrb[168].mxu0  ;;  %v15349_v4 = vpack.c.bf16 %v15347_v63, %v15348_v35  ;;  %v15360_v63 = vld [vmem:[#allocation34_spill] sm:$0xff] }
0x1580   : > { %v5826_v10 = vpop.f32.mrb[169].mxu0 }
0x1581   : > { %v9676_v42 = vpop.f32.mrb[170].mxu0 }
0x1582   : > { %v5862_v60 = vpack.c.bf16 %v9676_v42, %v9675_v8  ;;  %v5829_v32 = vpop.f32.mrb[171].mxu0  ;;  %v15351_v42 = vld [vmem:[#allocation31_spill] sm:$0xff] }
0x1583   : > { %v5861_v22 = vpack.c.bf16 %v5829_v32, %v5826_v10  ;;  %v15350_v10 = vld [vmem:[#allocation33_spill] sm:$0xff]  ;;  %v6489_v32 = vpop.permute.xlu0 %6488 }
0x1585   : > { %9693 = vmatprep.mubr.msk.bf16.mxu0 %vm1174_vm0, %v5861_v22 }
0x1586   : > { %9694 = vmatmul.mubr.msk.bf16.gmra.mrb[184].mxu0 %vm1174_vm0, %v5862_v60  ;;  %v15352_v60 = vpack.c.bf16 %v15350_v10, %v15351_v42  ;;  %v15363_v42 = vld [vmem:[#allocation39_spill] sm:$0xff] }
0x15ab   : > { %v9679_v18 = vpop.f32.mrb[172].mxu0 }
0x15ac   : > { %v5842_v41 = vpop.f32.mrb[173].mxu0 }
0x15ad   : > { %v9680_v19 = vpop.f32.mrb[174].mxu0 }
0x15ae   : > { %v5864_v13 = vpack.c.bf16 %v9680_v19, %v9679_v18  ;;  %v5845_v47 = vpop.f32.mrb[175].mxu0  ;;  %v15354_v19 = vld [vmem:[#allocation30_spill] sm:$0xff] }
0x15af   : > { %v5863_v0 = vpack.c.bf16 %v5845_v47, %v5842_v41  ;;  %v15353_v41 = vld [vmem:[#allocation32_spill] sm:$0xff] }
0x15b1   : > { %9697 = vmatprep.mubr.msk.bf16.mxu0 %vm1174_vm0, %v5863_v0  ;;  %v15356_v0 = vld [vmem:[#allocation37_spill] sm:$0xff] }
0x15b2   : > { %9698 = vmatmul.mubr.msk.bf16.gmra.mrb[188].mxu0 %vm1174_vm0, %v5864_v13  ;;  %v15355_v13 = vpack.c.bf16 %v15353_v41, %v15354_v19 }
0x15b3   : > { %9705 = vmatprep.mubr.msk.bf16.mxu0 %vm1174_vm0, %v15346_v50 }
0x15ba   : > { %9706 = vmatmul.mubr.msk.bf16.vlgmr.msra.gmra.mrb[176].mxu0 %vm1174_vm0, %v15349_v4  ;;  %v6393_v8 = vpop.xlane.xlu1 %6392 }
0x15bb   : > { %9754 = vmatpush3.bf16.msra.mxu0 %v6477_v33  ;;  %9709 = vmatprep.mubr.msk.bf16.mxu0 %vm1174_vm0, %v15352_v60  ;;  %v15357_v33 = vld [vmem:[#allocation35_spill] sm:$0xff] }
0x15bc   : > { %9755 = vmatprep.subr.bf16.mxu0 %v6479_v40  ;;  %v15358_v36 = vpack.c.bf16 %v15356_v0, %v15357_v33  ;;  %v15366_v0 = vld [vmem:[#allocation38_spill] sm:$0xff] }
0x15be   : > { %v6389_v22 = vpop.xlane.xlu1 %6388 }
0x15bf   : > { %9756 = vmatpush3.bf16.msra.mxu0 %v6479_v40  ;;  %10834 = vrcp.f32 %v6389_v22  ;;  %v15359_v40 = vld [vmem:[#allocation36_spill] sm:$0xff] }
0x15c0   : > { %9757 = vmatprep.subr.bf16.mxu0 %v6481_v49  ;;  %v15361_v35 = vpack.c.bf16 %v15359_v40, %v15360_v63 }
0x15c2   : > { %v6401_v18 = vpop.xlane.xlu0 %6400  ;;  %9710 = vmatmul.mubr.msk.bf16.gmra.mrb[180].mxu0 %vm1174_vm0, %v15355_v13  ;;  %v6395_v47 = vpop.xlane.xlu1 %6394  ;;  %v15365_v13 = vld [vmem:[#allocation40_spill] sm:$0xff] }
0x15c3   : > { %9758 = vmatpush3.bf16.msra.mxu0 %v6481_v49  ;;  %9713 = vmatprep.mubr.msk.bf16.mxu0 %vm1174_vm0, %v15358_v36  ;;  %v15362_v49 = vld [vmem:[#allocation41_spill] sm:$0xff]  ;;  %v15367_v33 = vpack.c.bf16 %v15365_v13, %v15366_v0 }
0x15c4   : > { %9759 = vmatprep.subr.bf16.mxu0 %v6483_v24  ;;  %v15364_v60 = vpack.c.bf16 %v15362_v49, %v15363_v42 }
0x15c6   : > { %v6397_v5 = vpop.xlane.xlu0 %6396  ;;  %v6391_v50 = vpop.xlane.xlu1 %6390 }
0x15c7   : > { %9760 = vmatpush3.bf16.msra.mxu0 %v6483_v24  ;;  %10836 = vrcp.f32 %v6391_v50 }
0x15c8   : > { %9761 = vmatprep.subr.bf16.mxu0 %v6485_v34  ;;  %10838 = vrcp.f32 %v6395_v47 }
0x15c9   : > { %v10835_v41 = vpop.eup %10834 }
0x15ca   : > { %9714 = vmatmul.mubr.msk.bf16.gmra.mrb[184].mxu0 %vm1174_vm0, %v15361_v35  ;;  %v6403_v4 = vpop.xlane.xlu0 %6402  ;;  %v6399_v10 = vpop.xlane.xlu1 %6398  ;;  %v6452_v47 = vmul.f32 %v10835_v41, %v14152_v16 }
0x15cb   : > { %9762 = vmatpush3.bf16.msra.mxu0 %v6485_v34  ;;  %9717 = vmatprep.mubr.msk.bf16.mxu0 %vm1174_vm0, %v15364_v60  ;;  %10840 = vrcp.f32 %v6399_v10 }
0x15cc   : > { %9763 = vmatprep.subr.bf16.mxu0 %v6487_v21  ;;  %10842 = vrcp.f32 %v6393_v8 }
0x15cd   : > { %10844 = vrcp.f32 %v6397_v5 }
0x15ce   : > { %v6409_v24 = vpop.xlane.xlu0 %6408  ;;  %v6407_v22 = vpop.xlane.xlu1 %6406  ;;  %10846 = vrcp.f32 %v6403_v4 }
0x15cf   : > { %9764 = vmatpush3.bf16.msra.mxu0 %v6487_v21 }
0x15d0   : > { %9765 = vmatprep.subr.bf16.mxu0 %v6489_v32 }
0x15d1   : > { %v10837_v19 = vpop.eup %10836 }
0x15d2   : > { %9718 = vmatmul.mubr.msk.bf16.gmra.mrb[188].mxu0 %vm1174_vm0, %v15367_v33  ;;  %v6405_v34 = vpop.xlane.xlu0 %6404  ;;  %v6417_v36 = vpop.xlane.xlu1 %6416  ;;  %v6453_v50 = vmul.f32 %v10837_v19, %v14165_v17 }
0x15d3   : > { %9766 = vmatpush3.bf16.msra.mxu0 %v6489_v32  ;;  %10848 = vrcp.f32 %v6405_v34  ;;  %v10839_v5 = vpop.eup %10838 }
0x15d4   : > { %v6468_v8 = vpack.c.bf16 %v6453_v50, %v6452_v47  ;;  %10850 = vrcp.f32 %v6401_v18  ;;  %v6455_v49 = vmul.f32 %v10839_v5, %v14156_v12 }
0x15d5   : > { %v10841_v63 = vpop.eup %10840  ;;  %10852 = vrcp.f32 %v6407_v22 }
0x15d6   : > { %v6411_v21 = vpop.xlane.xlu0 %6410  ;;  %v6413_v40 = vpop.xlane.xlu1 %6412  ;;  %9769 = vmatprep.mubr.bf16.mxu0 %v6468_v8  ;;  %v6457_v16 = vmul.f32 %v10841_v63, %v14172_v26 }
0x15d7   : > { %v10843_v35 = vpop.eup %10842  ;;  %10854 = vrcp.f32 %v6411_v21 }
0x15d8   : > { %v10845_v10 = vpop.eup %10844  ;;  %v6454_v17 = vmul.f32 %v10843_v35, %v14147_v43 }
0x15d9   : > { %v6456_v18 = vmul.f32 %v10845_v10, %v14167_v14  ;;  %v10847_v60 = vpop.eup %10846 }
0x15da   : > { %v6415_v42 = vpop.xlane.xlu0 %6414  ;;  %v6491_v32 = vpop.permute.xlu1 %6490  ;;  %v6469_v4 = vpack.c.bf16 %v6455_v49, %v6454_v17  ;;  %v6459_v43 = vmul.f32 %v10847_v60, %v14174_v58 }
0x15db   : > { %9767 = vmatprep.subr.bf16.mxu0 %v6491_v32  ;;  %10856 = vrcp.f32 %v6415_v42  ;;  %v6470_v22 = vpack.c.bf16 %v6457_v16, %v6456_v18 }
0x15dc   : > { %9768 = vmatpush3.bf16.msra.mxu0 %v6491_v32  ;;  %10858 = vrcp.f32 %v6409_v24 }
0x15dd   : > { %v10849_v41 = vpop.eup %10848  ;;  %10860 = vrcp.f32 %v6413_v40 }
0x15de   : > { %v10851_v12 = vpop.eup %10850  ;;  %v6419_v26 = vpop.xlane.xlu0 %6418  ;;  %v6460_v34 = vmul.f32 %v10849_v41, %v14185_v20 }
0x15df   : > { %9770 = vmatmul.mubr.bf16.vlgmr.msra.gmra.mrb[192].mxu0 %v6469_v4  ;;  %v10853_v13 = vpop.eup %10852  ;;  %v6458_v24 = vmul.f32 %v10851_v12, %v14158_v23  ;;  %10862 = vrcp.f32 %v6419_v26 }
0x15e0   : > { %9773 = vmatprep.mubr.bf16.mxu0 %v6470_v22  ;;  %v9823_v19 = vpop.f32.mrb[176].mxu1  ;;  %v6461_v50 = vmul.f32 %v10853_v13, %v14179_v55  ;;  %10864 = vrcp.f32 %v6417_v36 }
0x15e1   : > { %v6868_v0 = vpop.f32.mrb[177].mxu1  ;;  %v6471_v8 = vpack.c.bf16 %v6459_v43, %v6458_v24  ;;  %v10855_v5 = vpop.eup %10854  ;;  %v14266_v55 = vadd.f32 %v9823_v19, %v15326_v15 }
0x15e2   : > { %v14254_v33 = vadd.f32 %v6868_v0, %v11776_v57  ;;  %v9824_v14 = vpop.f32.mrb[178].mxu1  ;;  %v6472_v58 = vpack.c.bf16 %v6461_v50, %v6460_v34  ;;  %v6463_v35 = vmul.f32 %v10855_v5, %v14191_v28 }
0x15e3   : > { %v6871_v47 = vpop.f32.mrb[179].mxu1  ;;  %v14277_v15 = vadd.f32 %v9824_v14, %v15187_v27 }
0x15e4   : > { %6931 = vmax.xlane.f32.xlu0 %v14254_v33  ;;  %v14261_v21 = vadd.f32 %v6871_v47, %v11793_v46 }
0x15e5   : > { %v10857_v57 = vpop.eup %10856 }
0x15e6   : > { %v10859_v40 = vpop.eup %10858  ;;  %v6465_v10 = vmul.f32 %v10857_v57, %v14197_v52 }
0x15e7   : > { %9774 = vmatmul.mubr.bf16.gmra.mrb[196].mxu0 %v6471_v8  ;;  %v10861_v23 = vpop.eup %10860  ;;  %v6462_v42 = vmul.f32 %v10859_v40, %v14181_v2 }
0x15e8   : > { %v9827_v63 = vpop.f32.mrb[180].mxu1  ;;  %6933 = vmax.xlane.f32.xlu0 %v14261_v21  ;;  %9777 = vmatprep.mubr.bf16.mxu0 %v6472_v58  ;;  %v6464_v32 = vmul.f32 %v10861_v23, %v14193_v3 }
0x15e9   : > { %v6884_v20 = vpop.f32.mrb[181].mxu1  ;;  %v6473_v16 = vpack.c.bf16 %v6463_v35, %v6462_v42  ;;  %v10863_v28 = vpop.eup %10862  ;;  %v6893_v41 = vadd.f32 %v9827_v63, %v15331_v29 }
0x15ea   : > { %v14269_v36 = vadd.f32 %v6884_v20, %v15329_v38  ;;  %v9828_v46 = vpop.f32.mrb[182].mxu1  ;;  %v6474_v17 = vpack.c.bf16 %v6465_v10, %v6464_v32  ;;  %v10865_v38 = vpop.eup %10864  ;;  %v6467_v2 = vmul.f32 %v10863_v28, %v14200_v59 }
0x15eb   : > { %v6887_v49 = vpop.f32.mrb[183].mxu1  ;;  %v6466_v22 = vmul.f32 %v10865_v38, %v14187_v11  ;;  %v14291_v59 = vadd.f32 %v9828_v46, %v15287_v30  ;;  %v10334_v30 = vld [vmem:[#allocation7 + $0x60] sm:$0xff]  }
0x15ec   : > { %6939 = vmax.xlane.f32.xlu1 %v14269_v36  ;;  %6935 = vmax.xlane.f32.xlu0 %v14266_v55  ;;  %v14282_v4 = vadd.f32 %v6887_v49, %v15288_v37 }
0x15ed   : > { %v6475_v27 = vpack.c.bf16 %v6467_v2, %v6466_v22  ;;  %9785 = vmatprep.subr.bf16.mxu0 %v10334_v30 }
0x15ee   : > { %9786 = vmatpush3.bf16.msra.mxu0 %v10334_v30 }
0x15ef   : > { %9778 = vmatmul.mubr.bf16.gmra.mrb[200].mxu0 %v6473_v16 }
0x15f0   : > { %v9831_v18 = vpop.f32.mrb[184].mxu1  ;;  %6937 = vmax.xlane.f32.xlu0 %v14277_v15  ;;  %9781 = vmatprep.mubr.bf16.mxu0 %v6474_v17 }
0x15f1   : > { %v6900_v52 = vpop.f32.mrb[185].mxu1 }
0x15f2   : > { %v9832_v60 = vpop.f32.mrb[186].mxu1  ;;  %v14296_v11 = vadd.f32 %v6900_v52, %v15333_v7  ;;  %v10335_v7 = vld [vmem:[#allocation7 + $0x68] sm:$0xff]  }
0x15f3   : > { %v6903_v3 = vpop.f32.mrb[187].mxu1  ;;  %v14308_v0 = vadd.f32 %v9832_v60, %v15307_v45  ;;  %9787 = vmatprep.subr.bf16.mxu0 %v10335_v7 }
0x15f4   : > { %6941 = vmax.xlane.f32.xlu0 %v14282_v4  ;;  %v14300_v29 = vadd.f32 %v6903_v3, %v15290_v25  ;;  %9788 = vmatpush3.bf16.msra.mxu0 %v10335_v7 }
0x15f7   : > { %9782 = vmatmul.mubr.bf16.gmra.mrb[204].mxu0 %v6475_v27 }
0x15f8   : > { %v9835_v12 = vpop.f32.mrb[188].mxu1  ;;  %6943 = vmax.xlane.f32.xlu0 %v6893_v41 }
0x15f9   : > { %v14288_v19 = vadd.f32 %v9835_v12, %v15339_v31  ;;  %v6916_v13 = vpop.f32.mrb[189].mxu1  ;;  %v14304_v31 = vadd.f32 %v9831_v18, %v15335_v61 }
0x15fa   : > { %v9836_v37 = vpop.f32.mrb[190].mxu1  ;;  %v14314_v25 = vadd.f32 %v6916_v13, %v15337_v53 }
0x15fb   : > { %v6919_v26 = vpop.f32.mrb[191].mxu1  ;;  %6959 = vmax.xlane.f32.xlu1 %v14288_v19  ;;  %v14326_v61 = vadd.f32 %v9836_v37, %v15311_v6 }
0x15fc   : > { %6945 = vmax.xlane.f32.xlu0 %v14291_v59  ;;  %v14320_v45 = vadd.f32 %v6919_v26, %v15310_v54 }
0x1600   : > { %6947 = vmax.xlane.f32.xlu0 %v14296_v11 }
0x1604   : > { %6949 = vmax.xlane.f32.xlu0 %v14300_v29 }
0x1608   : > { %6951 = vmax.xlane.f32.xlu0 %v14304_v31 }
0x160c   : > { %7099 = vrot.lane.b32.xlu1 %v15341_v44, %s11210_s11  ;;  %6953 = vmax.xlane.f32.xlu0 %v14308_v0 }
0x1610   : > { %7103 = vrot.lane.b32.xlu1 %v15342_v39, %s11210_s11  ;;  %6955 = vmax.xlane.f32.xlu0 %v14314_v25 }
0x1614   : > { %7105 = vrot.lane.b32.xlu1 %v15343_v62, %s11210_s11  ;;  %6957 = vmax.xlane.f32.xlu0 %v14320_v45 }
0x1618   : > { %7111 = vrot.lane.b32.xlu1 %v15323_v1, %s11210_s11  ;;  %6961 = vmax.xlane.f32.xlu0 %v14326_v61 }
0x162e   : > { %7101 = vrot.lane.b32.xlu0 %v13362_v9, %s11210_s11 }
0x1632   : > { %7107 = vrot.lane.b32.xlu0 %v15325_v48, %s11210_s11 }
0x1636   : > { %7109 = vrot.lane.b32.xlu0 %v15328_v51, %s11210_s11 }
0x1671   : > { %v6932_v54 = vpop.xlane.xlu0 %6931 }
0x1672   : > { %v6963_v6 = vsub.f32 %v14254_v33, %v6932_v54 }
0x1674   : > { %v6979_v43 = vmul.f32 1.442695, %v6963_v6 }
0x1675   : > { %v6934_v53 = vpop.xlane.xlu0 %6933 }
0x1676   : > { %v6964_v9 = vsub.f32 %v14261_v21, %v6934_v53 }
0x1678   : > { %v6981_v51 = vmul.f32 1.442695, %v6964_v9 }
0x1679   : > { %v6936_v44 = vpop.xlane.xlu0 %6935  ;;  %v6940_v48 = vpop.xlane.xlu1 %6939 }
0x167a   : > { %v6965_v39 = vsub.f32 %v14266_v55, %v6936_v44  ;;  %v6967_v24 = vsub.f32 %v14269_v36, %v6940_v48 }
0x167c   : > { %v6983_v62 = vmul.f32 1.442695, %v6965_v39  ;;  %v6987_v40 = vmul.f32 1.442695, %v6967_v24 }
0x167d   : > { %v6938_v1 = vpop.xlane.xlu0 %6937 }
0x167e   : > { %10866 = vpow2.f32 %v6983_v62  ;;  %v6966_v14 = vsub.f32 %v14277_v15, %v6938_v1 }
0x167f   : > { %10868 = vpow2.f32 %v6979_v43 }
0x1680   : > { %v6985_v47 = vmul.f32 1.442695, %v6966_v14 }
0x1681   : > { %v6942_v34 = vpop.xlane.xlu0 %6941 }
0x1682   : > { %10870 = vpow2.f32 %v6985_v47  ;;  %v6968_v33 = vsub.f32 %v14282_v4, %v6942_v34 }
0x1683   : > { %10872 = vpow2.f32 %v6981_v51 }
0x1684   : > { %v6989_v63 = vmul.f32 1.442695, %v6968_v33 }
0x1685   : > { %v6944_v50 = vpop.xlane.xlu0 %6943 }
0x1686   : > { %v6969_v8 = vsub.f32 %v6893_v41, %v6944_v50 }
0x1688   : > { %v14343_v5 = vpop.eup %10866  ;;  %v6991_v58 = vmul.f32 1.442695, %v6969_v8  ;;  %v6960_v57 = vpop.xlane.xlu1 %6959 }
0x1689   : > { %7015 = vadd.xlane.f32.xlu0 %v14343_v5  ;;  %v6946_v21 = vpop.xlane.xlu0 %6945  ;;  %v14347_v20 = vpop.eup %10868  ;;  %v6977_v10 = vsub.f32 %v14288_v19, %v6960_v57 }
0x168a   : > { %10874 = vpow2.f32 %v6991_v58  ;;  %v6970_v23 = vsub.f32 %v14291_v59, %v6946_v21 }
0x168b   : > { %10876 = vpow2.f32 %v6987_v40  ;;  %v7007_v15 = vmul.f32 1.442695, %v6977_v10 }
0x168c   : > { %v14349_v35 = vpop.permute.xlu1 %7099  ;;  %10878 = vpow2.f32 %v6989_v63  ;;  %v6993_v36 = vmul.f32 1.442695, %v6970_v23  ;;  %v14353_v46 = vpop.eup %10870 }
0x168d   : > { %7011 = vadd.xlane.f32.xlu0 %v14347_v20  ;;  %v6948_v55 = vpop.xlane.xlu0 %6947  ;;  %9837 = vmatprep.subr.bf16.mxu0 %v14349_v35  ;;  %v14358_v32 = vpop.eup %10872 }
0x168e   : > { %10880 = vpow2.f32 %v6993_v36  ;;  %v6971_v38 = vsub.f32 %v14296_v11, %v6948_v55 }
0x1690   : > { %v6995_v3 = vmul.f32 1.442695, %v6971_v38  ;;  %v7104_v48 = vpop.permute.xlu1 %7103 }
0x1691   : > { %7017 = vadd.xlane.f32.xlu0 %v14353_v46  ;;  %v6950_v49 = vpop.xlane.xlu0 %6949 }
0x1692   : > { %v6972_v42 = vsub.f32 %v14300_v29, %v6950_v49 }
0x1694   : > { %v14360_v16 = vpop.eup %10874  ;;  %v6997_v28 = vmul.f32 1.442695, %v6972_v42  ;;  %v7106_v33 = vpop.permute.xlu1 %7105 }
0x1695   : > { %7013 = vadd.xlane.f32.xlu0 %v14358_v32  ;;  %7023 = vadd.xlane.f32.xlu1 %v14360_v16  ;;  %v6952_v17 = vpop.xlane.xlu0 %6951  ;;  %v14366_v52 = vpop.eup %10876 }
0x1696   : > { %10882 = vpow2.f32 %v6997_v28  ;;  %v6973_v18 = vsub.f32 %v14304_v31, %v6952_v17  ;;  %v14368_v2 = vpop.eup %10878 }
0x1697   : > { %10884 = vpow2.f32 %v7007_v15 }
0x1698   : > { %v6999_v4 = vmul.f32 1.442695, %v6973_v18  ;;  %v14373_v27 = vpop.eup %10880  ;;  %v7112_v28 = vpop.permute.xlu1 %7111 }
0x1699   : > { %7021 = vadd.xlane.f32.xlu0 %v14368_v2  ;;  %v6954_v60 = vpop.xlane.xlu0 %6953  ;;  %7019 = vadd.xlane.f32.xlu1 %v14366_v52 }
0x169a   : > { %10886 = vpow2.f32 %v6999_v4  ;;  %v6974_v22 = vsub.f32 %v14308_v0, %v6954_v60 }
0x169b   : > { %10888 = vpow2.f32 %v6995_v3 }
0x169c   : > { %v7001_v12 = vmul.f32 1.442695, %v6974_v22 }
0x169d   : > { %v6956_v41 = vpop.xlane.xlu0 %6955  ;;  %7025 = vadd.xlane.f32.xlu1 %v14373_v27 }
0x169e   : > { %v6975_v19 = vsub.f32 %v14314_v25, %v6956_v41  ;;  %10890 = vpow2.f32 %v7001_v12 }
0x16a0   : > { %v14377_v13 = vpop.eup %10882  ;;  %v7003_v59 = vmul.f32 1.442695, %v6975_v19 }
0x16a1   : > { %7029 = vadd.xlane.f32.xlu0 %v14377_v13  ;;  %v6958_v37 = vpop.xlane.xlu0 %6957  ;;  %v14381_v11 = vpop.eup %10884 }
0x16a2   : > { %v6976_v26 = vsub.f32 %v14320_v45, %v6958_v37  ;;  %10892 = vpow2.f32 %v7003_v59 }
0x16a4   : > { %v14383_v29 = vpop.eup %10886  ;;  %v7005_v31 = vmul.f32 1.442695, %v6976_v26 }
0x16a5   : > { %v6962_v30 = vpop.xlane.xlu0 %6961  ;;  %7031 = vadd.xlane.f32.xlu1 %v14383_v29  ;;  %7039 = vadd.xlane.f32.xlu0 %v14381_v11  ;;  %v14388_v7 = vpop.eup %10888 }
0x16a6   : > { %10894 = vpow2.f32 %v7005_v31  ;;  %v6978_v0 = vsub.f32 %v14326_v61, %v6962_v30 }
0x16a8   : > { %v7009_v25 = vmul.f32 1.442695, %v6978_v0  ;;  %v14391_v45 = vpop.eup %10890 }
0x16a9   : > { %7027 = vadd.xlane.f32.xlu1 %v14388_v7  ;;  %v7102_v14 = vpop.permute.xlu0 %7101 }
0x16aa   : > { %10896 = vpow2.f32 %v7009_v25 }
0x16ac   : > { %v14394_v54 = vpop.eup %10892 }
0x16ad   : > { %7033 = vadd.xlane.f32.xlu1 %v14391_v45  ;;  %v7108_v57 = vpop.permute.xlu0 %7107 }
0x16b0   : > { %v14396_v53 = vpop.eup %10894 }
0x16b1   : > { %7035 = vadd.xlane.f32.xlu1 %v14394_v54  ;;  %7037 = vadd.xlane.f32.xlu0 %v14396_v53 }
0x16b2   : > { %v9771_v44 = vpop.f32.mrb[192].mxu0 }
0x16b3   : > { %v6534_v61 = vpop.f32.mrb[193].mxu0 }
0x16b4   : > { %v14400_v6 = vpop.eup %10896  ;;  %v9772_v39 = vpop.f32.mrb[194].mxu0 }
0x16b5   : > { %v6598_v62 = vpack.c.bf16 %v9772_v39, %v9771_v44  ;;  %v6537_v1 = vpop.f32.mrb[195].mxu0  ;;  %7041 = vadd.xlane.f32.xlu1 %v14400_v6 }
0x16b6   : > { %v6597_v43 = vpack.c.bf16 %v6537_v1, %v6534_v61  ;;  %v10336_v1 = vld [vmem:[#allocation7 + $0x70] sm:$0xff]  }
0x16b8   : > { %9789 = vmatprep.mubr.msk.bf16.mxu0 %vm1174_vm0, %v6597_v43 }
0x16b9   : > { %9790 = vmatmul.mubr.msk.bf16.vlgmr.msra.gmra.mrb[176].mxu0 %vm1174_vm0, %v6598_v62 }
0x16ba   : > { %9838 = vmatpush3.bf16.msra.mxu0 %v14349_v35  ;;  %v9775_v9 = vpop.f32.mrb[196].mxu0  ;;  %v7110_v35 = vpop.permute.xlu0 %7109 }
0x16bb   : > { %9839 = vmatprep.subr.bf16.mxu0 %v7102_v14  ;;  %v6550_v34 = vpop.f32.mrb[197].mxu0 }
0x16bc   : > { %v9776_v47 = vpop.f32.mrb[198].mxu0 }
0x16bd   : > { %v6600_v51 = vpack.c.bf16 %v9776_v47, %v9775_v9  ;;  %v6553_v24 = vpop.f32.mrb[199].mxu0 }
0x16be   : > { %v6599_v50 = vpack.c.bf16 %v6553_v24, %v6550_v34  ;;  %9840 = vmatpush3.bf16.msra.mxu0 %v7102_v14 }
0x16bf   : > { %9841 = vmatprep.subr.bf16.mxu0 %v7104_v48 }
0x16c0   : > { %9793 = vmatprep.mubr.msk.bf16.mxu0 %vm1174_vm0, %v6599_v50 }
0x16c1   : > { %9794 = vmatmul.mubr.msk.bf16.gmra.mrb[180].mxu0 %vm1174_vm0, %v6600_v51  ;;  %v10337_v51 = vld [vmem:[#allocation7 + $0x78] sm:$0xff]  }
0x16c2   : > { %9842 = vmatpush3.bf16.msra.mxu0 %v7104_v48  ;;  %v9779_v8 = vpop.f32.mrb[200].mxu0 }
0x16c3   : > { %9843 = vmatprep.subr.bf16.mxu0 %v7106_v33  ;;  %v6566_v58 = vpop.f32.mrb[201].mxu0 }
0x16c4   : > { %v9780_v40 = vpop.f32.mrb[202].mxu0 }
0x16c5   : > { %v6602_v21 = vpack.c.bf16 %v9780_v40, %v9779_v8  ;;  %v6569_v63 = vpop.f32.mrb[203].mxu0 }
0x16c6   : > { %v6601_v23 = vpack.c.bf16 %v6569_v63, %v6566_v58  ;;  %9844 = vmatpush3.bf16.msra.mxu0 %v7106_v33 }
0x16c7   : > { %9845 = vmatprep.subr.bf16.mxu0 %v7108_v57  ;;  %7113 = vrot.lane.b32.xlu0 %v15322_v56, %s11210_s11 }
0x16c8   : > { %9797 = vmatprep.mubr.msk.bf16.mxu0 %vm1174_vm0, %v6601_v23 }
0x16c9   : > { %9798 = vmatmul.mubr.msk.bf16.gmra.mrb[184].mxu0 %vm1174_vm0, %v6602_v21 }
0x16ca   : > { %9846 = vmatpush3.bf16.msra.mxu0 %v7108_v57  ;;  %v9783_v55 = vpop.f32.mrb[204].mxu0 }
0x16cb   : > { %9847 = vmatprep.subr.bf16.mxu0 %v7110_v35  ;;  %v6582_v36 = vpop.f32.mrb[205].mxu0 }
0x16cc   : > { %v9784_v10 = vpop.f32.mrb[206].mxu0 }
0x16cd   : > { %v6604_v49 = vpack.c.bf16 %v9784_v10, %v9783_v55  ;;  %v6585_v42 = vpop.f32.mrb[207].mxu0 }
0x16ce   : > { %v6603_v15 = vpack.c.bf16 %v6585_v42, %v6582_v36  ;;  %9848 = vmatpush3.bf16.msra.mxu0 %v7110_v35 }
0x16cf   : > { %9849 = vmatprep.subr.bf16.mxu0 %v7112_v28 }
0x16d0   : > { %9801 = vmatprep.mubr.msk.bf16.mxu0 %vm1174_vm0, %v6603_v15 }
0x16d1   : > { %9802 = vmatmul.mubr.msk.bf16.gmra.mrb[188].mxu0 %vm1174_vm0, %v6604_v49 }
0x16d2   : > { %9850 = vmatpush3.bf16.msra.mxu0 %v7112_v28 }
0x1716   : > { %v7016_v56 = vpop.xlane.xlu0 %7015 }
0x171a   : > { %v7012_v17 = vpop.xlane.xlu0 %7011 }
0x171b   : > { %10898 = vrcp.f32 %v7012_v17 }
0x171e   : > { %v7018_v38 = vpop.xlane.xlu0 %7017 }
0x1722   : > { %v7014_v18 = vpop.xlane.xlu0 %7013  ;;  %v7024_v4 = vpop.xlane.xlu1 %7023 }
0x1723   : > { %10900 = vrcp.f32 %v7014_v18 }
0x1724   : > { %10902 = vrcp.f32 %v7018_v38 }
0x1725   : > { %v10899_v3 = vpop.eup %10898 }
0x1726   : > { %v7020_v60 = vpop.xlane.xlu1 %7019  ;;  %v7075_v12 = vmul.f32 %v10899_v3, %v14347_v20  ;;  %v7022_v59 = vpop.xlane.xlu0 %7021 }
0x1727   : > { %10904 = vrcp.f32 %v7022_v59 }
0x1728   : > { %10906 = vrcp.f32 %v7020_v60 }
0x1729   : > { %10908 = vrcp.f32 %v7016_v56 }
0x172a   : > { %v7026_v41 = vpop.xlane.xlu1 %7025 }
0x172b   : > { %10910 = vrcp.f32 %v7026_v41 }
0x172d   : > { %v10901_v22 = vpop.eup %10900 }
0x172e   : > { %v7076_v19 = vmul.f32 %v10901_v22, %v14358_v32  ;;  %v7030_v31 = vpop.xlane.xlu0 %7029  ;;  %v10903_v44 = vpop.eup %10902 }
0x172f   : > { %v7078_v62 = vmul.f32 %v10903_v44, %v14353_v46 }
0x1730   : > { %v7091_v37 = vpack.c.bf16 %v7076_v19, %v7075_v12 }
0x1731   : > { %v10905_v61 = vpop.eup %10904 }
0x1732   : > { %9853 = vmatprep.mubr.bf16.mxu0 %v7091_v37  ;;  %v7032_v26 = vpop.xlane.xlu1 %7031  ;;  %v7040_v0 = vpop.xlane.xlu0 %7039  ;;  %v7080_v34 = vmul.f32 %v10905_v61, %v14368_v2  ;;  %v14438_v61 = vld [vmem:[#allocation11 + $0x10] sm:$0xff] }
0x1733   : > { %v10907_v39 = vpop.eup %10906 }
0x1734   : > { %v10909_v32 = vpop.eup %10908  ;;  %v7079_v9 = vmul.f32 %v10907_v39, %v14366_v52 }
0x1735   : > { %v7077_v48 = vmul.f32 %v10909_v32, %v14343_v5  ;;  %v10911_v24 = vpop.eup %10910 }
0x1736   : > { %v7028_v30 = vpop.xlane.xlu1 %7027  ;;  %v7093_v46 = vpack.c.bf16 %v7080_v34, %v7079_v9  ;;  %v7082_v5 = vmul.f32 %v10911_v24, %v14373_v27  ;;  %v15370_v9 = vld [vmem:[#allocation57_spill] sm:$0xff] }
0x1737   : > { %10912 = vrcp.f32 %v7028_v30  ;;  %v7092_v47 = vpack.c.bf16 %v7078_v62, %v7077_v48 }
0x1738   : > { %10914 = vrcp.f32 %v7024_v4 }
0x1739   : > { %10916 = vrcp.f32 %v7030_v31 }
0x173a   : > { %v7034_v25 = vpop.xlane.xlu1 %7033 }
0x173b   : > { %10918 = vrcp.f32 %v7034_v25 }
0x173e   : > { %v7038_v20 = vpop.xlane.xlu0 %7037  ;;  %v7036_v43 = vpop.xlane.xlu1 %7035 }
0x173f   : > { %10920 = vrcp.f32 %v7038_v20  ;;  %v15368_v20 = vld [vmem:[#allocation28_spill] sm:$0xff] }
0x1740   : > { %10922 = vrcp.f32 %v7036_v43  ;;  %v15369_v39 = vsub.s32 3, %v15368_v20 }
0x1741   : > { %10924 = vrcp.f32 %v7032_v26  ;;  %v10913_v50 = vpop.eup %10912 }
0x1742   : > { %v7114_v14 = vpop.permute.xlu0 %7113  ;;  %v10915_v33 = vpop.eup %10914  ;;  %v7083_v8 = vmul.f32 %v10913_v50, %v14388_v7  ;;  %v7380_v32 = vrot.slane %v14438_v61, %v15369_v39  ;;  %v15384_v39 = vld [vmem:[#allocation72_spill] sm:$0xff] }
0x1743   : > { %9851 = vmatprep.subr.bf16.mxu0 %v7114_v14  ;;  %v10917_v52 = vpop.eup %10916  ;;  %v7042_v2 = vpop.xlane.xlu1 %7041  ;;  %v7081_v58 = vmul.f32 %v10915_v33, %v14360_v16 }
0x1744   : > { %9852 = vmatpush3.bf16.msra.mxu0 %v7114_v14  ;;  %10926 = vrcp.f32 %v7042_v2  ;;  %v7084_v57 = vmul.f32 %v10917_v52, %v14377_v13  ;;  %v15372_v2 = vld [vmem:[#allocation48_spill] sm:$0xff] }
0x1745   : > { %9869 = vmatprep.subr.bf16.mxu0 %v10336_v1  ;;  %v10919_v40 = vpop.eup %10918  ;;  %v7094_v21 = vpack.c.bf16 %v7082_v5, %v7081_v58  ;;  %10928 = vrcp.f32 %v7040_v0 }
0x1746   : > { %v7095_v23 = vpack.c.bf16 %v7084_v57, %v7083_v8  ;;  %v7086_v27 = vmul.f32 %v10919_v40, %v14391_v45  ;;  %v15373_v40 = vld [vmem:[#allocation52_spill] sm:$0xff] }
0x1747   : > { %9854 = vmatmul.mubr.bf16.vlgmr.msra.gmra.mrb[208].mxu0 %v7092_v47 }
0x1748   : > { %9857 = vmatprep.mubr.bf16.mxu0 %v7093_v46  ;;  %9870 = vmatpush3.bf16.msra.mxu0 %v10336_v1 }
0x1749   : > { %9871 = vmatprep.subr.bf16.mxu0 %v10337_v51  ;;  %v10921_v63 = vpop.eup %10920 }
0x174a   : > { %v10923_v35 = vpop.eup %10922  ;;  %v7088_v7 = vmul.f32 %v10921_v63, %v14396_v53  ;;  %v15374_v63 = vld [vmem:[#allocation87_spill] sm:$0xff] }
0x174b   : > { %v10925_v55 = vpop.eup %10924  ;;  %v7087_v36 = vmul.f32 %v10923_v35, %v14394_v54 }
0x174c   : > { %9872 = vmatpush3.bf16.msra.mxu0 %v10337_v51  ;;  %v7085_v16 = vmul.f32 %v10925_v55, %v14383_v29  ;;  %v15371_v51 = vld [vmem:[#allocation86_spill] sm:$0xff] }
0x174d   : > { %v7097_v49 = vpack.c.bf16 %v7088_v7, %v7087_v36 }
0x174e   : > { %v7096_v10 = vpack.c.bf16 %v7086_v27, %v7085_v16  ;;  %v10927_v13 = vpop.eup %10926  ;;  %v15375_v16 = vld [vmem:[#allocation53_spill] sm:$0xff] }
0x174f   : > { %9858 = vmatmul.mubr.bf16.gmra.mrb[212].mxu0 %v7094_v21  ;;  %v10929_v42 = vpop.eup %10928  ;;  %v7090_v28 = vmul.f32 %v10927_v13, %v14400_v6 }
0x1750   : > { %9861 = vmatprep.mubr.bf16.mxu0 %v7095_v23  ;;  %v7089_v15 = vmul.f32 %v10929_v42, %v14381_v11 }
0x1752   : > { %v7098_v56 = vpack.c.bf16 %v7090_v28, %v7089_v15 }
0x1757   : > { %9862 = vmatmul.mubr.bf16.gmra.mrb[216].mxu0 %v7096_v10 }
0x1758   : > { %9865 = vmatprep.mubr.bf16.mxu0 %v7097_v49  ;;  %v15376_v49 = vld [vmem:[#allocation49_spill] sm:$0xff] }
0x175f   : > { %9866 = vmatmul.mubr.bf16.gmra.mrb[220].mxu0 %v7098_v56 }
0x181a   : > { %v9855_v17 = vpop.f32.mrb[208].mxu0 }
0x181b   : > { %v7157_v45 = vpop.f32.mrb[209].mxu0 }
0x181c   : > { %v9856_v38 = vpop.f32.mrb[210].mxu0 }
0x181d   : > { %v7221_v54 = vpack.c.bf16 %v9856_v38, %v9855_v17  ;;  %v7160_v18 = vpop.f32.mrb[211].mxu0  ;;  %v15377_v38 = vld [vmem:[#allocation51_spill] sm:$0xff] }
0x181e   : > { %v7220_v53 = vpack.c.bf16 %v7160_v18, %v7157_v45 }
0x1820   : > { %9873 = vmatprep.mubr.msk.bf16.mxu0 %vm1174_vm0, %v7220_v53  ;;  %v15378_v53 = vld [vmem:[#allocation70_spill] sm:$0xff] }
0x1821   : > { %9874 = vmatmul.mubr.msk.bf16.vlgmr.msra.gmra.mrb[176].mxu0 %vm1174_vm0, %v7221_v54 }
0x1822   : > { %v9859_v29 = vpop.f32.mrb[212].mxu0 }
0x1823   : > { %v7173_v4 = vpop.f32.mrb[213].mxu0 }
0x1824   : > { %v9860_v60 = vpop.f32.mrb[214].mxu0 }
0x1825   : > { %v7223_v3 = vpack.c.bf16 %v9860_v60, %v9859_v29  ;;  %v7176_v22 = vpop.f32.mrb[215].mxu0  ;;  %v15379_v60 = vld [vmem:[#allocation54_spill] sm:$0xff] }
0x1826   : > { %v7222_v6 = vpack.c.bf16 %v7176_v22, %v7173_v4 }
0x1828   : > { %9877 = vmatprep.mubr.msk.bf16.mxu0 %vm1174_vm0, %v7222_v6  ;;  %v15380_v6 = vld [vmem:[#allocation50_spill] sm:$0xff] }
0x1829   : > { %9878 = vmatmul.mubr.msk.bf16.gmra.mrb[180].mxu0 %vm1174_vm0, %v7223_v3 }
0x182a   : > { %v9863_v11 = vpop.f32.mrb[216].mxu0 }
0x182b   : > { %v7189_v41 = vpop.f32.mrb[217].mxu0 }
0x182c   : > { %v9864_v12 = vpop.f32.mrb[218].mxu0 }
0x182d   : > { %v7225_v19 = vpack.c.bf16 %v9864_v12, %v9863_v11  ;;  %v7192_v59 = vpop.f32.mrb[219].mxu0  ;;  %v15381_v12 = vld [vmem:[#allocation73_spill] sm:$0xff] }
0x182e   : > { %v7224_v37 = vpack.c.bf16 %v7192_v59, %v7189_v41 }
0x1830   : > { %9881 = vmatprep.mubr.msk.bf16.mxu0 %vm1174_vm0, %v7224_v37  ;;  %v15382_v37 = vld [vmem:[#allocation55_spill] sm:$0xff] }
0x1831   : > { %9882 = vmatmul.mubr.msk.bf16.gmra.mrb[184].mxu0 %vm1174_vm0, %v7225_v19 }
0x1832   : > { %v9867_v26 = vpop.f32.mrb[220].mxu0 }
0x1833   : > { %v7205_v31 = vpop.f32.mrb[221].mxu0 }
0x1834   : > { %v9868_v30 = vpop.f32.mrb[222].mxu0 }
0x1835   : > { %v7227_v0 = vpack.c.bf16 %v9868_v30, %v9867_v26  ;;  %v7208_v25 = vpop.f32.mrb[223].mxu0  ;;  %v15383_v30 = vld [vmem:[#allocation71_spill] sm:$0xff] }
0x1836   : > { %v7226_v44 = vpack.c.bf16 %v7208_v25, %v7205_v31 }
0x1838   : > { %9885 = vmatprep.mubr.msk.bf16.mxu0 %vm1174_vm0, %v7226_v44 }
0x1839   : > { %9886 = vmatmul.mubr.msk.bf16.gmra.mrb[188].mxu0 %vm1174_vm0, %v7227_v0 }
0x18f4   : > { %v9875_v62 = vpop.f32.mrb[176].mxu0 }
0x18f5   : > { %v7383_v1 = vadd.f32 %v9875_v62, %v7380_v32  ;;  %v7298_v43 = vpop.f32.mrb[177].mxu0 }
0x18f6   : > { %v9876_v14 = vpop.f32.mrb[178].mxu0  ;;  %v7381_v48 = vadd.f32 %v7380_v32, %v7298_v43 }
0x18f7   : > { %v14444_v34 = vadd.f32 %v7383_v1, %v15370_v9  ;;  %v7301_v47 = vpop.f32.mrb[179].mxu0  ;;  %v7384_v46 = vadd.f32 %v9876_v14, %v7380_v32  ;;  %v15385_v1 = vld [vmem:[#allocation77_spill] sm:$0xff] }
0x18f8   : > { %v7397_v24 = vadd.f32 %v7381_v48, %v15371_v51  ;;  %v7382_v8 = vadd.f32 %v7380_v32, %v7301_v47 }
0x18f9   : > { %7417 = vadd.xlane.f32.xlu1 %v14444_v34  ;;  %v14449_v5 = vadd.f32 %v7384_v46, %v15372_v2 }
0x18fa   : > { %v7398_v23 = vadd.f32 %v7382_v8, %v15374_v63 }
0x18fc   : > { %v9879_v50 = vpop.f32.mrb[180].mxu0 }
0x18fd   : > { %7413 = vadd.xlane.f32.xlu1 %v7397_v24  ;;  %v7314_v33 = vpop.f32.mrb[181].mxu0  ;;  %v7387_v7 = vadd.f32 %v9879_v50, %v7380_v32 }
0x18fe   : > { %v9880_v52 = vpop.f32.mrb[182].mxu0  ;;  %v7385_v35 = vadd.f32 %v7380_v32, %v7314_v33 }
0x18ff   : > { %v7317_v58 = vpop.f32.mrb[183].mxu0  ;;  %v7403_v42 = vadd.f32 %v7387_v7, %v15376_v49  ;;  %v7388_v28 = vadd.f32 %v9880_v52, %v7380_v32 }
0x1900   : > { %v7386_v57 = vadd.f32 %v7380_v32, %v7317_v58  ;;  %v7401_v10 = vadd.f32 %v7385_v35, %v15375_v16 }
0x1901   : > { %7419 = vadd.xlane.f32.xlu1 %v14449_v5  ;;  %v7404_v54 = vadd.f32 %v7388_v28, %v15377_v38 }
0x1902   : > { %v14453_v21 = vadd.f32 %v7386_v57, %v15373_v40 }
0x1904   : > { %7423 = vadd.xlane.f32.xlu0 %v14453_v21  ;;  %v9883_v55 = vpop.f32.mrb[184].mxu0 }
0x1905   : > { %7415 = vadd.xlane.f32.xlu1 %v7398_v23  ;;  %v7330_v27 = vpop.f32.mrb[185].mxu0  ;;  %v7391_v18 = vadd.f32 %v9883_v55, %v7380_v32 }
0x1906   : > { %v9884_v36 = vpop.f32.mrb[186].mxu0  ;;  %v7389_v22 = vadd.f32 %v7380_v32, %v7330_v27 }
0x1907   : > { %v7333_v13 = vpop.f32.mrb[187].mxu0  ;;  %v14465_v3 = vadd.f32 %v7391_v18, %v15379_v60  ;;  %v7392_v41 = vadd.f32 %v9884_v36, %v7380_v32 }
0x1908   : > { %v14469_v11 = vadd.f32 %v7389_v22, %v15380_v6  ;;  %v7390_v59 = vadd.f32 %v7380_v32, %v7333_v13 }
0x1909   : > { %7421 = vadd.xlane.f32.xlu1 %v7401_v10  ;;  %v14473_v19 = vadd.f32 %v7392_v41, %v15381_v12  ;;  %v10341_v41 = vld [vmem:[#allocation8 + $0x58] sm:$0xff]  }
0x190a   : > { %v14477_v26 = vadd.f32 %v7390_v59, %v15382_v37 }
0x190c   : > { %v9887_v15 = vpop.f32.mrb[188].mxu0 }
0x190d   : > { %v7395_v56 = vadd.f32 %v9887_v15, %v7380_v32  ;;  %7425 = vadd.xlane.f32.xlu1 %v7403_v42  ;;  %v7346_v17 = vpop.f32.mrb[189].mxu0 }
0x190e   : > { %v9888_v45 = vpop.f32.mrb[190].mxu0  ;;  %v7393_v31 = vadd.f32 %v7380_v32, %v7346_v17 }
0x190f   : > { %v14461_v29 = vadd.f32 %v7395_v56, %v15378_v53  ;;  %v7349_v4 = vpop.f32.mrb[191].mxu0  ;;  %v7396_v44 = vadd.f32 %v9888_v45, %v7380_v32  ;;  %v10338_v56 = vld [vmem:[#allocation8 + $0x40] sm:$0xff]   ;;  %v10339_v45 = vld [vmem:[#allocation8 + $0x48] sm:$0xff]  }
0x1910   : > { %v14481_v0 = vadd.f32 %v7393_v31, %v15383_v30  ;;  %v7394_v25 = vadd.f32 %v7380_v32, %v7349_v4  ;;  %9889 = vmatprep.subr.bf16.mxu1 %v10338_v56  ;;  %v10340_v4 = vld [vmem:[#allocation8 + $0x50] sm:$0xff]   ;;  %v10342_v30 = vld [vmem:[#allocation8 + $0x60] sm:$0xff]  }
0x1911   : > { %7427 = vadd.xlane.f32.xlu1 %v7404_v54  ;;  %7441 = vadd.xlane.f32.xlu0 %v14461_v29  ;;  %v14489_v43 = vadd.f32 %v7396_v44, %v15385_v1 }
0x1912   : > { %v14485_v62 = vadd.f32 %v7394_v25, %v15384_v39  ;;  %9890 = vmatpush3.bf16.msra.mxu1 %v10338_v56 }
0x1913   : > { %9891 = vmatprep.subr.bf16.mxu1 %v10339_v45 }
0x1915   : > { %7433 = vadd.xlane.f32.xlu1 %v14465_v3 }
0x1916   : > { %9892 = vmatpush3.bf16.msra.mxu1 %v10339_v45 }
0x1917   : > { %9893 = vmatprep.subr.bf16.mxu1 %v10340_v4 }
0x1919   : > { %7429 = vadd.xlane.f32.xlu1 %v14469_v11 }
0x191a   : > { %9894 = vmatpush3.bf16.msra.mxu1 %v10340_v4 }
0x191b   : > { %9895 = vmatprep.subr.bf16.mxu1 %v10341_v41 }
0x191d   : > { %7435 = vadd.xlane.f32.xlu1 %v14473_v19 }
0x191e   : > { %9896 = vmatpush3.bf16.msra.mxu1 %v10341_v41 }
0x191f   : > { %9897 = vmatprep.subr.bf16.mxu1 %v10342_v30 }
0x1921   : > { %7431 = vadd.xlane.f32.xlu1 %v14477_v26 }
0x1922   : > { %9898 = vmatpush3.bf16.msra.mxu1 %v10342_v30 }
0x1925   : > { %7437 = vadd.xlane.f32.xlu1 %v14481_v0 }
0x1929   : > { %7439 = vadd.xlane.f32.xlu1 %v14485_v62 }
0x192d   : > { %7443 = vadd.xlane.f32.xlu1 %v14489_v43 }
0x1986   : > { %v7418_v14 = vpop.xlane.xlu1 %7417 }
0x1987   : > { %v7447_v48 = vmul.f32 0.0078125, %v7418_v14 }
0x1989   : > { %v14495_v50 = vsub.f32 %v14444_v34, %v7447_v48 }
0x198a   : > { %v7414_v9 = vpop.xlane.xlu1 %7413 }
0x198b   : > { %v7445_v47 = vmul.f32 0.0078125, %v7414_v9  ;;  %v7479_v8 = vmul.f32 %v14495_v50, %v14495_v50  ;;  %v10343_v9 = vld [vmem:[#allocation8 + $0x68] sm:$0xff]  }
0x198c   : > { %9899 = vmatprep.subr.bf16.mxu1 %v10343_v9 }
0x198d   : > { %v14492_v51 = vsub.f32 %v7397_v24, %v7445_v47  ;;  %9900 = vmatpush3.bf16.msra.mxu1 %v10343_v9 }
0x198e   : > { %v7420_v46 = vpop.xlane.xlu1 %7419 }
0x198f   : > { %v7477_v32 = vmul.f32 %v14492_v51, %v14492_v51  ;;  %v7448_v52 = vmul.f32 0.0078125, %v7420_v46 }
0x1991   : > { %7493 = vadd.xlane.f32.xlu0 %v7477_v32  ;;  %v7424_v58 = vpop.xlane.xlu0 %7423  ;;  %v14504_v40 = vsub.f32 %v14449_v5, %v7448_v52 }
0x1992   : > { %v7416_v33 = vpop.xlane.xlu1 %7415  ;;  %v7450_v34 = vmul.f32 0.0078125, %v7424_v58 }
0x1993   : > { %v7446_v2 = vmul.f32 0.0078125, %v7416_v33  ;;  %v7480_v5 = vmul.f32 %v14504_v40, %v14504_v40  ;;  %v10344_v33 = vld [vmem:[#allocation8 + $0x70] sm:$0xff]  }
0x1994   : > { %v14511_v36 = vsub.f32 %v14453_v21, %v7450_v34  ;;  %9901 = vmatprep.subr.bf16.mxu1 %v10344_v33 }
0x1995   : > { %v14501_v57 = vsub.f32 %v7398_v23, %v7446_v2  ;;  %7497 = vadd.xlane.f32.xlu0 %v7479_v8  ;;  %9902 = vmatpush3.bf16.msra.mxu1 %v10344_v33 }
0x1996   : > { %v7422_v24 = vpop.xlane.xlu1 %7421  ;;  %v7482_v21 = vmul.f32 %v14511_v36, %v14511_v36 }
0x1997   : > { %v7449_v63 = vmul.f32 0.0078125, %v7422_v24  ;;  %v7478_v35 = vmul.f32 %v14501_v57, %v14501_v57  ;;  %v14567_v24 = vld [vmem:[#allocation10 + $0x40] sm:$0xff]  }
0x1999   : > { %v14508_v55 = vsub.f32 %v7401_v10, %v7449_v63  ;;  %7495 = vadd.xlane.f32.xlu1 %v7478_v35 }
0x199a   : > { %v7426_v27 = vpop.xlane.xlu1 %7425 }
0x199b   : > { %v7451_v7 = vmul.f32 0.0078125, %v7426_v27  ;;  %v7481_v23 = vmul.f32 %v14508_v55, %v14508_v55 }
0x199d   : > { %v14517_v16 = vsub.f32 %v7403_v42, %v7451_v7  ;;  %7501 = vadd.xlane.f32.xlu0 %v7481_v23  ;;  %7499 = vadd.xlane.f32.xlu1 %v7480_v5 }
0x199e   : > { %v7428_v13 = vpop.xlane.xlu1 %7427  ;;  %v7442_v37 = vpop.xlane.xlu0 %7441 }
0x199f   : > { %v7452_v49 = vmul.f32 0.0078125, %v7428_v13  ;;  %v7483_v10 = vmul.f32 %v14517_v16, %v14517_v16  ;;  %v7459_v25 = vmul.f32 0.0078125, %v7442_v37 }
0x19a1   : > { %v14523_v28 = vsub.f32 %v7404_v54, %v7452_v49  ;;  %7505 = vadd.xlane.f32.xlu0 %v7483_v10  ;;  %7503 = vadd.xlane.f32.xlu1 %v7482_v21  ;;  %v14549_v48 = vsub.f32 %v14461_v29, %v7459_v25 }
0x19a2   : > { %v7434_v15 = vpop.xlane.xlu1 %7433 }
0x19a3   : > { %v7484_v42 = vmul.f32 %v14523_v28, %v14523_v28  ;;  %v7455_v38 = vmul.f32 0.0078125, %v7434_v15  ;;  %v7491_v29 = vmul.f32 %v14549_v48, %v14549_v48 }
0x19a5   : > { %7507 = vadd.xlane.f32.xlu1 %v7484_v42  ;;  %v14531_v60 = vsub.f32 %v14465_v3, %v7455_v38 }
0x19a6   : > { %v7430_v17 = vpop.xlane.xlu1 %7429 }
0x19a7   : > { %v7453_v18 = vmul.f32 0.0078125, %v7430_v17 }
0x19a9   : > { %v14528_v53 = vsub.f32 %v14469_v11, %v7453_v18  ;;  %v7487_v11 = vmul.f32 %v14531_v60, %v14531_v60 }
0x19aa   : > { %v7436_v54 = vpop.xlane.xlu1 %7435 }
0x19ab   : > { %v7485_v22 = vmul.f32 %v14528_v53, %v14528_v53  ;;  %v7456_v12 = vmul.f32 0.0078125, %v7436_v54 }
0x19ad   : > { %7509 = vadd.xlane.f32.xlu0 %v7485_v22  ;;  %v14541_v44 = vsub.f32 %v14473_v19, %v7456_v12 }
0x19ae   : > { %v7432_v6 = vpop.xlane.xlu1 %7431 }
0x19af   : > { %v7454_v59 = vmul.f32 0.0078125, %v7432_v6  ;;  %v7488_v46 = vmul.f32 %v14541_v44, %v14541_v44  ;;  %v15386_v6 = vsub.s32 6, %v15368_v20 }
0x19b1   : > { %v14538_v31 = vsub.f32 %v14477_v26, %v7454_v59  ;;  %7513 = vadd.xlane.f32.xlu0 %v7487_v11  ;;  %v14573_v41 = vrot.slane %v14438_v61, %v15386_v6 }
0x19b2   : > { %v7438_v3 = vpop.xlane.xlu1 %7437 }
0x19b3   : > { %v7457_v39 = vmul.f32 0.0078125, %v7438_v3  ;;  %v7486_v1 = vmul.f32 %v14538_v31, %v14538_v31 }
0x19b5   : > { %v14546_v14 = vsub.f32 %v14481_v0, %v7457_v39  ;;  %7511 = vadd.xlane.f32.xlu1 %v7486_v1 }
0x19b6   : > { %v7440_v26 = vpop.xlane.xlu1 %7439 }
0x19b7   : > { %v7458_v47 = vmul.f32 0.0078125, %v7440_v26  ;;  %v7489_v19 = vmul.f32 %v14546_v14, %v14546_v14  ;;  %v15387_v26 = vsub.s32 7, %v15368_v20 }
0x19b9   : > { %v14556_v32 = vsub.f32 %v14485_v62, %v7458_v47  ;;  %7517 = vadd.xlane.f32.xlu0 %v7489_v19  ;;  %7515 = vadd.xlane.f32.xlu1 %v7488_v46  ;;  %v10345_v62 = vld [vmem:[#allocation8 + $0x78] sm:$0xff]   ;;  %v14582_v9 = vrot.slane %v14438_v61, %v15387_v26 }
0x19ba   : > { %v7444_v0 = vpop.xlane.xlu1 %7443  ;;  %9903 = vmatprep.subr.bf16.mxu1 %v10345_v62 }
0x19bb   : > { %v7460_v52 = vmul.f32 0.0078125, %v7444_v0  ;;  %v7490_v2 = vmul.f32 %v14556_v32, %v14556_v32  ;;  %9904 = vmatpush3.bf16.msra.mxu1 %v10345_v62 }
0x19bc   : > { %9921 = vmatprep.subr.bf16.mxu1 %v14567_v24 }
0x19bd   : > { %v14563_v8 = vsub.f32 %v14489_v43, %v7460_v52  ;;  %7521 = vadd.xlane.f32.xlu0 %v7491_v29  ;;  %7519 = vadd.xlane.f32.xlu1 %v7490_v2 }
0x19bf   : > { %v7492_v58 = vmul.f32 %v14563_v8, %v14563_v8 }
0x19c1   : > { %7523 = vadd.xlane.f32.xlu1 %v7492_v58 }
0x1a1e   : > { %v7494_v34 = vpop.xlane.xlu0 %7493 }
0x1a1f   : > { %v7525_v63 = vmul.f32 0.0078125, %v7494_v34 }
0x1a21   : > { %v7541_v35 = vadd.f32 1e-05, %v7525_v63 }
0x1a22   : > { %v7498_v27 = vpop.xlane.xlu0 %7497 }
0x1a23   : > { %v7527_v43 = vmul.f32 0.0078125, %v7498_v27  ;;  %10930 = vrsqrt.f32 %v7541_v35 }
0x1a25   : > { %v7543_v7 = vadd.f32 1e-05, %v7527_v43 }
0x1a26   : > { %v7496_v23 = vpop.xlane.xlu1 %7495 }
0x1a27   : > { %v7526_v5 = vmul.f32 0.0078125, %v7496_v23  ;;  %10932 = vrsqrt.f32 %v7543_v7 }
0x1a29   : > { %v7542_v13 = vadd.f32 1e-05, %v7526_v5 }
0x1a2a   : > { %v7502_v49 = vpop.xlane.xlu0 %7501  ;;  %v7500_v10 = vpop.xlane.xlu1 %7499 }
0x1a2b   : > { %10934 = vrsqrt.f32 %v7542_v13  ;;  %v7529_v21 = vmul.f32 0.0078125, %v7502_v49  ;;  %v7528_v15 = vmul.f32 0.0078125, %v7500_v10  ;;  %v10347_v10 = vld [vmem:[#allocation10 + $0x48] sm:$0xff]  }
0x1a2d   : > { %v7545_v56 = vadd.f32 1e-05, %v7529_v21  ;;  %v7544_v42 = vadd.f32 1e-05, %v7528_v15  ;;  %v10931_v38 = vpop.eup %10930 }
0x1a2e   : > { %v7506_v17 = vpop.xlane.xlu0 %7505  ;;  %v7504_v45 = vpop.xlane.xlu1 %7503  ;;  %v7573_v59 = vmul.f32 %v10931_v38, %v14492_v51 }
0x1a2f   : > { %10936 = vrsqrt.f32 %v7545_v56  ;;  %v7531_v18 = vmul.f32 0.0078125, %v7506_v17  ;;  %v7530_v54 = vmul.f32 0.0078125, %v7504_v45 }
0x1a30   : > { %10938 = vrsqrt.f32 %v7544_v42  ;;  %v7593_v1 = vmul.f32 %v14573_v41, %v7573_v59 }
0x1a31   : > { %v7547_v4 = vadd.f32 1e-05, %v7531_v18  ;;  %v7546_v22 = vadd.f32 1e-05, %v7530_v54  ;;  %v10933_v11 = vpop.eup %10932 }
0x1a32   : > { %v7508_v12 = vpop.xlane.xlu1 %7507  ;;  %v7575_v25 = vmul.f32 %v10933_v11, %v14495_v50  ;;  %v14587_v33 = vadd.f32 %v14582_v9, %v7593_v1 }
0x1a33   : > { %10940 = vrsqrt.f32 %v7547_v4  ;;  %v7532_v37 = vmul.f32 0.0078125, %v7508_v12 }
0x1a34   : > { %10942 = vrsqrt.f32 %v7546_v22  ;;  %v7595_v46 = vmul.f32 %v14573_v41, %v7575_v25 }
0x1a35   : > { %v10935_v3 = vpop.eup %10934  ;;  %v7548_v30 = vadd.f32 1e-05, %v7532_v37 }
0x1a36   : > { %v7574_v39 = vmul.f32 %v10935_v3, %v14501_v57  ;;  %v14598_v27 = vadd.f32 %v14582_v9, %v7595_v46  ;;  %v10349_v3 = vld [vmem:[#allocation10 + $0x58] sm:$0xff]  }
0x1a37   : > { %10944 = vrsqrt.f32 %v7548_v30 }
0x1a38   : > { %v7594_v51 = vmul.f32 %v14573_v41, %v7574_v39 }
0x1a39   : > { %v10937_v47 = vpop.eup %10936 }
0x1a3a   : > { %v10939_v19 = vpop.eup %10938  ;;  %v7510_v0 = vpop.xlane.xlu0 %7509  ;;  %v14590_v50 = vadd.f32 %v14582_v9, %v7594_v51  ;;  %v7577_v29 = vmul.f32 %v10937_v47, %v14508_v55 }
0x1a3b   : > { %v7576_v57 = vmul.f32 %v10939_v19, %v14504_v40  ;;  %v7533_v52 = vmul.f32 0.0078125, %v7510_v0  ;;  %v10350_v19 = vld [vmem:[#allocation10 + $0x60] sm:$0xff]  }
0x1a3c   : > { %v7629_v2 = vpack.c.bf16 %v14590_v50, %v14587_v33  ;;  %v7597_v23 = vmul.f32 %v14573_v41, %v7577_v29 }
0x1a3d   : > { %v10941_v62 = vpop.eup %10940  ;;  %v7596_v58 = vmul.f32 %v14573_v41, %v7576_v57  ;;  %v7549_v34 = vadd.f32 1e-05, %v7533_v52 }
0x1a3e   : > { %v10943_v63 = vpop.eup %10942  ;;  %v7514_v35 = vpop.xlane.xlu0 %7513  ;;  %9905 = vmatprep.mubr.bf16.mxu1 %v7629_v2  ;;  %v7579_v43 = vmul.f32 %v10941_v62, %v14517_v16  ;;  %v10351_v62 = vld [vmem:[#allocation10 + $0x68] sm:$0xff]  }
0x1a3f   : > { %v7535_v7 = vmul.f32 0.0078125, %v7514_v35  ;;  %v14602_v40 = vadd.f32 %v14582_v9, %v7596_v58  ;;  %v7578_v55 = vmul.f32 %v10943_v63, %v14511_v36  ;;  %10946 = vrsqrt.f32 %v7549_v34 }
0x1a40   : > { %v7599_v56 = vmul.f32 %v14573_v41, %v7579_v43  ;;  %v14612_v36 = vadd.f32 %v14582_v9, %v7597_v23 }
0x1a41   : > { %v10945_v5 = vpop.eup %10944  ;;  %v7630_v13 = vpack.c.bf16 %v14602_v40, %v14598_v27  ;;  %v7598_v49 = vmul.f32 %v14573_v41, %v7578_v55  ;;  %v7551_v21 = vadd.f32 1e-05, %v7535_v7 }
0x1a42   : > { %v7512_v15 = vpop.xlane.xlu1 %7511  ;;  %v7580_v16 = vmul.f32 %v10945_v5, %v14523_v28  ;;  %v10348_v28 = vld [vmem:[#allocation10 + $0x50] sm:$0xff]   ;;  %v14622_v22 = vadd.f32 %v14582_v9, %v7599_v56 }
0x1a43   : > { %9906 = vmatmul.mubr.bf16.vlgmr.msra.gmra.mrb[192].mxu1 %v7630_v13  ;;  %v7534_v42 = vmul.f32 0.0078125, %v7512_v15  ;;  %v14615_v17 = vadd.f32 %v14582_v9, %v7598_v49  ;;  %10948 = vrsqrt.f32 %v7551_v21 }
0x1a44   : > { %v7600_v45 = vmul.f32 %v14573_v41, %v7580_v16  ;;  %9922 = vmatpush3.bf16.msra.mxu1 %v14567_v24 }
0x1a45   : > { %v7550_v38 = vadd.f32 1e-05, %v7534_v42  ;;  %v7631_v18 = vpack.c.bf16 %v14615_v17, %v14612_v36  ;;  %9923 = vmatprep.subr.bf16.mxu1 %v10347_v10 }
0x1a46   : > { %v7518_v54 = vpop.xlane.xlu0 %7517  ;;  %v7516_v4 = vpop.xlane.xlu1 %7515  ;;  %v14625_v6 = vadd.f32 %v14582_v9, %v7600_v45 }
0x1a47   : > { %10950 = vrsqrt.f32 %v7550_v38  ;;  %v7537_v12 = vmul.f32 0.0078125, %v7518_v54  ;;  %9909 = vmatprep.mubr.bf16.mxu1 %v7631_v18  ;;  %v7536_v59 = vmul.f32 0.0078125, %v7516_v4 }
0x1a48   : > { %v7632_v24 = vpack.c.bf16 %v14625_v6, %v14622_v22  ;;  %9924 = vmatpush3.bf16.msra.mxu1 %v10347_v10 }
0x1a49   : > { %v7553_v11 = vadd.f32 1e-05, %v7537_v12  ;;  %v7552_v37 = vadd.f32 1e-05, %v7536_v59  ;;  %9925 = vmatprep.subr.bf16.mxu1 %v10348_v28  ;;  %v10947_v39 = vpop.eup %10946  ;;  %v10352_v59 = vld [vmem:[#allocation10 + $0x70] sm:$0xff]  }
0x1a4a   : > { %v7522_v30 = vpop.xlane.xlu0 %7521  ;;  %v7520_v25 = vpop.xlane.xlu1 %7519  ;;  %v7581_v0 = vmul.f32 %v10947_v39, %v14528_v53 }
0x1a4b   : > { %10952 = vrsqrt.f32 %v7553_v11  ;;  %v7539_v1 = vmul.f32 0.0078125, %v7522_v30  ;;  %9910 = vmatmul.mubr.bf16.gmra.mrb[196].mxu1 %v7632_v24  ;;  %v7538_v26 = vmul.f32 0.0078125, %v7520_v25  ;;  %v10353_v24 = vld [vmem:[#allocation10 + $0x78] sm:$0xff]  }
0x1a4c   : > { %10954 = vrsqrt.f32 %v7552_v37  ;;  %9926 = vmatpush3.bf16.msra.mxu1 %v10348_v28  ;;  %v7601_v34 = vmul.f32 %v14573_v41, %v7581_v0 }
0x1a4d   : > { %v7555_v51 = vadd.f32 1e-05, %v7539_v1  ;;  %v7554_v47 = vadd.f32 1e-05, %v7538_v26  ;;  %9927 = vmatprep.subr.bf16.mxu1 %v10349_v3  ;;  %v10949_v52 = vpop.eup %10948 }
0x1a4e   : > { %v7524_v46 = vpop.xlane.xlu1 %7523  ;;  %v7583_v63 = vmul.f32 %v10949_v52, %v14531_v60  ;;  %v14635_v7 = vadd.f32 %v14582_v9, %v7601_v34 }
0x1a4f   : > { %10956 = vrsqrt.f32 %v7555_v51  ;;  %v7540_v57 = vmul.f32 0.0078125, %v7524_v46 }
0x1a50   : > { %10958 = vrsqrt.f32 %v7554_v47  ;;  %9928 = vmatpush3.bf16.msra.mxu1 %v10349_v3 }
0x1a51   : > { %v10951_v29 = vpop.eup %10950  ;;  %v7556_v2 = vadd.f32 1e-05, %v7540_v57  ;;  %9929 = vmatprep.subr.bf16.mxu1 %v10350_v19 }
0x1a52   : > { %v7582_v58 = vmul.f32 %v10951_v29, %v14538_v31  ;;  %v7603_v31 = vmul.f32 %v14573_v41, %v7583_v63 }
0x1a53   : > { %10960 = vrsqrt.f32 %v7556_v2 }
0x1a54   : > { %v7602_v35 = vmul.f32 %v14573_v41, %v7582_v58  ;;  %9930 = vmatpush3.bf16.msra.mxu1 %v10350_v19  ;;  %v14648_v15 = vadd.f32 %v14582_v9, %v7603_v31 }
0x1a55   : > { %v10953_v53 = vpop.eup %10952  ;;  %9931 = vmatprep.subr.bf16.mxu1 %v10351_v62 }
0x1a56   : > { %v10955_v43 = vpop.eup %10954  ;;  %v14638_v55 = vadd.f32 %v14582_v9, %v7602_v35  ;;  %v7585_v5 = vmul.f32 %v10953_v53, %v14546_v14 }
0x1a57   : > { %v7584_v23 = vmul.f32 %v10955_v43, %v14541_v44 }
0x1a58   : > { %v7633_v60 = vpack.c.bf16 %v14638_v55, %v14635_v7  ;;  %9932 = vmatpush3.bf16.msra.mxu1 %v10351_v62  ;;  %v7605_v14 = vmul.f32 %v14573_v41, %v7585_v5 }
0x1a59   : > { %v10957_v13 = vpop.eup %10956  ;;  %v7604_v49 = vmul.f32 %v14573_v41, %v7584_v23  ;;  %9933 = vmatprep.subr.bf16.mxu1 %v10352_v59 }
0x1a5a   : > { %v10959_v10 = vpop.eup %10958  ;;  %9913 = vmatprep.mubr.bf16.mxu1 %v7633_v60  ;;  %v7587_v21 = vmul.f32 %v10957_v13, %v14549_v48  ;;  %v14661_v18 = vadd.f32 %v14582_v9, %v7605_v14 }
0x1a5b   : > { %v14651_v44 = vadd.f32 %v14582_v9, %v7604_v49  ;;  %v7586_v16 = vmul.f32 %v10959_v10, %v14556_v32 }
0x1a5c   : > { %v7607_v48 = vmul.f32 %v14573_v41, %v7587_v21  ;;  %9934 = vmatpush3.bf16.msra.mxu1 %v10352_v59 }
0x1a5d   : > { %v10961_v56 = vpop.eup %10960  ;;  %v7634_v42 = vpack.c.bf16 %v14651_v44, %v14648_v15  ;;  %v7606_v45 = vmul.f32 %v14573_v41, %v7586_v16  ;;  %9935 = vmatprep.subr.bf16.mxu1 %v10353_v24 }
0x1a5e   : > { %v7588_v38 = vmul.f32 %v10961_v56, %v14563_v8  ;;  %v14670_v4 = vadd.f32 %v14582_v9, %v7607_v48 }
0x1a5f   : > { %9914 = vmatmul.mubr.bf16.gmra.mrb[200].mxu1 %v7634_v42  ;;  %v14664_v28 = vadd.f32 %v14582_v9, %v7606_v45 }
0x1a60   : > { %v7608_v32 = vmul.f32 %v14573_v41, %v7588_v38  ;;  %9936 = vmatpush3.bf16.msra.mxu1 %v10353_v24  ;;  %v15388_v41 = vsub.s32 4, %v15368_v20 }
0x1a61   : > { %v7635_v54 = vpack.c.bf16 %v14664_v28, %v14661_v18 }
0x1a62   : > { %v14673_v12 = vadd.f32 %v14582_v9, %v7608_v32  ;;  %v7657_v11 = vrot.slane %v14438_v61, %v15388_v41 }
0x1a63   : > { %9917 = vmatprep.mubr.bf16.mxu1 %v7635_v54 }
0x1a64   : > { %v7636_v8 = vpack.c.bf16 %v14673_v12, %v14670_v4 }
0x1a67   : > { %9918 = vmatmul.mubr.bf16.gmra.mrb[204].mxu1 %v7636_v8 }
0x1b16   : > { %v9907_v37 = vpop.f32.mrb[192].mxu1 }
0x1b17   : > { %v7749_v3 = vadd.f32 %v9907_v37, %v7657_v11  ;;  %v7740_v30 = vpop.f32.mrb[193].mxu1 }
0x1b18   : > { %v7741_v9 = vadd.f32 %v7740_v30, %v7657_v11  ;;  %v9908_v25 = vpop.f32.mrb[194].mxu1 }
0x1b19   : > { %v7752_v39 = vadd.f32 %v9908_v25, %v7657_v11  ;;  %v7743_v1 = vpop.f32.mrb[195].mxu1  ;;  %v7805_v51 = vmax.f32 %v7749_v3, 0.0 }
0x1b1a   : > { %v7744_v26 = vadd.f32 %v7743_v1, %v7657_v11  ;;  %v7803_v19 = vmax.f32 %v7741_v9, 0.0 }
0x1b1b   : > { %v7806_v47 = vmax.f32 %v7752_v39, 0.0 }
0x1b1c   : > { %v7804_v46 = vmax.f32 %v7744_v26, 0.0 }
0x1b1d   : > { %v7820_v0 = vpack.c.bf16 %v7806_v47, %v7805_v51 }
0x1b1e   : > { %v7819_v57 = vpack.c.bf16 %v7804_v46, %v7803_v19  ;;  %v9911_v52 = vpop.f32.mrb[196].mxu1  ;;  %v15389_v46 = vsub.s32 5, %v15368_v20 }
0x1b1f   : > { %v7765_v29 = vadd.f32 %v9911_v52, %v7657_v11  ;;  %v7756_v2 = vpop.f32.mrb[197].mxu1 }
0x1b20   : > { %v7757_v62 = vadd.f32 %v7756_v2, %v7657_v11  ;;  %v9912_v58 = vpop.f32.mrb[198].mxu1  ;;  %9937 = vmatprep.mubr.bf16.mxu1 %v7819_v57 }
0x1b21   : > { %v7768_v34 = vadd.f32 %v9912_v58, %v7657_v11  ;;  %v7759_v63 = vpop.f32.mrb[199].mxu1  ;;  %9938 = vmatmul.mubr.bf16.vlgmr.msra.gmra.mrb[208].mxu1 %v7820_v0  ;;  %v7809_v53 = vmax.f32 %v7765_v29, 0.0  ;;  %v7847_v0 = vrot.slane %v14438_v61, %v15389_v46 }
0x1b22   : > { %v7760_v35 = vadd.f32 %v7759_v63, %v7657_v11  ;;  %v7807_v23 = vmax.f32 %v7757_v62, 0.0 }
0x1b23   : > { %v7810_v43 = vmax.f32 %v7768_v34, 0.0 }
0x1b24   : > { %v7808_v31 = vmax.f32 %v7760_v35, 0.0 }
0x1b25   : > { %v7822_v5 = vpack.c.bf16 %v7810_v43, %v7809_v53 }
0x1b26   : > { %v7821_v60 = vpack.c.bf16 %v7808_v31, %v7807_v23 }
0x1b28   : > { %9941 = vmatprep.mubr.bf16.mxu1 %v7821_v60 }
0x1b29   : > { %9942 = vmatmul.mubr.bf16.gmra.mrb[212].mxu1 %v7822_v5 }
0x1b32   : > { %v9915_v13 = vpop.f32.mrb[200].mxu1 }
0x1b33   : > { %v7781_v49 = vadd.f32 %v9915_v13, %v7657_v11  ;;  %v7772_v10 = vpop.f32.mrb[201].mxu1 }
0x1b34   : > { %v7773_v21 = vadd.f32 %v7772_v10, %v7657_v11  ;;  %v9916_v16 = vpop.f32.mrb[202].mxu1 }
0x1b35   : > { %v7784_v14 = vadd.f32 %v9916_v16, %v7657_v11  ;;  %v7775_v56 = vpop.f32.mrb[203].mxu1  ;;  %v7813_v45 = vmax.f32 %v7781_v49, 0.0 }
0x1b36   : > { %v7776_v42 = vadd.f32 %v7775_v56, %v7657_v11  ;;  %v7811_v48 = vmax.f32 %v7773_v21, 0.0 }
0x1b37   : > { %v7814_v38 = vmax.f32 %v7784_v14, 0.0 }
0x1b38   : > { %v7812_v32 = vmax.f32 %v7776_v42, 0.0 }
0x1b39   : > { %v7824_v54 = vpack.c.bf16 %v7814_v38, %v7813_v45 }
0x1b3a   : > { %v7823_v8 = vpack.c.bf16 %v7812_v32, %v7811_v48  ;;  %v9919_v59 = vpop.f32.mrb[204].mxu1 }
0x1b3b   : > { %v7797_v24 = vadd.f32 %v9919_v59, %v7657_v11  ;;  %v7788_v41 = vpop.f32.mrb[205].mxu1 }
0x1b3c   : > { %v7789_v37 = vadd.f32 %v7788_v41, %v7657_v11  ;;  %v9920_v3 = vpop.f32.mrb[206].mxu1  ;;  %9945 = vmatprep.mubr.bf16.mxu1 %v7823_v8 }
0x1b3d   : > { %v7800_v30 = vadd.f32 %v9920_v3, %v7657_v11  ;;  %v7791_v9 = vpop.f32.mrb[207].mxu1  ;;  %9946 = vmatmul.mubr.bf16.gmra.mrb[216].mxu1 %v7824_v54  ;;  %v7817_v39 = vmax.f32 %v7797_v24, 0.0 }
0x1b3e   : > { %v7792_v25 = vadd.f32 %v7791_v9, %v7657_v11  ;;  %v7815_v26 = vmax.f32 %v7789_v37, 0.0 }
0x1b3f   : > { %v7818_v1 = vmax.f32 %v7800_v30, 0.0 }
0x1b40   : > { %v7816_v51 = vmax.f32 %v7792_v25, 0.0 }
0x1b41   : > { %v7826_v47 = vpack.c.bf16 %v7818_v1, %v7817_v39 }
0x1b42   : > { %v7825_v19 = vpack.c.bf16 %v7816_v51, %v7815_v26 }
0x1b44   : > { %9949 = vmatprep.mubr.bf16.mxu1 %v7825_v19 }
0x1b45   : > { %9950 = vmatmul.mubr.bf16.gmra.mrb[220].mxu1 %v7826_v47 }
0x1bf4   : > { %v9939_v57 = vpop.f32.mrb[208].mxu1 }
0x1bf5   : > { %v7939_v52 = vadd.f32 %v9939_v57, %v7847_v0  ;;  %v7930_v29 = vpop.f32.mrb[209].mxu1 }
0x1bf6   : > { %v9940_v2 = vpop.f32.mrb[210].mxu1  ;;  %v7931_v11 = vadd.f32 %v7930_v29, %v7847_v0 }
0x1bf7   : > { %v14684_v62 = vadd.f32 %v7939_v52, %v14598_v27  ;;  %v7942_v58 = vadd.f32 %v9940_v2, %v7847_v0  ;;  %v7933_v34 = vpop.f32.mrb[211].mxu1 }
0x1bf8   : > { %v7934_v35 = vadd.f32 %v7933_v34, %v7847_v0  ;;  %v14689_v53 = vadd.f32 %v7931_v11, %v14587_v33 }
0x1bf9   : > { %v7996_v63 = vadd.f32 %v7942_v58, %v14602_v40  ;;  %8013 = vadd.xlane.f32.xlu0 %v14684_v62 }
0x1bfa   : > { %v14692_v20 = vadd.f32 %v7934_v35, %v14590_v50 }
0x1bfb   : > { %8015 = vadd.xlane.f32.xlu1 %v7996_v63 }
0x1bfc   : > { %v9943_v61 = vpop.f32.mrb[212].mxu1 }
0x1bfd   : > { %v7955_v43 = vadd.f32 %v9943_v61, %v7847_v0  ;;  %v7946_v23 = vpop.f32.mrb[213].mxu1  ;;  %8009 = vadd.xlane.f32.xlu0 %v14689_v53 }
0x1bfe   : > { %v9944_v27 = vpop.f32.mrb[214].mxu1  ;;  %v7947_v40 = vadd.f32 %v7946_v23, %v7847_v0 }
0x1bff   : > { %v14696_v31 = vadd.f32 %v7955_v43, %v14622_v22  ;;  %v7958_v5 = vadd.f32 %v9944_v27, %v7847_v0  ;;  %v7949_v60 = vpop.f32.mrb[215].mxu1  ;;  %8011 = vadd.xlane.f32.xlu1 %v14692_v20 }
0x1c00   : > { %v7950_v13 = vadd.f32 %v7949_v60, %v7847_v0  ;;  %v14704_v50 = vadd.f32 %v7947_v40, %v14612_v36 }
0x1c01   : > { %v14700_v33 = vadd.f32 %v7958_v5, %v14625_v6  ;;  %8021 = vadd.xlane.f32.xlu0 %v14696_v31 }
0x1c02   : > { %v14708_v49 = vadd.f32 %v7950_v13, %v14615_v17 }
0x1c03   : > { %8023 = vadd.xlane.f32.xlu1 %v14700_v33 }
0x1c05   : > { %8017 = vadd.xlane.f32.xlu0 %v14704_v50 }
0x1c07   : > { %8019 = vadd.xlane.f32.xlu1 %v14708_v49 }
0x1c10   : > { %v9947_v22 = vpop.f32.mrb[216].mxu1 }
0x1c11   : > { %v7971_v10 = vadd.f32 %v9947_v22, %v7847_v0  ;;  %v7962_v21 = vpop.f32.mrb[217].mxu1 }
0x1c12   : > { %v9948_v6 = vpop.f32.mrb[218].mxu1  ;;  %v7963_v14 = vadd.f32 %v7962_v21, %v7847_v0 }
0x1c13   : > { %v14713_v16 = vadd.f32 %v7971_v10, %v14648_v15  ;;  %v7974_v56 = vadd.f32 %v9948_v6, %v7847_v0  ;;  %v7965_v36 = vpop.f32.mrb[219].mxu1 }
0x1c14   : > { %v7966_v45 = vadd.f32 %v7965_v36, %v7847_v0  ;;  %v14720_v17 = vadd.f32 %v7963_v14, %v14635_v7 }
0x1c15   : > { %v14716_v42 = vadd.f32 %v7974_v56, %v14651_v44  ;;  %8029 = vadd.xlane.f32.xlu0 %v14713_v16 }
0x1c16   : > { %v14724_v48 = vadd.f32 %v7966_v45, %v14638_v55 }
0x1c17   : > { %8031 = vadd.xlane.f32.xlu1 %v14716_v42 }
0x1c18   : > { %v9951_v38 = vpop.f32.mrb[220].mxu1 }
0x1c19   : > { %8025 = vadd.xlane.f32.xlu0 %v14720_v17  ;;  %v7978_v15 = vpop.f32.mrb[221].mxu1  ;;  %v7987_v8 = vadd.f32 %v9951_v38, %v7847_v0 }
0x1c1a   : > { %v7979_v32 = vadd.f32 %v7978_v15, %v7847_v0  ;;  %v9952_v54 = vpop.f32.mrb[222].mxu1 }
0x1c1b   : > { %8027 = vadd.xlane.f32.xlu1 %v14724_v48  ;;  %v7981_v44 = vpop.f32.mrb[223].mxu1  ;;  %v7990_v24 = vadd.f32 %v9952_v54, %v7847_v0  ;;  %v14736_v55 = vadd.f32 %v7987_v8, %v14670_v4 }
0x1c1c   : > { %v14729_v59 = vadd.f32 %v7979_v32, %v14661_v18  ;;  %v7982_v7 = vadd.f32 %v7981_v44, %v7847_v0 }
0x1c1d   : > { %v14740_v37 = vadd.f32 %v7990_v24, %v14673_v12 }
0x1c1e   : > { %v14732_v41 = vadd.f32 %v7982_v7, %v14664_v28  ;;  %8033 = vadd.xlane.f32.xlu0 %v14729_v59 }
0x1c20   : > { %8035 = vadd.xlane.f32.xlu1 %v14732_v41 }
0x1c22   : > { %8037 = vadd.xlane.f32.xlu0 %v14736_v55 }
0x1c24   : > { %8039 = vadd.xlane.f32.xlu1 %v14740_v37 }
0x1c86   : > { %v8014_v18 = vpop.xlane.xlu0 %8013 }
0x1c87   : > { %v8043_v3 = vmul.f32 0.0078125, %v8014_v18 }
0x1c88   : > { %v8016_v30 = vpop.xlane.xlu1 %8015 }
0x1c89   : > { %v14745_v28 = vsub.f32 %v14684_v62, %v8043_v3  ;;  %v8044_v9 = vmul.f32 0.0078125, %v8016_v30 }
0x1c8a   : > { %v8010_v25 = vpop.xlane.xlu0 %8009 }
0x1c8b   : > { %v14747_v39 = vsub.f32 %v7996_v63, %v8044_v9  ;;  %v8041_v4 = vmul.f32 0.0078125, %v8010_v25  ;;  %v8075_v1 = vmul.f32 %v14745_v28, %v14745_v28 }
0x1c8c   : > { %v8012_v12 = vpop.xlane.xlu1 %8011 }
0x1c8d   : > { %v14752_v26 = vsub.f32 %v14689_v53, %v8041_v4  ;;  %v8042_v51 = vmul.f32 0.0078125, %v8012_v12  ;;  %8093 = vadd.xlane.f32.xlu0 %v8075_v1  ;;  %v8076_v47 = vmul.f32 %v14747_v39, %v14747_v39 }
0x1c8e   : > { %v8022_v19 = vpop.xlane.xlu0 %8021 }
0x1c8f   : > { %v14757_v46 = vsub.f32 %v14692_v20, %v8042_v51  ;;  %v8047_v0 = vmul.f32 0.0078125, %v8022_v19  ;;  %8095 = vadd.xlane.f32.xlu1 %v8076_v47  ;;  %v8073_v57 = vmul.f32 %v14752_v26, %v14752_v26 }
0x1c90   : > { %v8024_v52 = vpop.xlane.xlu1 %8023 }
0x1c91   : > { %v14762_v29 = vsub.f32 %v14696_v31, %v8047_v0  ;;  %v8048_v2 = vmul.f32 0.0078125, %v8024_v52  ;;  %8089 = vadd.xlane.f32.xlu0 %v8073_v57  ;;  %v8074_v62 = vmul.f32 %v14757_v46, %v14757_v46 }
0x1c92   : > { %v8018_v11 = vpop.xlane.xlu0 %8017 }
0x1c93   : > { %v14767_v58 = vsub.f32 %v14700_v33, %v8048_v2  ;;  %v8045_v34 = vmul.f32 0.0078125, %v8018_v11  ;;  %8091 = vadd.xlane.f32.xlu1 %v8074_v62  ;;  %v8079_v63 = vmul.f32 %v14762_v29, %v14762_v29  ;;  %v4452_v62 = vld [vmem:[#allocation11 + $0x18] sm:$0xff] }
0x1c94   : > { %v8020_v35 = vpop.xlane.xlu1 %8019 }
0x1c95   : > { %v14772_v53 = vsub.f32 %v14704_v50, %v8045_v34  ;;  %v8046_v61 = vmul.f32 0.0078125, %v8020_v35  ;;  %8101 = vadd.xlane.f32.xlu0 %v8079_v63  ;;  %v8080_v20 = vmul.f32 %v14767_v58, %v14767_v58 }
0x1c97   : > { %v14777_v43 = vsub.f32 %v14708_v49, %v8046_v61  ;;  %8103 = vadd.xlane.f32.xlu1 %v8080_v20  ;;  %v8077_v23 = vmul.f32 %v14772_v53, %v14772_v53  ;;  %v15390_v20 = vld [vmem:[#allocation46_spill] sm:$0xff] }
0x1c99   : > { %8097 = vadd.xlane.f32.xlu0 %v8077_v23  ;;  %v8078_v27 = vmul.f32 %v14777_v43, %v14777_v43  ;;  %v14824_v23 = vrot.slane %v4452_v62, %v15390_v20 }
0x1c9b   : > { %8099 = vadd.xlane.f32.xlu1 %v8078_v27 }
0x1ca2   : > { %v8030_v31 = vpop.xlane.xlu0 %8029 }
0x1ca3   : > { %v8051_v40 = vmul.f32 0.0078125, %v8030_v31 }
0x1ca4   : > { %v8032_v5 = vpop.xlane.xlu1 %8031 }
0x1ca5   : > { %v14784_v60 = vsub.f32 %v14713_v16, %v8051_v40  ;;  %v8052_v33 = vmul.f32 0.0078125, %v8032_v5 }
0x1ca6   : > { %v8026_v13 = vpop.xlane.xlu0 %8025 }
0x1ca7   : > { %v14787_v50 = vsub.f32 %v14716_v42, %v8052_v33  ;;  %v8049_v49 = vmul.f32 0.0078125, %v8026_v13  ;;  %v8083_v22 = vmul.f32 %v14784_v60, %v14784_v60  ;;  %v15391_v33 = vld [vmem:[#allocation47_spill] sm:$0xff] }
0x1ca8   : > { %v8028_v10 = vpop.xlane.xlu1 %8027  ;;  %v14827_v13 = vrot.slane %v4452_v62, %v15391_v33 }
0x1ca9   : > { %v14792_v21 = vsub.f32 %v14720_v17, %v8049_v49  ;;  %v8050_v6 = vmul.f32 0.0078125, %v8028_v10  ;;  %8109 = vadd.xlane.f32.xlu0 %v8083_v22  ;;  %v8084_v14 = vmul.f32 %v14787_v50, %v14787_v50 }
0x1cab   : > { %v14797_v16 = vsub.f32 %v14724_v48, %v8050_v6  ;;  %8111 = vadd.xlane.f32.xlu1 %v8084_v14  ;;  %v8034_v56 = vpop.xlane.xlu0 %8033  ;;  %v8081_v36 = vmul.f32 %v14792_v21, %v14792_v21 }
0x1cac   : > { %v8053_v42 = vmul.f32 0.0078125, %v8034_v56 }
0x1cad   : > { %v8036_v45 = vpop.xlane.xlu1 %8035  ;;  %8105 = vadd.xlane.f32.xlu0 %v8081_v36  ;;  %v8082_v17 = vmul.f32 %v14797_v16, %v14797_v16 }
0x1cae   : > { %v14804_v38 = vsub.f32 %v14729_v59, %v8053_v42  ;;  %v8054_v15 = vmul.f32 0.0078125, %v8036_v45 }
0x1caf   : > { %8107 = vadd.xlane.f32.xlu1 %v8082_v17  ;;  %v8038_v32 = vpop.xlane.xlu0 %8037 }
0x1cb0   : > { %v14807_v48 = vsub.f32 %v14732_v41, %v8054_v15  ;;  %v8055_v54 = vmul.f32 0.0078125, %v8038_v32  ;;  %v8085_v44 = vmul.f32 %v14804_v38, %v14804_v38 }
0x1cb1   : > { %v8040_v8 = vpop.xlane.xlu1 %8039 }
0x1cb2   : > { %v14812_v7 = vsub.f32 %v14736_v55, %v8055_v54  ;;  %v8056_v24 = vmul.f32 0.0078125, %v8040_v8  ;;  %8113 = vadd.xlane.f32.xlu0 %v8085_v44  ;;  %v8086_v59 = vmul.f32 %v14807_v48, %v14807_v48 }
0x1cb4   : > { %v14817_v18 = vsub.f32 %v14740_v37, %v8056_v24  ;;  %8115 = vadd.xlane.f32.xlu1 %v8086_v59  ;;  %v8087_v41 = vmul.f32 %v14812_v7, %v14812_v7 }
0x1cb6   : > { %8117 = vadd.xlane.f32.xlu0 %v8087_v41  ;;  %v8088_v3 = vmul.f32 %v14817_v18, %v14817_v18 }
0x1cb8   : > { %8119 = vadd.xlane.f32.xlu1 %v8088_v3 }
0x1d1a   : > { %v8094_v30 = vpop.xlane.xlu0 %8093 }
0x1d1b   : > { %v8123_v55 = vmul.f32 0.0078125, %v8094_v30 }
0x1d1c   : > { %v8096_v9 = vpop.xlane.xlu1 %8095 }
0x1d1d   : > { %v8139_v25 = vadd.f32 1e-05, %v8123_v55  ;;  %v8124_v4 = vmul.f32 0.0078125, %v8096_v9 }
0x1d1e   : > { %v8090_v1 = vpop.xlane.xlu0 %8089 }
0x1d1f   : > { %10962 = vrsqrt.f32 %v8139_v25  ;;  %v8140_v12 = vadd.f32 1e-05, %v8124_v4  ;;  %v8121_v51 = vmul.f32 0.0078125, %v8090_v1 }
0x1d20   : > { %v8092_v37 = vpop.xlane.xlu1 %8091 }
0x1d21   : > { %10964 = vrsqrt.f32 %v8140_v12  ;;  %v8137_v47 = vadd.f32 1e-05, %v8121_v51  ;;  %v8122_v19 = vmul.f32 0.0078125, %v8092_v37 }
0x1d22   : > { %v8102_v0 = vpop.xlane.xlu0 %8101 }
0x1d23   : > { %10966 = vrsqrt.f32 %v8137_v47  ;;  %v8138_v57 = vadd.f32 1e-05, %v8122_v19  ;;  %v8127_v52 = vmul.f32 0.0078125, %v8102_v0 }
0x1d24   : > { %v8104_v2 = vpop.xlane.xlu1 %8103 }
0x1d25   : > { %10968 = vrsqrt.f32 %v8138_v57  ;;  %v8143_v11 = vadd.f32 1e-05, %v8127_v52  ;;  %v8128_v34 = vmul.f32 0.0078125, %v8104_v2 }
0x1d26   : > { %v8098_v63 = vpop.xlane.xlu0 %8097 }
0x1d27   : > { %10970 = vrsqrt.f32 %v8143_v11  ;;  %v8144_v35 = vadd.f32 1e-05, %v8128_v34  ;;  %v8125_v61 = vmul.f32 0.0078125, %v8098_v63 }
0x1d28   : > { %v8100_v27 = vpop.xlane.xlu1 %8099 }
0x1d29   : > { %v10963_v31 = vpop.eup %10962  ;;  %10972 = vrsqrt.f32 %v8144_v35  ;;  %v8141_v40 = vadd.f32 1e-05, %v8125_v61  ;;  %v8126_v5 = vmul.f32 0.0078125, %v8100_v27 }
0x1d2a   : > { %v8171_v49 = vmul.f32 %v10963_v31, %v14745_v28 }
0x1d2b   : > { %v10965_v22 = vpop.eup %10964  ;;  %10974 = vrsqrt.f32 %v8141_v40  ;;  %v8142_v10 = vadd.f32 1e-05, %v8126_v5 }
0x1d2c   : > { %v8191_v6 = vmul.f32 %v14824_v23, %v8171_v49  ;;  %v8172_v14 = vmul.f32 %v10965_v22, %v14747_v39 }
0x1d2d   : > { %v10967_v56 = vpop.eup %10966  ;;  %10976 = vrsqrt.f32 %v8142_v10 }
0x1d2e   : > { %v8211_v36 = vadd.f32 %v14827_v13, %v8191_v6  ;;  %v8192_v42 = vmul.f32 %v14824_v23, %v8172_v14  ;;  %v8169_v45 = vmul.f32 %v10967_v56, %v14752_v26 }
0x1d2f   : > { %v10969_v17 = vpop.eup %10968 }
0x1d30   : > { %8227 = vst [vmem:[%s14837_s28 + $0x10] sm:$0xff] %v8211_v36  ;;  %v8212_v28 = vadd.f32 %v14827_v13, %v8192_v42  ;;  %v8189_v39 = vmul.f32 %v14824_v23, %v8169_v45  ;;  %v8170_v15 = vmul.f32 %v10969_v17, %v14757_v46 }
0x1d31   : > { %v10971_v32 = vpop.eup %10970 }
0x1d32   : > { %8228 = vst [vmem:[%s14837_s28 + $0x18] sm:$0xff] %v8212_v28  ;;  %v8209_v54 = vadd.f32 %v14827_v13, %v8189_v39  ;;  %v8190_v26 = vmul.f32 %v14824_v23, %v8170_v15  ;;  %v8175_v44 = vmul.f32 %v10971_v32, %v14762_v29 }
0x1d33   : > { %v10973_v8 = vpop.eup %10972 }
0x1d34   : > { %8225 = vst [vmem:[%s14837_s28] sm:$0xff] %v8209_v54  ;;  %v8210_v24 = vadd.f32 %v14827_v13, %v8190_v26  ;;  %v8195_v59 = vmul.f32 %v14824_v23, %v8175_v44  ;;  %v8176_v41 = vmul.f32 %v10973_v8, %v14767_v58 }
0x1d35   : > { %v10975_v3 = vpop.eup %10974 }
0x1d36   : > { %8226 = vst [vmem:[%s14837_s28 + $0x8] sm:$0xff] %v8210_v24  ;;  %v8215_v46 = vadd.f32 %v14827_v13, %v8195_v59  ;;  %v8196_v30 = vmul.f32 %v14824_v23, %v8176_v41  ;;  %v8173_v55 = vmul.f32 %v10975_v3, %v14772_v53  ;;  %v8110_v9 = vpop.xlane.xlu0 %8109 }
0x1d37   : > { %v10977_v25 = vpop.eup %10976  ;;  %v8131_v29 = vmul.f32 0.0078125, %v8110_v9 }
0x1d38   : > { %8231 = vst [vmem:[%s14837_s28 + $0x30] sm:$0xff] %v8215_v46  ;;  %v8216_v4 = vadd.f32 %v14827_v13, %v8196_v30  ;;  %v8193_v1 = vmul.f32 %v14824_v23, %v8173_v55  ;;  %v8174_v58 = vmul.f32 %v10977_v25, %v14777_v43  ;;  %v8112_v12 = vpop.xlane.xlu1 %8111 }
0x1d39   : > { %v8147_v51 = vadd.f32 1e-05, %v8131_v29  ;;  %v8132_v37 = vmul.f32 0.0078125, %v8112_v12 }
0x1d3a   : > { %8232 = vst [vmem:[%s14837_s28 + $0x38] sm:$0xff] %v8216_v4  ;;  %v8213_v47 = vadd.f32 %v14827_v13, %v8193_v1  ;;  %v8194_v53 = vmul.f32 %v14824_v23, %v8174_v58  ;;  %v8106_v19 = vpop.xlane.xlu0 %8105 }
0x1d3b   : > { %10978 = vrsqrt.f32 %v8147_v51  ;;  %v8148_v0 = vadd.f32 1e-05, %v8132_v37  ;;  %v8129_v57 = vmul.f32 0.0078125, %v8106_v19 }
0x1d3c   : > { %8229 = vst [vmem:[%s14837_s28 + $0x20] sm:$0xff] %v8213_v47  ;;  %v8214_v52 = vadd.f32 %v14827_v13, %v8194_v53  ;;  %v8108_v2 = vpop.xlane.xlu1 %8107 }
0x1d3d   : > { %10980 = vrsqrt.f32 %v8148_v0  ;;  %v8145_v62 = vadd.f32 1e-05, %v8129_v57  ;;  %v8130_v43 = vmul.f32 0.0078125, %v8108_v2 }
0x1d3e   : > { %8230 = vst [vmem:[%s14837_s28 + $0x28] sm:$0xff] %v8214_v52 }
0x1d3f   : > { %10982 = vrsqrt.f32 %v8145_v62  ;;  %v8146_v11 = vadd.f32 1e-05, %v8130_v43  ;;  %v8114_v34 = vpop.xlane.xlu0 %8113 }
0x1d40   : > { %v8133_v63 = vmul.f32 0.0078125, %v8114_v34 }
0x1d41   : > { %10984 = vrsqrt.f32 %v8146_v11  ;;  %v8116_v35 = vpop.xlane.xlu1 %8115 }
0x1d42   : > { %v8149_v61 = vadd.f32 1e-05, %v8133_v63  ;;  %v8134_v20 = vmul.f32 0.0078125, %v8116_v35 }
0x1d43   : > { %v8118_v27 = vpop.xlane.xlu0 %8117 }
0x1d44   : > { %10986 = vrsqrt.f32 %v8149_v61  ;;  %v8150_v31 = vadd.f32 1e-05, %v8134_v20  ;;  %v8135_v40 = vmul.f32 0.0078125, %v8118_v27 }
0x1d45   : > { %v10979_v5 = vpop.eup %10978  ;;  %v8120_v33 = vpop.xlane.xlu1 %8119 }
0x1d46   : > { %v8179_v49 = vmul.f32 %v10979_v5, %v14784_v60  ;;  %10988 = vrsqrt.f32 %v8150_v31  ;;  %v8151_v22 = vadd.f32 1e-05, %v8135_v40  ;;  %v8136_v10 = vmul.f32 0.0078125, %v8120_v33 }
0x1d47   : > { %v10981_v6 = vpop.eup %10980 }
0x1d48   : > { %v8199_v14 = vmul.f32 %v14824_v23, %v8179_v49  ;;  %v8180_v56 = vmul.f32 %v10981_v6, %v14787_v50  ;;  %10990 = vrsqrt.f32 %v8151_v22  ;;  %v8152_v36 = vadd.f32 1e-05, %v8136_v10 }
0x1d49   : > { %v10983_v42 = vpop.eup %10982 }
0x1d4a   : > { %v8219_v45 = vadd.f32 %v14827_v13, %v8199_v14  ;;  %v8200_v17 = vmul.f32 %v14824_v23, %v8180_v56  ;;  %v8177_v28 = vmul.f32 %v10983_v42, %v14792_v21  ;;  %10992 = vrsqrt.f32 %v8152_v36 }
0x1d4b   : > { %v10985_v60 = vpop.eup %10984 }
0x1d4c   : > { %8235 = vst [vmem:[%s14837_s28 + $0x50] sm:$0xff] %v8219_v45  ;;  %v8220_v39 = vadd.f32 %v14827_v13, %v8200_v17  ;;  %v8197_v15 = vmul.f32 %v14824_v23, %v8177_v28  ;;  %v8178_v50 = vmul.f32 %v10985_v60, %v14797_v16 }
0x1d4e   : > { %v10987_v32 = vpop.eup %10986  ;;  %8236 = vst [vmem:[%s14837_s28 + $0x58] sm:$0xff] %v8220_v39  ;;  %v8217_v54 = vadd.f32 %v14827_v13, %v8197_v15  ;;  %v8198_v26 = vmul.f32 %v14824_v23, %v8178_v50 }
0x1d4f   : > { %v8181_v44 = vmul.f32 %v10987_v32, %v14804_v38 }
0x1d50   : > { %v10989_v21 = vpop.eup %10988  ;;  %8233 = vst [vmem:[%s14837_s28 + $0x40] sm:$0xff] %v8217_v54  ;;  %v8218_v8 = vadd.f32 %v14827_v13, %v8198_v26 }
0x1d51   : > { %v8201_v24 = vmul.f32 %v14824_v23, %v8181_v44  ;;  %v8182_v59 = vmul.f32 %v10989_v21, %v14807_v48 }
0x1d52   : > { %v10991_v16 = vpop.eup %10990  ;;  %8234 = vst [vmem:[%s14837_s28 + $0x48] sm:$0xff] %v8218_v8 }
0x1d53   : > { %v8221_v41 = vadd.f32 %v14827_v13, %v8201_v24  ;;  %v8202_v3 = vmul.f32 %v14824_v23, %v8182_v59  ;;  %v8183_v38 = vmul.f32 %v10991_v16, %v14812_v7 }
0x1d54   : > { %v10993_v46 = vpop.eup %10992 }
0x1d55   : > { %8237 = vst [vmem:[%s14837_s28 + $0x60] sm:$0xff] %v8221_v41  ;;  %v8222_v30 = vadd.f32 %v14827_v13, %v8202_v3  ;;  %v8203_v55 = vmul.f32 %v14824_v23, %v8183_v38  ;;  %v8184_v9 = vmul.f32 %v10993_v46, %v14817_v18 }
0x1d57   : > { %8238 = vst [vmem:[%s14837_s28 + $0x68] sm:$0xff] %v8222_v30  ;;  %v8223_v48 = vadd.f32 %v14827_v13, %v8203_v55  ;;  %v8204_v25 = vmul.f32 %v14824_v23, %v8184_v9 }
0x1d59   : > { %8239 = vst [vmem:[%s14837_s28 + $0x70] sm:$0xff] %v8223_v48  ;;  %v8224_v29 = vadd.f32 %v14827_v13, %v8204_v25 }
0x1d5b   : > { %8240 = vst [vmem:[%s14837_s28 + $0x78] sm:$0xff] %v8224_v29 }
0x1d5c   : > { %s8656_s21 = sshll.u32 %s11274_s25, 8  ;;  %s8271_s10 = sshll.u32 %s14837_s28, 4  ;;  %s8272_s10 = int_to_ptr.vmem [resolvable:$true] %s8271_s10 }
0x1d5d   : > { %s15392_s19 = sld [smem:[#allocation89_spill]]  ;;  %s11211_s27 = smov 256  }
0x1d5e   : > { %p15393_p8 = scmp.ne.s32.totalorder %s15112_s9, 0  ;;  %s11212_s30 = smov 512  }
0x1d5f   : > { %s11213_s26 = smov 2   ;;  %s11214_s12 = smov 128  }
0x1d60   : > { %10142 = sst [smem:[#allocation17]] (%p15393_p8), %s11211_s27  ;;  %s11215_s25 = smov 8  }
0x1d61   : > { %10143 = sst [smem:[#allocation17 + $0x1]] (%p15393_p8), %s11212_s30  ;;  %s11216_s15 = smov [#allocation16]  }
0x1d62   : > { %10144 = sst [smem:[#allocation17 + $0x2]] (%p15393_p8), %s11213_s26  ;;  %s11217_s18 = smov 0  }
0x1d63   : > { %s8254_s29 = scalar_lea.hbm %s15392_s19, %s8656_s21  ;;  %10145 = sst [smem:[#allocation17 + $0x3]] (%p15393_p8), %s11214_s12 }
0x1d64   : > { %10146 = sst [smem:[#allocation17 + $0x4]] (%p15393_p8), %s11214_s12 }
0x1d65   : > { %10147 = sst [smem:[#allocation17 + $0x5]] (%p15393_p8), %s11215_s25 }
0x1d66   : > { %10148 = dma.general (%p15393_p8), %s8272_s10, 2048, %s8254_s29, %s8242_s1, %s11216_s15, [#allocation17], %s11217_s18, 0  }
0x1d67 PF: > { %s15394_s14 = sld [smem:[#allocation24_spill]]  ;;  %s15395_s20 = sld [smem:[#allocation27_spill]] }
0x1d6d   : > { %s8299_s16 = sand.u32 1, %s15394_s14   ;;  %p15396_p9 = scmp.ne.s32.totalorder %s15395_s20, 0 }
0x1d6e   : > { %s8300_s6 = scalar_lea.sflag [#allocation4], %s8299_s16 }
0x1d6f   : > { %p10167_p10 = pnand %p8412_p4, %p15396_p9 }
0x1d71   : > { %11170 = dma.done.wait (!%p10167_p10), %s8300_s6, 2048  }
0x1d72   : > { %11172 = vsyncadd (!%p10167_p10), %s8300_s6, 4294965248  ;;  %s15397_s24 = sld [smem:[#allocation25_spill]]  ;;  %s15398_s7 = sld [smem:[#allocation26_spill]] }
0x1d73   : > { %s15399_s21 = smov %s11179_s22  ;;  %s15400_s22 = smov %s11183_s23 }
0x1d78   : > { %p22_p1 = scmp.ge.s32.totalorder %s15397_s24, 4   ;;  %s15401_s23 = smov %s15398_s7 }
0x1d7a   :  { %24 = sbr.rel (!%p22_p1) target bundleno = 11 (0xb), region = 124 }
0x1d81   :  { %8305 = vsyncpa [#allocation3], 1 }
0x1d82   :  { %8307 = vsyncpa [#allocation3 + $0x1], 1 }
0x1d83   :  { %8308 = vsyncpa [#allocation6], 1 }
0x1d84   :  { %8309 = vsyncpa [#allocation9], 1 }
0x1d85   :  { %8310 = vsyncpa [#allocation12], 1 }
0x1d86   :  { %8311 = vsyncpa [#allocation4], 1 }
0x1d87   :  { %8313 = vsyncpa [#allocation4 + $0x1], 1 }

</bundles_post_ra>
